<compile_context>
chip_gen: v7x
topology: tpu7x:2x2x1
jax: 0.10.0
libtpu: 0.0.40
codegen_flags: <defaults>
</compile_context>

<pallas_src>
import functools
import jax
import jax.numpy as jnp
from jax.experimental import pallas as pl
from jax.experimental.pallas import tpu as pltpu


def _round_up(x, m):
    return ((x + m - 1) // m) * m


# ---------------------------------------------------------------------------
# Pallas kernels
# ---------------------------------------------------------------------------
def _mm_bias_kernel(x_ref, w_ref, b_ref, o_ref, *, relu):
    """One grid step = one M tile; full K and N resident.  out = relu?(x @ w + b)."""
    out = jnp.dot(x_ref[...], w_ref[...], preferred_element_type=jnp.float32)
    out = out + b_ref[...]
    if relu:
        out = jnp.maximum(out, 0.0)
    o_ref[...] = out.astype(o_ref.dtype)


def pallas_matmul_bias(x_p, w_p, b_p, *, relu, out_m, out_n):
    """relu?(x_p @ w_p + b_p) for pre-padded bf16 x_p / w_p and f32 (1, N_pad) bias."""
    M_pad, K_pad = x_p.shape
    N_pad = w_p.shape[1]
    # M_pad is a multiple of 128 when >=128, otherwise a multiple of 16 (bf16 sublane).
    tm = 128 if M_pad >= 128 else M_pad
    grid = (M_pad // tm,)
    cost = pl.CostEstimate(
        flops=2 * M_pad * K_pad * N_pad,
        transcendentals=0,
        bytes_accessed=(M_pad * K_pad + K_pad * N_pad) * 2 + M_pad * N_pad * 4,
    )
    out = pl.pallas_call(
        functools.partial(_mm_bias_kernel, relu=relu),
        out_shape=jax.ShapeDtypeStruct((M_pad, N_pad), jnp.float32),
        grid_spec=pltpu.PrefetchScalarGridSpec(
            num_scalar_prefetch=0,
            grid=grid,
            in_specs=[
                pl.BlockSpec((tm, K_pad), lambda i: (i, 0)),      # activations: per-M tile
                pl.BlockSpec((K_pad, N_pad), lambda i: (0, 0)),   # weight: VMEM-resident
                pl.BlockSpec((1, N_pad), lambda i: (0, 0)),       # bias: VMEM-resident
            ],
            out_specs=pl.BlockSpec((tm, N_pad), lambda i: (i, 0)),
        ),
        compiler_params=pltpu.CompilerParams(
            dimension_semantics=("parallel",),
            vmem_limit_bytes=48 << 20,          # fits v7x's 64 MiB VMEM with headroom
        ),
        cost_estimate=cost,
    )(x_p, w_p, b_p)
    return out[:out_m, :out_n]


def _mlp_kernel(x_ref, w1_ref, b1_ref, w2_ref, b2_ref, w3_ref, b3_ref, o_ref):
    """Fused MLP head: relu(x@w1+b1) -> relu(.@w2+b2) -> .@w3+b3 in one kernel body."""
    h = jnp.dot(x_ref[...], w1_ref[...], preferred_element_type=jnp.float32) + b1_ref[...]
    h = jnp.maximum(h, 0.0).astype(jnp.bfloat16)
    h = jnp.dot(h, w2_ref[...], preferred_element_type=jnp.float32) + b2_ref[...]
    h = jnp.maximum(h, 0.0).astype(jnp.bfloat16)
    o_ref[...] = (jnp.dot(h, w3_ref[...], preferred_element_type=jnp.float32)
                  + b3_ref[...]).astype(o_ref.dtype)


def pallas_mlp_head(x_p, fc1, fc2, fc3, *, out_m, out_n):
    M_pad, K_pad = x_p.shape
    w1, b1 = fc1
    w2, b2 = fc2
    w3, b3 = fc3
    N1, N2, N3 = w1.shape[1], w2.shape[1], w3.shape[1]
    cost = pl.CostEstimate(
        flops=2 * M_pad * (K_pad * N1 + N1 * N2 + N2 * N3),
        transcendentals=0,
        bytes_accessed=(M_pad * K_pad + K_pad * N1 + N1 * N2 + N2 * N3) * 2
                       + M_pad * N3 * 4,
    )
    full = lambda i: (0, 0)
    out = pl.pallas_call(
        _mlp_kernel,
        out_shape=jax.ShapeDtypeStruct((M_pad, N3), jnp.float32),
        grid_spec=pltpu.PrefetchScalarGridSpec(
            num_scalar_prefetch=0,
            grid=(1,),
            in_specs=[
                pl.BlockSpec((M_pad, K_pad), full),
                pl.BlockSpec((K_pad, N1), full),
                pl.BlockSpec((1, N1), full),
                pl.BlockSpec((N1, N2), full),
                pl.BlockSpec((1, N2), full),
                pl.BlockSpec((N2, N3), full),
                pl.BlockSpec((1, N3), full),
            ],
            out_specs=pl.BlockSpec((M_pad, N3), full),
        ),
        compiler_params=pltpu.CompilerParams(
            dimension_semantics=("arbitrary",),
            vmem_limit_bytes=48 << 20,
        ),
        cost_estimate=cost,
    )(x_p, w1, b1, w2, b2, w3, b3)
    return out[:out_m, :out_n]


# ---------------------------------------------------------------------------
# Convolution glue: im2col (plain JAX) + activation padding helper
# ---------------------------------------------------------------------------
def _im2col(x_nhwc, k, stride, pad):
    """x_nhwc: (N, H, W, C) -> patches (N, H_out, W_out, k*k*C) in (kh, kw, C) order."""
    x = jnp.pad(x_nhwc, ((0, 0), (pad, pad), (pad, pad), (0, 0)))
    _, Hp, Wp, _ = x.shape
    H_out = (Hp - k) // stride + 1
    W_out = (Wp - k) // stride + 1
    cols = []
    for i in range(k):
        for j in range(k):
            cols.append(x[:, i:i + stride * H_out:stride,
                          j:j + stride * W_out:stride, :])
    return jnp.concatenate(cols, axis=-1), H_out, W_out


def _pad_activation(x2d):
    """Cast to bf16 and pad (M, K) -> (M_pad, K_pad) for the matmul kernels."""
    M, K = x2d.shape
    M_pad = _round_up(M, 128) if M >= 128 else _round_up(M, 16)
    K_pad = _round_up(K, 128)
    return jnp.pad(x2d.astype(jnp.bfloat16), ((0, M_pad - M), (0, K_pad - K)))


# ---------------------------------------------------------------------------
# DQN parameters (raw), one-time layout preparation, forward pass
# ---------------------------------------------------------------------------
def init_dqn_params(key, n_channels, board_h, board_w, n_actions):
    """Deterministic init (uniform +/- 1/sqrt(fan_in), like PyTorch defaults)."""
    keys = jax.random.split(key, 14)
    params = {}

    def conv_init(kw, kb, c_out, c_in, ksz):
        fan_in = c_in * ksz * ksz
        bound = 1.0 / jnp.sqrt(fan_in)
        w = jax.random.uniform(kw, (c_out, c_in, ksz, ksz), jnp.float32, -bound, bound)
        b = jax.random.uniform(kb, (c_out,), jnp.float32, -bound, bound)
        return w, b

    def lin_init(kw, kb, d_in, d_out):
        bound = 1.0 / jnp.sqrt(d_in)
        w = jax.random.uniform(kw, (d_in, d_out), jnp.float32, -bound, bound)
        b = jax.random.uniform(kb, (d_out,), jnp.float32, -bound, bound)
        return w, b

    params["conv1"] = conv_init(keys[0], keys[1], 64, n_channels, 5)
    params["conv2"] = conv_init(keys[2], keys[3], 128, 64, 3)
    params["conv3"] = conv_init(keys[4], keys[5], 256, 128, 3)
    params["conv4"] = conv_init(keys[6], keys[7], 256, 256, 3)

    h3 = (board_h + 1) // 2  # stride-2 conv, padding 1, kernel 3
    w3 = (board_w + 1) // 2
    flattened = 256 * h3 * w3
    params["fc1"] = lin_init(keys[8], keys[9], flattened, 128)
    params["fc2"] = lin_init(keys[10], keys[11], 128, 64)
    params["fc3"] = lin_init(keys[12], keys[13], 64, n_actions)
    return params


def prepare_dqn_params(params, board_h, board_w):
    """One-time layout plumbing: transpose / pad / cast weights for the Pallas kernels."""
    def prep_matrix(w_mat, b):
        K, N = w_mat.shape
        K_pad, N_pad = _round_up(K, 128), _round_up(N, 128)
        w_p = jnp.zeros((K_pad, N_pad), jnp.bfloat16).at[:K, :N].set(
            w_mat.astype(jnp.bfloat16))
        b_p = jnp.zeros((1, N_pad), jnp.float32).at[0, :N].set(b)
        return w_p, b_p

    def prep_conv(w_oihw, b):
        c_out, c_in, k, _ = w_oihw.shape
        # (O, I, kH, kW) -> (kH, kW, I, O) -> (kH*kW*I, O) to match im2col patch order.
        w_mat = jnp.transpose(w_oihw, (2, 3, 1, 0)).reshape(k * k * c_in, c_out)
        return prep_matrix(w_mat, b)

    prep = {name: prep_conv(*params[name])
            for name in ("conv1", "conv2", "conv3", "conv4")}

    # fc1: permute rows from torch's NCHW flatten(1) order to NHWC flatten order so the
    # runtime (N,H,W,C)->(N,C,H,W) transpose before the head can be deleted.
    h3, w3 = (board_h + 1) // 2, (board_w + 1) // 2
    c4 = params["conv4"][0].shape[0]
    w1, b1 = params["fc1"]
    w1_nhwc = jnp.transpose(w1.reshape(c4, h3, w3, w1.shape[1]),
                            (1, 2, 0, 3)).reshape(h3 * w3 * c4, w1.shape[1])
    prep["fc1"] = prep_matrix(w1_nhwc, b1)
    prep["fc2"] = prep_matrix(*params["fc2"])
    prep["fc3"] = prep_matrix(*params["fc3"])
    return prep


_CONV_CFG = (
    # name, kernel, stride, pad, c_out   (matches nn.Sequential in the PyTorch DQN)
    ("conv1", 5, 1, 2, 64),
    ("conv2", 3, 1, 1, 128),
    ("conv3", 3, 2, 1, 256),
    ("conv4", 3, 1, 1, 256),
)


def dqn_forward(prep, x_nchw, n_actions):
    """Forward pass of DQN.  x_nchw: (N, C, H, W) float32 -> (N, n_actions) float32."""
    x = jnp.transpose(x_nchw, (0, 2, 3, 1))  # NCHW -> NHWC for im2col
    for name, k, stride, pad, c_out in _CONV_CFG:
        w_p, b_p = prep[name]
        patches, ho, wo = _im2col(x, k, stride, pad)
        n = patches.shape[0]
        m = n * ho * wo
        x_p = _pad_activation(patches.reshape(m, patches.shape[-1]))
        out = pallas_matmul_bias(x_p, w_p, b_p, relu=True, out_m=m, out_n=c_out)
        x = out.reshape(n, ho, wo, c_out)

    # Fused MLP head on the NHWC flatten (fc1 rows were pre-permuted to match torch's
    # flatten(1) on NCHW), all three layers in a single pallas_call.
    n = x.shape[0]
    xf = _pad_activation(x.reshape(n, -1))
    return pallas_mlp_head(xf, prep["fc1"], prep["fc2"], prep["fc3"],
                           out_m=n, out_n=n_actions)


# ---------------------------------------------------------------------------
# Pure-XLA reference mirroring the kernel numerics (bf16 matmul inputs, f32 accumulate)
# ---------------------------------------------------------------------------
def _ref_forward(params, x_nchw):
    bf = jnp.bfloat16

    def mm(a, w, b):
        return jnp.dot(a.astype(bf), w.astype(bf),
                       preferred_element_type=jnp.float32) + b

    def conv(x, w, b, stride, pad):
        k = w.shape[2]
        patches, ho, wo = _im2col(x, k, stride, pad)
        wm = jnp.transpose(w, (2, 3, 1, 0)).reshape(patches.shape[-1], w.shape[0])
        o = jnp.maximum(mm(patches.reshape(-1, patches.shape[-1]), wm, b), 0.0)
        return o.reshape(x.shape[0], ho, wo, w.shape[0])

    x = jnp.transpose(x_nchw, (0, 2, 3, 1))
    x = conv(x, *params["conv1"], 1, 2)
    x = conv(x, *params["conv2"], 1, 1)
    x = conv(x, *params["conv3"], 2, 1)
    x = conv(x, *params["conv4"], 1, 1)
    xf = jnp.transpose(x, (0, 3, 1, 2)).reshape(x.shape[0], -1)  # torch flatten(1) order
    h = jnp.maximum(mm(xf, *params["fc1"]), 0.0)
    h = jnp.maximum(mm(h, *params["fc2"]), 0.0)
    return mm(h, *params["fc3"])


if __name__ == "__main__":
    key = jax.random.PRNGKey(0)
    k_param, k_input = jax.random.split(key)

    batch, n_channels, board_h, board_w, n_actions = 2, 4, 16, 16, 8
    params = init_dqn_params(k_param, n_channels, board_h, board_w, n_actions)
    prep = prepare_dqn_params(params, board_h, board_w)     # one-time layout plumbing
    x = jax.random.normal(k_input, (batch, n_channels, board_h, board_w), jnp.float32)

    fwd = jax.jit(dqn_forward, static_argnames=("n_actions",))
    out = jax.block_until_ready(fwd(prep, x, n_actions=n_actions))
    assert out.shape == (batch, n_actions), out.shape

    ref = jax.block_until_ready(_ref_forward(params, x))
    assert jnp.allclose(out, ref, atol=5e-3, rtol=5e-3), (
        "Pallas output mismatch vs reference, max abs diff = "
        f"{float(jnp.max(jnp.abs(out - ref)))}")

    print("KERNEL_OK")
</pallas_src>

<mosaic_0001>
module attributes {stable_mosaic.version = 11 : i64} {
  func.func @_mm_bias_kernel(%arg0: i32, %arg1: memref<128x128xbf16, #tpu.memory_space<vmem>>, %arg2: memref<128x128xbf16, #tpu.memory_space<vmem>>, %arg3: memref<1x128xf32, #tpu.memory_space<vmem>>, %arg4: memref<128x128xf32, #tpu.memory_space<vmem>>) attributes {dimension_semantics = [#tpu.dimension_semantics<parallel>], iteration_bounds = array<i64: 4>, scalar_prefetch = 0 : i64, scratch_operands = 0 : i64, tpu.core_type = #tpu.core_type<tc>, window_params = [{transform_indices = @transform_0, window_bounds = array<i64: 128, 128>}, {pipeline_mode = #tpu.pipeline_mode<synchronous>, transform_indices = @transform_1, window_bounds = array<i64: 128, 128>}, {pipeline_mode = #tpu.pipeline_mode<synchronous>, transform_indices = @transform_2, window_bounds = array<i64: 1, 128>}, {transform_indices = @transform_3, window_bounds = array<i64: 128, 128>}]} {
    %c0 = arith.constant 0 : index
    %c0_0 = arith.constant 0 : index
    %0 = vector.load %arg1[%c0, %c0_0] : memref<128x128xbf16, #tpu.memory_space<vmem>>, vector<128x128xbf16>
    %c0_1 = arith.constant 0 : index
    %c0_2 = arith.constant 0 : index
    %1 = vector.load %arg2[%c0_1, %c0_2] : memref<128x128xbf16, #tpu.memory_space<vmem>>, vector<128x128xbf16>
    %cst = arith.constant dense<0.000000e+00> : vector<128x128xf32>
    %2 = tpu.matmul %0, %1, %cst {dimension_numbers = #tpu.dot_dimension_numbers<[1], [0], [0], [1], [0, 0, 1, 1], [], []>} : vector<128x128xbf16>, vector<128x128xbf16>, vector<128x128xf32> -> vector<128x128xf32>
    %c0_3 = arith.constant 0 : index
    %c0_4 = arith.constant 0 : index
    %3 = vector.load %arg3[%c0_3, %c0_4] : memref<1x128xf32, #tpu.memory_space<vmem>>, vector<1x128xf32>
    %4 = vector.broadcast %3 : vector<1x128xf32> to vector<128x128xf32>
    %5 = arith.addf %2, %4 : vector<128x128xf32>
    %cst_5 = arith.constant 0.000000e+00 : f32
    %6 = vector.broadcast %cst_5 : f32 to vector<128x128xf32>
    %7 = arith.maximumf %5, %6 : vector<128x128xf32>
    %c0_6 = arith.constant 0 : index
    %c0_7 = arith.constant 0 : index
    %8 = vector.load %arg4[%c0_6, %c0_7] : memref<128x128xf32, #tpu.memory_space<vmem>>, vector<128x128xf32>
    tpu.vector_store %arg4[%c0_6, %c0_7], %7 {strides = array<i32>} : memref<128x128xf32, #tpu.memory_space<vmem>>, vector<128x128xf32>,
    return
  }
  func.func @transform_0(%arg0: i32) -> (i32, i32) {
    %c0_i32 = arith.constant 0 : i32
    %c0_i32_0 = arith.constant 0 : i32
    return %arg0, %c0_i32 : i32, i32
  }
  func.func @transform_1(%arg0: i32) -> (i32, i32) {
    %c0_i32 = arith.constant 0 : i32
    %c0_i32_0 = arith.constant 0 : i32
    %c0_i32_1 = arith.constant 0 : i32
    return %c0_i32, %c0_i32_0 : i32, i32
  }
  func.func @transform_2(%arg0: i32) -> (i32, i32) {
    %c0_i32 = arith.constant 0 : i32
    %c0_i32_0 = arith.constant 0 : i32
    %c0_i32_1 = arith.constant 0 : i32
    return %c0_i32, %c0_i32_0 : i32, i32
  }
  func.func @transform_3(%arg0: i32) -> (i32, i32) {
    %c0_i32 = arith.constant 0 : i32
    %c0_i32_0 = arith.constant 0 : i32
    return %arg0, %c0_i32 : i32, i32
  }
}

module attributes {stable_mosaic.version = 11 : i64} {
  func.func @_mm_bias_kernel(%arg0: i32, %arg1: memref<128x640xbf16, #tpu.memory_space<vmem>>, %arg2: memref<640x128xbf16, #tpu.memory_space<vmem>>, %arg3: memref<1x128xf32, #tpu.memory_space<vmem>>, %arg4: memref<128x128xf32, #tpu.memory_space<vmem>>) attributes {dimension_semantics = [#tpu.dimension_semantics<parallel>], iteration_bounds = array<i64: 4>, scalar_prefetch = 0 : i64, scratch_operands = 0 : i64, tpu.core_type = #tpu.core_type<tc>, window_params = [{transform_indices = @transform_0, window_bounds = array<i64: 128, 640>}, {pipeline_mode = #tpu.pipeline_mode<synchronous>, transform_indices = @transform_1, window_bounds = array<i64: 640, 128>}, {pipeline_mode = #tpu.pipeline_mode<synchronous>, transform_indices = @transform_2, window_bounds = array<i64: 1, 128>}, {transform_indices = @transform_3, window_bounds = array<i64: 128, 128>}]} {
    %c0 = arith.constant 0 : index
    %c0_0 = arith.constant 0 : index
    %0 = vector.load %arg1[%c0, %c0_0] : memref<128x640xbf16, #tpu.memory_space<vmem>>, vector<128x640xbf16>
    %c0_1 = arith.constant 0 : index
    %c0_2 = arith.constant 0 : index
    %1 = vector.load %arg2[%c0_1, %c0_2] : memref<640x128xbf16, #tpu.memory_space<vmem>>, vector<640x128xbf16>
    %cst = arith.constant dense<0.000000e+00> : vector<128x128xf32>
    %2 = tpu.matmul %0, %1, %cst {dimension_numbers = #tpu.dot_dimension_numbers<[1], [0], [0], [1], [0, 0, 1, 1], [], []>} : vector<128x640xbf16>, vector<640x128xbf16>, vector<128x128xf32> -> vector<128x128xf32>
    %c0_3 = arith.constant 0 : index
    %c0_4 = arith.constant 0 : index
    %3 = vector.load %arg3[%c0_3, %c0_4] : memref<1x128xf32, #tpu.memory_space<vmem>>, vector<1x128xf32>
    %4 = vector.broadcast %3 : vector<1x128xf32> to vector<128x128xf32>
    %5 = arith.addf %2, %4 : vector<128x128xf32>
    %cst_5 = arith.constant 0.000000e+00 : f32
    %6 = vector.broadcast %cst_5 : f32 to vector<128x128xf32>
    %7 = arith.maximumf %5, %6 : vector<128x128xf32>
    %c0_6 = arith.constant 0 : index
    %c0_7 = arith.constant 0 : index
    %8 = vector.load %arg4[%c0_6, %c0_7] : memref<128x128xf32, #tpu.memory_space<vmem>>, vector<128x128xf32>
    tpu.vector_store %arg4[%c0_6, %c0_7], %7 {strides = array<i32>} : memref<128x128xf32, #tpu.memory_space<vmem>>, vector<128x128xf32>,
    return
  }
  func.func @transform_0(%arg0: i32) -> (i32, i32) {
    %c0_i32 = arith.constant 0 : i32
    %c0_i32_0 = arith.constant 0 : i32
    return %arg0, %c0_i32 : i32, i32
  }
  func.func @transform_1(%arg0: i32) -> (i32, i32) {
    %c0_i32 = arith.constant 0 : i32
    %c0_i32_0 = arith.constant 0 : i32
    %c0_i32_1 = arith.constant 0 : i32
    return %c0_i32, %c0_i32_0 : i32, i32
  }
  func.func @transform_2(%arg0: i32) -> (i32, i32) {
    %c0_i32 = arith.constant 0 : i32
    %c0_i32_0 = arith.constant 0 : i32
    %c0_i32_1 = arith.constant 0 : i32
    return %c0_i32, %c0_i32_0 : i32, i32
  }
  func.func @transform_3(%arg0: i32) -> (i32, i32) {
    %c0_i32 = arith.constant 0 : i32
    %c0_i32_0 = arith.constant 0 : i32
    return %arg0, %c0_i32 : i32, i32
  }
}

module attributes {stable_mosaic.version = 11 : i64} {
  func.func @_mm_bias_kernel(%arg0: i32, %arg1: memref<128x1152xbf16, #tpu.memory_space<vmem>>, %arg2: memref<1152x256xbf16, #tpu.memory_space<vmem>>, %arg3: memref<1x256xf32, #tpu.memory_space<vmem>>, %arg4: memref<128x256xf32, #tpu.memory_space<vmem>>) attributes {dimension_semantics = [#tpu.dimension_semantics<parallel>], iteration_bounds = array<i64: 1>, scalar_prefetch = 0 : i64, scratch_operands = 0 : i64, tpu.core_type = #tpu.core_type<tc>, window_params = [{transform_indices = @transform_0, window_bounds = array<i64: 128, 1152>}, {pipeline_mode = #tpu.pipeline_mode<synchronous>, transform_indices = @transform_1, window_bounds = array<i64: 1152, 256>}, {pipeline_mode = #tpu.pipeline_mode<synchronous>, transform_indices = @transform_2, window_bounds = array<i64: 1, 256>}, {transform_indices = @transform_3, window_bounds = array<i64: 128, 256>}]} {
    %c0 = arith.constant 0 : index
    %c0_0 = arith.constant 0 : index
    %0 = vector.load %arg1[%c0, %c0_0] : memref<128x1152xbf16, #tpu.memory_space<vmem>>, vector<128x1152xbf16>
    %c0_1 = arith.constant 0 : index
    %c0_2 = arith.constant 0 : index
    %1 = vector.load %arg2[%c0_1, %c0_2] : memref<1152x256xbf16, #tpu.memory_space<vmem>>, vector<1152x256xbf16>
    %cst = arith.constant dense<0.000000e+00> : vector<128x256xf32>
    %2 = tpu.matmul %0, %1, %cst {dimension_numbers = #tpu.dot_dimension_numbers<[1], [0], [0], [1], [0, 0, 1, 1], [], []>} : vector<128x1152xbf16>, vector<1152x256xbf16>, vector<128x256xf32> -> vector<128x256xf32>
    %c0_3 = arith.constant 0 : index
    %c0_4 = arith.constant 0 : index
    %3 = vector.load %arg3[%c0_3, %c0_4] : memref<1x256xf32, #tpu.memory_space<vmem>>, vector<1x256xf32>
    %4 = vector.broadcast %3 : vector<1x256xf32> to vector<128x256xf32>
    %5 = arith.addf %2, %4 : vector<128x256xf32>
    %cst_5 = arith.constant 0.000000e+00 : f32
    %6 = vector.broadcast %cst_5 : f32 to vector<128x256xf32>
    %7 = arith.maximumf %5, %6 : vector<128x256xf32>
    %c0_6 = arith.constant 0 : index
    %c0_7 = arith.constant 0 : index
    %8 = vector.load %arg4[%c0_6, %c0_7] : memref<128x256xf32, #tpu.memory_space<vmem>>, vector<128x256xf32>
    tpu.vector_store %arg4[%c0_6, %c0_7], %7 {strides = array<i32>} : memref<128x256xf32, #tpu.memory_space<vmem>>, vector<128x256xf32>,
    return
  }
  func.func @transform_0(%arg0: i32) -> (i32, i32) {
    %c0_i32 = arith.constant 0 : i32
    %c0_i32_0 = arith.constant 0 : i32
    return %arg0, %c0_i32 : i32, i32
  }
  func.func @transform_1(%arg0: i32) -> (i32, i32) {
    %c0_i32 = arith.constant 0 : i32
    %c0_i32_0 = arith.constant 0 : i32
    %c0_i32_1 = arith.constant 0 : i32
    return %c0_i32, %c0_i32_0 : i32, i32
  }
  func.func @transform_2(%arg0: i32) -> (i32, i32) {
    %c0_i32 = arith.constant 0 : i32
    %c0_i32_0 = arith.constant 0 : i32
    %c0_i32_1 = arith.constant 0 : i32
    return %c0_i32, %c0_i32_0 : i32, i32
  }
  func.func @transform_3(%arg0: i32) -> (i32, i32) {
    %c0_i32 = arith.constant 0 : i32
    %c0_i32_0 = arith.constant 0 : i32
    return %arg0, %c0_i32 : i32, i32
  }
}

module attributes {stable_mosaic.version = 11 : i64} {
  func.func @_mm_bias_kernel(%arg0: i32, %arg1: memref<128x2304xbf16, #tpu.memory_space<vmem>>, %arg2: memref<2304x256xbf16, #tpu.memory_space<vmem>>, %arg3: memref<1x256xf32, #tpu.memory_space<vmem>>, %arg4: memref<128x256xf32, #tpu.memory_space<vmem>>) attributes {dimension_semantics = [#tpu.dimension_semantics<parallel>], iteration_bounds = array<i64: 1>, scalar_prefetch = 0 : i64, scratch_operands = 0 : i64, tpu.core_type = #tpu.core_type<tc>, window_params = [{transform_indices = @transform_0, window_bounds = array<i64: 128, 2304>}, {pipeline_mode = #tpu.pipeline_mode<synchronous>, transform_indices = @transform_1, window_bounds = array<i64: 2304, 256>}, {pipeline_mode = #tpu.pipeline_mode<synchronous>, transform_indices = @transform_2, window_bounds = array<i64: 1, 256>}, {transform_indices = @transform_3, window_bounds = array<i64: 128, 256>}]} {
    %c0 = arith.constant 0 : index
    %c0_0 = arith.constant 0 : index
    %0 = vector.load %arg1[%c0, %c0_0] : memref<128x2304xbf16, #tpu.memory_space<vmem>>, vector<128x2304xbf16>
    %c0_1 = arith.constant 0 : index
    %c0_2 = arith.constant 0 : index
    %1 = vector.load %arg2[%c0_1, %c0_2] : memref<2304x256xbf16, #tpu.memory_space<vmem>>, vector<2304x256xbf16>
    %cst = arith.constant dense<0.000000e+00> : vector<128x256xf32>
    %2 = tpu.matmul %0, %1, %cst {dimension_numbers = #tpu.dot_dimension_numbers<[1], [0], [0], [1], [0, 0, 1, 1], [], []>} : vector<128x2304xbf16>, vector<2304x256xbf16>, vector<128x256xf32> -> vector<128x256xf32>
    %c0_3 = arith.constant 0 : index
    %c0_4 = arith.constant 0 : index
    %3 = vector.load %arg3[%c0_3, %c0_4] : memref<1x256xf32, #tpu.memory_space<vmem>>, vector<1x256xf32>
    %4 = vector.broadcast %3 : vector<1x256xf32> to vector<128x256xf32>
    %5 = arith.addf %2, %4 : vector<128x256xf32>
    %cst_5 = arith.constant 0.000000e+00 : f32
    %6 = vector.broadcast %cst_5 : f32 to vector<128x256xf32>
    %7 = arith.maximumf %5, %6 : vector<128x256xf32>
    %c0_6 = arith.constant 0 : index
    %c0_7 = arith.constant 0 : index
    %8 = vector.load %arg4[%c0_6, %c0_7] : memref<128x256xf32, #tpu.memory_space<vmem>>, vector<128x256xf32>
    tpu.vector_store %arg4[%c0_6, %c0_7], %7 {strides = array<i32>} : memref<128x256xf32, #tpu.memory_space<vmem>>, vector<128x256xf32>,
    return
  }
  func.func @transform_0(%arg0: i32) -> (i32, i32) {
    %c0_i32 = arith.constant 0 : i32
    %c0_i32_0 = arith.constant 0 : i32
    return %arg0, %c0_i32 : i32, i32
  }
  func.func @transform_1(%arg0: i32) -> (i32, i32) {
    %c0_i32 = arith.constant 0 : i32
    %c0_i32_0 = arith.constant 0 : i32
    %c0_i32_1 = arith.constant 0 : i32
    return %c0_i32, %c0_i32_0 : i32, i32
  }
  func.func @transform_2(%arg0: i32) -> (i32, i32) {
    %c0_i32 = arith.constant 0 : i32
    %c0_i32_0 = arith.constant 0 : i32
    %c0_i32_1 = arith.constant 0 : i32
    return %c0_i32, %c0_i32_0 : i32, i32
  }
  func.func @transform_3(%arg0: i32) -> (i32, i32) {
    %c0_i32 = arith.constant 0 : i32
    %c0_i32_0 = arith.constant 0 : i32
    return %arg0, %c0_i32 : i32, i32
  }
}

module attributes {stable_mosaic.version = 11 : i64} {
  func.func @_mlp_kernel(%arg0: i32, %arg1: memref<16x16384xbf16, #tpu.memory_space<vmem>>, %arg2: memref<16384x128xbf16, #tpu.memory_space<vmem>>, %arg3: memref<1x128xf32, #tpu.memory_space<vmem>>, %arg4: memref<128x128xbf16, #tpu.memory_space<vmem>>, %arg5: memref<1x128xf32, #tpu.memory_space<vmem>>, %arg6: memref<128x128xbf16, #tpu.memory_space<vmem>>, %arg7: memref<1x128xf32, #tpu.memory_space<vmem>>, %arg8: memref<16x128xf32, #tpu.memory_space<vmem>>) attributes {dimension_semantics = [#tpu.dimension_semantics<arbitrary>], iteration_bounds = array<i64: 1>, scalar_prefetch = 0 : i64, scratch_operands = 0 : i64, tpu.core_type = #tpu.core_type<tc>, window_params = [{pipeline_mode = #tpu.pipeline_mode<synchronous>, transform_indices = @transform_0, window_bounds = array<i64: 16, 16384>}, {pipeline_mode = #tpu.pipeline_mode<synchronous>, transform_indices = @transform_1, window_bounds = array<i64: 16384, 128>}, {pipeline_mode = #tpu.pipeline_mode<synchronous>, transform_indices = @transform_2, window_bounds = array<i64: 1, 128>}, {pipeline_mode = #tpu.pipeline_mode<synchronous>, transform_indices = @transform_3, window_bounds = array<i64: 128, 128>}, {pipeline_mode = #tpu.pipeline_mode<synchronous>, transform_indices = @transform_4, window_bounds = array<i64: 1, 128>}, {pipeline_mode = #tpu.pipeline_mode<synchronous>, transform_indices = @transform_5, window_bounds = array<i64: 128, 128>}, {pipeline_mode = #tpu.pipeline_mode<synchronous>, transform_indices = @transform_6, window_bounds = array<i64: 1, 128>}, {pipeline_mode = #tpu.pipeline_mode<synchronous>, transform_indices = @transform_7, window_bounds = array<i64: 16, 128>}]} {
    %c0 = arith.constant 0 : index
    %c0_0 = arith.constant 0 : index
    %0 = vector.load %arg1[%c0, %c0_0] : memref<16x16384xbf16, #tpu.memory_space<vmem>>, vector<16x16384xbf16>
    %c0_1 = arith.constant 0 : index
    %c0_2 = arith.constant 0 : index
    %1 = vector.load %arg2[%c0_1, %c0_2] : memref<16384x128xbf16, #tpu.memory_space<vmem>>, vector<16384x128xbf16>
    %cst = arith.constant dense<0.000000e+00> : vector<16x128xf32>
    %2 = tpu.matmul %0, %1, %cst {dimension_numbers = #tpu.dot_dimension_numbers<[1], [0], [0], [1], [0, 0, 1, 1], [], []>} : vector<16x16384xbf16>, vector<16384x128xbf16>, vector<16x128xf32> -> vector<16x128xf32>
    %c0_3 = arith.constant 0 : index
    %c0_4 = arith.constant 0 : index
    %3 = vector.load %arg3[%c0_3, %c0_4] : memref<1x128xf32, #tpu.memory_space<vmem>>, vector<1x128xf32>
    %4 = vector.broadcast %3 : vector<1x128xf32> to vector<16x128xf32>
    %5 = arith.addf %2, %4 : vector<16x128xf32>
    %cst_5 = arith.constant 0.000000e+00 : f32
    %6 = vector.broadcast %cst_5 : f32 to vector<16x128xf32>
    %7 = arith.maximumf %5, %6 : vector<16x128xf32>
    %8 = arith.truncf %7 : vector<16x128xf32> to vector<16x128xbf16>
    %c0_6 = arith.constant 0 : index
    %c0_7 = arith.constant 0 : index
    %9 = vector.load %arg4[%c0_6, %c0_7] : memref<128x128xbf16, #tpu.memory_space<vmem>>, vector<128x128xbf16>
    %cst_8 = arith.constant dense<0.000000e+00> : vector<16x128xf32>
    %10 = tpu.matmul %8, %9, %cst_8 {dimension_numbers = #tpu.dot_dimension_numbers<[1], [0], [0], [1], [0, 0, 1, 1], [], []>} : vector<16x128xbf16>, vector<128x128xbf16>, vector<16x128xf32> -> vector<16x128xf32>
    %c0_9 = arith.constant 0 : index
    %c0_10 = arith.constant 0 : index
    %11 = vector.load %arg5[%c0_9, %c0_10] : memref<1x128xf32, #tpu.memory_space<vmem>>, vector<1x128xf32>
    %12 = vector.broadcast %11 : vector<1x128xf32> to vector<16x128xf32>
    %13 = arith.addf %10, %12 : vector<16x128xf32>
    %cst_11 = arith.constant 0.000000e+00 : f32
    %14 = vector.broadcast %cst_11 : f32 to vector<16x128xf32>
    %15 = arith.maximumf %13, %14 : vector<16x128xf32>
    %16 = arith.truncf %15 : vector<16x128xf32> to vector<16x128xbf16>
    %c0_12 = arith.constant 0 : index
    %c0_13 = arith.constant 0 : index
    %17 = vector.load %arg6[%c0_12, %c0_13] : memref<128x128xbf16, #tpu.memory_space<vmem>>, vector<128x128xbf16>
    %cst_14 = arith.constant dense<0.000000e+00> : vector<16x128xf32>
    %18 = tpu.matmul %16, %17, %cst_14 {dimension_numbers = #tpu.dot_dimension_numbers<[1], [0], [0], [1], [0, 0, 1, 1], [], []>} : vector<16x128xbf16>, vector<128x128xbf16>, vector<16x128xf32> -> vector<16x128xf32>
    %c0_15 = arith.constant 0 : index
    %c0_16 = arith.constant 0 : index
    %19 = vector.load %arg7[%c0_15, %c0_16] : memref<1x128xf32, #tpu.memory_space<vmem>>, vector<1x128xf32>
    %20 = vector.broadcast %19 : vector<1x128xf32> to vector<16x128xf32>
    %21 = arith.addf %18, %20 : vector<16x128xf32>
    %c0_17 = arith.constant 0 : index
    %c0_18 = arith.constant 0 : index
    %22 = vector.load %arg8[%c0_17, %c0_18] : memref<16x128xf32, #tpu.memory_space<vmem>>, vector<16x128xf32>
    tpu.vector_store %arg8[%c0_17, %c0_18], %21 {strides = array<i32>} : memref<16x128xf32, #tpu.memory_space<vmem>>, vector<16x128xf32>,
    return
  }
  func.func @transform_0(%arg0: i32) -> (i32, i32) {
    %c0_i32 = arith.constant 0 : i32
    %c0_i32_0 = arith.constant 0 : i32
    %c0_i32_1 = arith.constant 0 : i32
    return %c0_i32, %c0_i32_0 : i32, i32
  }
  func.func @transform_1(%arg0: i32) -> (i32, i32) {
    %c0_i32 = arith.constant 0 : i32
    %c0_i32_0 = arith.constant 0 : i32
    %c0_i32_1 = arith.constant 0 : i32
    return %c0_i32, %c0_i32_0 : i32, i32
  }
  func.func @transform_2(%arg0: i32) -> (i32, i32) {
    %c0_i32 = arith.constant 0 : i32
    %c0_i32_0 = arith.constant 0 : i32
    %c0_i32_1 = arith.constant 0 : i32
    return %c0_i32, %c0_i32_0 : i32, i32
  }
  func.func @transform_3(%arg0: i32) -> (i32, i32) {
    %c0_i32 = arith.constant 0 : i32
    %c0_i32_0 = arith.constant 0 : i32
    %c0_i32_1 = arith.constant 0 : i32
    return %c0_i32, %c0_i32_0 : i32, i32
  }
  func.func @transform_4(%arg0: i32) -> (i32, i32) {
    %c0_i32 = arith.constant 0 : i32
    %c0_i32_0 = arith.constant 0 : i32
    %c0_i32_1 = arith.constant 0 : i32
    return %c0_i32, %c0_i32_0 : i32, i32
  }
  func.func @transform_5(%arg0: i32) -> (i32, i32) {
    %c0_i32 = arith.constant 0 : i32
    %c0_i32_0 = arith.constant 0 : i32
    %c0_i32_1 = arith.constant 0 : i32
    return %c0_i32, %c0_i32_0 : i32, i32
  }
  func.func @transform_6(%arg0: i32) -> (i32, i32) {
    %c0_i32 = arith.constant 0 : i32
    %c0_i32_0 = arith.constant 0 : i32
    %c0_i32_1 = arith.constant 0 : i32
    return %c0_i32, %c0_i32_0 : i32, i32
  }
  func.func @transform_7(%arg0: i32) -> (i32, i32) {
    %c0_i32 = arith.constant 0 : i32
    %c0_i32_0 = arith.constant 0 : i32
    %c0_i32_1 = arith.constant 0 : i32
    return %c0_i32, %c0_i32_0 : i32, i32
  }
}

</mosaic_0001>

<bundles_post_ra>
// kernel: dqn_forward.5
= control target key start
LH: loop header
LB: loop body
LE: loop exit
PB: predicated region body
PF: predicated region fallthrough
CT: control target
= control target key end

     0   :  { %s639_s12 = smov 0   ;;  %s715_s0 = inlined_call_operand.vmem [shape: bf16[512,128], index: 0, kind: input, shape index: {}]   ;;  %s716_s1 = inlined_call_operand.vmem [shape: bf16[128,128], index: 1, kind: input, shape index: {}]   ;;  %s717_s2 = inlined_call_operand.vmem [shape: f32[1,128], index: 2, kind: input, shape index: {}]   ;;  %s718_s3 = inlined_call_operand.vmem [shape: f32[512,128], index: 3, kind: output, shape index: {}]  }
   0x1 LB: > { %s495_s13 = sadd.s32 4294967295, %s617_s12   ;;  %p499_p0 = scmp.ge.s32.totalorder %s617_s12, 1  ;;  %s617_s12 = sphi %s639_s12, %s13_s12  }
   0x2   : > { %p138_p1 = scmp.lt.s32.totalorder %s617_s12, 5 }
   0x4   : > { %p139_p2 = pnand %p499_p0, %p138_p1 }
   0x5   : > { %v595_v0 = vld [vmem:[%s716_s1] sm:$0xff] (!%p139_p2)   ;;  %s500_s16 = sshll.u32 (!%p139_p2), %s495_s13, 4  ;;  %v596_v1 = vld [vmem:[%s716_s1 + $0x8] sm:$0xff] (!%p139_p2)   ;;  %v597_v2 = vld [vmem:[%s716_s1 + $0x10] sm:$0xff] (!%p139_p2)  }
   0x6   : > { %142 = sbr.rel (%p139_p2) target bundleno = 266 (0x10a), region = 32  ;;  %p163_p3 = scmp.lt.s32.totalorder (!%p139_p2), %s500_s16, 63  ;;  %539 = vmatprep.subr.bf16.mxu0 (!%p139_p2), %v595_v0  ;;  %571 = vmatprep.subr.bf16.mxu1 (!%p139_p2), %v595_v0  ;;  %v598_v3 = vld [vmem:[%s716_s1 + $0x18] sm:$0xff] (!%p139_p2)   ;;  %v599_v6 = vld [vmem:[%s716_s1 + $0x20] sm:$0xff] (!%p139_p2)   ;;  %v600_v7 = vld [vmem:[%s716_s1 + $0x28] sm:$0xff] (!%p139_p2)  }
   0x7   : > { %540 = vmatpush3.bf16.msra.mxu0 (!%p139_p2), %v595_v0  ;;  %579 = vmatpush3.bf16.msra.mxu1 (!%p139_p2), %v595_v0  ;;  %v601_v8 = vld [vmem:[%s716_s1 + $0x30] sm:$0xff] (!%p139_p2)   ;;  %v602_v9 = vld [vmem:[%s716_s1 + $0x38] sm:$0xff] (!%p139_p2)   ;;  %v504_v16 = vld [vmem:[%s717_s2] ss:$0 sm:$0xff] (!%p139_p2) }
   0x8   : > { %541 = vmatprep.subr.bf16.mxu0 (!%p139_p2), %v596_v1  ;;  %572 = vmatprep.subr.bf16.mxu1 (!%p139_p2), %v596_v1 }
   0xb   : > { %542 = vmatpush3.bf16.msra.mxu0 (!%p139_p2), %v596_v1  ;;  %580 = vmatpush3.bf16.msra.mxu1 (!%p139_p2), %v596_v1 }
   0xc   : > { %543 = vmatprep.subr.bf16.mxu0 (!%p139_p2), %v597_v2  ;;  %573 = vmatprep.subr.bf16.mxu1 (!%p139_p2), %v597_v2 }
   0xd   : > { %s720_s16 = smov (!%p163_p3, %s500_s16), 63 }
   0xe   : > { %s501_s21 = sshll.u32 %s720_s16, 2  ;;  %s503_s10 = sshll.u32 %s720_s16, 3 }
   0xf   : > { %s662_s24 = scalar_lea.vmem %s715_s0, %s501_s21  ;;  %544 = vmatpush3.bf16.msra.mxu0 %v597_v2  ;;  %581 = vmatpush3.bf16.msra.mxu1 %v597_v2  ;;  %s694_s14 = scalar_lea.vmem %s718_s3, %s503_s10 }
  0x10   : > { %v603_v4 = vld [vmem:[%s662_s24] sm:$0xff]   ;;  %545 = vmatprep.subr.bf16.mxu0 %v598_v3  ;;  %574 = vmatprep.subr.bf16.mxu1 %v598_v3  ;;  %v605_v10 = vld [vmem:[%s662_s24 + $0x8] sm:$0xff]   ;;  %v607_v12 = vld [vmem:[%s662_s24 + $0x10] sm:$0xff]  }
  0x11   : > { %v604_v5 = vld [vmem:[%s662_s24 + $0x20] sm:$0xff]   ;;  %555 = vmatprep.mubr.bf16.mxu0 %v603_v4  ;;  %v606_v11 = vld [vmem:[%s662_s24 + $0x28] sm:$0xff]   ;;  %v608_v13 = vld [vmem:[%s662_s24 + $0x30] sm:$0xff]  }
  0x12   : > { %563 = vmatprep.mubr.bf16.mxu1 %v604_v5  ;;  %v609_v14 = vld [vmem:[%s662_s24 + $0x18] sm:$0xff]  }
  0x13   : > { %546 = vmatpush3.bf16.msra.mxu0 %v598_v3  ;;  %582 = vmatpush3.bf16.msra.mxu1 %v598_v3  ;;  %v610_v15 = vld [vmem:[%s662_s24 + $0x38] sm:$0xff]  }
  0x14   : > { %547 = vmatprep.subr.bf16.mxu0 %v599_v6  ;;  %575 = vmatprep.subr.bf16.mxu1 %v599_v6 }
  0x17   : > { %548 = vmatpush3.bf16.msra.mxu0 %v599_v6  ;;  %583 = vmatpush3.bf16.msra.mxu1 %v599_v6 }
  0x18   : > { %549 = vmatprep.subr.bf16.mxu0 %v600_v7  ;;  %576 = vmatprep.subr.bf16.mxu1 %v600_v7 }
  0x1b   : > { %550 = vmatpush3.bf16.msra.mxu0 %v600_v7  ;;  %584 = vmatpush3.bf16.msra.mxu1 %v600_v7 }
  0x1c   : > { %551 = vmatprep.subr.bf16.mxu0 %v601_v8  ;;  %577 = vmatprep.subr.bf16.mxu1 %v601_v8 }
  0x1f   : > { %552 = vmatpush3.bf16.msra.mxu0 %v601_v8  ;;  %585 = vmatpush3.bf16.msra.mxu1 %v601_v8 }
  0x20   : > { %553 = vmatprep.subr.bf16.mxu0 %v602_v9  ;;  %578 = vmatprep.subr.bf16.mxu1 %v602_v9 }
  0x23   : > { %554 = vmatpush3.bf16.msra.mxu0 %v602_v9  ;;  %586 = vmatpush3.bf16.msra.mxu1 %v602_v9 }
  0x26   : > { %556 = vmatmul.mubr.bf16.vlgmr.msra.gmra.mrb[0].mxu0 %v605_v10  ;;  %564 = vmatmul.mubr.bf16.vlgmr.msra.gmra.mrb[0].mxu1 %v606_v11 }
  0x27   : > { %559 = vmatprep.mubr.bf16.mxu0 %v607_v12  ;;  %567 = vmatprep.mubr.bf16.mxu1 %v608_v13 }
  0x2e   : > { %560 = vmatmul.mubr.bf16.gmra.mrb[4].mxu0 %v609_v14  ;;  %568 = vmatmul.mubr.bf16.gmra.mrb[4].mxu1 %v610_v15 }
  0xf9   : > { %v557_v17 = vpop.f32.mrb[0].mxu0  ;;  %v565_v18 = vpop.f32.mrb[0].mxu1 }
  0xfa   : > { %v353_v19 = vadd.f32 %v557_v17, %v504_v16  ;;  %v385_v20 = vadd.f32 %v565_v18, %v504_v16  ;;  %v344_v21 = vpop.f32.mrb[1].mxu0  ;;  %v376_v22 = vpop.f32.mrb[1].mxu1 }
  0xfb   : > { %v345_v23 = vadd.f32 %v504_v16, %v344_v21  ;;  %v377_v24 = vadd.f32 %v504_v16, %v376_v22  ;;  %v558_v25 = vpop.f32.mrb[2].mxu0  ;;  %v566_v26 = vpop.f32.mrb[2].mxu1 }
  0xfc   : > { %v409_v27 = vmax.f32 %v353_v19, 0.0  ;;  %v417_v28 = vmax.f32 %v385_v20, 0.0  ;;  %v356_v29 = vadd.f32 %v558_v25, %v504_v16  ;;  %v388_v30 = vadd.f32 %v566_v26, %v504_v16  ;;  %v347_v31 = vpop.f32.mrb[3].mxu0  ;;  %v379_v32 = vpop.f32.mrb[3].mxu1 }
  0xfd   : > { %v407_v33 = vmax.f32 %v345_v23, 0.0  ;;  %v415_v34 = vmax.f32 %v377_v24, 0.0  ;;  %v348_v35 = vadd.f32 %v504_v16, %v347_v31  ;;  %v380_v36 = vadd.f32 %v504_v16, %v379_v32 }
  0xfe   : > { %425 = vst [vmem:[%s694_s14 + $0x10] sm:$0xff] %v409_v27  ;;  %433 = vst [vmem:[%s694_s14 + $0x50] sm:$0xff] %v417_v28  ;;  %v410_v37 = vmax.f32 %v356_v29, 0.0  ;;  %v418_v38 = vmax.f32 %v388_v30, 0.0 }
  0xff   : > { %423 = vst [vmem:[%s694_s14] sm:$0xff] %v407_v33  ;;  %431 = vst [vmem:[%s694_s14 + $0x40] sm:$0xff] %v415_v34  ;;  %v408_v39 = vmax.f32 %v348_v35, 0.0  ;;  %v416_v40 = vmax.f32 %v380_v36, 0.0 }
 0x100   : > { %426 = vst [vmem:[%s694_s14 + $0x18] sm:$0xff] %v410_v37  ;;  %434 = vst [vmem:[%s694_s14 + $0x58] sm:$0xff] %v418_v38 }
 0x101   : > { %424 = vst [vmem:[%s694_s14 + $0x8] sm:$0xff] %v408_v39  ;;  %432 = vst [vmem:[%s694_s14 + $0x48] sm:$0xff] %v416_v40  ;;  %v561_v41 = vpop.f32.mrb[4].mxu0  ;;  %v569_v42 = vpop.f32.mrb[4].mxu1 }
 0x102   : > { %v369_v43 = vadd.f32 %v561_v41, %v504_v16  ;;  %v401_v44 = vadd.f32 %v569_v42, %v504_v16  ;;  %v360_v45 = vpop.f32.mrb[5].mxu0  ;;  %v392_v46 = vpop.f32.mrb[5].mxu1 }
 0x103   : > { %v361_v47 = vadd.f32 %v504_v16, %v360_v45  ;;  %v393_v48 = vadd.f32 %v504_v16, %v392_v46  ;;  %v562_v49 = vpop.f32.mrb[6].mxu0  ;;  %v570_v50 = vpop.f32.mrb[6].mxu1 }
 0x104   : > { %v413_v51 = vmax.f32 %v369_v43, 0.0  ;;  %v421_v52 = vmax.f32 %v401_v44, 0.0  ;;  %v372_v53 = vadd.f32 %v562_v49, %v504_v16  ;;  %v404_v54 = vadd.f32 %v570_v50, %v504_v16  ;;  %v363_v55 = vpop.f32.mrb[7].mxu0  ;;  %v395_v56 = vpop.f32.mrb[7].mxu1 }
 0x105   : > { %v411_v57 = vmax.f32 %v361_v47, 0.0  ;;  %v419_v58 = vmax.f32 %v393_v48, 0.0  ;;  %v364_v59 = vadd.f32 %v504_v16, %v363_v55  ;;  %v396_v60 = vadd.f32 %v504_v16, %v395_v56 }
 0x106   : > { %429 = vst [vmem:[%s694_s14 + $0x30] sm:$0xff] %v413_v51  ;;  %437 = vst [vmem:[%s694_s14 + $0x70] sm:$0xff] %v421_v52  ;;  %v414_v61 = vmax.f32 %v372_v53, 0.0  ;;  %v422_v62 = vmax.f32 %v404_v54, 0.0 }
 0x107   : > { %427 = vst [vmem:[%s694_s14 + $0x20] sm:$0xff] %v411_v57  ;;  %435 = vst [vmem:[%s694_s14 + $0x60] sm:$0xff] %v419_v58  ;;  %v412_v63 = vmax.f32 %v364_v59, 0.0  ;;  %v420_v0 = vmax.f32 %v396_v60, 0.0 }
 0x108   : > { %430 = vst [vmem:[%s694_s14 + $0x38] sm:$0xff] %v414_v61  ;;  %438 = vst [vmem:[%s694_s14 + $0x78] sm:$0xff] %v422_v62 }
 0x109   : > { %428 = vst [vmem:[%s694_s14 + $0x28] sm:$0xff] %v412_v63  ;;  %436 = vst [vmem:[%s694_s14 + $0x68] sm:$0xff] %v420_v0 }
 0x10a PF: > { %s13_s12 = sadd.s32 1, %s617_s12  }
 0x10b   : > { %p10_p4 = scmp.ge.s32.totalorder %s13_s12, 6  }
 0x10d   :  { %12 = sbr.rel (!%p10_p4) target bundleno = 1 (0x1), region = 62 }

// kernel: dqn_forward.6
= control target key start
LH: loop header
LB: loop body
LE: loop exit
PB: predicated region body
PF: predicated region fallthrough
CT: control target
= control target key end

     0   :  { %s1557_s12 = smov 0   ;;  %s1811_s0 = inlined_call_operand.vmem [shape: bf16[512,640], index: 0, kind: input, shape index: {}]   ;;  %s1812_s1 = inlined_call_operand.vmem [shape: bf16[640,128], index: 1, kind: input, shape index: {}]   ;;  %s1813_s2 = inlined_call_operand.vmem [shape: f32[1,128], index: 2, kind: input, shape index: {}]   ;;  %s1814_s3 = inlined_call_operand.vmem [shape: f32[512,128], index: 3, kind: output, shape index: {}]  }
   0x1 LB: > { %s1140_s13 = sadd.s32 4294967295, %s1535_s12   ;;  %p1144_p0 = scmp.ge.s32.totalorder %s1535_s12, 1  ;;  %s1535_s12 = sphi %s1557_s12, %s13_s12  }
   0x2   : > { %p139_p1 = scmp.lt.s32.totalorder %s1535_s12, 5 }
   0x4   : > { %p140_p2 = pnand %p1144_p0, %p139_p1 }
   0x5   : > { %v1433_v0 = vld [vmem:[%s1812_s1 + $0x40] sm:$0xff] (!%p140_p2)   ;;  %v1437_v4 = vld [vmem:[%s1812_s1 + $0x48] sm:$0xff] (!%p140_p2)   ;;  %v1441_v8 = vld [vmem:[%s1812_s1 + $0x50] sm:$0xff] (!%p140_p2)   ;;  %s1145_s19 = sshll.u32 (!%p140_p2), %s1140_s13, 4 }
   0x6   : > { %143 = sbr.rel (%p140_p2) target bundleno = 332 (0x14c), region = 32  ;;  %v1434_v1 = vld [vmem:[%s1812_s1 + $0xc0] sm:$0xff] (!%p140_p2)   ;;  %1232 = vmatprep.subr.bf16.mxu0 (!%p140_p2), %v1433_v0  ;;  %v1438_v5 = vld [vmem:[%s1812_s1 + $0xc8] sm:$0xff] (!%p140_p2)   ;;  %v1442_v9 = vld [vmem:[%s1812_s1 + $0xd0] sm:$0xff] (!%p140_p2)   ;;  %p165_p3 = scmp.lt.s32.totalorder (!%p140_p2), %s1145_s19, 63 }
   0x7   : > { %v1435_v2 = vld [vmem:[%s1812_s1] sm:$0xff] (!%p140_p2)   ;;  %1296 = vmatprep.subr.bf16.mxu1 (!%p140_p2), %v1434_v1  ;;  %v1439_v6 = vld [vmem:[%s1812_s1 + $0x8] sm:$0xff] (!%p140_p2)   ;;  %v1443_v10 = vld [vmem:[%s1812_s1 + $0x10] sm:$0xff] (!%p140_p2)  }
   0x8   : > { %v1436_v3 = vld [vmem:[%s1812_s1 + $0x80] sm:$0xff] (!%p140_p2)   ;;  %1233 = vmatpush3.bf16.msra.mxu0 (!%p140_p2), %v1435_v2  ;;  %v1440_v7 = vld [vmem:[%s1812_s1 + $0x88] sm:$0xff] (!%p140_p2)   ;;  %v1444_v11 = vld [vmem:[%s1812_s1 + $0x90] sm:$0xff] (!%p140_p2)  }
   0x9   : > { %1297 = vmatpush3.bf16.msra.mxu1 (!%p140_p2), %v1436_v3  ;;  %1234 = vmatprep.subr.bf16.mxu0 (!%p140_p2), %v1437_v4  ;;  %v1445_v12 = vld [vmem:[%s1812_s1 + $0x58] sm:$0xff] (!%p140_p2)   ;;  %v1449_v16 = vld [vmem:[%s1812_s1 + $0x60] sm:$0xff] (!%p140_p2)   ;;  %v1453_v20 = vld [vmem:[%s1812_s1 + $0x68] sm:$0xff] (!%p140_p2)  }
   0xa   : > { %1298 = vmatprep.subr.bf16.mxu1 (!%p140_p2), %v1438_v5  ;;  %v1446_v13 = vld [vmem:[%s1812_s1 + $0xd8] sm:$0xff] (!%p140_p2)   ;;  %v1450_v17 = vld [vmem:[%s1812_s1 + $0xe0] sm:$0xff] (!%p140_p2)   ;;  %v1454_v21 = vld [vmem:[%s1812_s1 + $0xe8] sm:$0xff] (!%p140_p2)  }
   0xb   : > { %v1447_v14 = vld [vmem:[%s1812_s1 + $0x18] sm:$0xff] (!%p140_p2)   ;;  %v1451_v18 = vld [vmem:[%s1812_s1 + $0x20] sm:$0xff] (!%p140_p2)   ;;  %v1455_v22 = vld [vmem:[%s1812_s1 + $0x28] sm:$0xff] (!%p140_p2)  }
   0xc   : > { %1235 = vmatpush3.bf16.msra.mxu0 (!%p140_p2), %v1439_v6  ;;  %v1448_v15 = vld [vmem:[%s1812_s1 + $0x98] sm:$0xff] (!%p140_p2)   ;;  %v1452_v19 = vld [vmem:[%s1812_s1 + $0xa0] sm:$0xff] (!%p140_p2)   ;;  %v1456_v23 = vld [vmem:[%s1812_s1 + $0xa8] sm:$0xff] (!%p140_p2)  }
   0xd   : > { %1299 = vmatpush3.bf16.msra.mxu1 %v1440_v7  ;;  %1236 = vmatprep.subr.bf16.mxu0 %v1441_v8  ;;  %s1816_s19 = smov (!%p165_p3, %s1145_s19), 63  ;;  %v1457_v24 = vld [vmem:[%s1812_s1 + $0x70] sm:$0xff]   ;;  %v1461_v28 = vld [vmem:[%s1812_s1 + $0x78] sm:$0xff]   ;;  %v1471_v36 = vld [vmem:[%s1812_s1 + $0x100] sm:$0xff]  }
   0xe   : > { %1300 = vmatprep.subr.bf16.mxu1 %v1442_v9  ;;  %v1458_v25 = vld [vmem:[%s1812_s1 + $0xf0] sm:$0xff]   ;;  %s1424_s16 = smul.u32 20, %s1816_s19  ;;  %v1462_v29 = vld [vmem:[%s1812_s1 + $0xf8] sm:$0xff]   ;;  %v1478_v39 = vld [vmem:[%s1812_s1 + $0x108] sm:$0xff]   ;;  %s1148_s26 = sshll.u32 %s1816_s19, 3 }
   0xf   : > { %v1459_v26 = vld [vmem:[%s1812_s1 + $0x30] sm:$0xff]   ;;  %v1463_v30 = vld [vmem:[%s1812_s1 + $0x38] sm:$0xff]   ;;  %v1499_v50 = vld [vmem:[%s1812_s1 + $0x120] sm:$0xff]   ;;  %s1781_s28 = scalar_lea.vmem %s1814_s3, %s1148_s26 }
  0x10   : > { %1237 = vmatpush3.bf16.msra.mxu0 %v1443_v10  ;;  %v1460_v27 = vld [vmem:[%s1812_s1 + $0xb0] sm:$0xff]   ;;  %s1663_s13 = scalar_lea.vmem %s1811_s0, %s1424_s16  ;;  %v1464_v31 = vld [vmem:[%s1812_s1 + $0xb8] sm:$0xff]   ;;  %v1506_v51 = vld [vmem:[%s1812_s1 + $0x128] sm:$0xff]  }
  0x11   : > { %1301 = vmatpush3.bf16.msra.mxu1 %v1444_v11  ;;  %1238 = vmatprep.subr.bf16.mxu0 %v1445_v12  ;;  %v1465_v32 = vld [vmem:[%s1663_s13] ss:$20 sps:$4 sm:$0xff]   ;;  %v1467_v33 = vld [vmem:[%s1663_s13 + $0x4] ss:$20 sps:$4 sm:$0xff]   ;;  %v1468_v34 = vld [vmem:[%s1663_s13 + $0x8] ss:$20 sps:$4 sm:$0xff]  }
  0x12   : > { %1302 = vmatprep.subr.bf16.mxu1 %v1446_v13  ;;  %v1470_v35 = vld [vmem:[%s1663_s13 + $0xc] ss:$20 sps:$4 sm:$0xff]   ;;  %793 = vmatprep.mubr.bf16.mxu0 %v1467_v33  ;;  %v1474_v38 = vld [vmem:[%s1663_s13 + $0x34] ss:$20 sps:$4 sm:$0xff]   ;;  %v1477_v41 = vld [vmem:[%s1663_s13 + $0x30] ss:$20 sps:$4 sm:$0xff]  }
  0x13   : > { %890 = vmatprep.mubr.bf16.mxu1 %v1470_v35  ;;  %v1472_v37 = vld [vmem:[%s1663_s13 + $0x2c] ss:$20 sps:$4 sm:$0xff]   ;;  %v1476_v40 = vld [vmem:[%s1663_s13 + $0x28] ss:$20 sps:$4 sm:$0xff]   ;;  %v1485_v44 = vld [vmem:[%s1812_s1 + $0x110] sm:$0xff]  }
  0x14   : > { %1239 = vmatpush3.bf16.msra.mxu0 %v1447_v14  ;;  %v1479_v42 = vld [vmem:[%s1663_s13 + $0x54] ss:$20 sps:$4 sm:$0xff]   ;;  %v1481_v43 = vld [vmem:[%s1663_s13 + $0x5c] ss:$20 sps:$4 sm:$0xff]   ;;  %v1484_v47 = vld [vmem:[%s1663_s13 + $0x58] ss:$20 sps:$4 sm:$0xff]  }
  0x15   : > { %1303 = vmatpush3.bf16.msra.mxu1 %v1448_v15  ;;  %1240 = vmatprep.subr.bf16.mxu0 %v1449_v16  ;;  %v1492_v45 = vld [vmem:[%s1812_s1 + $0x118] sm:$0xff]   ;;  %v1483_v46 = vld [vmem:[%s1663_s13 + $0x50] ss:$20 sps:$4 sm:$0xff]   ;;  %v1491_v53 = vld [vmem:[%s1663_s13 + $0x80] ss:$20 sps:$4 sm:$0xff]  }
  0x16   : > { %1304 = vmatprep.subr.bf16.mxu1 %v1450_v17  ;;  %v1486_v48 = vld [vmem:[%s1663_s13 + $0x7c] ss:$20 sps:$4 sm:$0xff]   ;;  %v1488_v49 = vld [vmem:[%s1663_s13 + $0x84] ss:$20 sps:$4 sm:$0xff]   ;;  %v1495_v56 = vld [vmem:[%s1663_s13 + $0xac] ss:$20 sps:$4 sm:$0xff]  }
  0x17   : > { %v1490_v52 = vld [vmem:[%s1663_s13 + $0x78] ss:$20 sps:$4 sm:$0xff]   ;;  %v1513_v55 = vld [vmem:[%s1812_s1 + $0x130] sm:$0xff]   ;;  %v1498_v59 = vld [vmem:[%s1663_s13 + $0xa8] ss:$20 sps:$4 sm:$0xff]  }
  0x18   : > { %1241 = vmatpush3.bf16.msra.mxu0 %v1451_v18  ;;  %v1493_v54 = vld [vmem:[%s1663_s13 + $0xa4] ss:$20 sps:$4 sm:$0xff]   ;;  %v1497_v58 = vld [vmem:[%s1663_s13 + $0xa0] ss:$20 sps:$4 sm:$0xff]   ;;  %v1504_v62 = vld [vmem:[%s1663_s13 + $0xc8] ss:$20 sps:$4 sm:$0xff]  }
  0x19   : > { %1305 = vmatpush3.bf16.msra.mxu1 %v1452_v19  ;;  %1242 = vmatprep.subr.bf16.mxu0 %v1453_v20  ;;  %v1520_v57 = vld [vmem:[%s1812_s1 + $0x138] sm:$0xff]   ;;  %v1500_v60 = vld [vmem:[%s1663_s13 + $0xcc] ss:$20 sps:$4 sm:$0xff]   ;;  %v1502_v61 = vld [vmem:[%s1663_s13 + $0xd4] ss:$20 sps:$4 sm:$0xff]  }
  0x1a   : > { %1306 = vmatprep.subr.bf16.mxu1 %v1454_v21  ;;  %v1505_v63 = vld [vmem:[%s1663_s13 + $0xd0] ss:$20 sps:$4 sm:$0xff]   ;;  %v1507_v0 = vld [vmem:[%s1663_s13 + $0xf4] ss:$20 sps:$4 sm:$0xff]   ;;  %v1512_v3 = vld [vmem:[%s1663_s13 + $0xf8] ss:$20 sps:$4 sm:$0xff]  }
  0x1b   : > { %v1509_v1 = vld [vmem:[%s1663_s13 + $0xfc] ss:$20 sps:$4 sm:$0xff]   ;;  %v1516_v5 = vld [vmem:[%s1663_s13 + $0x124] ss:$20 sps:$4 sm:$0xff]   ;;  %v1519_v7 = vld [vmem:[%s1663_s13 + $0x120] ss:$20 sps:$4 sm:$0xff]  }
  0x1c   : > { %1243 = vmatpush3.bf16.msra.mxu0 %v1455_v22  ;;  %v1511_v2 = vld [vmem:[%s1663_s13 + $0xf0] ss:$20 sps:$4 sm:$0xff]   ;;  %v1518_v6 = vld [vmem:[%s1663_s13 + $0x118] ss:$20 sps:$4 sm:$0xff]   ;;  %v1525_v12 = vld [vmem:[%s1663_s13 + $0x60] ss:$20 sps:$4 sm:$0xff]  }
  0x1d   : > { %1307 = vmatpush3.bf16.msra.mxu1 %v1456_v23  ;;  %1244 = vmatprep.subr.bf16.mxu0 %v1457_v24  ;;  %v1514_v4 = vld [vmem:[%s1663_s13 + $0x11c] ss:$20 sps:$4 sm:$0xff]   ;;  %v1523_v10 = vld [vmem:[%s1663_s13 + $0x38] ss:$20 sps:$4 sm:$0xff]   ;;  %v1526_v13 = vld [vmem:[%s1663_s13 + $0x100] ss:$20 sps:$4 sm:$0xff]  }
  0x1e   : > { %1308 = vmatprep.subr.bf16.mxu1 %v1458_v25  ;;  %v1521_v8 = vld [vmem:[%s1663_s13 + $0x10] ss:$20 sps:$4 sm:$0xff]   ;;  %v1524_v11 = vld [vmem:[%s1663_s13 + $0xd8] ss:$20 sps:$4 sm:$0xff]   ;;  %v1527_v14 = vld [vmem:[%s1663_s13 + $0x88] ss:$20 sps:$4 sm:$0xff]  }
  0x1f   : > { %v1522_v9 = vld [vmem:[%s1663_s13 + $0xb0] ss:$20 sps:$4 sm:$0xff]   ;;  %v1528_v15 = vld [vmem:[%s1663_s13 + $0x128] ss:$20 sps:$4 sm:$0xff]   ;;  %v1738_v18 = vld [vmem:[%s1813_s2] ss:$0 sm:$0xff] }
  0x20   : > { %1245 = vmatpush3.bf16.msra.mxu0 %v1459_v26 }
  0x21   : > { %1309 = vmatpush3.bf16.msra.mxu1 %v1460_v27  ;;  %1246 = vmatprep.subr.bf16.mxu0 %v1461_v28 }
  0x22   : > { %1310 = vmatprep.subr.bf16.mxu1 %v1462_v29 }
  0x24   : > { %1247 = vmatpush3.bf16.msra.mxu0 %v1463_v30 }
  0x25   : > { %1311 = vmatpush3.bf16.msra.mxu1 %v1464_v31  ;;  %1376 = vmatprep.subr.bf16.mxu0 %v1471_v36 }
  0x26   : > { %1408 = vmatprep.subr.bf16.mxu1 %v1471_v36 }
  0x27   : > { %794 = vmatmul.mubr.bf16.vlgmr.msra.gmra.mrb[0].mxu0 %v1465_v32 }
  0x28   : > { %891 = vmatmul.mubr.bf16.vlgmr.msra.gmra.mrb[0].mxu1 %v1468_v34  ;;  %1377 = vmatpush3.bf16.msra.mxu0 %v1471_v36 }
  0x29   : > { %1416 = vmatpush3.bf16.msra.mxu1 %v1471_v36  ;;  %801 = vmatprep.mubr.bf16.mxu0 %v1472_v37 }
  0x2a   : > { %898 = vmatprep.mubr.bf16.mxu1 %v1474_v38  ;;  %1378 = vmatprep.subr.bf16.mxu0 %v1478_v39 }
  0x2b   : > { %1409 = vmatprep.subr.bf16.mxu1 %v1478_v39 }
  0x2c   : > { %1379 = vmatpush3.bf16.msra.mxu0 %v1478_v39 }
  0x2d   : > { %1417 = vmatpush3.bf16.msra.mxu1 %v1478_v39  ;;  %1380 = vmatprep.subr.bf16.mxu0 %v1485_v44 }
  0x2e   : > { %1410 = vmatprep.subr.bf16.mxu1 %v1485_v44 }
  0x2f   : > { %802 = vmatmul.mubr.bf16.gmra.mrb[4].mxu0 %v1476_v40 }
  0x30   : > { %899 = vmatmul.mubr.bf16.gmra.mrb[4].mxu1 %v1477_v41  ;;  %809 = vmatprep.mubr.bf16.mxu0 %v1479_v42 }
  0x31   : > { %906 = vmatprep.mubr.bf16.mxu1 %v1481_v43  ;;  %1381 = vmatpush3.bf16.msra.mxu0 %v1485_v44 }
  0x32   : > { %1418 = vmatpush3.bf16.msra.mxu1 %v1485_v44  ;;  %1382 = vmatprep.subr.bf16.mxu0 %v1492_v45 }
  0x33   : > { %1411 = vmatprep.subr.bf16.mxu1 %v1492_v45 }
  0x35   : > { %1383 = vmatpush3.bf16.msra.mxu0 %v1492_v45 }
  0x36   : > { %1419 = vmatpush3.bf16.msra.mxu1 %v1492_v45  ;;  %1384 = vmatprep.subr.bf16.mxu0 %v1499_v50 }
  0x37   : > { %810 = vmatmul.mubr.bf16.gmra.mrb[8].mxu0 %v1483_v46  ;;  %1412 = vmatprep.subr.bf16.mxu1 %v1499_v50 }
  0x38   : > { %907 = vmatmul.mubr.bf16.gmra.mrb[8].mxu1 %v1484_v47  ;;  %817 = vmatprep.mubr.bf16.mxu0 %v1486_v48 }
  0x39   : > { %914 = vmatprep.mubr.bf16.mxu1 %v1488_v49  ;;  %1385 = vmatpush3.bf16.msra.mxu0 %v1499_v50 }
  0x3a   : > { %1420 = vmatpush3.bf16.msra.mxu1 %v1499_v50  ;;  %1386 = vmatprep.subr.bf16.mxu0 %v1506_v51 }
  0x3b   : > { %1413 = vmatprep.subr.bf16.mxu1 %v1506_v51 }
  0x3d   : > { %1387 = vmatpush3.bf16.msra.mxu0 %v1506_v51 }
  0x3e   : > { %1421 = vmatpush3.bf16.msra.mxu1 %v1506_v51  ;;  %1388 = vmatprep.subr.bf16.mxu0 %v1513_v55 }
  0x3f   : > { %818 = vmatmul.mubr.bf16.gmra.mrb[12].mxu0 %v1490_v52  ;;  %1414 = vmatprep.subr.bf16.mxu1 %v1513_v55 }
  0x40   : > { %915 = vmatmul.mubr.bf16.gmra.mrb[12].mxu1 %v1491_v53  ;;  %825 = vmatprep.mubr.bf16.mxu0 %v1493_v54 }
  0x41   : > { %922 = vmatprep.mubr.bf16.mxu1 %v1495_v56  ;;  %1389 = vmatpush3.bf16.msra.mxu0 %v1513_v55 }
  0x42   : > { %1422 = vmatpush3.bf16.msra.mxu1 %v1513_v55  ;;  %1390 = vmatprep.subr.bf16.mxu0 %v1520_v57 }
  0x43   : > { %1415 = vmatprep.subr.bf16.mxu1 %v1520_v57 }
  0x45   : > { %1391 = vmatpush3.bf16.msra.mxu0 %v1520_v57 }
  0x46   : > { %1423 = vmatpush3.bf16.msra.mxu1 %v1520_v57 }
  0x47   : > { %826 = vmatmul.mubr.bf16.gmra.mrb[16].mxu0 %v1497_v58 }
  0x48   : > { %923 = vmatmul.mubr.bf16.gmra.mrb[16].mxu1 %v1498_v59  ;;  %833 = vmatprep.mubr.bf16.mxu0 %v1500_v60 }
  0x49   : > { %930 = vmatprep.mubr.bf16.mxu1 %v1502_v61 }
  0x4f   : > { %834 = vmatmul.mubr.bf16.gmra.mrb[20].mxu0 %v1504_v62 }
  0x50   : > { %931 = vmatmul.mubr.bf16.gmra.mrb[20].mxu1 %v1505_v63  ;;  %841 = vmatprep.mubr.bf16.mxu0 %v1507_v0 }
  0x51   : > { %938 = vmatprep.mubr.bf16.mxu1 %v1509_v1 }
  0x57   : > { %842 = vmatmul.mubr.bf16.gmra.mrb[24].mxu0 %v1511_v2 }
  0x58   : > { %939 = vmatmul.mubr.bf16.gmra.mrb[24].mxu1 %v1512_v3  ;;  %849 = vmatprep.mubr.bf16.mxu0 %v1514_v4 }
  0x59   : > { %946 = vmatprep.mubr.bf16.mxu1 %v1516_v5 }
  0x5f   : > { %850 = vmatmul.mubr.bf16.gmra.mrb[28].mxu0 %v1518_v6 }
  0x60   : > { %947 = vmatmul.mubr.bf16.gmra.mrb[28].mxu1 %v1519_v7  ;;  %1392 = vmatprep.mubr.bf16.mxu0 %v1521_v8 }
  0x61   : > { %1400 = vmatprep.mubr.bf16.mxu1 %v1522_v9 }
  0x67   : > { %1393 = vmatmul.mubr.bf16.vlgmr.msra.gmra.mrb[32].mxu0 %v1523_v10 }
  0x68   : > { %1401 = vmatmul.mubr.bf16.vlgmr.msra.gmra.mrb[32].mxu1 %v1524_v11  ;;  %1396 = vmatprep.mubr.bf16.mxu0 %v1525_v12 }
  0x69   : > { %1404 = vmatprep.mubr.bf16.mxu1 %v1526_v13 }
  0x6f   : > { %1397 = vmatmul.mubr.bf16.gmra.mrb[36].mxu0 %v1527_v14 }
  0x70   : > { %1405 = vmatmul.mubr.bf16.gmra.mrb[36].mxu1 %v1528_v15 }
  0xfa   : > { %v1248_v16 = vpop.f32.mrb[0].mxu0 }
  0xfb   : > { %v1312_v17 = vpop.f32.mrb[0].mxu1  ;;  %v1249_v19 = vpop.f32.mrb[1].mxu0 }
  0xfc   : > { %v1250_v20 = vadd.f32 %v1249_v19, %v1248_v16  ;;  %v1313_v21 = vpop.f32.mrb[1].mxu1  ;;  %v1251_v22 = vpop.f32.mrb[2].mxu0 }
  0xfd   : > { %v1314_v23 = vadd.f32 %v1313_v21, %v1312_v17  ;;  %v1315_v24 = vpop.f32.mrb[2].mxu1  ;;  %v1252_v25 = vpop.f32.mrb[3].mxu0 }
  0xfe   : > { %v796_v26 = vadd.f32 %v1250_v20, %v1738_v18  ;;  %v1253_v27 = vadd.f32 %v1252_v25, %v1251_v22  ;;  %v1316_v28 = vpop.f32.mrb[3].mxu1 }
  0xff   : > { %v1317_v29 = vadd.f32 %v1316_v28, %v1315_v24 }
 0x100   : > { %v799_v30 = vadd.f32 %v1253_v27, %v1738_v18  ;;  %v1742_v31 = vadd.f32 %v1314_v23, %v796_v26 }
 0x102   : > { %v1254_v32 = vpop.f32.mrb[4].mxu0  ;;  %v1744_v33 = vadd.f32 %v1317_v29, %v799_v30 }
 0x103   : > { %v1318_v34 = vpop.f32.mrb[4].mxu1  ;;  %v1255_v35 = vpop.f32.mrb[5].mxu0 }
 0x104   : > { %v1256_v36 = vadd.f32 %v1255_v35, %v1254_v32  ;;  %v1319_v37 = vpop.f32.mrb[5].mxu1  ;;  %v1257_v38 = vpop.f32.mrb[6].mxu0 }
 0x105   : > { %v1320_v39 = vadd.f32 %v1319_v37, %v1318_v34  ;;  %v1321_v40 = vpop.f32.mrb[6].mxu1  ;;  %v1258_v41 = vpop.f32.mrb[7].mxu0 }
 0x106   : > { %v804_v42 = vadd.f32 %v1256_v36, %v1738_v18  ;;  %v1259_v43 = vadd.f32 %v1258_v41, %v1257_v38  ;;  %v1322_v44 = vpop.f32.mrb[7].mxu1 }
 0x107   : > { %v1323_v45 = vadd.f32 %v1322_v44, %v1321_v40 }
 0x108   : > { %v807_v46 = vadd.f32 %v1259_v43, %v1738_v18  ;;  %v1748_v47 = vadd.f32 %v1320_v39, %v804_v42 }
 0x10a   : > { %v1260_v48 = vpop.f32.mrb[8].mxu0  ;;  %v1750_v49 = vadd.f32 %v1323_v45, %v807_v46 }
 0x10b   : > { %v1324_v50 = vpop.f32.mrb[8].mxu1  ;;  %v1261_v51 = vpop.f32.mrb[9].mxu0 }
 0x10c   : > { %v1262_v52 = vadd.f32 %v1261_v51, %v1260_v48  ;;  %v1325_v53 = vpop.f32.mrb[9].mxu1  ;;  %v1263_v54 = vpop.f32.mrb[10].mxu0 }
 0x10d   : > { %v1326_v55 = vadd.f32 %v1325_v53, %v1324_v50  ;;  %v1327_v56 = vpop.f32.mrb[10].mxu1  ;;  %v1264_v57 = vpop.f32.mrb[11].mxu0 }
 0x10e   : > { %v812_v58 = vadd.f32 %v1262_v52, %v1738_v18  ;;  %v1265_v59 = vadd.f32 %v1264_v57, %v1263_v54  ;;  %v1328_v60 = vpop.f32.mrb[11].mxu1 }
 0x10f   : > { %v1329_v61 = vadd.f32 %v1328_v60, %v1327_v56 }
 0x110   : > { %v815_v62 = vadd.f32 %v1265_v59, %v1738_v18  ;;  %v1754_v63 = vadd.f32 %v1326_v55, %v812_v58 }
 0x112   : > { %v1266_v0 = vpop.f32.mrb[12].mxu0  ;;  %v1756_v1 = vadd.f32 %v1329_v61, %v815_v62 }
 0x113   : > { %v1330_v2 = vpop.f32.mrb[12].mxu1  ;;  %v1267_v3 = vpop.f32.mrb[13].mxu0 }
 0x114   : > { %v1268_v4 = vadd.f32 %v1267_v3, %v1266_v0  ;;  %v1331_v5 = vpop.f32.mrb[13].mxu1  ;;  %v1269_v6 = vpop.f32.mrb[14].mxu0 }
 0x115   : > { %v1332_v7 = vadd.f32 %v1331_v5, %v1330_v2  ;;  %v1333_v8 = vpop.f32.mrb[14].mxu1  ;;  %v1270_v9 = vpop.f32.mrb[15].mxu0 }
 0x116   : > { %v820_v10 = vadd.f32 %v1268_v4, %v1738_v18  ;;  %v1271_v11 = vadd.f32 %v1270_v9, %v1269_v6  ;;  %v1334_v12 = vpop.f32.mrb[15].mxu1 }
 0x117   : > { %v1335_v13 = vadd.f32 %v1334_v12, %v1333_v8 }
 0x118   : > { %v823_v14 = vadd.f32 %v1271_v11, %v1738_v18  ;;  %v1760_v15 = vadd.f32 %v1332_v7, %v820_v10 }
 0x11a   : > { %v1272_v16 = vpop.f32.mrb[16].mxu0  ;;  %v1762_v17 = vadd.f32 %v1335_v13, %v823_v14 }
 0x11b   : > { %v1336_v19 = vpop.f32.mrb[16].mxu1  ;;  %v1273_v20 = vpop.f32.mrb[17].mxu0 }
 0x11c   : > { %v1274_v21 = vadd.f32 %v1273_v20, %v1272_v16  ;;  %v1337_v22 = vpop.f32.mrb[17].mxu1  ;;  %v1275_v23 = vpop.f32.mrb[18].mxu0 }
 0x11d   : > { %v1338_v24 = vadd.f32 %v1337_v22, %v1336_v19  ;;  %v1339_v25 = vpop.f32.mrb[18].mxu1  ;;  %v1276_v26 = vpop.f32.mrb[19].mxu0 }
 0x11e   : > { %v828_v27 = vadd.f32 %v1274_v21, %v1738_v18  ;;  %v1277_v28 = vadd.f32 %v1276_v26, %v1275_v23  ;;  %v1340_v29 = vpop.f32.mrb[19].mxu1 }
 0x11f   : > { %v1341_v30 = vadd.f32 %v1340_v29, %v1339_v25 }
 0x120   : > { %v831_v32 = vadd.f32 %v1277_v28, %v1738_v18  ;;  %v925_v34 = vadd.f32 %v1338_v24, %v828_v27 }
 0x122   : > { %v1278_v35 = vpop.f32.mrb[20].mxu0  ;;  %v1766_v36 = vadd.f32 %v1341_v30, %v831_v32 }
 0x123   : > { %v1342_v37 = vpop.f32.mrb[20].mxu1  ;;  %v1279_v38 = vpop.f32.mrb[21].mxu0 }
 0x124   : > { %v1280_v39 = vadd.f32 %v1279_v38, %v1278_v35  ;;  %v1343_v40 = vpop.f32.mrb[21].mxu1  ;;  %v1281_v41 = vpop.f32.mrb[22].mxu0 }
 0x125   : > { %v1344_v42 = vadd.f32 %v1343_v40, %v1342_v37  ;;  %v1345_v43 = vpop.f32.mrb[22].mxu1  ;;  %v1282_v44 = vpop.f32.mrb[23].mxu0 }
 0x126   : > { %v836_v45 = vadd.f32 %v1280_v39, %v1738_v18  ;;  %v1283_v46 = vadd.f32 %v1282_v44, %v1281_v41  ;;  %v1346_v48 = vpop.f32.mrb[23].mxu1 }
 0x127   : > { %v1347_v50 = vadd.f32 %v1346_v48, %v1345_v43 }
 0x128   : > { %v839_v51 = vadd.f32 %v1283_v46, %v1738_v18  ;;  %v933_v52 = vadd.f32 %v1344_v42, %v836_v45 }
 0x12a   : > { %v1284_v53 = vpop.f32.mrb[24].mxu0  ;;  %v936_v54 = vadd.f32 %v1347_v50, %v839_v51 }
 0x12b   : > { %v1348_v55 = vpop.f32.mrb[24].mxu1  ;;  %v1285_v56 = vpop.f32.mrb[25].mxu0 }
 0x12c   : > { %v1286_v57 = vadd.f32 %v1285_v56, %v1284_v53  ;;  %v1349_v58 = vpop.f32.mrb[25].mxu1  ;;  %v1287_v59 = vpop.f32.mrb[26].mxu0 }
 0x12d   : > { %v1350_v60 = vadd.f32 %v1349_v58, %v1348_v55  ;;  %v1351_v61 = vpop.f32.mrb[26].mxu1  ;;  %v1288_v62 = vpop.f32.mrb[27].mxu0 }
 0x12e   : > { %v844_v0 = vadd.f32 %v1286_v57, %v1738_v18  ;;  %v1289_v2 = vadd.f32 %v1288_v62, %v1287_v59  ;;  %v1352_v3 = vpop.f32.mrb[27].mxu1 }
 0x12f   : > { %v1353_v4 = vadd.f32 %v1352_v3, %v1351_v61 }
 0x130   : > { %v847_v5 = vadd.f32 %v1289_v2, %v1738_v18  ;;  %v941_v6 = vadd.f32 %v1350_v60, %v844_v0 }
 0x132   : > { %v1290_v7 = vpop.f32.mrb[28].mxu0  ;;  %v1772_v8 = vadd.f32 %v1353_v4, %v847_v5 }
 0x133   : > { %v1354_v9 = vpop.f32.mrb[28].mxu1  ;;  %v1291_v10 = vpop.f32.mrb[29].mxu0 }
 0x134   : > { %v1292_v11 = vadd.f32 %v1291_v10, %v1290_v7  ;;  %v1355_v12 = vpop.f32.mrb[29].mxu1  ;;  %v1293_v13 = vpop.f32.mrb[30].mxu0 }
 0x135   : > { %v1356_v14 = vadd.f32 %v1355_v12, %v1354_v9  ;;  %v1357_v16 = vpop.f32.mrb[30].mxu1  ;;  %v1294_v19 = vpop.f32.mrb[31].mxu0 }
 0x136   : > { %v852_v20 = vadd.f32 %v1292_v11, %v1738_v18  ;;  %v1295_v21 = vadd.f32 %v1294_v19, %v1293_v13  ;;  %v1358_v22 = vpop.f32.mrb[31].mxu1 }
 0x137   : > { %v1359_v23 = vadd.f32 %v1358_v22, %v1357_v16 }
 0x138   : > { %v855_v24 = vadd.f32 %v1295_v21, %v1738_v18  ;;  %v949_v25 = vadd.f32 %v1356_v14, %v852_v20 }
 0x13a   : > { %v1394_v26 = vpop.f32.mrb[32].mxu0  ;;  %v952_v27 = vadd.f32 %v1359_v23, %v855_v24 }
 0x13b   : > { %v998_v28 = vadd.f32 %v1394_v26, %v1748_v47  ;;  %v1402_v29 = vpop.f32.mrb[32].mxu1  ;;  %v989_v30 = vpop.f32.mrb[33].mxu0 }
 0x13c   : > { %v1030_v32 = vadd.f32 %v1402_v29, %v933_v52  ;;  %v990_v35 = vadd.f32 %v989_v30, %v1742_v31  ;;  %v1021_v37 = vpop.f32.mrb[33].mxu1  ;;  %v1395_v18 = vpop.f32.mrb[34].mxu0 }
 0x13d   : > { %v1054_v38 = vmax.f32 %v998_v28, 0.0  ;;  %v1022_v39 = vadd.f32 %v1021_v37, %v925_v34  ;;  %v1001_v40 = vadd.f32 %v1395_v18, %v1750_v49  ;;  %v1403_v47 = vpop.f32.mrb[34].mxu1  ;;  %v992_v41 = vpop.f32.mrb[35].mxu0 }
 0x13e   : > { %v1062_v42 = vmax.f32 %v1030_v32, 0.0  ;;  %v1052_v43 = vmax.f32 %v990_v35, 0.0  ;;  %v1033_v44 = vadd.f32 %v1403_v47, %v936_v54  ;;  %v993_v45 = vadd.f32 %v992_v41, %v1744_v33  ;;  %v1024_v31 = vpop.f32.mrb[35].mxu1 }
 0x13f   : > { %1070 = vst [vmem:[%s1781_s28 + $0x10] sm:$0xff] %v1054_v38  ;;  %v1060_v46 = vmax.f32 %v1022_v39, 0.0  ;;  %v1055_v48 = vmax.f32 %v1001_v40, 0.0  ;;  %v1025_v34 = vadd.f32 %v1024_v31, %v1766_v36 }
 0x140   : > { %1078 = vst [vmem:[%s1781_s28 + $0x50] sm:$0xff] %v1062_v42  ;;  %1068 = vst [vmem:[%s1781_s28] sm:$0xff] %v1052_v43  ;;  %v1063_v49 = vmax.f32 %v1033_v44, 0.0  ;;  %v1053_v50 = vmax.f32 %v993_v45, 0.0 }
 0x141   : > { %1076 = vst [vmem:[%s1781_s28 + $0x40] sm:$0xff] %v1060_v46  ;;  %1071 = vst [vmem:[%s1781_s28 + $0x18] sm:$0xff] %v1055_v48  ;;  %v1061_v51 = vmax.f32 %v1025_v34, 0.0 }
 0x142   : > { %1079 = vst [vmem:[%s1781_s28 + $0x58] sm:$0xff] %v1063_v49  ;;  %1069 = vst [vmem:[%s1781_s28 + $0x8] sm:$0xff] %v1053_v50  ;;  %v1398_v52 = vpop.f32.mrb[36].mxu0 }
 0x143   : > { %1077 = vst [vmem:[%s1781_s28 + $0x48] sm:$0xff] %v1061_v51  ;;  %v1014_v33 = vadd.f32 %v1398_v52, %v1760_v15  ;;  %v1406_v53 = vpop.f32.mrb[36].mxu1  ;;  %v1005_v54 = vpop.f32.mrb[37].mxu0 }
 0x144   : > { %v1046_v55 = vadd.f32 %v1406_v53, %v949_v25  ;;  %v1006_v56 = vadd.f32 %v1005_v54, %v1754_v63  ;;  %v1037_v36 = vpop.f32.mrb[37].mxu1  ;;  %v1399_v57 = vpop.f32.mrb[38].mxu0 }
 0x145   : > { %v1058_v58 = vmax.f32 %v1014_v33, 0.0  ;;  %v1038_v59 = vadd.f32 %v1037_v36, %v941_v6  ;;  %v1017_v60 = vadd.f32 %v1399_v57, %v1762_v17  ;;  %v1407_v61 = vpop.f32.mrb[38].mxu1  ;;  %v1008_v62 = vpop.f32.mrb[39].mxu0 }
 0x146   : > { %v1066_v0 = vmax.f32 %v1046_v55, 0.0  ;;  %v1056_v15 = vmax.f32 %v1006_v56, 0.0  ;;  %v1049_v2 = vadd.f32 %v1407_v61, %v952_v27  ;;  %v1009_v63 = vadd.f32 %v1008_v62, %v1756_v1  ;;  %v1040_v3 = vpop.f32.mrb[39].mxu1 }
 0x147   : > { %1074 = vst [vmem:[%s1781_s28 + $0x30] sm:$0xff] %v1058_v58  ;;  %v1064_v4 = vmax.f32 %v1038_v59, 0.0  ;;  %v1059_v5 = vmax.f32 %v1017_v60, 0.0  ;;  %v1041_v6 = vadd.f32 %v1040_v3, %v1772_v8 }
 0x148   : > { %1082 = vst [vmem:[%s1781_s28 + $0x70] sm:$0xff] %v1066_v0  ;;  %1072 = vst [vmem:[%s1781_s28 + $0x20] sm:$0xff] %v1056_v15  ;;  %v1067_v17 = vmax.f32 %v1049_v2, 0.0  ;;  %v1057_v7 = vmax.f32 %v1009_v63, 0.0 }
 0x149   : > { %1080 = vst [vmem:[%s1781_s28 + $0x60] sm:$0xff] %v1064_v4  ;;  %1075 = vst [vmem:[%s1781_s28 + $0x38] sm:$0xff] %v1059_v5  ;;  %v1065_v9 = vmax.f32 %v1041_v6, 0.0 }
 0x14a   : > { %1083 = vst [vmem:[%s1781_s28 + $0x78] sm:$0xff] %v1067_v17  ;;  %1073 = vst [vmem:[%s1781_s28 + $0x28] sm:$0xff] %v1057_v7 }
 0x14b   : > { %1081 = vst [vmem:[%s1781_s28 + $0x68] sm:$0xff] %v1065_v9 }
 0x14c PF: > { %s13_s12 = sadd.s32 1, %s1535_s12  }
 0x14d   : > { %p10_p4 = scmp.ge.s32.totalorder %s13_s12, 6  }
 0x14f   :  { %12 = sbr.rel (!%p10_p4) target bundleno = 1 (0x1), region = 62 }

// kernel: dqn_forward.7
= control target key start
LH: loop header
LB: loop body
LE: loop exit
PB: predicated region body
PF: predicated region fallthrough
CT: control target
= control target key end

     0   :  { %s3758_s1 = inlined_call_operand.vmem [shape: bf16[1152,256], index: 1, kind: input, shape index: {}]   ;;  %s3759_s0 = inlined_call_operand.vmem [shape: bf16[128,1152], index: 0, kind: input, shape index: {}]   ;;  %s3760_s2 = inlined_call_operand.vmem [shape: f32[1,256], index: 2, kind: input, shape index: {}]   ;;  %s3761_s3 = inlined_call_operand.vmem [shape: f32[128,256], index: 3, kind: output, shape index: {}]  }
   0x1   :  { %v2381_v0 = vld [vmem:[%s3758_s1 + $0x4] ss:$8 sps:$4 sm:$0xff]   ;;  %v2385_v2 = vld [vmem:[%s3758_s1] ss:$8 sps:$4 sm:$0xff]   ;;  %v2387_v4 = vld [vmem:[%s3758_s1 + $0x14] ss:$8 sps:$4 sm:$0xff]  }
   0x2   :  { %v2383_v1 = vld [vmem:[%s3758_s1 + $0x204] ss:$8 sps:$4 sm:$0xff]   ;;  %1339 = vmatprep.subr.bf16.mxu1 %v2381_v0  ;;  %v2386_v3 = vld [vmem:[%s3758_s1 + $0x200] ss:$8 sps:$4 sm:$0xff]   ;;  %v2389_v5 = vld [vmem:[%s3758_s1 + $0x214] ss:$8 sps:$4 sm:$0xff]  }
   0x3   :  { %1565 = vmatprep.subr.bf16.mxu0 %v2383_v1  ;;  %1340 = vmatpush1.bf16.msra.mxu1 %v2385_v2  ;;  %v2391_v6 = vld [vmem:[%s3758_s1 + $0x10] ss:$8 sps:$4 sm:$0xff]   ;;  %v2393_v8 = vld [vmem:[%s3758_s1 + $0x24] ss:$8 sps:$4 sm:$0xff]   ;;  %v2397_v10 = vld [vmem:[%s3758_s1 + $0x20] ss:$8 sps:$4 sm:$0xff]  }
   0x4   :  { %1566 = vmatpush1.bf16.msra.mxu0 %v2386_v3  ;;  %1341 = vmatprep.subr.bf16.mxu1 %v2387_v4  ;;  %v2392_v7 = vld [vmem:[%s3758_s1 + $0x210] ss:$8 sps:$4 sm:$0xff]   ;;  %v2395_v9 = vld [vmem:[%s3758_s1 + $0x224] ss:$8 sps:$4 sm:$0xff]   ;;  %v2398_v11 = vld [vmem:[%s3758_s1 + $0x220] ss:$8 sps:$4 sm:$0xff]  }
   0x5   :  { %1567 = vmatprep.subr.bf16.mxu0 %v2389_v5  ;;  %v2399_v12 = vld [vmem:[%s3758_s1 + $0x34] ss:$8 sps:$4 sm:$0xff]   ;;  %v2403_v14 = vld [vmem:[%s3758_s1 + $0x30] ss:$8 sps:$4 sm:$0xff]   ;;  %v2405_v16 = vld [vmem:[%s3758_s1 + $0x44] ss:$8 sps:$4 sm:$0xff]  }
   0x6   :  { %v2401_v13 = vld [vmem:[%s3758_s1 + $0x234] ss:$8 sps:$4 sm:$0xff]   ;;  %v2404_v15 = vld [vmem:[%s3758_s1 + $0x230] ss:$8 sps:$4 sm:$0xff]   ;;  %v2407_v17 = vld [vmem:[%s3758_s1 + $0x244] ss:$8 sps:$4 sm:$0xff]  }
   0x7   :  { %1342 = vmatpush1.bf16.msra.mxu1 %v2391_v6  ;;  %v2409_v18 = vld [vmem:[%s3758_s1 + $0x40] ss:$8 sps:$4 sm:$0xff]   ;;  %v2411_v20 = vld [vmem:[%s3758_s1 + $0x54] ss:$8 sps:$4 sm:$0xff]   ;;  %v2415_v22 = vld [vmem:[%s3758_s1 + $0x50] ss:$8 sps:$4 sm:$0xff]  }
   0x8   :  { %1568 = vmatpush1.bf16.msra.mxu0 %v2392_v7  ;;  %1343 = vmatprep.subr.bf16.mxu1 %v2393_v8  ;;  %v2410_v19 = vld [vmem:[%s3758_s1 + $0x240] ss:$8 sps:$4 sm:$0xff]   ;;  %v2413_v21 = vld [vmem:[%s3758_s1 + $0x254] ss:$8 sps:$4 sm:$0xff]   ;;  %v2416_v23 = vld [vmem:[%s3758_s1 + $0x250] ss:$8 sps:$4 sm:$0xff]  }
   0x9   :  { %1569 = vmatprep.subr.bf16.mxu0 %v2395_v9  ;;  %v2417_v24 = vld [vmem:[%s3758_s1 + $0x64] ss:$8 sps:$4 sm:$0xff]   ;;  %v2421_v26 = vld [vmem:[%s3758_s1 + $0x60] ss:$8 sps:$4 sm:$0xff]   ;;  %v2423_v28 = vld [vmem:[%s3758_s1 + $0x74] ss:$8 sps:$4 sm:$0xff]  }
   0xa   :  { %v2419_v25 = vld [vmem:[%s3758_s1 + $0x264] ss:$8 sps:$4 sm:$0xff]   ;;  %v2422_v27 = vld [vmem:[%s3758_s1 + $0x260] ss:$8 sps:$4 sm:$0xff]   ;;  %v2425_v29 = vld [vmem:[%s3758_s1 + $0x274] ss:$8 sps:$4 sm:$0xff]  }
   0xb   :  { %1344 = vmatpush1.bf16.msra.mxu1 %v2397_v10  ;;  %v2427_v30 = vld [vmem:[%s3758_s1 + $0x70] ss:$8 sps:$4 sm:$0xff]   ;;  %v2429_v32 = vld [vmem:[%s3758_s1 + $0x84] ss:$8 sps:$4 sm:$0xff]   ;;  %v2433_v34 = vld [vmem:[%s3758_s1 + $0x80] ss:$8 sps:$4 sm:$0xff]  }
   0xc   :  { %1570 = vmatpush1.bf16.msra.mxu0 %v2398_v11  ;;  %1345 = vmatprep.subr.bf16.mxu1 %v2399_v12  ;;  %v2428_v31 = vld [vmem:[%s3758_s1 + $0x270] ss:$8 sps:$4 sm:$0xff]   ;;  %v2431_v33 = vld [vmem:[%s3758_s1 + $0x284] ss:$8 sps:$4 sm:$0xff]   ;;  %v2434_v35 = vld [vmem:[%s3758_s1 + $0x280] ss:$8 sps:$4 sm:$0xff]  }
   0xd   :  { %1571 = vmatprep.subr.bf16.mxu0 %v2401_v13  ;;  %v2435_v36 = vld [vmem:[%s3758_s1 + $0x94] ss:$8 sps:$4 sm:$0xff]   ;;  %v2439_v38 = vld [vmem:[%s3758_s1 + $0x90] ss:$8 sps:$4 sm:$0xff]   ;;  %v2441_v40 = vld [vmem:[%s3758_s1 + $0xa4] ss:$8 sps:$4 sm:$0xff]  }
   0xe   :  { %v2437_v37 = vld [vmem:[%s3758_s1 + $0x294] ss:$8 sps:$4 sm:$0xff]   ;;  %v2440_v39 = vld [vmem:[%s3758_s1 + $0x290] ss:$8 sps:$4 sm:$0xff]   ;;  %v2443_v41 = vld [vmem:[%s3758_s1 + $0x2a4] ss:$8 sps:$4 sm:$0xff]  }
   0xf   :  { %1346 = vmatpush1.bf16.msra.mxu1 %v2403_v14  ;;  %v2445_v42 = vld [vmem:[%s3758_s1 + $0xa0] ss:$8 sps:$4 sm:$0xff]   ;;  %v2447_v44 = vld [vmem:[%s3758_s1 + $0xb4] ss:$8 sps:$4 sm:$0xff]   ;;  %v2451_v46 = vld [vmem:[%s3758_s1 + $0xb0] ss:$8 sps:$4 sm:$0xff]  }
  0x10   :  { %1572 = vmatpush1.bf16.msra.mxu0 %v2404_v15  ;;  %1347 = vmatprep.subr.bf16.mxu1 %v2405_v16  ;;  %v2446_v43 = vld [vmem:[%s3758_s1 + $0x2a0] ss:$8 sps:$4 sm:$0xff]   ;;  %v2449_v45 = vld [vmem:[%s3758_s1 + $0x2b4] ss:$8 sps:$4 sm:$0xff]   ;;  %v2452_v47 = vld [vmem:[%s3758_s1 + $0x2b0] ss:$8 sps:$4 sm:$0xff]  }
  0x11   :  { %1573 = vmatprep.subr.bf16.mxu0 %v2407_v17  ;;  %v2453_v48 = vld [vmem:[%s3758_s1 + $0xc4] ss:$8 sps:$4 sm:$0xff]   ;;  %v2482_v51 = vld [vmem:[%s3759_s0 + $0x14] ss:$36 sps:$4 sm:$0xff]   ;;  %v2457_v52 = vld [vmem:[%s3758_s1 + $0xc0] ss:$8 sps:$4 sm:$0xff]  }
  0x12   :  { %v2479_v49 = vld [vmem:[%s3759_s0 + $0x4] ss:$36 sps:$4 sm:$0xff]   ;;  %1597 = vmatprep.mubr.bf16.mxu0 %v2482_v51  ;;  %v2459_v54 = vld [vmem:[%s3758_s1 + $0xd4] ss:$8 sps:$4 sm:$0xff]   ;;  %v2463_v56 = vld [vmem:[%s3758_s1 + $0xd0] ss:$8 sps:$4 sm:$0xff]  }
  0x13   :  { %1348 = vmatpush1.bf16.msra.mxu1 %v2409_v18  ;;  %v2455_v50 = vld [vmem:[%s3758_s1 + $0x2c4] ss:$8 sps:$4 sm:$0xff]   ;;  %1371 = vmatprep.mubr.bf16.mxu1 %v2479_v49  ;;  %v2458_v53 = vld [vmem:[%s3758_s1 + $0x2c0] ss:$8 sps:$4 sm:$0xff]   ;;  %v2461_v55 = vld [vmem:[%s3758_s1 + $0x2d4] ss:$8 sps:$4 sm:$0xff]  }
  0x14   :  { %1574 = vmatpush1.bf16.msra.mxu0 %v2410_v19  ;;  %1349 = vmatprep.subr.bf16.mxu1 %v2411_v20  ;;  %v2464_v57 = vld [vmem:[%s3758_s1 + $0x2d0] ss:$8 sps:$4 sm:$0xff]   ;;  %v2465_v58 = vld [vmem:[%s3758_s1 + $0xe4] ss:$8 sps:$4 sm:$0xff]   ;;  %v2469_v60 = vld [vmem:[%s3758_s1 + $0xe0] ss:$8 sps:$4 sm:$0xff]  }
  0x15   :  { %1575 = vmatprep.subr.bf16.mxu0 %v2413_v21  ;;  %v2467_v59 = vld [vmem:[%s3758_s1 + $0x2e4] ss:$8 sps:$4 sm:$0xff]   ;;  %v2470_v61 = vld [vmem:[%s3758_s1 + $0x2e0] ss:$8 sps:$4 sm:$0xff]   ;;  %v2471_v62 = vld [vmem:[%s3758_s1 + $0xf4] ss:$8 sps:$4 sm:$0xff]  }
  0x16   :  { %v2473_v63 = vld [vmem:[%s3758_s1 + $0x2f4] ss:$8 sps:$4 sm:$0xff]   ;;  %v2475_v0 = vld [vmem:[%s3758_s1 + $0xf0] ss:$8 sps:$4 sm:$0xff]   ;;  %v2485_v2 = vld [vmem:[%s3758_s1 + $0x104] ss:$8 sps:$4 sm:$0xff]  }
  0x17   :  { %1350 = vmatpush1.bf16.msra.mxu1 %v2415_v22  ;;  %v2476_v1 = vld [vmem:[%s3758_s1 + $0x2f0] ss:$8 sps:$4 sm:$0xff]   ;;  %v2926_v3 = vld [vmem:[%s3758_s1 + $0x304] ss:$8 sps:$4 sm:$0xff]   ;;  %v2483_v6 = vld [vmem:[%s3758_s1 + $0x100] ss:$8 sps:$4 sm:$0xff]  }
  0x18   :  { %1576 = vmatpush1.bf16.msra.mxu0 %v2416_v23  ;;  %1351 = vmatprep.subr.bf16.mxu1 %v2417_v24  ;;  %v2477_v4 = vld [vmem:[%s3759_s0] ss:$36 sps:$4 sm:$0xff]   ;;  %v2480_v5 = vld [vmem:[%s3759_s0 + $0x10] ss:$36 sps:$4 sm:$0xff]   ;;  %v2499_v16 = vld [vmem:[%s3759_s0 + $0x48] ss:$36 sps:$4 sm:$0xff]  }
  0x19   :  { %1577 = vmatprep.subr.bf16.mxu0 %v2419_v25  ;;  %v2940_v7 = vld [vmem:[%s3758_s1 + $0x300] ss:$8 sps:$4 sm:$0xff]   ;;  %v2491_v8 = vld [vmem:[%s3758_s1 + $0x114] ss:$8 sps:$4 sm:$0xff]   ;;  %v2495_v10 = vld [vmem:[%s3759_s0 + $0x4c] ss:$36 sps:$4 sm:$0xff]  }
  0x1a   :  { %v2949_v9 = vld [vmem:[%s3758_s1 + $0x314] ss:$8 sps:$4 sm:$0xff]   ;;  %v2489_v12 = vld [vmem:[%s3758_s1 + $0x110] ss:$8 sps:$4 sm:$0xff]   ;;  %v2502_v14 = vld [vmem:[%s3758_s1 + $0x124] ss:$8 sps:$4 sm:$0xff]  }
  0x1b   :  { %1352 = vmatpush1.bf16.msra.mxu1 %v2421_v26  ;;  %v2497_v11 = vld [vmem:[%s3759_s0 + $0x5c] ss:$36 sps:$4 sm:$0xff]   ;;  %v2964_v13 = vld [vmem:[%s3758_s1 + $0x310] ss:$8 sps:$4 sm:$0xff]   ;;  %v2973_v15 = vld [vmem:[%s3758_s1 + $0x324] ss:$8 sps:$4 sm:$0xff]  }
  0x1c   :  { %1578 = vmatpush1.bf16.msra.mxu0 %v2422_v27  ;;  %1353 = vmatprep.subr.bf16.mxu1 %v2423_v28  ;;  %v2500_v17 = vld [vmem:[%s3758_s1 + $0x120] ss:$8 sps:$4 sm:$0xff]   ;;  %v2503_v18 = vld [vmem:[%s3759_s0 + $0x58] ss:$36 sps:$4 sm:$0xff]   ;;  %v2520_v26 = vld [vmem:[%s3758_s1 + $0x144] ss:$8 sps:$4 sm:$0xff]  }
  0x1d   :  { %1579 = vmatprep.subr.bf16.mxu0 %v2425_v29  ;;  %v2987_v19 = vld [vmem:[%s3758_s1 + $0x320] ss:$8 sps:$4 sm:$0xff]   ;;  %v2509_v20 = vld [vmem:[%s3758_s1 + $0x134] ss:$8 sps:$4 sm:$0xff]   ;;  %v2507_v24 = vld [vmem:[%s3758_s1 + $0x130] ss:$8 sps:$4 sm:$0xff]  }
  0x1e   :  { %v2997_v21 = vld [vmem:[%s3758_s1 + $0x334] ss:$8 sps:$4 sm:$0xff]   ;;  %v2515_v23 = vld [vmem:[%s3759_s0 + $0xa4] ss:$36 sps:$4 sm:$0xff]   ;;  %v3012_v25 = vld [vmem:[%s3758_s1 + $0x330] ss:$8 sps:$4 sm:$0xff]  }
  0x1f   :  { %1354 = vmatpush1.bf16.msra.mxu1 %v2427_v30  ;;  %v2513_v22 = vld [vmem:[%s3759_s0 + $0x94] ss:$36 sps:$4 sm:$0xff]   ;;  %v3021_v27 = vld [vmem:[%s3758_s1 + $0x344] ss:$8 sps:$4 sm:$0xff]   ;;  %v2518_v29 = vld [vmem:[%s3758_s1 + $0x140] ss:$8 sps:$4 sm:$0xff]  }
  0x20   :  { %1580 = vmatpush1.bf16.msra.mxu0 %v2428_v31  ;;  %1355 = vmatprep.subr.bf16.mxu1 %v2429_v32  ;;  %v2517_v28 = vld [vmem:[%s3759_s0 + $0x90] ss:$36 sps:$4 sm:$0xff]   ;;  %v2521_v30 = vld [vmem:[%s3759_s0 + $0xa0] ss:$36 sps:$4 sm:$0xff]  }
  0x21   :  { %1581 = vmatprep.subr.bf16.mxu0 %v2431_v33  ;;  %v3035_v31 = vld [vmem:[%s3758_s1 + $0x340] ss:$8 sps:$4 sm:$0xff]   ;;  %v2527_v32 = vld [vmem:[%s3758_s1 + $0x154] ss:$8 sps:$4 sm:$0xff]   ;;  %v3108_v49 = vld [vmem:[%s3758_s1 + $0x370] ss:$8 sps:$4 sm:$0xff]  }
  0x22   :  { %v3045_v33 = vld [vmem:[%s3758_s1 + $0x354] ss:$8 sps:$4 sm:$0xff]   ;;  %v3117_v51 = vld [vmem:[%s3758_s1 + $0x384] ss:$8 sps:$4 sm:$0xff]  }
  0x23   :  { %1356 = vmatpush1.bf16.msra.mxu1 %v2433_v34  ;;  %v2531_v34 = vld [vmem:[%s3759_s0 + $0xdc] ss:$36 sps:$4 sm:$0xff]  }
  0x24   :  { %1582 = vmatpush1.bf16.msra.mxu0 %v2434_v35  ;;  %1357 = vmatprep.subr.bf16.mxu1 %v2435_v36  ;;  %v2533_v35 = vld [vmem:[%s3759_s0 + $0xec] ss:$36 sps:$4 sm:$0xff]  }
  0x25   :  { %1583 = vmatprep.subr.bf16.mxu0 %v2437_v37  ;;  %v2525_v36 = vld [vmem:[%s3758_s1 + $0x150] ss:$8 sps:$4 sm:$0xff]  }
  0x26   :  { %v3060_v37 = vld [vmem:[%s3758_s1 + $0x350] ss:$8 sps:$4 sm:$0xff]  }
  0x27   :  { %1358 = vmatpush1.bf16.msra.mxu1 %v2439_v38  ;;  %v2538_v38 = vld [vmem:[%s3758_s1 + $0x164] ss:$8 sps:$4 sm:$0xff]  }
  0x28   :  { %1584 = vmatpush1.bf16.msra.mxu0 %v2440_v39  ;;  %1359 = vmatprep.subr.bf16.mxu1 %v2441_v40  ;;  %v3069_v39 = vld [vmem:[%s3758_s1 + $0x364] ss:$8 sps:$4 sm:$0xff]   ;;  %v2535_v40 = vld [vmem:[%s3759_s0 + $0xd8] ss:$36 sps:$4 sm:$0xff]  }
  0x29   :  { %1585 = vmatprep.subr.bf16.mxu0 %v2443_v41  ;;  %v2536_v41 = vld [vmem:[%s3758_s1 + $0x160] ss:$8 sps:$4 sm:$0xff]  }
  0x2b   :  { %1360 = vmatpush1.bf16.msra.mxu1 %v2445_v42  ;;  %v2539_v42 = vld [vmem:[%s3759_s0 + $0xe8] ss:$36 sps:$4 sm:$0xff]  }
  0x2c   :  { %1586 = vmatpush1.bf16.msra.mxu0 %v2446_v43  ;;  %1361 = vmatprep.subr.bf16.mxu1 %v2447_v44  ;;  %v3083_v43 = vld [vmem:[%s3758_s1 + $0x360] ss:$8 sps:$4 sm:$0xff]   ;;  %v2545_v44 = vld [vmem:[%s3758_s1 + $0x174] ss:$8 sps:$4 sm:$0xff]  }
  0x2d   :  { %1587 = vmatprep.subr.bf16.mxu0 %v2449_v45  ;;  %v3093_v45 = vld [vmem:[%s3758_s1 + $0x374] ss:$8 sps:$4 sm:$0xff]  }
  0x2f   :  { %1362 = vmatpush1.bf16.msra.mxu1 %v2451_v46  ;;  %v2549_v46 = vld [vmem:[%s3759_s0 + $0x124] ss:$36 sps:$4 sm:$0xff]  }
  0x30   :  { %1588 = vmatpush1.bf16.msra.mxu0 %v2452_v47  ;;  %1363 = vmatprep.subr.bf16.mxu1 %v2453_v48  ;;  %v2551_v47 = vld [vmem:[%s3759_s0 + $0x134] ss:$36 sps:$4 sm:$0xff]  }
  0x31   :  { %1589 = vmatprep.subr.bf16.mxu0 %v2455_v50  ;;  %v2543_v48 = vld [vmem:[%s3758_s1 + $0x170] ss:$8 sps:$4 sm:$0xff]   ;;  %v2556_v50 = vld [vmem:[%s3758_s1 + $0x184] ss:$8 sps:$4 sm:$0xff]  }
  0x33   :  { %1364 = vmatpush1.bf16.msra.mxu1 %v2457_v52  ;;  %v2553_v52 = vld [vmem:[%s3759_s0 + $0x120] ss:$36 sps:$4 sm:$0xff]  }
  0x34   :  { %1590 = vmatpush1.bf16.msra.mxu0 %v2458_v53  ;;  %1365 = vmatprep.subr.bf16.mxu1 %v2459_v54  ;;  %v2554_v53 = vld [vmem:[%s3758_s1 + $0x180] ss:$8 sps:$4 sm:$0xff]   ;;  %v2557_v54 = vld [vmem:[%s3759_s0 + $0x130] ss:$36 sps:$4 sm:$0xff]  }
  0x35   :  { %1591 = vmatprep.subr.bf16.mxu0 %v2461_v55  ;;  %v3131_v55 = vld [vmem:[%s3758_s1 + $0x380] ss:$8 sps:$4 sm:$0xff]  }
  0x37   :  { %1366 = vmatpush1.bf16.msra.mxu1 %v2463_v56  ;;  %v2563_v56 = vld [vmem:[%s3758_s1 + $0x194] ss:$8 sps:$4 sm:$0xff]  }
  0x38   :  { %1592 = vmatpush1.bf16.msra.mxu0 %v2464_v57  ;;  %1367 = vmatprep.subr.bf16.mxu1 %v2465_v58  ;;  %v3141_v57 = vld [vmem:[%s3758_s1 + $0x394] ss:$8 sps:$4 sm:$0xff]   ;;  %v2567_v58 = vld [vmem:[%s3759_s0 + $0x16c] ss:$36 sps:$4 sm:$0xff]  }
  0x39   :  { %1593 = vmatprep.subr.bf16.mxu0 %v2467_v59  ;;  %v2569_v59 = vld [vmem:[%s3759_s0 + $0x17c] ss:$36 sps:$4 sm:$0xff]  }
  0x3b   :  { %1368 = vmatpush1.bf16.msra.mxu1 %v2469_v60  ;;  %v2561_v60 = vld [vmem:[%s3758_s1 + $0x190] ss:$8 sps:$4 sm:$0xff]  }
  0x3c   :  { %1594 = vmatpush1.bf16.msra.mxu0 %v2470_v61  ;;  %1369 = vmatprep.subr.bf16.mxu1 %v2471_v62  ;;  %v3156_v61 = vld [vmem:[%s3758_s1 + $0x390] ss:$8 sps:$4 sm:$0xff]   ;;  %v2574_v62 = vld [vmem:[%s3758_s1 + $0x1a4] ss:$8 sps:$4 sm:$0xff]  }
  0x3d   :  { %1595 = vmatprep.subr.bf16.mxu0 %v2473_v63  ;;  %v3165_v63 = vld [vmem:[%s3758_s1 + $0x3a4] ss:$8 sps:$4 sm:$0xff]  }
  0x3f   :  { %1370 = vmatpush1.bf16.msra.mxu1 %v2475_v0  ;;  %v2571_v0 = vld [vmem:[%s3759_s0 + $0x168] ss:$36 sps:$4 sm:$0xff]  }
  0x40   :  { %1596 = vmatpush1.bf16.msra.mxu0 %v2476_v1  ;;  %1452 = vmatprep.subr.bf16.mxu1 %v2485_v2  ;;  %v2572_v1 = vld [vmem:[%s3758_s1 + $0x1a0] ss:$8 sps:$4 sm:$0xff]   ;;  %v2575_v2 = vld [vmem:[%s3759_s0 + $0x178] ss:$36 sps:$4 sm:$0xff]  }
  0x41   :  { %1678 = vmatprep.subr.bf16.mxu0 %v2926_v3 }
  0x42   :  { %1372 = vmatmul.mubr.bf16.vlgmr.msra.gmra.mrb[0].mxu1 %v2477_v4  ;;  %v3179_v4 = vld [vmem:[%s3758_s1 + $0x3a0] ss:$8 sps:$4 sm:$0xff]  }
  0x43   :  { %1598 = vmatmul.mubr.bf16.vlgmr.msra.gmra.mrb[0].mxu0 %v2480_v5  ;;  %1453 = vmatpush1.bf16.msra.mxu1 %v2483_v6  ;;  %v2581_v5 = vld [vmem:[%s3758_s1 + $0x1b4] ss:$8 sps:$4 sm:$0xff]  }
  0x44   :  { %1679 = vmatpush1.bf16.msra.mxu0 %v2940_v7  ;;  %1454 = vmatprep.subr.bf16.mxu1 %v2491_v8  ;;  %v3189_v6 = vld [vmem:[%s3758_s1 + $0x3b4] ss:$8 sps:$4 sm:$0xff]  }
  0x45   :  { %1680 = vmatprep.subr.bf16.mxu0 %v2949_v9  ;;  %1381 = vmatprep.mubr.bf16.mxu1 %v2495_v10  ;;  %v2585_v8 = vld [vmem:[%s3759_s0 + $0x1b4] ss:$36 sps:$4 sm:$0xff]   ;;  %v2587_v10 = vld [vmem:[%s3759_s0 + $0x1c4] ss:$36 sps:$4 sm:$0xff]  }
  0x46   :  { %1607 = vmatprep.mubr.bf16.mxu0 %v2497_v11  ;;  %v2579_v11 = vld [vmem:[%s3758_s1 + $0x1b0] ss:$8 sps:$4 sm:$0xff]  }
  0x47   :  { %1455 = vmatpush1.bf16.msra.mxu1 %v2489_v12  ;;  %v3203_v12 = vld [vmem:[%s3758_s1 + $0x3b0] ss:$8 sps:$4 sm:$0xff]  }
  0x48   :  { %1681 = vmatpush1.bf16.msra.mxu0 %v2964_v13  ;;  %1456 = vmatprep.subr.bf16.mxu1 %v2502_v14  ;;  %v2592_v14 = vld [vmem:[%s3758_s1 + $0x1c4] ss:$8 sps:$4 sm:$0xff]  }
  0x49   :  { %1682 = vmatprep.subr.bf16.mxu0 %v2973_v15 }
  0x4a   :  { %1382 = vmatmul.mubr.bf16.gmra.mrb[4].mxu1 %v2499_v16  ;;  %v3213_v16 = vld [vmem:[%s3758_s1 + $0x3c4] ss:$8 sps:$4 sm:$0xff]  }
  0x4b   :  { %1608 = vmatmul.mubr.bf16.gmra.mrb[4].mxu0 %v2503_v18  ;;  %1457 = vmatpush1.bf16.msra.mxu1 %v2500_v17  ;;  %v2589_v17 = vld [vmem:[%s3759_s0 + $0x1b0] ss:$36 sps:$4 sm:$0xff]   ;;  %v2590_v18 = vld [vmem:[%s3758_s1 + $0x1c0] ss:$8 sps:$4 sm:$0xff]  }
  0x4c   :  { %1683 = vmatpush1.bf16.msra.mxu0 %v2987_v19  ;;  %1458 = vmatprep.subr.bf16.mxu1 %v2509_v20  ;;  %v2593_v20 = vld [vmem:[%s3759_s0 + $0x1c0] ss:$36 sps:$4 sm:$0xff]  }
  0x4d   :  { %1684 = vmatprep.subr.bf16.mxu0 %v2997_v21  ;;  %1391 = vmatprep.mubr.bf16.mxu1 %v2513_v22  ;;  %v3227_v22 = vld [vmem:[%s3758_s1 + $0x3c0] ss:$8 sps:$4 sm:$0xff]  }
  0x4e   :  { %1617 = vmatprep.mubr.bf16.mxu0 %v2515_v23  ;;  %v2599_v23 = vld [vmem:[%s3758_s1 + $0x1d4] ss:$8 sps:$4 sm:$0xff]  }
  0x4f   :  { %1459 = vmatpush1.bf16.msra.mxu1 %v2507_v24  ;;  %v3237_v24 = vld [vmem:[%s3758_s1 + $0x3d4] ss:$8 sps:$4 sm:$0xff]  }
  0x50   :  { %1685 = vmatpush1.bf16.msra.mxu0 %v3012_v25  ;;  %1460 = vmatprep.subr.bf16.mxu1 %v2520_v26  ;;  %v2603_v26 = vld [vmem:[%s3759_s0 + $0x1fc] ss:$36 sps:$4 sm:$0xff]  }
  0x51   :  { %1686 = vmatprep.subr.bf16.mxu0 %v3021_v27 }
  0x52   :  { %1392 = vmatmul.mubr.bf16.gmra.mrb[8].mxu1 %v2517_v28  ;;  %v2605_v28 = vld [vmem:[%s3759_s0 + $0x20c] ss:$36 sps:$4 sm:$0xff]  }
  0x53   :  { %1618 = vmatmul.mubr.bf16.gmra.mrb[8].mxu0 %v2521_v30  ;;  %1461 = vmatpush1.bf16.msra.mxu1 %v2518_v29  ;;  %v2597_v29 = vld [vmem:[%s3758_s1 + $0x1d0] ss:$8 sps:$4 sm:$0xff]  }
  0x54   :  { %1687 = vmatpush1.bf16.msra.mxu0 %v3035_v31  ;;  %1462 = vmatprep.subr.bf16.mxu1 %v2527_v32  ;;  %v3251_v30 = vld [vmem:[%s3758_s1 + $0x3d0] ss:$8 sps:$4 sm:$0xff]   ;;  %v2610_v32 = vld [vmem:[%s3758_s1 + $0x1e4] ss:$8 sps:$4 sm:$0xff]  }
  0x55   :  { %1688 = vmatprep.subr.bf16.mxu0 %v3045_v33  ;;  %1401 = vmatprep.mubr.bf16.mxu1 %v2531_v34  ;;  %v3261_v34 = vld [vmem:[%s3758_s1 + $0x3e4] ss:$8 sps:$4 sm:$0xff]  }
  0x56   :  { %1627 = vmatprep.mubr.bf16.mxu0 %v2533_v35  ;;  %v2607_v35 = vld [vmem:[%s3759_s0 + $0x1f8] ss:$36 sps:$4 sm:$0xff]  }
  0x57   :  { %1463 = vmatpush1.bf16.msra.mxu1 %v2525_v36  ;;  %v2608_v36 = vld [vmem:[%s3758_s1 + $0x1e0] ss:$8 sps:$4 sm:$0xff]  }
  0x58   :  { %1689 = vmatpush1.bf16.msra.mxu0 %v3060_v37  ;;  %1464 = vmatprep.subr.bf16.mxu1 %v2538_v38  ;;  %v2611_v38 = vld [vmem:[%s3759_s0 + $0x208] ss:$36 sps:$4 sm:$0xff]  }
  0x59   :  { %1690 = vmatprep.subr.bf16.mxu0 %v3069_v39 }
  0x5a   :  { %1402 = vmatmul.mubr.bf16.gmra.mrb[12].mxu1 %v2535_v40  ;;  %v3275_v40 = vld [vmem:[%s3758_s1 + $0x3e0] ss:$8 sps:$4 sm:$0xff]  }
  0x5b   :  { %1628 = vmatmul.mubr.bf16.gmra.mrb[12].mxu0 %v2539_v42  ;;  %1465 = vmatpush1.bf16.msra.mxu1 %v2536_v41  ;;  %v2617_v41 = vld [vmem:[%s3758_s1 + $0x1f4] ss:$8 sps:$4 sm:$0xff]  }
  0x5c   :  { %1691 = vmatpush1.bf16.msra.mxu0 %v3083_v43  ;;  %1466 = vmatprep.subr.bf16.mxu1 %v2545_v44  ;;  %v3285_v42 = vld [vmem:[%s3758_s1 + $0x3f4] ss:$8 sps:$4 sm:$0xff]   ;;  %v2623_v44 = vld [vmem:[%s3759_s0 + $0xc] ss:$36 sps:$4 sm:$0xff]  }
  0x5d   :  { %1692 = vmatprep.subr.bf16.mxu0 %v3093_v45  ;;  %1411 = vmatprep.mubr.bf16.mxu1 %v2549_v46  ;;  %v2626_v46 = vld [vmem:[%s3759_s0 + $0x1c] ss:$36 sps:$4 sm:$0xff]  }
  0x5e   :  { %1637 = vmatprep.mubr.bf16.mxu0 %v2551_v47  ;;  %v2615_v47 = vld [vmem:[%s3758_s1 + $0x1f0] ss:$8 sps:$4 sm:$0xff]  }
  0x5f   :  { %1467 = vmatpush1.bf16.msra.mxu1 %v2543_v48  ;;  %v3300_v48 = vld [vmem:[%s3758_s1 + $0x3f0] ss:$8 sps:$4 sm:$0xff]  }
  0x60   :  { %1693 = vmatpush1.bf16.msra.mxu0 %v3108_v49  ;;  %1468 = vmatprep.subr.bf16.mxu1 %v2556_v50  ;;  %v2629_v50 = vld [vmem:[%s3758_s1 + $0x404] ss:$8 sps:$4 sm:$0xff]  }
  0x61   :  { %1694 = vmatprep.subr.bf16.mxu0 %v3117_v51 }
  0x62   :  { %1412 = vmatmul.mubr.bf16.gmra.mrb[16].mxu1 %v2553_v52  ;;  %v2621_v52 = vld [vmem:[%s3759_s0 + $0x8] ss:$36 sps:$4 sm:$0xff]  }
  0x63   :  { %1638 = vmatmul.mubr.bf16.gmra.mrb[16].mxu0 %v2557_v54  ;;  %1469 = vmatpush1.bf16.msra.mxu1 %v2554_v53  ;;  %v2624_v53 = vld [vmem:[%s3759_s0 + $0x18] ss:$36 sps:$4 sm:$0xff]   ;;  %v2627_v54 = vld [vmem:[%s3758_s1 + $0x400] ss:$8 sps:$4 sm:$0xff]  }
  0x64   :  { %1695 = vmatpush1.bf16.msra.mxu0 %v3131_v55  ;;  %1470 = vmatprep.subr.bf16.mxu1 %v2563_v56  ;;  %v2632_v56 = vld [vmem:[%s3758_s1 + $0x414] ss:$8 sps:$4 sm:$0xff]  }
  0x65   :  { %1696 = vmatprep.subr.bf16.mxu0 %v3141_v57  ;;  %1421 = vmatprep.mubr.bf16.mxu1 %v2567_v58  ;;  %v2633_v58 = vld [vmem:[%s3759_s0 + $0x54] ss:$36 sps:$4 sm:$0xff]  }
  0x66   :  { %1647 = vmatprep.mubr.bf16.mxu0 %v2569_v59  ;;  %v2635_v59 = vld [vmem:[%s3759_s0 + $0x64] ss:$36 sps:$4 sm:$0xff]  }
  0x67   :  { %1471 = vmatpush1.bf16.msra.mxu1 %v2561_v60  ;;  %v2630_v60 = vld [vmem:[%s3758_s1 + $0x410] ss:$8 sps:$4 sm:$0xff]  }
  0x68   :  { %1697 = vmatpush1.bf16.msra.mxu0 %v3156_v61  ;;  %1472 = vmatprep.subr.bf16.mxu1 %v2574_v62  ;;  %v2637_v62 = vld [vmem:[%s3759_s0 + $0x50] ss:$36 sps:$4 sm:$0xff]  }
  0x69   :  { %1698 = vmatprep.subr.bf16.mxu0 %v3165_v63 }
  0x6a   :  { %1422 = vmatmul.mubr.bf16.gmra.mrb[20].mxu1 %v2571_v0  ;;  %v2644_v0 = vld [vmem:[%s3758_s1 + $0x434] ss:$8 sps:$4 sm:$0xff]  }
  0x6b   :  { %1648 = vmatmul.mubr.bf16.gmra.mrb[20].mxu0 %v2575_v2  ;;  %1473 = vmatpush1.bf16.msra.mxu1 %v2572_v1  ;;  %v2645_v1 = vld [vmem:[%s3759_s0 + $0x9c] ss:$36 sps:$4 sm:$0xff]   ;;  %v2653_v2 = vld [vmem:[%s3758_s1 + $0x444] ss:$8 sps:$4 sm:$0xff]  }
  0x6c   :  { %1699 = vmatpush1.bf16.msra.mxu0 %v3179_v4  ;;  %1474 = vmatprep.subr.bf16.mxu1 %v2581_v5  ;;  %v2649_v5 = vld [vmem:[%s3759_s0 + $0x98] ss:$36 sps:$4 sm:$0xff]  }
  0x6d   :  { %1700 = vmatprep.subr.bf16.mxu0 %v3189_v6  ;;  %1431 = vmatprep.mubr.bf16.mxu1 %v2585_v8  ;;  %v2656_v8 = vld [vmem:[%s3758_s1 + $0x454] ss:$8 sps:$4 sm:$0xff]  }
  0x6e   :  { %1657 = vmatprep.mubr.bf16.mxu0 %v2587_v10  ;;  %v2657_v10 = vld [vmem:[%s3759_s0 + $0xe4] ss:$36 sps:$4 sm:$0xff]  }
  0x6f   :  { %1475 = vmatpush1.bf16.msra.mxu1 %v2579_v11  ;;  %v2665_v11 = vld [vmem:[%s3758_s1 + $0x464] ss:$8 sps:$4 sm:$0xff]  }
  0x70   :  { %1701 = vmatpush1.bf16.msra.mxu0 %v3203_v12  ;;  %1476 = vmatprep.subr.bf16.mxu1 %v2592_v14  ;;  %v2661_v14 = vld [vmem:[%s3759_s0 + $0xe0] ss:$36 sps:$4 sm:$0xff]  }
  0x71   :  { %1702 = vmatprep.subr.bf16.mxu0 %v3213_v16 }
  0x72   :  { %1432 = vmatmul.mubr.bf16.gmra.mrb[24].mxu1 %v2589_v17  ;;  %v2668_v17 = vld [vmem:[%s3758_s1 + $0x474] ss:$8 sps:$4 sm:$0xff]  }
  0x73   :  { %1658 = vmatmul.mubr.bf16.gmra.mrb[24].mxu0 %v2593_v20  ;;  %1477 = vmatpush1.bf16.msra.mxu1 %v2590_v18  ;;  %v2669_v18 = vld [vmem:[%s3759_s0 + $0x12c] ss:$36 sps:$4 sm:$0xff]  }
  0x74   :  { %1703 = vmatpush1.bf16.msra.mxu0 %v3227_v22  ;;  %1478 = vmatprep.subr.bf16.mxu1 %v2599_v23  ;;  %v2671_v20 = vld [vmem:[%s3759_s0 + $0x128] ss:$36 sps:$4 sm:$0xff]  }
  0x75   :  { %1704 = vmatprep.subr.bf16.mxu0 %v3237_v24  ;;  %1441 = vmatprep.mubr.bf16.mxu1 %v2603_v26  ;;  %v2676_v23 = vld [vmem:[%s3759_s0 + $0x68] ss:$36 sps:$4 sm:$0xff]  }
  0x76   :  { %1667 = vmatprep.mubr.bf16.mxu0 %v2605_v28  ;;  %v2692_v26 = vld [vmem:[%s3759_s0 + $0x188] ss:$36 sps:$4 sm:$0xff]  }
  0x77   :  { %1479 = vmatpush1.bf16.msra.mxu1 %v2597_v29  ;;  %v2693_v28 = vld [vmem:[%s3759_s0 + $0x1cc] ss:$36 sps:$4 sm:$0xff]  }
  0x78   :  { %1705 = vmatpush1.bf16.msra.mxu0 %v3251_v30  ;;  %1480 = vmatprep.subr.bf16.mxu1 %v2610_v32  ;;  %v2695_v29 = vld [vmem:[%s3759_s0 + $0x1c8] ss:$36 sps:$4 sm:$0xff]   ;;  %v2697_v32 = vld [vmem:[%s3759_s0 + $0x214] ss:$36 sps:$4 sm:$0xff]  }
  0x79   :  { %1706 = vmatprep.subr.bf16.mxu0 %v3261_v34 }
  0x7a   :  { %1442 = vmatmul.mubr.bf16.gmra.mrb[28].mxu1 %v2607_v35  ;;  %v2700_v35 = vld [vmem:[%s3759_s0 + $0x218] ss:$36 sps:$4 sm:$0xff]  }
  0x7b   :  { %1668 = vmatmul.mubr.bf16.gmra.mrb[28].mxu0 %v2611_v38  ;;  %1481 = vmatpush1.bf16.msra.mxu1 %v2608_v36 }
  0x7c   :  { %1707 = vmatpush1.bf16.msra.mxu0 %v3275_v40  ;;  %1482 = vmatprep.subr.bf16.mxu1 %v2617_v41 }
  0x7d   :  { %1708 = vmatprep.subr.bf16.mxu0 %v3285_v42  ;;  %1484 = vmatprep.mubr.bf16.mxu1 %v2623_v44 }
  0x7e   :  { %1710 = vmatprep.mubr.bf16.mxu0 %v2626_v46 }
  0x7f   :  { %1483 = vmatpush1.bf16.msra.mxu1 %v2615_v47 }
  0x80   :  { %1709 = vmatpush1.bf16.msra.mxu0 %v3300_v48  ;;  %2188 = vmatprep.subr.bf16.mxu1 %v2926_v3  ;;  %v2641_v3 = vld [vmem:[%s3758_s1 + $0x424] ss:$8 sps:$4 sm:$0xff]  }
  0x81   :  { %1791 = vmatprep.subr.bf16.mxu0 %v2629_v50 }
  0x82   :  { %1485 = vmatmul.mubr.bf16.vlgmr.msra.gmra.mrb[0].mxu1 %v2621_v52 }
  0x83   :  { %1711 = vmatmul.mubr.bf16.vlgmr.msra.gmra.mrb[0].mxu0 %v2624_v53  ;;  %2204 = vmatpush1.bf16.msra.mxu1 %v2940_v7  ;;  %v2638_v7 = vld [vmem:[%s3759_s0 + $0x60] ss:$36 sps:$4 sm:$0xff]  }
  0x84   :  { %1792 = vmatpush1.bf16.msra.mxu0 %v2627_v54  ;;  %2189 = vmatprep.subr.bf16.mxu1 %v2949_v9  ;;  %v2639_v9 = vld [vmem:[%s3758_s1 + $0x420] ss:$8 sps:$4 sm:$0xff]  }
  0x85   :  { %1793 = vmatprep.subr.bf16.mxu0 %v2632_v56  ;;  %1494 = vmatprep.mubr.bf16.mxu1 %v2633_v58 }
  0x86   :  { %1720 = vmatprep.mubr.bf16.mxu0 %v2635_v59 }
  0x87   :  { %2205 = vmatpush1.bf16.msra.mxu1 %v2964_v13  ;;  %v2647_v13 = vld [vmem:[%s3759_s0 + $0xac] ss:$36 sps:$4 sm:$0xff]  }
  0x88   :  { %1794 = vmatpush1.bf16.msra.mxu0 %v2630_v60  ;;  %2190 = vmatprep.subr.bf16.mxu1 %v2973_v15  ;;  %v2642_v15 = vld [vmem:[%s3758_s1 + $0x430] ss:$8 sps:$4 sm:$0xff]  }
  0x89   :  { %1795 = vmatprep.subr.bf16.mxu0 %v2641_v3 }
  0x8a   :  { %1495 = vmatmul.mubr.bf16.gmra.mrb[4].mxu1 %v2637_v62 }
  0x8b   :  { %1721 = vmatmul.mubr.bf16.gmra.mrb[4].mxu0 %v2638_v7  ;;  %2206 = vmatpush1.bf16.msra.mxu1 %v2987_v19  ;;  %v2650_v19 = vld [vmem:[%s3759_s0 + $0xa8] ss:$36 sps:$4 sm:$0xff]  }
  0x8c   :  { %1796 = vmatpush1.bf16.msra.mxu0 %v2639_v9  ;;  %2191 = vmatprep.subr.bf16.mxu1 %v2997_v21  ;;  %v2651_v21 = vld [vmem:[%s3758_s1 + $0x440] ss:$8 sps:$4 sm:$0xff]  }
  0x8d   :  { %1797 = vmatprep.subr.bf16.mxu0 %v2644_v0  ;;  %1504 = vmatprep.mubr.bf16.mxu1 %v2645_v1 }
  0x8e   :  { %1730 = vmatprep.mubr.bf16.mxu0 %v2647_v13 }
  0x8f   :  { %2207 = vmatpush1.bf16.msra.mxu1 %v3012_v25  ;;  %v2659_v25 = vld [vmem:[%s3759_s0 + $0xf4] ss:$36 sps:$4 sm:$0xff]  }
  0x90   :  { %1798 = vmatpush1.bf16.msra.mxu0 %v2642_v15  ;;  %2192 = vmatprep.subr.bf16.mxu1 %v3021_v27  ;;  %v2654_v27 = vld [vmem:[%s3758_s1 + $0x450] ss:$8 sps:$4 sm:$0xff]   ;;  %v241_v15 = vlaneseq }
  0x91   :  { %1799 = vmatprep.subr.bf16.mxu0 %v2653_v2 }
  0x92   :  { %1505 = vmatmul.mubr.bf16.gmra.mrb[8].mxu1 %v2649_v5 }
  0x93   :  { %1731 = vmatmul.mubr.bf16.gmra.mrb[8].mxu0 %v2650_v19  ;;  %2208 = vmatpush1.bf16.msra.mxu1 %v3035_v31  ;;  %v2662_v31 = vld [vmem:[%s3759_s0 + $0xf0] ss:$36 sps:$4 sm:$0xff]  }
  0x94   :  { %1800 = vmatpush1.bf16.msra.mxu0 %v2651_v21  ;;  %2193 = vmatprep.subr.bf16.mxu1 %v3045_v33  ;;  %v2663_v33 = vld [vmem:[%s3758_s1 + $0x460] ss:$8 sps:$4 sm:$0xff]   ;;  %v242_v21 = vshrl.u32 %v241_v15, 7 }
  0x95   :  { %1801 = vmatprep.subr.bf16.mxu0 %v2656_v8  ;;  %1514 = vmatprep.mubr.bf16.mxu1 %v2657_v10 }
  0x96   :  { %1740 = vmatprep.mubr.bf16.mxu0 %v2659_v25  ;;  %v243_v10 = vsub.s32 0, %v242_v21  ;;  %v239_v25 = vld [vmem:[%s3760_s2] sm:$0x3] }
  0x97   :  { %2209 = vmatpush1.bf16.msra.mxu1 %v3060_v37  ;;  %v2666_v37 = vld [vmem:[%s3758_s1 + $0x470] ss:$8 sps:$4 sm:$0xff]  }
  0x98   :  { %1802 = vmatpush1.bf16.msra.mxu0 %v2654_v27  ;;  %2194 = vmatprep.subr.bf16.mxu1 %v3069_v39  ;;  %v2701_v39 = vmov 0   ;;  %v247_v27 = vsub.s32 1, %v242_v21 }
  0x99   :  { %1803 = vmatprep.subr.bf16.mxu0 %v2665_v11 }
  0x9a   :  { %1515 = vmatmul.mubr.bf16.gmra.mrb[12].mxu1 %v2661_v14 }
  0x9b   :  { %1741 = vmatmul.mubr.bf16.gmra.mrb[12].mxu0 %v2662_v31  ;;  %2210 = vmatpush1.bf16.msra.mxu1 %v3083_v43  ;;  %v2672_v43 = vld [vmem:[%s3759_s0 + $0x20] ss:$36 sps:$4 sm:$0xff]  }
  0x9c   :  { %1804 = vmatpush1.bf16.msra.mxu0 %v2663_v33  ;;  %2195 = vmatprep.subr.bf16.mxu1 %v3093_v45  ;;  %v2673_v45 = vld [vmem:[%s3759_s0 + $0x174] ss:$36 sps:$4 sm:$0xff]   ;;  %v3553_v33 = vrot.slane %v239_v25, %v243_v10 }
  0x9d   :  { %1805 = vmatprep.subr.bf16.mxu0 %v2668_v17  ;;  %1524 = vmatprep.mubr.bf16.mxu1 %v2669_v18  ;;  %v3557_v18 = vrot.slane %v239_v25, %v247_v27 }
  0x9e   :  { %1823 = vmatprep.mubr.bf16.mxu0 %v2701_v39 }
  0x9f   :  { %2211 = vmatpush1.bf16.msra.mxu1 %v3108_v49  ;;  %v2675_v49 = vld [vmem:[%s3759_s0 + $0x170] ss:$36 sps:$4 sm:$0xff]  }
  0xa0   :  { %1806 = vmatpush1.bf16.msra.mxu0 %v2666_v37  ;;  %2196 = vmatprep.subr.bf16.mxu1 %v3117_v51  ;;  %v2677_v51 = vld [vmem:[%s3759_s0 + $0x1bc] ss:$36 sps:$4 sm:$0xff]  }
  0xa2   :  { %1525 = vmatmul.mubr.bf16.gmra.mrb[16].mxu1 %v2671_v20 }
  0xa3   :  { %1824 = vmatmul.mubr.bf16.vlgmr.msra.gmra.mrb[0].mxu0 %v2672_v43  ;;  %2212 = vmatpush1.bf16.msra.mxu1 %v3131_v55  ;;  %v2679_v55 = vld [vmem:[%s3759_s0 + $0x1b8] ss:$36 sps:$4 sm:$0xff]  }
  0xa4   :  { %1534 = vmatprep.mubr.bf16.mxu1 %v2673_v45  ;;  %2197 = vmatprep.subr.bf16.mxu1 %v3141_v57  ;;  %v2680_v57 = vld [vmem:[%s3759_s0 + $0xb0] ss:$36 sps:$4 sm:$0xff]  }
  0xa5   :  { %1833 = vmatprep.mubr.bf16.mxu0 %v2701_v39 }
  0xa7   :  { %2213 = vmatpush1.bf16.msra.mxu1 %v3156_v61  ;;  %v2681_v61 = vld [vmem:[%s3759_s0 + $0x204] ss:$36 sps:$4 sm:$0xff]  }
  0xa8   :  { %2198 = vmatprep.subr.bf16.mxu1 %v3165_v63  ;;  %v2683_v63 = vld [vmem:[%s3759_s0 + $0x200] ss:$36 sps:$4 sm:$0xff]  }
  0xaa   :  { %1535 = vmatmul.mubr.bf16.gmra.mrb[20].mxu1 %v2675_v49 }
  0xab   :  { %1834 = vmatmul.mubr.bf16.gmra.mrb[4].mxu0 %v2676_v23  ;;  %2214 = vmatpush1.bf16.msra.mxu1 %v3179_v4  ;;  %v2684_v4 = vld [vmem:[%s3759_s0 + $0xf8] ss:$36 sps:$4 sm:$0xff]  }
  0xac   :  { %1544 = vmatprep.mubr.bf16.mxu1 %v2677_v51  ;;  %2199 = vmatprep.subr.bf16.mxu1 %v3189_v6  ;;  %v2687_v6 = vld [vmem:[%s3759_s0 + $0x13c] ss:$36 sps:$4 sm:$0xff]  }
  0xad   :  { %1843 = vmatprep.mubr.bf16.mxu0 %v2701_v39 }
  0xaf   :  { %2215 = vmatpush1.bf16.msra.mxu1 %v3203_v12  ;;  %v2685_v12 = vld [vmem:[%s3759_s0 + $0x138] ss:$36 sps:$4 sm:$0xff]  }
  0xb0   :  { %2200 = vmatprep.subr.bf16.mxu1 %v3213_v16  ;;  %v2688_v16 = vld [vmem:[%s3759_s0 + $0x140] ss:$36 sps:$4 sm:$0xff]  }
  0xb2   :  { %1545 = vmatmul.mubr.bf16.gmra.mrb[24].mxu1 %v2679_v55 }
  0xb3   :  { %1844 = vmatmul.mubr.bf16.gmra.mrb[8].mxu0 %v2680_v57  ;;  %2216 = vmatpush1.bf16.msra.mxu1 %v3227_v22  ;;  %v2689_v22 = vld [vmem:[%s3759_s0 + $0x184] ss:$36 sps:$4 sm:$0xff]  }
  0xb4   :  { %1554 = vmatprep.mubr.bf16.mxu1 %v2681_v61  ;;  %2201 = vmatprep.subr.bf16.mxu1 %v3237_v24  ;;  %v2691_v24 = vld [vmem:[%s3759_s0 + $0x180] ss:$36 sps:$4 sm:$0xff]  }
  0xb5   :  { %1853 = vmatprep.mubr.bf16.mxu0 %v2701_v39 }
  0xb7   :  { %2217 = vmatpush1.bf16.msra.mxu1 %v3251_v30  ;;  %v2696_v30 = vld [vmem:[%s3759_s0 + $0x1d0] ss:$36 sps:$4 sm:$0xff]  }
  0xb8   :  { %2202 = vmatprep.subr.bf16.mxu1 %v3261_v34  ;;  %v2699_v34 = vld [vmem:[%s3759_s0 + $0x210] ss:$36 sps:$4 sm:$0xff]  }
  0xba   :  { %1555 = vmatmul.mubr.bf16.gmra.mrb[28].mxu1 %v2683_v63 }
  0xbb   :  { %1854 = vmatmul.mubr.bf16.gmra.mrb[12].mxu0 %v2684_v4  ;;  %2218 = vmatpush1.bf16.msra.mxu1 %v3275_v40 }
  0xbc   :  { %1750 = vmatprep.mubr.bf16.mxu1 %v2687_v6  ;;  %2203 = vmatprep.subr.bf16.mxu1 %v3285_v42 }
  0xbd   :  { %1863 = vmatprep.mubr.bf16.mxu0 %v2701_v39 }
  0xbf   :  { %2219 = vmatpush1.bf16.msra.mxu1 %v3300_v48 }
  0xc2   :  { %1751 = vmatmul.mubr.bf16.vlgmr.msra.gmra.mrb[32].mxu1 %v2685_v12 }
  0xc3   :  { %1864 = vmatmul.mubr.bf16.gmra.mrb[32].mxu0 %v2688_v16  ;;  %1760 = vmatprep.mubr.bf16.mxu1 %v2689_v22 }
  0xc4   :  { %1873 = vmatprep.mubr.bf16.mxu0 %v2701_v39 }
  0xca   :  { %1761 = vmatmul.mubr.bf16.gmra.mrb[36].mxu1 %v2691_v24 }
  0xcb   :  { %1874 = vmatmul.mubr.bf16.gmra.mrb[36].mxu0 %v2692_v26  ;;  %1770 = vmatprep.mubr.bf16.mxu1 %v2693_v28 }
  0xcc   :  { %1883 = vmatprep.mubr.bf16.mxu0 %v2701_v39 }
  0xd2   :  { %1771 = vmatmul.mubr.bf16.gmra.mrb[40].mxu1 %v2695_v29 }
  0xd3   :  { %1884 = vmatmul.mubr.bf16.gmra.mrb[40].mxu0 %v2696_v30  ;;  %1780 = vmatprep.mubr.bf16.mxu1 %v2697_v32 }
  0xd4   :  { %1893 = vmatprep.mubr.bf16.mxu0 %v2701_v39 }
  0xda   :  { %1781 = vmatmul.mubr.bf16.gmra.mrb[44].mxu1 %v2699_v34 }
  0xdb   :  { %1894 = vmatmul.mubr.bf16.gmra.mrb[44].mxu0 %v2700_v35 }
 0x136   :  { %v1639_v36 = vpop.f32.mrb[16].mxu0 }
 0x137   :  { %v3506_v38 = vpop.f32.mrb[17].mxu0 }
 0x138   :  { %v3508_v40 = vpop.f32.mrb[18].mxu0 }
 0x139   :  { %v3510_v41 = vpop.f32.mrb[19].mxu0 }
 0x13e   :  { %v3512_v42 = vpop.f32.mrb[20].mxu0 }
 0x13f   :  { %v3514_v44 = vpop.f32.mrb[21].mxu0 }
 0x140   :  { %v3516_v46 = vpop.f32.mrb[22].mxu0 }
 0x141   :  { %v3518_v47 = vpop.f32.mrb[23].mxu0 }
 0x146   :  { %v3520_v48 = vpop.f32.mrb[24].mxu0 }
 0x147   :  { %v3522_v50 = vpop.f32.mrb[25].mxu0 }
 0x148   :  { %v3524_v52 = vpop.f32.mrb[26].mxu0 }
 0x149   :  { %v3526_v53 = vpop.f32.mrb[27].mxu0 }
 0x14e   :  { %v3528_v54 = vpop.f32.mrb[28].mxu0 }
 0x14f   :  { %v3530_v56 = vpop.f32.mrb[29].mxu0 }
 0x150   :  { %v3532_v58 = vpop.f32.mrb[30].mxu0 }
 0x151   :  { %v3534_v59 = vpop.f32.mrb[31].mxu0 }
 0x155   :  { %v1486_v60 = vpop.f32.mrb[0].mxu1 }
 0x156   :  { %v1488_v3 = vpop.f32.mrb[1].mxu1  ;;  %v2220_v37 = vadd.f32 %v1486_v60, %v3553_v33 }
 0x157   :  { %v1490_v62 = vpop.f32.mrb[2].mxu1  ;;  %v2222_v39 = vadd.f32 %v1488_v3, %v3557_v18 }
 0x158   :  { %v1492_v7 = vpop.f32.mrb[3].mxu1  ;;  %v2224_v45 = vadd.f32 %v1490_v62, %v3553_v33 }
 0x159   :  { %v2226_v57 = vadd.f32 %v1492_v7, %v3557_v18 }
 0x15d   :  { %v1496_v9 = vpop.f32.mrb[4].mxu1 }
 0x15e   :  { %v1498_v0 = vpop.f32.mrb[5].mxu1  ;;  %v2228_v62 = vadd.f32 %v1496_v9, %v3553_v33 }
 0x15f   :  { %v1500_v1 = vpop.f32.mrb[6].mxu1 }
 0x160   :  { %v1502_v13 = vpop.f32.mrb[7].mxu1  ;;  %v2232_v15 = vadd.f32 %v1500_v1, %v3553_v33 }
 0x161   :  { %v2234_v9 = vadd.f32 %v1502_v13, %v3557_v18 }
 0x165   :  { %v3536_v2 = vpop.f32.mrb[8].mxu1 }
 0x166   :  { %v3538_v5 = vpop.f32.mrb[9].mxu1 }
 0x167   :  { %v3540_v19 = vpop.f32.mrb[10].mxu1 }
 0x168   :  { %v3542_v8 = vpop.f32.mrb[11].mxu1 }
 0x16d   :  { %v3547_v11 = vpop.f32.mrb[12].mxu1 }
 0x16e   :  { %v3549_v14 = vpop.f32.mrb[13].mxu1 }
 0x16f   :  { %v3551_v31 = vpop.f32.mrb[14].mxu1 }
 0x170   :  { %v3555_v17 = vpop.f32.mrb[15].mxu1 }
 0x175   :  { %v1526_v20 = vpop.f32.mrb[16].mxu1 }
 0x176   :  { %v1825_v43 = vpop.f32.mrb[0].mxu0  ;;  %v2252_v49 = vadd.f32 %v1526_v20, %v3553_v33  ;;  %v1528_v51 = vpop.f32.mrb[17].mxu1 }
 0x177   :  { %v2221_v23 = vadd.f32 %v2220_v37, %v1825_v43  ;;  %v1827_v55 = vpop.f32.mrb[1].mxu0  ;;  %v2256_v61 = vadd.f32 %v1528_v51, %v3557_v18  ;;  %v1530_v4 = vpop.f32.mrb[18].mxu1 }
 0x178   :  { %v2223_v63 = vadd.f32 %v2222_v39, %v1827_v55  ;;  %v1829_v6 = vpop.f32.mrb[2].mxu0  ;;  %v2260_v16 = vadd.f32 %v1530_v4, %v3553_v33  ;;  %v1532_v24 = vpop.f32.mrb[19].mxu1  ;;  %v3566_v28 = vadd.f32 %v2252_v49, %v1639_v36 }
 0x179   :  { %v1904_v12 = vmax.f32 %v2221_v23, 0.0  ;;  %v2225_v22 = vadd.f32 %v2224_v45, %v1829_v6  ;;  %v1831_v26 = vpop.f32.mrb[3].mxu0  ;;  %v2264_v30 = vadd.f32 %v1532_v24, %v3557_v18  ;;  %v3570_v34 = vadd.f32 %v2256_v61, %v3506_v38 }
 0x17a   :  { %v1905_v29 = vmax.f32 %v2223_v63, 0.0  ;;  %v2227_v32 = vadd.f32 %v2226_v57, %v1831_v26  ;;  %v3576_v60 = vadd.f32 %v2260_v16, %v3508_v40  ;;  %v2230_v38 = vadd.f32 %v1498_v0, %v3557_v18 }
 0x17b   :  { %1936 = vst [vmem:[%s3761_s3] sm:$0xff] %v1904_v12  ;;  %v1906_v35 = vmax.f32 %v2225_v22, 0.0  ;;  %v3582_v3 = vadd.f32 %v2264_v30, %v3510_v41  ;;  %v2238_v6 = vadd.f32 %v3538_v5, %v3557_v18  ;;  %v2242_v26 = vadd.f32 %v3542_v8, %v3557_v18 }
 0x17c   :  { %1937 = vst [vmem:[%s3761_s3 + $0x8] sm:$0xff] %v1905_v29  ;;  %v1907_v36 = vmax.f32 %v2227_v32, 0.0 }
 0x17d   :  { %1938 = vst [vmem:[%s3761_s3 + $0x10] sm:$0xff] %v1906_v35  ;;  %v1536_v40 = vpop.f32.mrb[20].mxu1 }
 0x17e   :  { %1939 = vst [vmem:[%s3761_s3 + $0x18] sm:$0xff] %v1907_v36  ;;  %v1835_v7 = vpop.f32.mrb[4].mxu0  ;;  %v2268_v21 = vadd.f32 %v1536_v40, %v3553_v33  ;;  %v1538_v10 = vpop.f32.mrb[21].mxu1 }
 0x17f   :  { %v2229_v41 = vadd.f32 %v2228_v62, %v1835_v7  ;;  %v1837_v25 = vpop.f32.mrb[5].mxu0  ;;  %v2272_v27 = vadd.f32 %v1538_v10, %v3557_v18  ;;  %v1540_v39 = vpop.f32.mrb[22].mxu1 }
 0x180   :  { %v2231_v37 = vadd.f32 %v2230_v38, %v1837_v25  ;;  %v1839_v0 = vpop.f32.mrb[6].mxu0  ;;  %v2276_v43 = vadd.f32 %v1540_v39, %v3553_v33  ;;  %v1542_v49 = vpop.f32.mrb[23].mxu1  ;;  %v3598_v1 = vadd.f32 %v2268_v21, %v3512_v42 }
 0x181   :  { %v1908_v20 = vmax.f32 %v2229_v41, 0.0  ;;  %v2233_v45 = vadd.f32 %v2232_v15, %v1839_v0  ;;  %v1841_v23 = vpop.f32.mrb[7].mxu0  ;;  %v2280_v55 = vadd.f32 %v1542_v49, %v3557_v18  ;;  %v3602_v13 = vadd.f32 %v2272_v27, %v3514_v44 }
 0x182   :  { %v1909_v51 = vmax.f32 %v2231_v37, 0.0  ;;  %v2235_v57 = vadd.f32 %v2234_v9, %v1841_v23  ;;  %v3608_v63 = vadd.f32 %v2276_v43, %v3516_v46  ;;  %v2236_v44 = vadd.f32 %v3536_v2, %v3553_v33 }
 0x183   :  { %1940 = vst [vmem:[%s3761_s3 + $0x20] sm:$0xff] %v1908_v20  ;;  %v1910_v61 = vmax.f32 %v2233_v45, 0.0  ;;  %v3614_v4 = vadd.f32 %v2280_v55, %v3518_v47  ;;  %v2240_v47 = vadd.f32 %v3540_v19, %v3553_v33  ;;  %v2246_v9 = vadd.f32 %v3549_v14, %v3557_v18 }
 0x184   :  { %1941 = vst [vmem:[%s3761_s3 + $0x28] sm:$0xff] %v1909_v51  ;;  %v1911_v42 = vmax.f32 %v2235_v57, 0.0  ;;  %v2250_v20 = vadd.f32 %v3555_v17, %v3557_v18 }
 0x185   :  { %1942 = vst [vmem:[%s3761_s3 + $0x30] sm:$0xff] %v1910_v61  ;;  %v1546_v46 = vpop.f32.mrb[24].mxu1 }
 0x186   :  { %1943 = vst [vmem:[%s3761_s3 + $0x38] sm:$0xff] %v1911_v42  ;;  %v1845_v12 = vpop.f32.mrb[8].mxu0  ;;  %v2284_v16 = vadd.f32 %v1546_v46, %v3553_v33  ;;  %v1548_v2 = vpop.f32.mrb[25].mxu1 }
 0x187   :  { %v2237_v22 = vadd.f32 %v2236_v44, %v1845_v12  ;;  %v1847_v24 = vpop.f32.mrb[9].mxu0  ;;  %v2288_v29 = vadd.f32 %v1548_v2, %v3557_v18  ;;  %v1550_v30 = vpop.f32.mrb[26].mxu1 }
 0x188   :  { %v2239_v5 = vadd.f32 %v2238_v6, %v1847_v24  ;;  %v1849_v32 = vpop.f32.mrb[10].mxu0  ;;  %v2292_v36 = vadd.f32 %v1550_v30, %v3553_v33  ;;  %v1552_v38 = vpop.f32.mrb[27].mxu1  ;;  %v3634_v19 = vadd.f32 %v2284_v16, %v3520_v48 }
 0x189   :  { %v1912_v35 = vmax.f32 %v2237_v22, 0.0  ;;  %v2241_v62 = vadd.f32 %v2240_v47, %v1849_v32  ;;  %v1851_v40 = vpop.f32.mrb[11].mxu0  ;;  %v2296_v15 = vadd.f32 %v1552_v38, %v3557_v18  ;;  %v3638_v8 = vadd.f32 %v2288_v29, %v3522_v50 }
 0x18a   :  { %v1913_v7 = vmax.f32 %v2239_v5, 0.0  ;;  %v2243_v21 = vadd.f32 %v2242_v26, %v1851_v40  ;;  %v3644_v10 = vadd.f32 %v2292_v36, %v3524_v52  ;;  %v2244_v50 = vadd.f32 %v3547_v11, %v3553_v33 }
 0x18b   :  { %1944 = vst [vmem:[%s3761_s3 + $0x40] sm:$0xff] %v1912_v35  ;;  %v1914_v41 = vmax.f32 %v2241_v62, 0.0  ;;  %v3650_v25 = vadd.f32 %v2296_v15, %v3526_v53  ;;  %v2248_v53 = vadd.f32 %v3551_v31, %v3553_v33 }
 0x18c   :  { %1945 = vst [vmem:[%s3761_s3 + $0x48] sm:$0xff] %v1913_v7  ;;  %v1915_v48 = vmax.f32 %v2243_v21, 0.0 }
 0x18d   :  { %1946 = vst [vmem:[%s3761_s3 + $0x50] sm:$0xff] %v1914_v41  ;;  %v1556_v52 = vpop.f32.mrb[28].mxu1 }
 0x18e   :  { %1947 = vst [vmem:[%s3761_s3 + $0x58] sm:$0xff] %v1915_v48  ;;  %v1855_v27 = vpop.f32.mrb[12].mxu0  ;;  %v2300_v37 = vadd.f32 %v1556_v52, %v3553_v33  ;;  %v1558_v11 = vpop.f32.mrb[29].mxu1 }
 0x18f   :  { %v2245_v39 = vadd.f32 %v2244_v50, %v1855_v27  ;;  %v1857_v0 = vpop.f32.mrb[13].mxu0  ;;  %v2304_v43 = vadd.f32 %v1558_v11, %v3557_v18  ;;  %v1560_v45 = vpop.f32.mrb[30].mxu1 }
 0x190   :  { %v2247_v14 = vadd.f32 %v2246_v9, %v1857_v0  ;;  %v1859_v49 = vpop.f32.mrb[14].mxu0  ;;  %v2308_v51 = vadd.f32 %v1560_v45, %v3553_v33  ;;  %v1562_v57 = vpop.f32.mrb[31].mxu1  ;;  %v3670_v31 = vadd.f32 %v2300_v37, %v3528_v54 }
 0x191   :  { %v1916_v23 = vmax.f32 %v2245_v39, 0.0  ;;  %v2249_v55 = vadd.f32 %v2248_v53, %v1859_v49  ;;  %v1861_v61 = vpop.f32.mrb[15].mxu0  ;;  %v2312_v44 = vadd.f32 %v1562_v57, %v3557_v18  ;;  %v3674_v17 = vadd.f32 %v2304_v43, %v3530_v56 }
 0x192   :  { %v1917_v42 = vmax.f32 %v2247_v14, 0.0  ;;  %v2251_v6 = vadd.f32 %v2250_v20, %v1861_v61  ;;  %v3680_v33 = vadd.f32 %v2308_v51, %v3532_v58 }
 0x193   :  { %1948 = vst [vmem:[%s3761_s3 + $0x60] sm:$0xff] %v1916_v23  ;;  %v1918_v46 = vmax.f32 %v2249_v55, 0.0  ;;  %v3686_v12 = vadd.f32 %v2312_v44, %v3534_v59 }
 0x194   :  { %1949 = vst [vmem:[%s3761_s3 + $0x68] sm:$0xff] %v1917_v42  ;;  %v1919_v54 = vmax.f32 %v2251_v6, 0.0 }
 0x195   :  { %1950 = vst [vmem:[%s3761_s3 + $0x70] sm:$0xff] %v1918_v46  ;;  %v1752_v56 = vpop.f32.mrb[32].mxu1 }
 0x196   :  { %1951 = vst [vmem:[%s3761_s3 + $0x78] sm:$0xff] %v1919_v54  ;;  %v1865_v18 = vpop.f32.mrb[32].mxu0  ;;  %v2254_v58 = vadd.f32 %v3566_v28, %v1752_v56  ;;  %v1754_v47 = vpop.f32.mrb[33].mxu1 }
 0x197   :  { %v1867_v16 = vpop.f32.mrb[33].mxu0  ;;  %v2258_v22 = vadd.f32 %v3570_v34, %v1754_v47  ;;  %v1756_v2 = vpop.f32.mrb[34].mxu1 }
 0x198   :  { %v1869_v24 = vpop.f32.mrb[34].mxu0  ;;  %v2255_v59 = vadd.f32 %v2254_v58, %v1865_v18  ;;  %v2262_v26 = vadd.f32 %v3576_v60, %v1756_v2  ;;  %v1758_v29 = vpop.f32.mrb[35].mxu1 }
 0x199   :  { %v1871_v5 = vpop.f32.mrb[35].mxu0  ;;  %v2259_v30 = vadd.f32 %v2258_v22, %v1867_v16  ;;  %v2266_v32 = vadd.f32 %v3582_v3, %v1758_v29 }
 0x19a   :  { %v1920_v35 = vmax.f32 %v2255_v59, 0.0  ;;  %v2263_v36 = vadd.f32 %v2262_v26, %v1869_v24 }
 0x19b   :  { %v1921_v62 = vmax.f32 %v2259_v30, 0.0  ;;  %v2267_v38 = vadd.f32 %v2266_v32, %v1871_v5 }
 0x19c   :  { %1952 = vst [vmem:[%s3761_s3 + $0x80] sm:$0xff] %v1920_v35  ;;  %v1922_v28 = vmax.f32 %v2263_v36, 0.0 }
 0x19d   :  { %1953 = vst [vmem:[%s3761_s3 + $0x88] sm:$0xff] %v1921_v62  ;;  %v1923_v34 = vmax.f32 %v2267_v38, 0.0  ;;  %v1762_v60 = vpop.f32.mrb[36].mxu1 }
 0x19e   :  { %v1875_v40 = vpop.f32.mrb[36].mxu0  ;;  %1954 = vst [vmem:[%s3761_s3 + $0x90] sm:$0xff] %v1922_v28  ;;  %v2270_v3 = vadd.f32 %v3598_v1, %v1762_v60  ;;  %v1764_v7 = vpop.f32.mrb[37].mxu1 }
 0x19f   :  { %v1877_v15 = vpop.f32.mrb[37].mxu0  ;;  %1955 = vst [vmem:[%s3761_s3 + $0x98] sm:$0xff] %v1923_v34  ;;  %v2274_v21 = vadd.f32 %v3602_v13, %v1764_v7  ;;  %v1766_v41 = vpop.f32.mrb[38].mxu1 }
 0x1a0   :  { %v1879_v48 = vpop.f32.mrb[38].mxu0  ;;  %v2271_v50 = vadd.f32 %v2270_v3, %v1875_v40  ;;  %v2278_v9 = vadd.f32 %v3608_v63, %v1766_v41  ;;  %v1768_v52 = vpop.f32.mrb[39].mxu1 }
 0x1a1   :  { %v1881_v27 = vpop.f32.mrb[39].mxu0  ;;  %v2275_v53 = vadd.f32 %v2274_v21, %v1877_v15  ;;  %v2282_v37 = vadd.f32 %v3614_v4, %v1768_v52 }
 0x1a2   :  { %v1924_v39 = vmax.f32 %v2271_v50, 0.0  ;;  %v2279_v1 = vadd.f32 %v2278_v9, %v1879_v48 }
 0x1a3   :  { %v1925_v11 = vmax.f32 %v2275_v53, 0.0  ;;  %v2283_v0 = vadd.f32 %v2282_v37, %v1881_v27 }
 0x1a4   :  { %1956 = vst [vmem:[%s3761_s3 + $0xa0] sm:$0xff] %v1924_v39  ;;  %v1926_v20 = vmax.f32 %v2279_v1, 0.0 }
 0x1a5   :  { %1957 = vst [vmem:[%s3761_s3 + $0xa8] sm:$0xff] %v1925_v11  ;;  %v1927_v13 = vmax.f32 %v2283_v0, 0.0  ;;  %v1772_v63 = vpop.f32.mrb[40].mxu1 }
 0x1a6   :  { %v1885_v43 = vpop.f32.mrb[40].mxu0  ;;  %1958 = vst [vmem:[%s3761_s3 + $0xb0] sm:$0xff] %v1926_v20  ;;  %v2286_v4 = vadd.f32 %v3634_v19, %v1772_v63  ;;  %v1774_v14 = vpop.f32.mrb[41].mxu1 }
 0x1a7   :  { %v1887_v45 = vpop.f32.mrb[41].mxu0  ;;  %1959 = vst [vmem:[%s3761_s3 + $0xb8] sm:$0xff] %v1927_v13  ;;  %v2290_v49 = vadd.f32 %v3638_v8, %v1774_v14  ;;  %v1776_v23 = vpop.f32.mrb[42].mxu1 }
 0x1a8   :  { %v1889_v51 = vpop.f32.mrb[42].mxu0  ;;  %v2287_v55 = vadd.f32 %v2286_v4, %v1885_v43  ;;  %v2294_v57 = vadd.f32 %v3644_v10, %v1776_v23  ;;  %v1778_v61 = vpop.f32.mrb[43].mxu1 }
 0x1a9   :  { %v1891_v42 = vpop.f32.mrb[43].mxu0  ;;  %v2291_v44 = vadd.f32 %v2290_v49, %v1887_v45  ;;  %v2298_v6 = vadd.f32 %v3650_v25, %v1778_v61 }
 0x1aa   :  { %v1928_v46 = vmax.f32 %v2287_v55, 0.0  ;;  %v2295_v19 = vadd.f32 %v2294_v57, %v1889_v51 }
 0x1ab   :  { %v1929_v54 = vmax.f32 %v2291_v44, 0.0  ;;  %v2299_v56 = vadd.f32 %v2298_v6, %v1891_v42 }
 0x1ac   :  { %1960 = vst [vmem:[%s3761_s3 + $0xc0] sm:$0xff] %v1928_v46  ;;  %v1930_v18 = vmax.f32 %v2295_v19, 0.0 }
 0x1ad   :  { %1961 = vst [vmem:[%s3761_s3 + $0xc8] sm:$0xff] %v1929_v54  ;;  %v1931_v8 = vmax.f32 %v2299_v56, 0.0  ;;  %v1782_v10 = vpop.f32.mrb[44].mxu1 }
 0x1ae   :  { %v1895_v58 = vpop.f32.mrb[44].mxu0  ;;  %1962 = vst [vmem:[%s3761_s3 + $0xd0] sm:$0xff] %v1930_v18  ;;  %v2302_v25 = vadd.f32 %v3670_v31, %v1782_v10  ;;  %v1784_v47 = vpop.f32.mrb[45].mxu1 }
 0x1af   :  { %v1897_v16 = vpop.f32.mrb[45].mxu0  ;;  %1963 = vst [vmem:[%s3761_s3 + $0xd8] sm:$0xff] %v1931_v8  ;;  %v2306_v22 = vadd.f32 %v3674_v17, %v1784_v47  ;;  %v1786_v2 = vpop.f32.mrb[46].mxu1 }
 0x1b0   :  { %v1899_v24 = vpop.f32.mrb[46].mxu0  ;;  %v2303_v59 = vadd.f32 %v2302_v25, %v1895_v58  ;;  %v2310_v26 = vadd.f32 %v3680_v33, %v1786_v2  ;;  %v1788_v29 = vpop.f32.mrb[47].mxu1 }
 0x1b1   :  { %v1901_v5 = vpop.f32.mrb[47].mxu0  ;;  %v2307_v30 = vadd.f32 %v2306_v22, %v1897_v16  ;;  %v2314_v32 = vadd.f32 %v3686_v12, %v1788_v29 }
 0x1b2   :  { %v1932_v35 = vmax.f32 %v2303_v59, 0.0  ;;  %v2311_v31 = vadd.f32 %v2310_v26, %v1899_v24 }
 0x1b3   :  { %v1933_v36 = vmax.f32 %v2307_v30, 0.0  ;;  %v2315_v62 = vadd.f32 %v2314_v32, %v1901_v5 }
 0x1b4   :  { %1964 = vst [vmem:[%s3761_s3 + $0xe0] sm:$0xff] %v1932_v35  ;;  %v1934_v38 = vmax.f32 %v2311_v31, 0.0 }
 0x1b5   :  { %1965 = vst [vmem:[%s3761_s3 + $0xe8] sm:$0xff] %v1933_v36  ;;  %v1935_v17 = vmax.f32 %v2315_v62, 0.0 }
 0x1b6   :  { %1966 = vst [vmem:[%s3761_s3 + $0xf0] sm:$0xff] %v1934_v38 }
 0x1b7   :  { %1967 = vst [vmem:[%s3761_s3 + $0xf8] sm:$0xff] %v1935_v17 }

// kernel: dqn_forward.8
= control target key start
LH: loop header
LB: loop body
LE: loop exit
PB: predicated region body
PF: predicated region fallthrough
CT: control target
= control target key end

     0   :  { %s6647_s1 = inlined_call_operand.vmem [shape: bf16[2304,256], index: 1, kind: input, shape index: {}]   ;;  %s6648_s0 = inlined_call_operand.vmem [shape: bf16[128,2304], index: 0, kind: input, shape index: {}]   ;;  %s6649_s2 = inlined_call_operand.vmem [shape: f32[1,256], index: 2, kind: input, shape index: {}]   ;;  %s6650_s3 = inlined_call_operand.vmem [shape: f32[128,256], index: 3, kind: output, shape index: {}]  }
   0x1   :  { %v4455_v0 = vld [vmem:[%s6647_s1 + $0x4] ss:$8 sps:$4 sm:$0xff]   ;;  %v4459_v2 = vld [vmem:[%s6647_s1] ss:$8 sps:$4 sm:$0xff]   ;;  %v4461_v4 = vld [vmem:[%s6647_s1 + $0x14] ss:$8 sps:$4 sm:$0xff]  }
   0x2   :  { %v4457_v1 = vld [vmem:[%s6647_s1 + $0x404] ss:$8 sps:$4 sm:$0xff]   ;;  %2618 = vmatprep.subr.bf16.mxu1 %v4455_v0  ;;  %v4460_v3 = vld [vmem:[%s6647_s1 + $0x400] ss:$8 sps:$4 sm:$0xff]   ;;  %v4463_v5 = vld [vmem:[%s6647_s1 + $0x414] ss:$8 sps:$4 sm:$0xff]  }
   0x3   :  { %3070 = vmatprep.subr.bf16.mxu0 %v4457_v1  ;;  %2619 = vmatpush1.bf16.msra.mxu1 %v4459_v2  ;;  %v4465_v6 = vld [vmem:[%s6647_s1 + $0x10] ss:$8 sps:$4 sm:$0xff]   ;;  %v4467_v8 = vld [vmem:[%s6647_s1 + $0x24] ss:$8 sps:$4 sm:$0xff]   ;;  %v4471_v10 = vld [vmem:[%s6647_s1 + $0x20] ss:$8 sps:$4 sm:$0xff]  }
   0x4   :  { %3071 = vmatpush1.bf16.msra.mxu0 %v4460_v3  ;;  %2620 = vmatprep.subr.bf16.mxu1 %v4461_v4  ;;  %v4466_v7 = vld [vmem:[%s6647_s1 + $0x410] ss:$8 sps:$4 sm:$0xff]   ;;  %v4469_v9 = vld [vmem:[%s6647_s1 + $0x424] ss:$8 sps:$4 sm:$0xff]   ;;  %v4472_v11 = vld [vmem:[%s6647_s1 + $0x420] ss:$8 sps:$4 sm:$0xff]  }
   0x5   :  { %3072 = vmatprep.subr.bf16.mxu0 %v4463_v5  ;;  %v4473_v12 = vld [vmem:[%s6647_s1 + $0x34] ss:$8 sps:$4 sm:$0xff]   ;;  %v4477_v14 = vld [vmem:[%s6647_s1 + $0x30] ss:$8 sps:$4 sm:$0xff]   ;;  %v4479_v16 = vld [vmem:[%s6647_s1 + $0x44] ss:$8 sps:$4 sm:$0xff]  }
   0x6   :  { %v4475_v13 = vld [vmem:[%s6647_s1 + $0x434] ss:$8 sps:$4 sm:$0xff]   ;;  %v4478_v15 = vld [vmem:[%s6647_s1 + $0x430] ss:$8 sps:$4 sm:$0xff]   ;;  %v4481_v17 = vld [vmem:[%s6647_s1 + $0x444] ss:$8 sps:$4 sm:$0xff]  }
   0x7   :  { %2621 = vmatpush1.bf16.msra.mxu1 %v4465_v6  ;;  %v4483_v18 = vld [vmem:[%s6647_s1 + $0x40] ss:$8 sps:$4 sm:$0xff]   ;;  %v4485_v20 = vld [vmem:[%s6647_s1 + $0x54] ss:$8 sps:$4 sm:$0xff]   ;;  %v4489_v22 = vld [vmem:[%s6647_s1 + $0x50] ss:$8 sps:$4 sm:$0xff]  }
   0x8   :  { %3073 = vmatpush1.bf16.msra.mxu0 %v4466_v7  ;;  %2622 = vmatprep.subr.bf16.mxu1 %v4467_v8  ;;  %v4484_v19 = vld [vmem:[%s6647_s1 + $0x440] ss:$8 sps:$4 sm:$0xff]   ;;  %v4487_v21 = vld [vmem:[%s6647_s1 + $0x454] ss:$8 sps:$4 sm:$0xff]   ;;  %v4490_v23 = vld [vmem:[%s6647_s1 + $0x450] ss:$8 sps:$4 sm:$0xff]  }
   0x9   :  { %3074 = vmatprep.subr.bf16.mxu0 %v4469_v9  ;;  %v4491_v24 = vld [vmem:[%s6647_s1 + $0x64] ss:$8 sps:$4 sm:$0xff]   ;;  %v4495_v26 = vld [vmem:[%s6647_s1 + $0x60] ss:$8 sps:$4 sm:$0xff]   ;;  %v4497_v28 = vld [vmem:[%s6647_s1 + $0x74] ss:$8 sps:$4 sm:$0xff]  }
   0xa   :  { %v4493_v25 = vld [vmem:[%s6647_s1 + $0x464] ss:$8 sps:$4 sm:$0xff]   ;;  %v4496_v27 = vld [vmem:[%s6647_s1 + $0x460] ss:$8 sps:$4 sm:$0xff]   ;;  %v4499_v29 = vld [vmem:[%s6647_s1 + $0x474] ss:$8 sps:$4 sm:$0xff]  }
   0xb   :  { %2623 = vmatpush1.bf16.msra.mxu1 %v4471_v10  ;;  %v4501_v30 = vld [vmem:[%s6647_s1 + $0x70] ss:$8 sps:$4 sm:$0xff]   ;;  %v4503_v32 = vld [vmem:[%s6647_s1 + $0x84] ss:$8 sps:$4 sm:$0xff]   ;;  %v4507_v34 = vld [vmem:[%s6647_s1 + $0x80] ss:$8 sps:$4 sm:$0xff]  }
   0xc   :  { %3075 = vmatpush1.bf16.msra.mxu0 %v4472_v11  ;;  %2624 = vmatprep.subr.bf16.mxu1 %v4473_v12  ;;  %v4502_v31 = vld [vmem:[%s6647_s1 + $0x470] ss:$8 sps:$4 sm:$0xff]   ;;  %v4505_v33 = vld [vmem:[%s6647_s1 + $0x484] ss:$8 sps:$4 sm:$0xff]   ;;  %v4508_v35 = vld [vmem:[%s6647_s1 + $0x480] ss:$8 sps:$4 sm:$0xff]  }
   0xd   :  { %3076 = vmatprep.subr.bf16.mxu0 %v4475_v13  ;;  %v4509_v36 = vld [vmem:[%s6647_s1 + $0x94] ss:$8 sps:$4 sm:$0xff]   ;;  %v4513_v38 = vld [vmem:[%s6647_s1 + $0x90] ss:$8 sps:$4 sm:$0xff]   ;;  %v4515_v40 = vld [vmem:[%s6647_s1 + $0xa4] ss:$8 sps:$4 sm:$0xff]  }
   0xe   :  { %v4511_v37 = vld [vmem:[%s6647_s1 + $0x494] ss:$8 sps:$4 sm:$0xff]   ;;  %v4514_v39 = vld [vmem:[%s6647_s1 + $0x490] ss:$8 sps:$4 sm:$0xff]   ;;  %v4517_v41 = vld [vmem:[%s6647_s1 + $0x4a4] ss:$8 sps:$4 sm:$0xff]  }
   0xf   :  { %2625 = vmatpush1.bf16.msra.mxu1 %v4477_v14  ;;  %v4519_v42 = vld [vmem:[%s6647_s1 + $0xa0] ss:$8 sps:$4 sm:$0xff]   ;;  %v4521_v44 = vld [vmem:[%s6647_s1 + $0xb4] ss:$8 sps:$4 sm:$0xff]   ;;  %v4525_v46 = vld [vmem:[%s6647_s1 + $0xb0] ss:$8 sps:$4 sm:$0xff]  }
  0x10   :  { %3077 = vmatpush1.bf16.msra.mxu0 %v4478_v15  ;;  %2626 = vmatprep.subr.bf16.mxu1 %v4479_v16  ;;  %v4520_v43 = vld [vmem:[%s6647_s1 + $0x4a0] ss:$8 sps:$4 sm:$0xff]   ;;  %v4523_v45 = vld [vmem:[%s6647_s1 + $0x4b4] ss:$8 sps:$4 sm:$0xff]   ;;  %v4526_v47 = vld [vmem:[%s6647_s1 + $0x4b0] ss:$8 sps:$4 sm:$0xff]  }
  0x11   :  { %3078 = vmatprep.subr.bf16.mxu0 %v4481_v17  ;;  %v4527_v48 = vld [vmem:[%s6647_s1 + $0xc4] ss:$8 sps:$4 sm:$0xff]   ;;  %v4531_v52 = vld [vmem:[%s6647_s1 + $0xc0] ss:$8 sps:$4 sm:$0xff]   ;;  %v4533_v54 = vld [vmem:[%s6647_s1 + $0xd4] ss:$8 sps:$4 sm:$0xff]  }
  0x12   :  { %v4553_v49 = vld [vmem:[%s6648_s0 + $0x4] ss:$72 sps:$4 sm:$0xff]   ;;  %v4532_v53 = vld [vmem:[%s6647_s1 + $0x4c0] ss:$8 sps:$4 sm:$0xff]   ;;  %v4535_v55 = vld [vmem:[%s6647_s1 + $0x4d4] ss:$8 sps:$4 sm:$0xff]  }
  0x13   :  { %2627 = vmatpush1.bf16.msra.mxu1 %v4483_v18  ;;  %v4529_v50 = vld [vmem:[%s6647_s1 + $0x4c4] ss:$8 sps:$4 sm:$0xff]   ;;  %2650 = vmatprep.mubr.bf16.mxu1 %v4553_v49  ;;  %v4537_v56 = vld [vmem:[%s6647_s1 + $0xd0] ss:$8 sps:$4 sm:$0xff]   ;;  %v4543_v60 = vld [vmem:[%s6647_s1 + $0xe0] ss:$8 sps:$4 sm:$0xff]  }
  0x14   :  { %3079 = vmatpush1.bf16.msra.mxu0 %v4484_v19  ;;  %2628 = vmatprep.subr.bf16.mxu1 %v4485_v20  ;;  %v4556_v51 = vld [vmem:[%s6648_s0 + $0x24] ss:$72 sps:$4 sm:$0xff]   ;;  %v4538_v57 = vld [vmem:[%s6647_s1 + $0x4d0] ss:$8 sps:$4 sm:$0xff]   ;;  %v4544_v61 = vld [vmem:[%s6647_s1 + $0x4e0] ss:$8 sps:$4 sm:$0xff]  }
  0x15   :  { %3080 = vmatprep.subr.bf16.mxu0 %v4487_v21  ;;  %3102 = vmatprep.mubr.bf16.mxu0 %v4556_v51  ;;  %v4539_v58 = vld [vmem:[%s6647_s1 + $0xe4] ss:$8 sps:$4 sm:$0xff]   ;;  %v4545_v62 = vld [vmem:[%s6647_s1 + $0xf4] ss:$8 sps:$4 sm:$0xff]   ;;  %v4549_v0 = vld [vmem:[%s6647_s1 + $0xf0] ss:$8 sps:$4 sm:$0xff]  }
  0x16   :  { %v4541_v59 = vld [vmem:[%s6647_s1 + $0x4e4] ss:$8 sps:$4 sm:$0xff]   ;;  %v4547_v63 = vld [vmem:[%s6647_s1 + $0x4f4] ss:$8 sps:$4 sm:$0xff]   ;;  %v4550_v1 = vld [vmem:[%s6647_s1 + $0x4f0] ss:$8 sps:$4 sm:$0xff]  }
  0x17   :  { %2629 = vmatpush1.bf16.msra.mxu1 %v4489_v22  ;;  %v4559_v2 = vld [vmem:[%s6647_s1 + $0x104] ss:$8 sps:$4 sm:$0xff]   ;;  %v4551_v4 = vld [vmem:[%s6648_s0] ss:$72 sps:$4 sm:$0xff]   ;;  %v4565_v8 = vld [vmem:[%s6647_s1 + $0x114] ss:$8 sps:$4 sm:$0xff]  }
  0x18   :  { %3081 = vmatpush1.bf16.msra.mxu0 %v4490_v23  ;;  %2630 = vmatprep.subr.bf16.mxu1 %v4491_v24  ;;  %v4562_v3 = vld [vmem:[%s6647_s1 + $0x504] ss:$8 sps:$4 sm:$0xff]   ;;  %v4554_v5 = vld [vmem:[%s6648_s0 + $0x20] ss:$72 sps:$4 sm:$0xff]   ;;  %v4568_v9 = vld [vmem:[%s6647_s1 + $0x514] ss:$8 sps:$4 sm:$0xff]  }
  0x19   :  { %3082 = vmatprep.subr.bf16.mxu0 %v4493_v25  ;;  %v4557_v6 = vld [vmem:[%s6647_s1 + $0x100] ss:$8 sps:$4 sm:$0xff]   ;;  %v4569_v10 = vld [vmem:[%s6648_s0 + $0x94] ss:$72 sps:$4 sm:$0xff]   ;;  %v4563_v12 = vld [vmem:[%s6647_s1 + $0x110] ss:$8 sps:$4 sm:$0xff]  }
  0x1a   :  { %v4560_v7 = vld [vmem:[%s6647_s1 + $0x500] ss:$8 sps:$4 sm:$0xff]   ;;  %v4571_v11 = vld [vmem:[%s6648_s0 + $0xb4] ss:$72 sps:$4 sm:$0xff]   ;;  %v4566_v13 = vld [vmem:[%s6647_s1 + $0x510] ss:$8 sps:$4 sm:$0xff]  }
  0x1b   :  { %2631 = vmatpush1.bf16.msra.mxu1 %v4495_v26  ;;  %v4576_v14 = vld [vmem:[%s6647_s1 + $0x124] ss:$8 sps:$4 sm:$0xff]   ;;  %v4573_v16 = vld [vmem:[%s6648_s0 + $0x90] ss:$72 sps:$4 sm:$0xff]   ;;  %v4574_v17 = vld [vmem:[%s6647_s1 + $0x120] ss:$8 sps:$4 sm:$0xff]  }
  0x1c   :  { %3083 = vmatpush1.bf16.msra.mxu0 %v4496_v27  ;;  %2632 = vmatprep.subr.bf16.mxu1 %v4497_v28  ;;  %v4580_v15 = vld [vmem:[%s6647_s1 + $0x524] ss:$8 sps:$4 sm:$0xff]   ;;  %v4577_v18 = vld [vmem:[%s6648_s0 + $0xb0] ss:$72 sps:$4 sm:$0xff]   ;;  %v4578_v19 = vld [vmem:[%s6647_s1 + $0x520] ss:$8 sps:$4 sm:$0xff]  }
  0x1d   :  { %3084 = vmatprep.subr.bf16.mxu0 %v4499_v29  ;;  %v4583_v20 = vld [vmem:[%s6647_s1 + $0x134] ss:$8 sps:$4 sm:$0xff]   ;;  %v4587_v22 = vld [vmem:[%s6648_s0 + $0x124] ss:$72 sps:$4 sm:$0xff]   ;;  %v4581_v24 = vld [vmem:[%s6647_s1 + $0x130] ss:$8 sps:$4 sm:$0xff]  }
  0x1e   :  { %v4586_v21 = vld [vmem:[%s6647_s1 + $0x534] ss:$8 sps:$4 sm:$0xff]   ;;  %v4589_v23 = vld [vmem:[%s6648_s0 + $0x144] ss:$72 sps:$4 sm:$0xff]   ;;  %v4584_v25 = vld [vmem:[%s6647_s1 + $0x530] ss:$8 sps:$4 sm:$0xff]  }
  0x1f   :  { %2633 = vmatpush1.bf16.msra.mxu1 %v4501_v30  ;;  %v4594_v26 = vld [vmem:[%s6647_s1 + $0x144] ss:$8 sps:$4 sm:$0xff]   ;;  %v4591_v28 = vld [vmem:[%s6648_s0 + $0x120] ss:$72 sps:$4 sm:$0xff]   ;;  %v4620_v49 = vld [vmem:[%s6647_s1 + $0x570] ss:$8 sps:$4 sm:$0xff]  }
  0x20   :  { %3085 = vmatpush1.bf16.msra.mxu0 %v4502_v31  ;;  %2634 = vmatprep.subr.bf16.mxu1 %v4503_v32  ;;  %v4598_v27 = vld [vmem:[%s6647_s1 + $0x544] ss:$8 sps:$4 sm:$0xff]   ;;  %v4592_v29 = vld [vmem:[%s6647_s1 + $0x140] ss:$8 sps:$4 sm:$0xff]   ;;  %v4601_v32 = vld [vmem:[%s6647_s1 + $0x154] ss:$8 sps:$4 sm:$0xff]  }
  0x21   :  { %3086 = vmatprep.subr.bf16.mxu0 %v4505_v33  ;;  %v4595_v30 = vld [vmem:[%s6648_s0 + $0x140] ss:$72 sps:$4 sm:$0xff]   ;;  %v4604_v33 = vld [vmem:[%s6647_s1 + $0x554] ss:$8 sps:$4 sm:$0xff]   ;;  %v4634_v51 = vld [vmem:[%s6647_s1 + $0x584] ss:$8 sps:$4 sm:$0xff]  }
  0x22   :  { %v4596_v31 = vld [vmem:[%s6647_s1 + $0x540] ss:$8 sps:$4 sm:$0xff]  }
  0x23   :  { %2635 = vmatpush1.bf16.msra.mxu1 %v4507_v34  ;;  %v4605_v34 = vld [vmem:[%s6648_s0 + $0x1b4] ss:$72 sps:$4 sm:$0xff]  }
  0x24   :  { %3087 = vmatpush1.bf16.msra.mxu0 %v4508_v35  ;;  %2636 = vmatprep.subr.bf16.mxu1 %v4509_v36  ;;  %v4607_v35 = vld [vmem:[%s6648_s0 + $0x1d4] ss:$72 sps:$4 sm:$0xff]   ;;  %v4599_v36 = vld [vmem:[%s6647_s1 + $0x150] ss:$8 sps:$4 sm:$0xff]  }
  0x25   :  { %3088 = vmatprep.subr.bf16.mxu0 %v4511_v37  ;;  %v4602_v37 = vld [vmem:[%s6647_s1 + $0x550] ss:$8 sps:$4 sm:$0xff]  }
  0x27   :  { %2637 = vmatpush1.bf16.msra.mxu1 %v4513_v38  ;;  %v4612_v38 = vld [vmem:[%s6647_s1 + $0x164] ss:$8 sps:$4 sm:$0xff]  }
  0x28   :  { %3089 = vmatpush1.bf16.msra.mxu0 %v4514_v39  ;;  %2638 = vmatprep.subr.bf16.mxu1 %v4515_v40  ;;  %v4616_v39 = vld [vmem:[%s6647_s1 + $0x564] ss:$8 sps:$4 sm:$0xff]   ;;  %v4609_v40 = vld [vmem:[%s6648_s0 + $0x1b0] ss:$72 sps:$4 sm:$0xff]  }
  0x29   :  { %3090 = vmatprep.subr.bf16.mxu0 %v4517_v41  ;;  %v4610_v41 = vld [vmem:[%s6647_s1 + $0x160] ss:$8 sps:$4 sm:$0xff]  }
  0x2b   :  { %2639 = vmatpush1.bf16.msra.mxu1 %v4519_v42  ;;  %v4613_v42 = vld [vmem:[%s6648_s0 + $0x1d0] ss:$72 sps:$4 sm:$0xff]  }
  0x2c   :  { %3091 = vmatpush1.bf16.msra.mxu0 %v4520_v43  ;;  %2640 = vmatprep.subr.bf16.mxu1 %v4521_v44  ;;  %v4614_v43 = vld [vmem:[%s6647_s1 + $0x560] ss:$8 sps:$4 sm:$0xff]   ;;  %v4619_v44 = vld [vmem:[%s6647_s1 + $0x174] ss:$8 sps:$4 sm:$0xff]  }
  0x2d   :  { %3092 = vmatprep.subr.bf16.mxu0 %v4523_v45  ;;  %v4622_v45 = vld [vmem:[%s6647_s1 + $0x574] ss:$8 sps:$4 sm:$0xff]  }
  0x2f   :  { %2641 = vmatpush1.bf16.msra.mxu1 %v4525_v46  ;;  %v4623_v46 = vld [vmem:[%s6648_s0 + $0x244] ss:$72 sps:$4 sm:$0xff]  }
  0x30   :  { %3093 = vmatpush1.bf16.msra.mxu0 %v4526_v47  ;;  %2642 = vmatprep.subr.bf16.mxu1 %v4527_v48  ;;  %v4625_v47 = vld [vmem:[%s6648_s0 + $0x264] ss:$72 sps:$4 sm:$0xff]   ;;  %v4617_v48 = vld [vmem:[%s6647_s1 + $0x170] ss:$8 sps:$4 sm:$0xff]  }
  0x31   :  { %3094 = vmatprep.subr.bf16.mxu0 %v4529_v50  ;;  %v4630_v50 = vld [vmem:[%s6647_s1 + $0x184] ss:$8 sps:$4 sm:$0xff]  }
  0x33   :  { %2643 = vmatpush1.bf16.msra.mxu1 %v4531_v52  ;;  %v4627_v52 = vld [vmem:[%s6648_s0 + $0x240] ss:$72 sps:$4 sm:$0xff]  }
  0x34   :  { %3095 = vmatpush1.bf16.msra.mxu0 %v4532_v53  ;;  %2644 = vmatprep.subr.bf16.mxu1 %v4533_v54  ;;  %v4628_v53 = vld [vmem:[%s6647_s1 + $0x180] ss:$8 sps:$4 sm:$0xff]  }
  0x35   :  { %3096 = vmatprep.subr.bf16.mxu0 %v4535_v55  ;;  %v4631_v54 = vld [vmem:[%s6648_s0 + $0x260] ss:$72 sps:$4 sm:$0xff]  }
  0x36   :  { %v4632_v55 = vld [vmem:[%s6647_s1 + $0x580] ss:$8 sps:$4 sm:$0xff]  }
  0x37   :  { %2645 = vmatpush1.bf16.msra.mxu1 %v4537_v56  ;;  %v4637_v56 = vld [vmem:[%s6647_s1 + $0x194] ss:$8 sps:$4 sm:$0xff]  }
  0x38   :  { %3097 = vmatpush1.bf16.msra.mxu0 %v4538_v57  ;;  %2646 = vmatprep.subr.bf16.mxu1 %v4539_v58  ;;  %v4640_v57 = vld [vmem:[%s6647_s1 + $0x594] ss:$8 sps:$4 sm:$0xff]  }
  0x39   :  { %3098 = vmatprep.subr.bf16.mxu0 %v4541_v59  ;;  %v4641_v58 = vld [vmem:[%s6648_s0 + $0x2d4] ss:$72 sps:$4 sm:$0xff]  }
  0x3a   :  { %v4643_v59 = vld [vmem:[%s6648_s0 + $0x2f4] ss:$72 sps:$4 sm:$0xff]  }
  0x3b   :  { %2647 = vmatpush1.bf16.msra.mxu1 %v4543_v60  ;;  %v4635_v60 = vld [vmem:[%s6647_s1 + $0x190] ss:$8 sps:$4 sm:$0xff]  }
  0x3c   :  { %3099 = vmatpush1.bf16.msra.mxu0 %v4544_v61  ;;  %2648 = vmatprep.subr.bf16.mxu1 %v4545_v62  ;;  %v4638_v61 = vld [vmem:[%s6647_s1 + $0x590] ss:$8 sps:$4 sm:$0xff]   ;;  %v4648_v62 = vld [vmem:[%s6647_s1 + $0x1a4] ss:$8 sps:$4 sm:$0xff]  }
  0x3d   :  { %3100 = vmatprep.subr.bf16.mxu0 %v4547_v63  ;;  %v4652_v63 = vld [vmem:[%s6647_s1 + $0x5a4] ss:$8 sps:$4 sm:$0xff]  }
  0x3f   :  { %2649 = vmatpush1.bf16.msra.mxu1 %v4549_v0  ;;  %v4645_v0 = vld [vmem:[%s6648_s0 + $0x2d0] ss:$72 sps:$4 sm:$0xff]  }
  0x40   :  { %3101 = vmatpush1.bf16.msra.mxu0 %v4550_v1  ;;  %2731 = vmatprep.subr.bf16.mxu1 %v4559_v2  ;;  %v4646_v1 = vld [vmem:[%s6647_s1 + $0x1a0] ss:$8 sps:$4 sm:$0xff]   ;;  %v4649_v2 = vld [vmem:[%s6648_s0 + $0x2f0] ss:$72 sps:$4 sm:$0xff]  }
  0x41   :  { %3183 = vmatprep.subr.bf16.mxu0 %v4562_v3  ;;  %v4650_v3 = vld [vmem:[%s6647_s1 + $0x5a0] ss:$8 sps:$4 sm:$0xff]  }
  0x42   :  { %2651 = vmatmul.mubr.bf16.vlgmr.msra.gmra.mrb[0].mxu1 %v4551_v4  ;;  %v4655_v4 = vld [vmem:[%s6647_s1 + $0x1b4] ss:$8 sps:$4 sm:$0xff]  }
  0x43   :  { %3103 = vmatmul.mubr.bf16.vlgmr.msra.gmra.mrb[0].mxu0 %v4554_v5  ;;  %2732 = vmatpush1.bf16.msra.mxu1 %v4557_v6  ;;  %v4658_v5 = vld [vmem:[%s6647_s1 + $0x5b4] ss:$8 sps:$4 sm:$0xff]   ;;  %v4659_v6 = vld [vmem:[%s6648_s0 + $0x364] ss:$72 sps:$4 sm:$0xff]  }
  0x44   :  { %3184 = vmatpush1.bf16.msra.mxu0 %v4560_v7  ;;  %2733 = vmatprep.subr.bf16.mxu1 %v4565_v8  ;;  %v4661_v7 = vld [vmem:[%s6648_s0 + $0x384] ss:$72 sps:$4 sm:$0xff]   ;;  %v4653_v8 = vld [vmem:[%s6647_s1 + $0x1b0] ss:$8 sps:$4 sm:$0xff]  }
  0x45   :  { %3185 = vmatprep.subr.bf16.mxu0 %v4568_v9  ;;  %2660 = vmatprep.mubr.bf16.mxu1 %v4569_v10  ;;  %v4656_v9 = vld [vmem:[%s6647_s1 + $0x5b0] ss:$8 sps:$4 sm:$0xff]   ;;  %v4666_v10 = vld [vmem:[%s6647_s1 + $0x1c4] ss:$8 sps:$4 sm:$0xff]  }
  0x46   :  { %3112 = vmatprep.mubr.bf16.mxu0 %v4571_v11  ;;  %v4670_v11 = vld [vmem:[%s6647_s1 + $0x5c4] ss:$8 sps:$4 sm:$0xff]  }
  0x47   :  { %2734 = vmatpush1.bf16.msra.mxu1 %v4563_v12  ;;  %v4663_v12 = vld [vmem:[%s6648_s0 + $0x360] ss:$72 sps:$4 sm:$0xff]  }
  0x48   :  { %3186 = vmatpush1.bf16.msra.mxu0 %v4566_v13  ;;  %2735 = vmatprep.subr.bf16.mxu1 %v4576_v14  ;;  %v4664_v13 = vld [vmem:[%s6647_s1 + $0x1c0] ss:$8 sps:$4 sm:$0xff]  }
  0x49   :  { %3187 = vmatprep.subr.bf16.mxu0 %v4580_v15  ;;  %v4667_v14 = vld [vmem:[%s6648_s0 + $0x380] ss:$72 sps:$4 sm:$0xff]  }
  0x4a   :  { %2661 = vmatmul.mubr.bf16.gmra.mrb[4].mxu1 %v4573_v16  ;;  %v4668_v15 = vld [vmem:[%s6647_s1 + $0x5c0] ss:$8 sps:$4 sm:$0xff]   ;;  %v4673_v16 = vld [vmem:[%s6647_s1 + $0x1d4] ss:$8 sps:$4 sm:$0xff]  }
  0x4b   :  { %3113 = vmatmul.mubr.bf16.gmra.mrb[4].mxu0 %v4577_v18  ;;  %2736 = vmatpush1.bf16.msra.mxu1 %v4574_v17  ;;  %v4676_v17 = vld [vmem:[%s6647_s1 + $0x5d4] ss:$8 sps:$4 sm:$0xff]  }
  0x4c   :  { %3188 = vmatpush1.bf16.msra.mxu0 %v4578_v19  ;;  %2737 = vmatprep.subr.bf16.mxu1 %v4583_v20  ;;  %v4677_v18 = vld [vmem:[%s6648_s0 + $0x3f4] ss:$72 sps:$4 sm:$0xff]   ;;  %v4671_v20 = vld [vmem:[%s6647_s1 + $0x1d0] ss:$8 sps:$4 sm:$0xff]  }
  0x4d   :  { %3189 = vmatprep.subr.bf16.mxu0 %v4586_v21  ;;  %2670 = vmatprep.mubr.bf16.mxu1 %v4587_v22  ;;  %v4679_v19 = vld [vmem:[%s6648_s0 + $0x414] ss:$72 sps:$4 sm:$0xff]   ;;  %v4674_v21 = vld [vmem:[%s6647_s1 + $0x5d0] ss:$8 sps:$4 sm:$0xff]   ;;  %v4684_v22 = vld [vmem:[%s6647_s1 + $0x1e4] ss:$8 sps:$4 sm:$0xff]  }
  0x4e   :  { %3122 = vmatprep.mubr.bf16.mxu0 %v4589_v23  ;;  %v4688_v23 = vld [vmem:[%s6647_s1 + $0x5e4] ss:$8 sps:$4 sm:$0xff]  }
  0x4f   :  { %2738 = vmatpush1.bf16.msra.mxu1 %v4581_v24  ;;  %v4681_v24 = vld [vmem:[%s6648_s0 + $0x3f0] ss:$72 sps:$4 sm:$0xff]  }
  0x50   :  { %3190 = vmatpush1.bf16.msra.mxu0 %v4584_v25  ;;  %2739 = vmatprep.subr.bf16.mxu1 %v4594_v26  ;;  %v4682_v25 = vld [vmem:[%s6647_s1 + $0x1e0] ss:$8 sps:$4 sm:$0xff]   ;;  %v4685_v26 = vld [vmem:[%s6648_s0 + $0x410] ss:$72 sps:$4 sm:$0xff]  }
  0x51   :  { %3191 = vmatprep.subr.bf16.mxu0 %v4598_v27  ;;  %v4686_v27 = vld [vmem:[%s6647_s1 + $0x5e0] ss:$8 sps:$4 sm:$0xff]  }
  0x52   :  { %2671 = vmatmul.mubr.bf16.gmra.mrb[8].mxu1 %v4591_v28  ;;  %v4691_v28 = vld [vmem:[%s6647_s1 + $0x1f4] ss:$8 sps:$4 sm:$0xff]  }
  0x53   :  { %3123 = vmatmul.mubr.bf16.gmra.mrb[8].mxu0 %v4595_v30  ;;  %2740 = vmatpush1.bf16.msra.mxu1 %v4592_v29  ;;  %v4694_v29 = vld [vmem:[%s6647_s1 + $0x5f4] ss:$8 sps:$4 sm:$0xff]  }
  0x54   :  { %3192 = vmatpush1.bf16.msra.mxu0 %v4596_v31  ;;  %2741 = vmatprep.subr.bf16.mxu1 %v4601_v32  ;;  %v4697_v30 = vld [vmem:[%s6648_s0 + $0xc] ss:$72 sps:$4 sm:$0xff]   ;;  %v4689_v32 = vld [vmem:[%s6647_s1 + $0x1f0] ss:$8 sps:$4 sm:$0xff]  }
  0x55   :  { %3193 = vmatprep.subr.bf16.mxu0 %v4604_v33  ;;  %2680 = vmatprep.mubr.bf16.mxu1 %v4605_v34  ;;  %v4700_v31 = vld [vmem:[%s6648_s0 + $0x2c] ss:$72 sps:$4 sm:$0xff]   ;;  %v4692_v33 = vld [vmem:[%s6647_s1 + $0x5f0] ss:$8 sps:$4 sm:$0xff]  }
  0x56   :  { %3132 = vmatprep.mubr.bf16.mxu0 %v4607_v35  ;;  %v4703_v34 = vld [vmem:[%s6647_s1 + $0x204] ss:$8 sps:$4 sm:$0xff]  }
  0x57   :  { %2742 = vmatpush1.bf16.msra.mxu1 %v4599_v36  ;;  %v4706_v35 = vld [vmem:[%s6647_s1 + $0x604] ss:$8 sps:$4 sm:$0xff]   ;;  %v4695_v36 = vld [vmem:[%s6648_s0 + $0x8] ss:$72 sps:$4 sm:$0xff]  }
  0x58   :  { %3194 = vmatpush1.bf16.msra.mxu0 %v4602_v37  ;;  %2743 = vmatprep.subr.bf16.mxu1 %v4612_v38  ;;  %v4698_v37 = vld [vmem:[%s6648_s0 + $0x28] ss:$72 sps:$4 sm:$0xff]  }
  0x59   :  { %3195 = vmatprep.subr.bf16.mxu0 %v4616_v39  ;;  %v4701_v38 = vld [vmem:[%s6647_s1 + $0x200] ss:$8 sps:$4 sm:$0xff]  }
  0x5a   :  { %2681 = vmatmul.mubr.bf16.gmra.mrb[12].mxu1 %v4609_v40  ;;  %v4704_v39 = vld [vmem:[%s6647_s1 + $0x600] ss:$8 sps:$4 sm:$0xff]   ;;  %v4709_v40 = vld [vmem:[%s6647_s1 + $0x214] ss:$8 sps:$4 sm:$0xff]  }
  0x5b   :  { %3133 = vmatmul.mubr.bf16.gmra.mrb[12].mxu0 %v4613_v42  ;;  %2744 = vmatpush1.bf16.msra.mxu1 %v4610_v41  ;;  %v4712_v41 = vld [vmem:[%s6647_s1 + $0x614] ss:$8 sps:$4 sm:$0xff]  }
  0x5c   :  { %3196 = vmatpush1.bf16.msra.mxu0 %v4614_v43  ;;  %2745 = vmatprep.subr.bf16.mxu1 %v4619_v44  ;;  %v4713_v42 = vld [vmem:[%s6648_s0 + $0x9c] ss:$72 sps:$4 sm:$0xff]   ;;  %v4707_v44 = vld [vmem:[%s6647_s1 + $0x210] ss:$8 sps:$4 sm:$0xff]  }
  0x5d   :  { %3197 = vmatprep.subr.bf16.mxu0 %v4622_v45  ;;  %2690 = vmatprep.mubr.bf16.mxu1 %v4623_v46  ;;  %v4715_v43 = vld [vmem:[%s6648_s0 + $0xbc] ss:$72 sps:$4 sm:$0xff]   ;;  %v4710_v45 = vld [vmem:[%s6647_s1 + $0x610] ss:$8 sps:$4 sm:$0xff]  }
  0x5e   :  { %3142 = vmatprep.mubr.bf16.mxu0 %v4625_v47  ;;  %v4720_v46 = vld [vmem:[%s6647_s1 + $0x224] ss:$8 sps:$4 sm:$0xff]  }
  0x5f   :  { %2746 = vmatpush1.bf16.msra.mxu1 %v4617_v48  ;;  %v4724_v47 = vld [vmem:[%s6647_s1 + $0x624] ss:$8 sps:$4 sm:$0xff]   ;;  %v4717_v48 = vld [vmem:[%s6648_s0 + $0x98] ss:$72 sps:$4 sm:$0xff]  }
  0x60   :  { %3198 = vmatpush1.bf16.msra.mxu0 %v4620_v49  ;;  %2747 = vmatprep.subr.bf16.mxu1 %v4630_v50  ;;  %v4718_v49 = vld [vmem:[%s6647_s1 + $0x220] ss:$8 sps:$4 sm:$0xff]  }
  0x61   :  { %3199 = vmatprep.subr.bf16.mxu0 %v4634_v51  ;;  %v4721_v50 = vld [vmem:[%s6648_s0 + $0xb8] ss:$72 sps:$4 sm:$0xff]  }
  0x62   :  { %2691 = vmatmul.mubr.bf16.gmra.mrb[16].mxu1 %v4627_v52  ;;  %v4722_v51 = vld [vmem:[%s6647_s1 + $0x620] ss:$8 sps:$4 sm:$0xff]   ;;  %v4727_v52 = vld [vmem:[%s6647_s1 + $0x234] ss:$8 sps:$4 sm:$0xff]  }
  0x63   :  { %3143 = vmatmul.mubr.bf16.gmra.mrb[16].mxu0 %v4631_v54  ;;  %2748 = vmatpush1.bf16.msra.mxu1 %v4628_v53  ;;  %v4730_v53 = vld [vmem:[%s6647_s1 + $0x634] ss:$8 sps:$4 sm:$0xff]  }
  0x64   :  { %3200 = vmatpush1.bf16.msra.mxu0 %v4632_v55  ;;  %2749 = vmatprep.subr.bf16.mxu1 %v4637_v56  ;;  %v4731_v54 = vld [vmem:[%s6648_s0 + $0x12c] ss:$72 sps:$4 sm:$0xff]   ;;  %v4725_v56 = vld [vmem:[%s6647_s1 + $0x230] ss:$8 sps:$4 sm:$0xff]  }
  0x65   :  { %3201 = vmatprep.subr.bf16.mxu0 %v4640_v57  ;;  %2700 = vmatprep.mubr.bf16.mxu1 %v4641_v58  ;;  %v4733_v55 = vld [vmem:[%s6648_s0 + $0x14c] ss:$72 sps:$4 sm:$0xff]   ;;  %v4728_v57 = vld [vmem:[%s6647_s1 + $0x630] ss:$8 sps:$4 sm:$0xff]  }
  0x66   :  { %3152 = vmatprep.mubr.bf16.mxu0 %v4643_v59  ;;  %v4738_v58 = vld [vmem:[%s6647_s1 + $0x244] ss:$8 sps:$4 sm:$0xff]  }
  0x67   :  { %2750 = vmatpush1.bf16.msra.mxu1 %v4635_v60  ;;  %v4742_v59 = vld [vmem:[%s6647_s1 + $0x644] ss:$8 sps:$4 sm:$0xff]   ;;  %v4735_v60 = vld [vmem:[%s6648_s0 + $0x128] ss:$72 sps:$4 sm:$0xff]  }
  0x68   :  { %3202 = vmatpush1.bf16.msra.mxu0 %v4638_v61  ;;  %2751 = vmatprep.subr.bf16.mxu1 %v4648_v62  ;;  %v4736_v61 = vld [vmem:[%s6647_s1 + $0x240] ss:$8 sps:$4 sm:$0xff]  }
  0x69   :  { %3203 = vmatprep.subr.bf16.mxu0 %v4652_v63  ;;  %v4739_v62 = vld [vmem:[%s6648_s0 + $0x148] ss:$72 sps:$4 sm:$0xff]  }
  0x6a   :  { %2701 = vmatmul.mubr.bf16.gmra.mrb[20].mxu1 %v4645_v0  ;;  %v4740_v63 = vld [vmem:[%s6647_s1 + $0x640] ss:$8 sps:$4 sm:$0xff]   ;;  %v4745_v0 = vld [vmem:[%s6647_s1 + $0x254] ss:$8 sps:$4 sm:$0xff]  }
  0x6b   :  { %3153 = vmatmul.mubr.bf16.gmra.mrb[20].mxu0 %v4649_v2  ;;  %2752 = vmatpush1.bf16.msra.mxu1 %v4646_v1  ;;  %v4748_v1 = vld [vmem:[%s6647_s1 + $0x654] ss:$8 sps:$4 sm:$0xff]  }
  0x6c   :  { %3204 = vmatpush1.bf16.msra.mxu0 %v4650_v3  ;;  %2753 = vmatprep.subr.bf16.mxu1 %v4655_v4  ;;  %v4749_v2 = vld [vmem:[%s6648_s0 + $0x1bc] ss:$72 sps:$4 sm:$0xff]   ;;  %v4743_v4 = vld [vmem:[%s6647_s1 + $0x250] ss:$8 sps:$4 sm:$0xff]  }
  0x6d   :  { %3205 = vmatprep.subr.bf16.mxu0 %v4658_v5  ;;  %2710 = vmatprep.mubr.bf16.mxu1 %v4659_v6  ;;  %v4751_v3 = vld [vmem:[%s6648_s0 + $0x1dc] ss:$72 sps:$4 sm:$0xff]   ;;  %v4746_v5 = vld [vmem:[%s6647_s1 + $0x650] ss:$8 sps:$4 sm:$0xff]  }
  0x6e   :  { %3162 = vmatprep.mubr.bf16.mxu0 %v4661_v7  ;;  %v4756_v6 = vld [vmem:[%s6647_s1 + $0x264] ss:$8 sps:$4 sm:$0xff]  }
  0x6f   :  { %2754 = vmatpush1.bf16.msra.mxu1 %v4653_v8  ;;  %v4760_v7 = vld [vmem:[%s6647_s1 + $0x664] ss:$8 sps:$4 sm:$0xff]   ;;  %v4753_v8 = vld [vmem:[%s6648_s0 + $0x1b8] ss:$72 sps:$4 sm:$0xff]  }
  0x70   :  { %3206 = vmatpush1.bf16.msra.mxu0 %v4656_v9  ;;  %2755 = vmatprep.subr.bf16.mxu1 %v4666_v10  ;;  %v4754_v9 = vld [vmem:[%s6647_s1 + $0x260] ss:$8 sps:$4 sm:$0xff]  }
  0x71   :  { %3207 = vmatprep.subr.bf16.mxu0 %v4670_v11  ;;  %v4757_v10 = vld [vmem:[%s6648_s0 + $0x1d8] ss:$72 sps:$4 sm:$0xff]  }
  0x72   :  { %2711 = vmatmul.mubr.bf16.gmra.mrb[24].mxu1 %v4663_v12  ;;  %v4758_v11 = vld [vmem:[%s6647_s1 + $0x660] ss:$8 sps:$4 sm:$0xff]   ;;  %v4763_v12 = vld [vmem:[%s6647_s1 + $0x274] ss:$8 sps:$4 sm:$0xff]  }
  0x73   :  { %3163 = vmatmul.mubr.bf16.gmra.mrb[24].mxu0 %v4667_v14  ;;  %2756 = vmatpush1.bf16.msra.mxu1 %v4664_v13  ;;  %v4766_v13 = vld [vmem:[%s6647_s1 + $0x674] ss:$8 sps:$4 sm:$0xff]  }
  0x74   :  { %3208 = vmatpush1.bf16.msra.mxu0 %v4668_v15  ;;  %2757 = vmatprep.subr.bf16.mxu1 %v4673_v16  ;;  %v4767_v14 = vld [vmem:[%s6648_s0 + $0x24c] ss:$72 sps:$4 sm:$0xff]   ;;  %v4761_v16 = vld [vmem:[%s6647_s1 + $0x270] ss:$8 sps:$4 sm:$0xff]  }
  0x75   :  { %3209 = vmatprep.subr.bf16.mxu0 %v4676_v17  ;;  %2720 = vmatprep.mubr.bf16.mxu1 %v4677_v18  ;;  %v4769_v15 = vld [vmem:[%s6648_s0 + $0x26c] ss:$72 sps:$4 sm:$0xff]   ;;  %v4764_v17 = vld [vmem:[%s6647_s1 + $0x670] ss:$8 sps:$4 sm:$0xff]  }
  0x76   :  { %3172 = vmatprep.mubr.bf16.mxu0 %v4679_v19  ;;  %v4774_v18 = vld [vmem:[%s6647_s1 + $0x284] ss:$8 sps:$4 sm:$0xff]  }
  0x77   :  { %2758 = vmatpush1.bf16.msra.mxu1 %v4671_v20  ;;  %v4778_v19 = vld [vmem:[%s6647_s1 + $0x684] ss:$8 sps:$4 sm:$0xff]   ;;  %v4771_v20 = vld [vmem:[%s6648_s0 + $0x248] ss:$72 sps:$4 sm:$0xff]  }
  0x78   :  { %3210 = vmatpush1.bf16.msra.mxu0 %v4674_v21  ;;  %2759 = vmatprep.subr.bf16.mxu1 %v4684_v22  ;;  %v4772_v21 = vld [vmem:[%s6647_s1 + $0x280] ss:$8 sps:$4 sm:$0xff]  }
  0x79   :  { %3211 = vmatprep.subr.bf16.mxu0 %v4688_v23  ;;  %v4775_v22 = vld [vmem:[%s6648_s0 + $0x268] ss:$72 sps:$4 sm:$0xff]  }
  0x7a   :  { %2721 = vmatmul.mubr.bf16.gmra.mrb[28].mxu1 %v4681_v24  ;;  %v4776_v23 = vld [vmem:[%s6647_s1 + $0x680] ss:$8 sps:$4 sm:$0xff]   ;;  %v4781_v24 = vld [vmem:[%s6647_s1 + $0x294] ss:$8 sps:$4 sm:$0xff]  }
  0x7b   :  { %3173 = vmatmul.mubr.bf16.gmra.mrb[28].mxu0 %v4685_v26  ;;  %2760 = vmatpush1.bf16.msra.mxu1 %v4682_v25  ;;  %v4784_v25 = vld [vmem:[%s6647_s1 + $0x694] ss:$8 sps:$4 sm:$0xff]  }
  0x7c   :  { %3212 = vmatpush1.bf16.msra.mxu0 %v4686_v27  ;;  %2761 = vmatprep.subr.bf16.mxu1 %v4691_v28  ;;  %v4785_v26 = vld [vmem:[%s6648_s0 + $0x2dc] ss:$72 sps:$4 sm:$0xff]   ;;  %v4779_v28 = vld [vmem:[%s6647_s1 + $0x290] ss:$8 sps:$4 sm:$0xff]  }
  0x7d   :  { %3213 = vmatprep.subr.bf16.mxu0 %v4694_v29  ;;  %2763 = vmatprep.mubr.bf16.mxu1 %v4697_v30  ;;  %v4787_v27 = vld [vmem:[%s6648_s0 + $0x2fc] ss:$72 sps:$4 sm:$0xff]   ;;  %v4782_v29 = vld [vmem:[%s6647_s1 + $0x690] ss:$8 sps:$4 sm:$0xff]  }
  0x7e   :  { %3215 = vmatprep.mubr.bf16.mxu0 %v4700_v31  ;;  %v4792_v30 = vld [vmem:[%s6647_s1 + $0x2a4] ss:$8 sps:$4 sm:$0xff]  }
  0x7f   :  { %2762 = vmatpush1.bf16.msra.mxu1 %v4689_v32  ;;  %v4796_v31 = vld [vmem:[%s6647_s1 + $0x6a4] ss:$8 sps:$4 sm:$0xff]   ;;  %v4789_v32 = vld [vmem:[%s6648_s0 + $0x2d8] ss:$72 sps:$4 sm:$0xff]  }
  0x80   :  { %3214 = vmatpush1.bf16.msra.mxu0 %v4692_v33  ;;  %2844 = vmatprep.subr.bf16.mxu1 %v4703_v34  ;;  %v4790_v33 = vld [vmem:[%s6647_s1 + $0x2a0] ss:$8 sps:$4 sm:$0xff]  }
  0x81   :  { %3296 = vmatprep.subr.bf16.mxu0 %v4706_v35  ;;  %v4793_v34 = vld [vmem:[%s6648_s0 + $0x2f8] ss:$72 sps:$4 sm:$0xff]  }
  0x82   :  { %2764 = vmatmul.mubr.bf16.vlgmr.msra.gmra.mrb[0].mxu1 %v4695_v36  ;;  %v4794_v35 = vld [vmem:[%s6647_s1 + $0x6a0] ss:$8 sps:$4 sm:$0xff]   ;;  %v4799_v36 = vld [vmem:[%s6647_s1 + $0x2b4] ss:$8 sps:$4 sm:$0xff]  }
  0x83   :  { %3216 = vmatmul.mubr.bf16.vlgmr.msra.gmra.mrb[0].mxu0 %v4698_v37  ;;  %2845 = vmatpush1.bf16.msra.mxu1 %v4701_v38  ;;  %v4802_v37 = vld [vmem:[%s6647_s1 + $0x6b4] ss:$8 sps:$4 sm:$0xff]  }
  0x84   :  { %3297 = vmatpush1.bf16.msra.mxu0 %v4704_v39  ;;  %2846 = vmatprep.subr.bf16.mxu1 %v4709_v40  ;;  %v4803_v38 = vld [vmem:[%s6648_s0 + $0x36c] ss:$72 sps:$4 sm:$0xff]   ;;  %v4797_v40 = vld [vmem:[%s6647_s1 + $0x2b0] ss:$8 sps:$4 sm:$0xff]  }
  0x85   :  { %3298 = vmatprep.subr.bf16.mxu0 %v4712_v41  ;;  %2773 = vmatprep.mubr.bf16.mxu1 %v4713_v42  ;;  %v4805_v39 = vld [vmem:[%s6648_s0 + $0x38c] ss:$72 sps:$4 sm:$0xff]   ;;  %v4800_v41 = vld [vmem:[%s6647_s1 + $0x6b0] ss:$8 sps:$4 sm:$0xff]  }
  0x86   :  { %3225 = vmatprep.mubr.bf16.mxu0 %v4715_v43  ;;  %v4810_v42 = vld [vmem:[%s6647_s1 + $0x2c4] ss:$8 sps:$4 sm:$0xff]  }
  0x87   :  { %2847 = vmatpush1.bf16.msra.mxu1 %v4707_v44  ;;  %v4814_v43 = vld [vmem:[%s6647_s1 + $0x6c4] ss:$8 sps:$4 sm:$0xff]   ;;  %v4807_v44 = vld [vmem:[%s6648_s0 + $0x368] ss:$72 sps:$4 sm:$0xff]  }
  0x88   :  { %3299 = vmatpush1.bf16.msra.mxu0 %v4710_v45  ;;  %2848 = vmatprep.subr.bf16.mxu1 %v4720_v46  ;;  %v4808_v45 = vld [vmem:[%s6647_s1 + $0x2c0] ss:$8 sps:$4 sm:$0xff]  }
  0x89   :  { %3300 = vmatprep.subr.bf16.mxu0 %v4724_v47  ;;  %v4811_v46 = vld [vmem:[%s6648_s0 + $0x388] ss:$72 sps:$4 sm:$0xff]  }
  0x8a   :  { %2774 = vmatmul.mubr.bf16.gmra.mrb[4].mxu1 %v4717_v48  ;;  %v4812_v47 = vld [vmem:[%s6647_s1 + $0x6c0] ss:$8 sps:$4 sm:$0xff]   ;;  %v4817_v48 = vld [vmem:[%s6647_s1 + $0x2d4] ss:$8 sps:$4 sm:$0xff]  }
  0x8b   :  { %3226 = vmatmul.mubr.bf16.gmra.mrb[4].mxu0 %v4721_v50  ;;  %2849 = vmatpush1.bf16.msra.mxu1 %v4718_v49  ;;  %v4820_v49 = vld [vmem:[%s6647_s1 + $0x6d4] ss:$8 sps:$4 sm:$0xff]  }
  0x8c   :  { %3301 = vmatpush1.bf16.msra.mxu0 %v4722_v51  ;;  %2850 = vmatprep.subr.bf16.mxu1 %v4727_v52  ;;  %v4821_v50 = vld [vmem:[%s6648_s0 + $0x3fc] ss:$72 sps:$4 sm:$0xff]   ;;  %v4815_v52 = vld [vmem:[%s6647_s1 + $0x2d0] ss:$8 sps:$4 sm:$0xff]  }
  0x8d   :  { %3302 = vmatprep.subr.bf16.mxu0 %v4730_v53  ;;  %2783 = vmatprep.mubr.bf16.mxu1 %v4731_v54  ;;  %v4823_v51 = vld [vmem:[%s6648_s0 + $0x41c] ss:$72 sps:$4 sm:$0xff]   ;;  %v4818_v53 = vld [vmem:[%s6647_s1 + $0x6d0] ss:$8 sps:$4 sm:$0xff]  }
  0x8e   :  { %3235 = vmatprep.mubr.bf16.mxu0 %v4733_v55  ;;  %v4828_v54 = vld [vmem:[%s6647_s1 + $0x2e4] ss:$8 sps:$4 sm:$0xff]  }
  0x8f   :  { %2851 = vmatpush1.bf16.msra.mxu1 %v4725_v56  ;;  %v4832_v55 = vld [vmem:[%s6647_s1 + $0x6e4] ss:$8 sps:$4 sm:$0xff]   ;;  %v4825_v56 = vld [vmem:[%s6648_s0 + $0x3f8] ss:$72 sps:$4 sm:$0xff]  }
  0x90   :  { %3303 = vmatpush1.bf16.msra.mxu0 %v4728_v57  ;;  %2852 = vmatprep.subr.bf16.mxu1 %v4738_v58  ;;  %v4826_v57 = vld [vmem:[%s6647_s1 + $0x2e0] ss:$8 sps:$4 sm:$0xff]  }
  0x91   :  { %3304 = vmatprep.subr.bf16.mxu0 %v4742_v59  ;;  %v4829_v58 = vld [vmem:[%s6648_s0 + $0x418] ss:$72 sps:$4 sm:$0xff]  }
  0x92   :  { %2784 = vmatmul.mubr.bf16.gmra.mrb[8].mxu1 %v4735_v60  ;;  %v4830_v59 = vld [vmem:[%s6647_s1 + $0x6e0] ss:$8 sps:$4 sm:$0xff]   ;;  %v4835_v60 = vld [vmem:[%s6647_s1 + $0x2f4] ss:$8 sps:$4 sm:$0xff]  }
  0x93   :  { %3236 = vmatmul.mubr.bf16.gmra.mrb[8].mxu0 %v4739_v62  ;;  %2853 = vmatpush1.bf16.msra.mxu1 %v4736_v61  ;;  %v4838_v61 = vld [vmem:[%s6647_s1 + $0x6f4] ss:$8 sps:$4 sm:$0xff]  }
  0x94   :  { %3305 = vmatpush1.bf16.msra.mxu0 %v4740_v63  ;;  %2854 = vmatprep.subr.bf16.mxu1 %v4745_v0  ;;  %v4841_v62 = vld [vmem:[%s6648_s0 + $0x14] ss:$72 sps:$4 sm:$0xff]   ;;  %v4833_v0 = vld [vmem:[%s6647_s1 + $0x2f0] ss:$8 sps:$4 sm:$0xff]  }
  0x95   :  { %3306 = vmatprep.subr.bf16.mxu0 %v4748_v1  ;;  %2793 = vmatprep.mubr.bf16.mxu1 %v4749_v2  ;;  %v4844_v63 = vld [vmem:[%s6648_s0 + $0x34] ss:$72 sps:$4 sm:$0xff]   ;;  %v4836_v1 = vld [vmem:[%s6647_s1 + $0x6f0] ss:$8 sps:$4 sm:$0xff]   ;;  %v4847_v2 = vld [vmem:[%s6647_s1 + $0x304] ss:$8 sps:$4 sm:$0xff]  }
  0x96   :  { %3245 = vmatprep.mubr.bf16.mxu0 %v4751_v3  ;;  %v4850_v3 = vld [vmem:[%s6647_s1 + $0x704] ss:$8 sps:$4 sm:$0xff]  }
  0x97   :  { %2855 = vmatpush1.bf16.msra.mxu1 %v4743_v4  ;;  %v4839_v4 = vld [vmem:[%s6648_s0 + $0x10] ss:$72 sps:$4 sm:$0xff]  }
  0x98   :  { %3307 = vmatpush1.bf16.msra.mxu0 %v4746_v5  ;;  %2856 = vmatprep.subr.bf16.mxu1 %v4756_v6  ;;  %v4842_v5 = vld [vmem:[%s6648_s0 + $0x30] ss:$72 sps:$4 sm:$0xff]   ;;  %v4845_v6 = vld [vmem:[%s6647_s1 + $0x300] ss:$8 sps:$4 sm:$0xff]  }
  0x99   :  { %3308 = vmatprep.subr.bf16.mxu0 %v4760_v7  ;;  %v4848_v7 = vld [vmem:[%s6647_s1 + $0x700] ss:$8 sps:$4 sm:$0xff]  }
  0x9a   :  { %2794 = vmatmul.mubr.bf16.gmra.mrb[12].mxu1 %v4753_v8  ;;  %v4853_v8 = vld [vmem:[%s6647_s1 + $0x314] ss:$8 sps:$4 sm:$0xff]  }
  0x9b   :  { %3246 = vmatmul.mubr.bf16.gmra.mrb[12].mxu0 %v4757_v10  ;;  %2857 = vmatpush1.bf16.msra.mxu1 %v4754_v9  ;;  %v4856_v9 = vld [vmem:[%s6647_s1 + $0x714] ss:$8 sps:$4 sm:$0xff]   ;;  %v4857_v10 = vld [vmem:[%s6648_s0 + $0xa4] ss:$72 sps:$4 sm:$0xff]  }
  0x9c   :  { %3309 = vmatpush1.bf16.msra.mxu0 %v4758_v11  ;;  %2858 = vmatprep.subr.bf16.mxu1 %v4763_v12  ;;  %v4859_v11 = vld [vmem:[%s6648_s0 + $0xc4] ss:$72 sps:$4 sm:$0xff]   ;;  %v4851_v12 = vld [vmem:[%s6647_s1 + $0x310] ss:$8 sps:$4 sm:$0xff]  }
  0x9d   :  { %3310 = vmatprep.subr.bf16.mxu0 %v4766_v13  ;;  %2803 = vmatprep.mubr.bf16.mxu1 %v4767_v14  ;;  %v4854_v13 = vld [vmem:[%s6647_s1 + $0x710] ss:$8 sps:$4 sm:$0xff]   ;;  %v4864_v14 = vld [vmem:[%s6647_s1 + $0x324] ss:$8 sps:$4 sm:$0xff]  }
  0x9e   :  { %3255 = vmatprep.mubr.bf16.mxu0 %v4769_v15  ;;  %v4868_v15 = vld [vmem:[%s6647_s1 + $0x724] ss:$8 sps:$4 sm:$0xff]  }
  0x9f   :  { %2859 = vmatpush1.bf16.msra.mxu1 %v4761_v16  ;;  %v4861_v16 = vld [vmem:[%s6648_s0 + $0xa0] ss:$72 sps:$4 sm:$0xff]  }
  0xa0   :  { %3311 = vmatpush1.bf16.msra.mxu0 %v4764_v17  ;;  %2860 = vmatprep.subr.bf16.mxu1 %v4774_v18  ;;  %v4862_v17 = vld [vmem:[%s6647_s1 + $0x320] ss:$8 sps:$4 sm:$0xff]  }
  0xa1   :  { %3312 = vmatprep.subr.bf16.mxu0 %v4778_v19  ;;  %v4865_v18 = vld [vmem:[%s6648_s0 + $0xc0] ss:$72 sps:$4 sm:$0xff]  }
  0xa2   :  { %2804 = vmatmul.mubr.bf16.gmra.mrb[16].mxu1 %v4771_v20  ;;  %v4866_v19 = vld [vmem:[%s6647_s1 + $0x720] ss:$8 sps:$4 sm:$0xff]   ;;  %v4871_v20 = vld [vmem:[%s6647_s1 + $0x334] ss:$8 sps:$4 sm:$0xff]  }
  0xa3   :  { %3256 = vmatmul.mubr.bf16.gmra.mrb[16].mxu0 %v4775_v22  ;;  %2861 = vmatpush1.bf16.msra.mxu1 %v4772_v21  ;;  %v4874_v21 = vld [vmem:[%s6647_s1 + $0x734] ss:$8 sps:$4 sm:$0xff]  }
  0xa4   :  { %3313 = vmatpush1.bf16.msra.mxu0 %v4776_v23  ;;  %2862 = vmatprep.subr.bf16.mxu1 %v4781_v24  ;;  %v4875_v22 = vld [vmem:[%s6648_s0 + $0x134] ss:$72 sps:$4 sm:$0xff]   ;;  %v4869_v24 = vld [vmem:[%s6647_s1 + $0x330] ss:$8 sps:$4 sm:$0xff]  }
  0xa5   :  { %3314 = vmatprep.subr.bf16.mxu0 %v4784_v25  ;;  %2813 = vmatprep.mubr.bf16.mxu1 %v4785_v26  ;;  %v4877_v23 = vld [vmem:[%s6648_s0 + $0x154] ss:$72 sps:$4 sm:$0xff]   ;;  %v4872_v25 = vld [vmem:[%s6647_s1 + $0x730] ss:$8 sps:$4 sm:$0xff]   ;;  %v4882_v26 = vld [vmem:[%s6647_s1 + $0x344] ss:$8 sps:$4 sm:$0xff]  }
  0xa6   :  { %3265 = vmatprep.mubr.bf16.mxu0 %v4787_v27  ;;  %v4886_v27 = vld [vmem:[%s6647_s1 + $0x744] ss:$8 sps:$4 sm:$0xff]  }
  0xa7   :  { %2863 = vmatpush1.bf16.msra.mxu1 %v4779_v28  ;;  %v4879_v28 = vld [vmem:[%s6648_s0 + $0x130] ss:$72 sps:$4 sm:$0xff]  }
  0xa8   :  { %3315 = vmatpush1.bf16.msra.mxu0 %v4782_v29  ;;  %2864 = vmatprep.subr.bf16.mxu1 %v4792_v30  ;;  %v4880_v29 = vld [vmem:[%s6647_s1 + $0x340] ss:$8 sps:$4 sm:$0xff]   ;;  %v4883_v30 = vld [vmem:[%s6648_s0 + $0x150] ss:$72 sps:$4 sm:$0xff]  }
  0xa9   :  { %3316 = vmatprep.subr.bf16.mxu0 %v4796_v31  ;;  %v4884_v31 = vld [vmem:[%s6647_s1 + $0x740] ss:$8 sps:$4 sm:$0xff]  }
  0xaa   :  { %2814 = vmatmul.mubr.bf16.gmra.mrb[20].mxu1 %v4789_v32  ;;  %v4889_v32 = vld [vmem:[%s6647_s1 + $0x354] ss:$8 sps:$4 sm:$0xff]  }
  0xab   :  { %3266 = vmatmul.mubr.bf16.gmra.mrb[20].mxu0 %v4793_v34  ;;  %2865 = vmatpush1.bf16.msra.mxu1 %v4790_v33  ;;  %v4892_v33 = vld [vmem:[%s6647_s1 + $0x754] ss:$8 sps:$4 sm:$0xff]   ;;  %v4893_v34 = vld [vmem:[%s6648_s0 + $0x1c4] ss:$72 sps:$4 sm:$0xff]  }
  0xac   :  { %3317 = vmatpush1.bf16.msra.mxu0 %v4794_v35  ;;  %2866 = vmatprep.subr.bf16.mxu1 %v4799_v36  ;;  %v4895_v35 = vld [vmem:[%s6648_s0 + $0x1e4] ss:$72 sps:$4 sm:$0xff]   ;;  %v4887_v36 = vld [vmem:[%s6647_s1 + $0x350] ss:$8 sps:$4 sm:$0xff]  }
  0xad   :  { %3318 = vmatprep.subr.bf16.mxu0 %v4802_v37  ;;  %2823 = vmatprep.mubr.bf16.mxu1 %v4803_v38  ;;  %v4890_v37 = vld [vmem:[%s6647_s1 + $0x750] ss:$8 sps:$4 sm:$0xff]   ;;  %v4900_v38 = vld [vmem:[%s6647_s1 + $0x364] ss:$8 sps:$4 sm:$0xff]  }
  0xae   :  { %3275 = vmatprep.mubr.bf16.mxu0 %v4805_v39  ;;  %v4904_v39 = vld [vmem:[%s6647_s1 + $0x764] ss:$8 sps:$4 sm:$0xff]  }
  0xaf   :  { %2867 = vmatpush1.bf16.msra.mxu1 %v4797_v40  ;;  %v4897_v40 = vld [vmem:[%s6648_s0 + $0x1c0] ss:$72 sps:$4 sm:$0xff]  }
  0xb0   :  { %3319 = vmatpush1.bf16.msra.mxu0 %v4800_v41  ;;  %2868 = vmatprep.subr.bf16.mxu1 %v4810_v42  ;;  %v4898_v41 = vld [vmem:[%s6647_s1 + $0x360] ss:$8 sps:$4 sm:$0xff]  }
  0xb1   :  { %3320 = vmatprep.subr.bf16.mxu0 %v4814_v43  ;;  %v4901_v42 = vld [vmem:[%s6648_s0 + $0x1e0] ss:$72 sps:$4 sm:$0xff]  }
  0xb2   :  { %2824 = vmatmul.mubr.bf16.gmra.mrb[24].mxu1 %v4807_v44  ;;  %v4902_v43 = vld [vmem:[%s6647_s1 + $0x760] ss:$8 sps:$4 sm:$0xff]   ;;  %v4907_v44 = vld [vmem:[%s6647_s1 + $0x374] ss:$8 sps:$4 sm:$0xff]  }
  0xb3   :  { %3276 = vmatmul.mubr.bf16.gmra.mrb[24].mxu0 %v4811_v46  ;;  %2869 = vmatpush1.bf16.msra.mxu1 %v4808_v45  ;;  %v4910_v45 = vld [vmem:[%s6647_s1 + $0x774] ss:$8 sps:$4 sm:$0xff]  }
  0xb4   :  { %3321 = vmatpush1.bf16.msra.mxu0 %v4812_v47  ;;  %2870 = vmatprep.subr.bf16.mxu1 %v4817_v48  ;;  %v4911_v46 = vld [vmem:[%s6648_s0 + $0x254] ss:$72 sps:$4 sm:$0xff]   ;;  %v4905_v48 = vld [vmem:[%s6647_s1 + $0x370] ss:$8 sps:$4 sm:$0xff]  }
  0xb5   :  { %3322 = vmatprep.subr.bf16.mxu0 %v4820_v49  ;;  %2833 = vmatprep.mubr.bf16.mxu1 %v4821_v50  ;;  %v4913_v47 = vld [vmem:[%s6648_s0 + $0x274] ss:$72 sps:$4 sm:$0xff]   ;;  %v4908_v49 = vld [vmem:[%s6647_s1 + $0x770] ss:$8 sps:$4 sm:$0xff]   ;;  %v4918_v50 = vld [vmem:[%s6647_s1 + $0x384] ss:$8 sps:$4 sm:$0xff]  }
  0xb6   :  { %3285 = vmatprep.mubr.bf16.mxu0 %v4823_v51  ;;  %v4922_v51 = vld [vmem:[%s6647_s1 + $0x784] ss:$8 sps:$4 sm:$0xff]  }
  0xb7   :  { %2871 = vmatpush1.bf16.msra.mxu1 %v4815_v52  ;;  %v4915_v52 = vld [vmem:[%s6648_s0 + $0x250] ss:$72 sps:$4 sm:$0xff]  }
  0xb8   :  { %3323 = vmatpush1.bf16.msra.mxu0 %v4818_v53  ;;  %2872 = vmatprep.subr.bf16.mxu1 %v4828_v54  ;;  %v4916_v53 = vld [vmem:[%s6647_s1 + $0x380] ss:$8 sps:$4 sm:$0xff]   ;;  %v4919_v54 = vld [vmem:[%s6648_s0 + $0x270] ss:$72 sps:$4 sm:$0xff]  }
  0xb9   :  { %3324 = vmatprep.subr.bf16.mxu0 %v4832_v55  ;;  %v4920_v55 = vld [vmem:[%s6647_s1 + $0x780] ss:$8 sps:$4 sm:$0xff]  }
  0xba   :  { %2834 = vmatmul.mubr.bf16.gmra.mrb[28].mxu1 %v4825_v56  ;;  %v4925_v56 = vld [vmem:[%s6647_s1 + $0x394] ss:$8 sps:$4 sm:$0xff]  }
  0xbb   :  { %3286 = vmatmul.mubr.bf16.gmra.mrb[28].mxu0 %v4829_v58  ;;  %2873 = vmatpush1.bf16.msra.mxu1 %v4826_v57  ;;  %v4928_v57 = vld [vmem:[%s6647_s1 + $0x794] ss:$8 sps:$4 sm:$0xff]   ;;  %v4929_v58 = vld [vmem:[%s6648_s0 + $0x2e4] ss:$72 sps:$4 sm:$0xff]  }
  0xbc   :  { %3325 = vmatpush1.bf16.msra.mxu0 %v4830_v59  ;;  %2874 = vmatprep.subr.bf16.mxu1 %v4835_v60  ;;  %v4931_v59 = vld [vmem:[%s6648_s0 + $0x304] ss:$72 sps:$4 sm:$0xff]   ;;  %v4923_v60 = vld [vmem:[%s6647_s1 + $0x390] ss:$8 sps:$4 sm:$0xff]  }
  0xbd   :  { %3326 = vmatprep.subr.bf16.mxu0 %v4838_v61  ;;  %2876 = vmatprep.mubr.bf16.mxu1 %v4841_v62  ;;  %v4926_v61 = vld [vmem:[%s6647_s1 + $0x790] ss:$8 sps:$4 sm:$0xff]   ;;  %v4936_v62 = vld [vmem:[%s6647_s1 + $0x3a4] ss:$8 sps:$4 sm:$0xff]  }
  0xbe   :  { %3328 = vmatprep.mubr.bf16.mxu0 %v4844_v63  ;;  %v4940_v63 = vld [vmem:[%s6647_s1 + $0x7a4] ss:$8 sps:$4 sm:$0xff]  }
  0xbf   :  { %2875 = vmatpush1.bf16.msra.mxu1 %v4833_v0  ;;  %v4933_v0 = vld [vmem:[%s6648_s0 + $0x2e0] ss:$72 sps:$4 sm:$0xff]  }
  0xc0   :  { %3327 = vmatpush1.bf16.msra.mxu0 %v4836_v1  ;;  %2957 = vmatprep.subr.bf16.mxu1 %v4847_v2  ;;  %v4934_v1 = vld [vmem:[%s6647_s1 + $0x3a0] ss:$8 sps:$4 sm:$0xff]  }
  0xc1   :  { %3409 = vmatprep.subr.bf16.mxu0 %v4850_v3  ;;  %v4937_v2 = vld [vmem:[%s6648_s0 + $0x300] ss:$72 sps:$4 sm:$0xff]  }
  0xc2   :  { %2877 = vmatmul.mubr.bf16.vlgmr.msra.gmra.mrb[0].mxu1 %v4839_v4  ;;  %v4938_v3 = vld [vmem:[%s6647_s1 + $0x7a0] ss:$8 sps:$4 sm:$0xff]   ;;  %v4943_v4 = vld [vmem:[%s6647_s1 + $0x3b4] ss:$8 sps:$4 sm:$0xff]  }
  0xc3   :  { %3329 = vmatmul.mubr.bf16.vlgmr.msra.gmra.mrb[0].mxu0 %v4842_v5  ;;  %2958 = vmatpush1.bf16.msra.mxu1 %v4845_v6  ;;  %v4946_v5 = vld [vmem:[%s6647_s1 + $0x7b4] ss:$8 sps:$4 sm:$0xff]  }
  0xc4   :  { %3410 = vmatpush1.bf16.msra.mxu0 %v4848_v7  ;;  %2959 = vmatprep.subr.bf16.mxu1 %v4853_v8  ;;  %v4947_v6 = vld [vmem:[%s6648_s0 + $0x374] ss:$72 sps:$4 sm:$0xff]   ;;  %v4941_v8 = vld [vmem:[%s6647_s1 + $0x3b0] ss:$8 sps:$4 sm:$0xff]  }
  0xc5   :  { %3411 = vmatprep.subr.bf16.mxu0 %v4856_v9  ;;  %2886 = vmatprep.mubr.bf16.mxu1 %v4857_v10  ;;  %v4949_v7 = vld [vmem:[%s6648_s0 + $0x394] ss:$72 sps:$4 sm:$0xff]   ;;  %v4944_v9 = vld [vmem:[%s6647_s1 + $0x7b0] ss:$8 sps:$4 sm:$0xff]   ;;  %v4954_v10 = vld [vmem:[%s6647_s1 + $0x3c4] ss:$8 sps:$4 sm:$0xff]  }
  0xc6   :  { %3338 = vmatprep.mubr.bf16.mxu0 %v4859_v11  ;;  %v4958_v11 = vld [vmem:[%s6647_s1 + $0x7c4] ss:$8 sps:$4 sm:$0xff]  }
  0xc7   :  { %2960 = vmatpush1.bf16.msra.mxu1 %v4851_v12  ;;  %v4951_v12 = vld [vmem:[%s6648_s0 + $0x370] ss:$72 sps:$4 sm:$0xff]  }
  0xc8   :  { %3412 = vmatpush1.bf16.msra.mxu0 %v4854_v13  ;;  %2961 = vmatprep.subr.bf16.mxu1 %v4864_v14  ;;  %v4952_v13 = vld [vmem:[%s6647_s1 + $0x3c0] ss:$8 sps:$4 sm:$0xff]   ;;  %v4955_v14 = vld [vmem:[%s6648_s0 + $0x390] ss:$72 sps:$4 sm:$0xff]  }
  0xc9   :  { %3413 = vmatprep.subr.bf16.mxu0 %v4868_v15  ;;  %v4956_v15 = vld [vmem:[%s6647_s1 + $0x7c0] ss:$8 sps:$4 sm:$0xff]  }
  0xca   :  { %2887 = vmatmul.mubr.bf16.gmra.mrb[4].mxu1 %v4861_v16  ;;  %v4961_v16 = vld [vmem:[%s6647_s1 + $0x3d4] ss:$8 sps:$4 sm:$0xff]  }
  0xcb   :  { %3339 = vmatmul.mubr.bf16.gmra.mrb[4].mxu0 %v4865_v18  ;;  %2962 = vmatpush1.bf16.msra.mxu1 %v4862_v17  ;;  %v4964_v17 = vld [vmem:[%s6647_s1 + $0x7d4] ss:$8 sps:$4 sm:$0xff]   ;;  %v4965_v18 = vld [vmem:[%s6648_s0 + $0x404] ss:$72 sps:$4 sm:$0xff]  }
  0xcc   :  { %3414 = vmatpush1.bf16.msra.mxu0 %v4866_v19  ;;  %2963 = vmatprep.subr.bf16.mxu1 %v4871_v20  ;;  %v4967_v19 = vld [vmem:[%s6648_s0 + $0x424] ss:$72 sps:$4 sm:$0xff]   ;;  %v4959_v20 = vld [vmem:[%s6647_s1 + $0x3d0] ss:$8 sps:$4 sm:$0xff]  }
  0xcd   :  { %3415 = vmatprep.subr.bf16.mxu0 %v4874_v21  ;;  %2896 = vmatprep.mubr.bf16.mxu1 %v4875_v22  ;;  %v4962_v21 = vld [vmem:[%s6647_s1 + $0x7d0] ss:$8 sps:$4 sm:$0xff]   ;;  %v4972_v22 = vld [vmem:[%s6647_s1 + $0x3e4] ss:$8 sps:$4 sm:$0xff]  }
  0xce   :  { %3348 = vmatprep.mubr.bf16.mxu0 %v4877_v23  ;;  %v4976_v23 = vld [vmem:[%s6647_s1 + $0x7e4] ss:$8 sps:$4 sm:$0xff]  }
  0xcf   :  { %2964 = vmatpush1.bf16.msra.mxu1 %v4869_v24  ;;  %v4969_v24 = vld [vmem:[%s6648_s0 + $0x400] ss:$72 sps:$4 sm:$0xff]  }
  0xd0   :  { %3416 = vmatpush1.bf16.msra.mxu0 %v4872_v25  ;;  %2965 = vmatprep.subr.bf16.mxu1 %v4882_v26  ;;  %v4970_v25 = vld [vmem:[%s6647_s1 + $0x3e0] ss:$8 sps:$4 sm:$0xff]  }
  0xd1   :  { %3417 = vmatprep.subr.bf16.mxu0 %v4886_v27  ;;  %v4973_v26 = vld [vmem:[%s6648_s0 + $0x420] ss:$72 sps:$4 sm:$0xff]  }
  0xd2   :  { %2897 = vmatmul.mubr.bf16.gmra.mrb[8].mxu1 %v4879_v28  ;;  %v4974_v27 = vld [vmem:[%s6647_s1 + $0x7e0] ss:$8 sps:$4 sm:$0xff]   ;;  %v4979_v28 = vld [vmem:[%s6647_s1 + $0x3f4] ss:$8 sps:$4 sm:$0xff]  }
  0xd3   :  { %3349 = vmatmul.mubr.bf16.gmra.mrb[8].mxu0 %v4883_v30  ;;  %2966 = vmatpush1.bf16.msra.mxu1 %v4880_v29  ;;  %v4982_v29 = vld [vmem:[%s6647_s1 + $0x7f4] ss:$8 sps:$4 sm:$0xff]  }
  0xd4   :  { %3418 = vmatpush1.bf16.msra.mxu0 %v4884_v31  ;;  %2967 = vmatprep.subr.bf16.mxu1 %v4889_v32  ;;  %v4985_v30 = vld [vmem:[%s6648_s0 + $0x1c] ss:$72 sps:$4 sm:$0xff]   ;;  %v4977_v32 = vld [vmem:[%s6647_s1 + $0x3f0] ss:$8 sps:$4 sm:$0xff]  }
  0xd5   :  { %3419 = vmatprep.subr.bf16.mxu0 %v4892_v33  ;;  %2906 = vmatprep.mubr.bf16.mxu1 %v4893_v34  ;;  %v4988_v31 = vld [vmem:[%s6648_s0 + $0x3c] ss:$72 sps:$4 sm:$0xff]   ;;  %v4980_v33 = vld [vmem:[%s6647_s1 + $0x7f0] ss:$8 sps:$4 sm:$0xff]  }
  0xd6   :  { %3358 = vmatprep.mubr.bf16.mxu0 %v4895_v35  ;;  %v4991_v34 = vld [vmem:[%s6647_s1 + $0x804] ss:$8 sps:$4 sm:$0xff]   ;;  %v4983_v35 = vld [vmem:[%s6648_s0 + $0x18] ss:$72 sps:$4 sm:$0xff]  }
  0xd7   :  { %2968 = vmatpush1.bf16.msra.mxu1 %v4887_v36  ;;  %v4986_v36 = vld [vmem:[%s6648_s0 + $0x38] ss:$72 sps:$4 sm:$0xff]  }
  0xd8   :  { %3420 = vmatpush1.bf16.msra.mxu0 %v4890_v37  ;;  %2969 = vmatprep.subr.bf16.mxu1 %v4900_v38  ;;  %v4989_v37 = vld [vmem:[%s6647_s1 + $0x800] ss:$8 sps:$4 sm:$0xff]   ;;  %v4994_v38 = vld [vmem:[%s6647_s1 + $0x814] ss:$8 sps:$4 sm:$0xff]  }
  0xd9   :  { %3421 = vmatprep.subr.bf16.mxu0 %v4904_v39  ;;  %v4995_v39 = vld [vmem:[%s6648_s0 + $0xac] ss:$72 sps:$4 sm:$0xff]  }
  0xda   :  { %2907 = vmatmul.mubr.bf16.gmra.mrb[12].mxu1 %v4897_v40  ;;  %v4997_v40 = vld [vmem:[%s6648_s0 + $0xcc] ss:$72 sps:$4 sm:$0xff]  }
  0xdb   :  { %3359 = vmatmul.mubr.bf16.gmra.mrb[12].mxu0 %v4901_v42  ;;  %2970 = vmatpush1.bf16.msra.mxu1 %v4898_v41  ;;  %v4992_v41 = vld [vmem:[%s6647_s1 + $0x810] ss:$8 sps:$4 sm:$0xff]   ;;  %v5003_v42 = vld [vmem:[%s6647_s1 + $0x824] ss:$8 sps:$4 sm:$0xff]  }
  0xdc   :  { %3422 = vmatpush1.bf16.msra.mxu0 %v4902_v43  ;;  %2971 = vmatprep.subr.bf16.mxu1 %v4907_v44  ;;  %v4999_v43 = vld [vmem:[%s6648_s0 + $0xa8] ss:$72 sps:$4 sm:$0xff]  }
  0xdd   :  { %3423 = vmatprep.subr.bf16.mxu0 %v4910_v45  ;;  %2916 = vmatprep.mubr.bf16.mxu1 %v4911_v46  ;;  %v5000_v44 = vld [vmem:[%s6648_s0 + $0xc8] ss:$72 sps:$4 sm:$0xff]   ;;  %v5006_v46 = vld [vmem:[%s6647_s1 + $0x834] ss:$8 sps:$4 sm:$0xff]  }
  0xde   :  { %3368 = vmatprep.mubr.bf16.mxu0 %v4913_v47  ;;  %v5001_v45 = vld [vmem:[%s6647_s1 + $0x820] ss:$8 sps:$4 sm:$0xff]   ;;  %v5007_v47 = vld [vmem:[%s6648_s0 + $0x13c] ss:$72 sps:$4 sm:$0xff]  }
  0xdf   :  { %2972 = vmatpush1.bf16.msra.mxu1 %v4905_v48  ;;  %v5009_v48 = vld [vmem:[%s6648_s0 + $0x15c] ss:$72 sps:$4 sm:$0xff]  }
  0xe0   :  { %3424 = vmatpush1.bf16.msra.mxu0 %v4908_v49  ;;  %2973 = vmatprep.subr.bf16.mxu1 %v4918_v50  ;;  %v5004_v49 = vld [vmem:[%s6647_s1 + $0x830] ss:$8 sps:$4 sm:$0xff]   ;;  %v5015_v50 = vld [vmem:[%s6647_s1 + $0x844] ss:$8 sps:$4 sm:$0xff]  }
  0xe1   :  { %3425 = vmatprep.subr.bf16.mxu0 %v4922_v51  ;;  %v5011_v51 = vld [vmem:[%s6648_s0 + $0x138] ss:$72 sps:$4 sm:$0xff]  }
  0xe2   :  { %2917 = vmatmul.mubr.bf16.gmra.mrb[16].mxu1 %v4915_v52  ;;  %v5012_v52 = vld [vmem:[%s6648_s0 + $0x158] ss:$72 sps:$4 sm:$0xff]  }
  0xe3   :  { %3369 = vmatmul.mubr.bf16.gmra.mrb[16].mxu0 %v4919_v54  ;;  %2974 = vmatpush1.bf16.msra.mxu1 %v4916_v53  ;;  %v5013_v53 = vld [vmem:[%s6647_s1 + $0x840] ss:$8 sps:$4 sm:$0xff]   ;;  %v5018_v54 = vld [vmem:[%s6647_s1 + $0x854] ss:$8 sps:$4 sm:$0xff]  }
  0xe4   :  { %3426 = vmatpush1.bf16.msra.mxu0 %v4920_v55  ;;  %2975 = vmatprep.subr.bf16.mxu1 %v4925_v56  ;;  %v5019_v55 = vld [vmem:[%s6648_s0 + $0x1cc] ss:$72 sps:$4 sm:$0xff]  }
  0xe5   :  { %3427 = vmatprep.subr.bf16.mxu0 %v4928_v57  ;;  %2926 = vmatprep.mubr.bf16.mxu1 %v4929_v58  ;;  %v5021_v56 = vld [vmem:[%s6648_s0 + $0x1ec] ss:$72 sps:$4 sm:$0xff]   ;;  %v5016_v57 = vld [vmem:[%s6647_s1 + $0x850] ss:$8 sps:$4 sm:$0xff]  }
  0xe6   :  { %3378 = vmatprep.mubr.bf16.mxu0 %v4931_v59  ;;  %v5027_v58 = vld [vmem:[%s6647_s1 + $0x864] ss:$8 sps:$4 sm:$0xff]   ;;  %v5023_v59 = vld [vmem:[%s6648_s0 + $0x1c8] ss:$72 sps:$4 sm:$0xff]  }
  0xe7   :  { %2976 = vmatpush1.bf16.msra.mxu1 %v4923_v60  ;;  %v5024_v60 = vld [vmem:[%s6648_s0 + $0x1e8] ss:$72 sps:$4 sm:$0xff]  }
  0xe8   :  { %3428 = vmatpush1.bf16.msra.mxu0 %v4926_v61  ;;  %2977 = vmatprep.subr.bf16.mxu1 %v4936_v62  ;;  %v5025_v61 = vld [vmem:[%s6647_s1 + $0x860] ss:$8 sps:$4 sm:$0xff]   ;;  %v5030_v62 = vld [vmem:[%s6647_s1 + $0x874] ss:$8 sps:$4 sm:$0xff]  }
  0xe9   :  { %3429 = vmatprep.subr.bf16.mxu0 %v4940_v63  ;;  %v5031_v63 = vld [vmem:[%s6648_s0 + $0x25c] ss:$72 sps:$4 sm:$0xff]  }
  0xea   :  { %2927 = vmatmul.mubr.bf16.gmra.mrb[20].mxu1 %v4933_v0  ;;  %v5033_v0 = vld [vmem:[%s6648_s0 + $0x27c] ss:$72 sps:$4 sm:$0xff]  }
  0xeb   :  { %3379 = vmatmul.mubr.bf16.gmra.mrb[20].mxu0 %v4937_v2  ;;  %2978 = vmatpush1.bf16.msra.mxu1 %v4934_v1  ;;  %v5028_v1 = vld [vmem:[%s6647_s1 + $0x870] ss:$8 sps:$4 sm:$0xff]   ;;  %v5039_v2 = vld [vmem:[%s6647_s1 + $0x884] ss:$8 sps:$4 sm:$0xff]  }
  0xec   :  { %3430 = vmatpush1.bf16.msra.mxu0 %v4938_v3  ;;  %2979 = vmatprep.subr.bf16.mxu1 %v4943_v4  ;;  %v5035_v3 = vld [vmem:[%s6648_s0 + $0x258] ss:$72 sps:$4 sm:$0xff]  }
  0xed   :  { %3431 = vmatprep.subr.bf16.mxu0 %v4946_v5  ;;  %2936 = vmatprep.mubr.bf16.mxu1 %v4947_v6  ;;  %v5036_v4 = vld [vmem:[%s6648_s0 + $0x278] ss:$72 sps:$4 sm:$0xff]   ;;  %v5042_v6 = vld [vmem:[%s6647_s1 + $0x894] ss:$8 sps:$4 sm:$0xff]  }
  0xee   :  { %3388 = vmatprep.mubr.bf16.mxu0 %v4949_v7  ;;  %v5037_v5 = vld [vmem:[%s6647_s1 + $0x880] ss:$8 sps:$4 sm:$0xff]   ;;  %v5043_v7 = vld [vmem:[%s6648_s0 + $0x2ec] ss:$72 sps:$4 sm:$0xff]  }
  0xef   :  { %2980 = vmatpush1.bf16.msra.mxu1 %v4941_v8  ;;  %v5045_v8 = vld [vmem:[%s6648_s0 + $0x30c] ss:$72 sps:$4 sm:$0xff]  }
  0xf0   :  { %3432 = vmatpush1.bf16.msra.mxu0 %v4944_v9  ;;  %2981 = vmatprep.subr.bf16.mxu1 %v4954_v10  ;;  %v5040_v9 = vld [vmem:[%s6647_s1 + $0x890] ss:$8 sps:$4 sm:$0xff]   ;;  %v5051_v10 = vld [vmem:[%s6647_s1 + $0x8a4] ss:$8 sps:$4 sm:$0xff]  }
  0xf1   :  { %3433 = vmatprep.subr.bf16.mxu0 %v4958_v11  ;;  %v5047_v11 = vld [vmem:[%s6648_s0 + $0x2e8] ss:$72 sps:$4 sm:$0xff]  }
  0xf2   :  { %2937 = vmatmul.mubr.bf16.gmra.mrb[24].mxu1 %v4951_v12  ;;  %v5048_v12 = vld [vmem:[%s6648_s0 + $0x308] ss:$72 sps:$4 sm:$0xff]  }
  0xf3   :  { %3389 = vmatmul.mubr.bf16.gmra.mrb[24].mxu0 %v4955_v14  ;;  %2982 = vmatpush1.bf16.msra.mxu1 %v4952_v13  ;;  %v5049_v13 = vld [vmem:[%s6647_s1 + $0x8a0] ss:$8 sps:$4 sm:$0xff]   ;;  %v5054_v14 = vld [vmem:[%s6647_s1 + $0x8b4] ss:$8 sps:$4 sm:$0xff]  }
  0xf4   :  { %3434 = vmatpush1.bf16.msra.mxu0 %v4956_v15  ;;  %2983 = vmatprep.subr.bf16.mxu1 %v4961_v16  ;;  %v5055_v15 = vld [vmem:[%s6648_s0 + $0x37c] ss:$72 sps:$4 sm:$0xff]  }
  0xf5   :  { %3435 = vmatprep.subr.bf16.mxu0 %v4964_v17  ;;  %2946 = vmatprep.mubr.bf16.mxu1 %v4965_v18  ;;  %v5057_v16 = vld [vmem:[%s6648_s0 + $0x39c] ss:$72 sps:$4 sm:$0xff]   ;;  %v5052_v17 = vld [vmem:[%s6647_s1 + $0x8b0] ss:$8 sps:$4 sm:$0xff]  }
  0xf6   :  { %3398 = vmatprep.mubr.bf16.mxu0 %v4967_v19  ;;  %v5063_v18 = vld [vmem:[%s6647_s1 + $0x8c4] ss:$8 sps:$4 sm:$0xff]   ;;  %v5059_v19 = vld [vmem:[%s6648_s0 + $0x378] ss:$72 sps:$4 sm:$0xff]  }
  0xf7   :  { %2984 = vmatpush1.bf16.msra.mxu1 %v4959_v20  ;;  %v5060_v20 = vld [vmem:[%s6648_s0 + $0x398] ss:$72 sps:$4 sm:$0xff]  }
  0xf8   :  { %3436 = vmatpush1.bf16.msra.mxu0 %v4962_v21  ;;  %2985 = vmatprep.subr.bf16.mxu1 %v4972_v22  ;;  %v5061_v21 = vld [vmem:[%s6647_s1 + $0x8c0] ss:$8 sps:$4 sm:$0xff]   ;;  %v5066_v22 = vld [vmem:[%s6647_s1 + $0x8d4] ss:$8 sps:$4 sm:$0xff]  }
  0xf9   :  { %3437 = vmatprep.subr.bf16.mxu0 %v4976_v23  ;;  %v5067_v23 = vld [vmem:[%s6648_s0 + $0x40c] ss:$72 sps:$4 sm:$0xff]  }
  0xfa   :  { %2947 = vmatmul.mubr.bf16.gmra.mrb[28].mxu1 %v4969_v24  ;;  %v5069_v24 = vld [vmem:[%s6648_s0 + $0x42c] ss:$72 sps:$4 sm:$0xff]  }
  0xfb   :  { %3399 = vmatmul.mubr.bf16.gmra.mrb[28].mxu0 %v4973_v26  ;;  %2986 = vmatpush1.bf16.msra.mxu1 %v4970_v25  ;;  %v5064_v25 = vld [vmem:[%s6647_s1 + $0x8d0] ss:$8 sps:$4 sm:$0xff]   ;;  %v5075_v26 = vld [vmem:[%s6647_s1 + $0x8e4] ss:$8 sps:$4 sm:$0xff]  }
  0xfc   :  { %3438 = vmatpush1.bf16.msra.mxu0 %v4974_v27  ;;  %2987 = vmatprep.subr.bf16.mxu1 %v4979_v28  ;;  %v5071_v27 = vld [vmem:[%s6648_s0 + $0x408] ss:$72 sps:$4 sm:$0xff]  }
  0xfd   :  { %3439 = vmatprep.subr.bf16.mxu0 %v4982_v29  ;;  %2989 = vmatprep.mubr.bf16.mxu1 %v4985_v30  ;;  %v5072_v28 = vld [vmem:[%s6648_s0 + $0x428] ss:$72 sps:$4 sm:$0xff]   ;;  %v5078_v30 = vld [vmem:[%s6647_s1 + $0x8f4] ss:$8 sps:$4 sm:$0xff]  }
  0xfe   :  { %3441 = vmatprep.mubr.bf16.mxu0 %v4988_v31  ;;  %v5073_v29 = vld [vmem:[%s6647_s1 + $0x8e0] ss:$8 sps:$4 sm:$0xff]   ;;  %v5081_v31 = vld [vmem:[%s6648_s0 + $0x44] ss:$72 sps:$4 sm:$0xff]  }
  0xff   :  { %2988 = vmatpush1.bf16.msra.mxu1 %v4977_v32  ;;  %v5084_v32 = vld [vmem:[%s6648_s0 + $0x284] ss:$72 sps:$4 sm:$0xff]  }
 0x100   :  { %3440 = vmatpush1.bf16.msra.mxu0 %v4980_v33  ;;  %4135 = vmatprep.subr.bf16.mxu1 %v4991_v34  ;;  %v5076_v33 = vld [vmem:[%s6647_s1 + $0x8f0] ss:$8 sps:$4 sm:$0xff]  }
 0x101   :  { %3522 = vmatprep.subr.bf16.mxu0 %v4991_v34  ;;  %v5079_v34 = vld [vmem:[%s6648_s0 + $0x40] ss:$72 sps:$4 sm:$0xff]  }
 0x102   :  { %2990 = vmatmul.mubr.bf16.vlgmr.msra.gmra.mrb[0].mxu1 %v4983_v35  ;;  %v5082_v35 = vld [vmem:[%s6648_s0 + $0x280] ss:$72 sps:$4 sm:$0xff]  }
 0x103   :  { %3442 = vmatmul.mubr.bf16.vlgmr.msra.gmra.mrb[0].mxu0 %v4986_v36  ;;  %4151 = vmatpush1.bf16.msra.mxu1 %v4989_v37  ;;  %v5085_v36 = vld [vmem:[%s6648_s0 + $0xd4] ss:$72 sps:$4 sm:$0xff]  }
 0x104   :  { %3523 = vmatpush1.bf16.msra.mxu0 %v4989_v37  ;;  %4136 = vmatprep.subr.bf16.mxu1 %v4994_v38  ;;  %v5087_v37 = vld [vmem:[%s6648_s0 + $0x314] ss:$72 sps:$4 sm:$0xff]  }
 0x105   :  { %3524 = vmatprep.subr.bf16.mxu0 %v4994_v38  ;;  %2999 = vmatprep.mubr.bf16.mxu1 %v4995_v39  ;;  %v5089_v38 = vld [vmem:[%s6648_s0 + $0xd0] ss:$72 sps:$4 sm:$0xff]  }
 0x106   :  { %3451 = vmatprep.mubr.bf16.mxu0 %v4997_v40  ;;  %v5090_v39 = vld [vmem:[%s6648_s0 + $0x310] ss:$72 sps:$4 sm:$0xff]   ;;  %v5091_v40 = vld [vmem:[%s6648_s0 + $0x164] ss:$72 sps:$4 sm:$0xff]  }
 0x107   :  { %4152 = vmatpush1.bf16.msra.mxu1 %v4992_v41 }
 0x108   :  { %3525 = vmatpush1.bf16.msra.mxu0 %v4992_v41  ;;  %4137 = vmatprep.subr.bf16.mxu1 %v5003_v42  ;;  %v5093_v41 = vld [vmem:[%s6648_s0 + $0x3a4] ss:$72 sps:$4 sm:$0xff]  }
 0x109   :  { %3526 = vmatprep.subr.bf16.mxu0 %v5003_v42  ;;  %v5095_v42 = vld [vmem:[%s6648_s0 + $0x160] ss:$72 sps:$4 sm:$0xff]  }
 0x10a   :  { %3000 = vmatmul.mubr.bf16.gmra.mrb[4].mxu1 %v4999_v43  ;;  %v5096_v43 = vld [vmem:[%s6648_s0 + $0x3a0] ss:$72 sps:$4 sm:$0xff]  }
 0x10b   :  { %3452 = vmatmul.mubr.bf16.gmra.mrb[4].mxu0 %v5000_v44  ;;  %4153 = vmatpush1.bf16.msra.mxu1 %v5001_v45  ;;  %v5097_v44 = vld [vmem:[%s6648_s0 + $0x1f4] ss:$72 sps:$4 sm:$0xff]  }
 0x10c   :  { %3527 = vmatpush1.bf16.msra.mxu0 %v5001_v45  ;;  %4138 = vmatprep.subr.bf16.mxu1 %v5006_v46  ;;  %v5099_v45 = vld [vmem:[%s6648_s0 + $0x434] ss:$72 sps:$4 sm:$0xff]  }
 0x10d   :  { %3528 = vmatprep.subr.bf16.mxu0 %v5006_v46  ;;  %3009 = vmatprep.mubr.bf16.mxu1 %v5007_v47  ;;  %v5101_v46 = vld [vmem:[%s6648_s0 + $0x1f0] ss:$72 sps:$4 sm:$0xff]  }
 0x10e   :  { %3461 = vmatprep.mubr.bf16.mxu0 %v5009_v48  ;;  %v5102_v47 = vld [vmem:[%s6648_s0 + $0x430] ss:$72 sps:$4 sm:$0xff]  }
 0x10f   :  { %4154 = vmatpush1.bf16.msra.mxu1 %v5004_v49 }
 0x110   :  { %3529 = vmatpush1.bf16.msra.mxu0 %v5004_v49  ;;  %4139 = vmatprep.subr.bf16.mxu1 %v5015_v50 }
 0x111   :  { %3530 = vmatprep.subr.bf16.mxu0 %v5015_v50 }
 0x112   :  { %3010 = vmatmul.mubr.bf16.gmra.mrb[8].mxu1 %v5011_v51 }
 0x113   :  { %3462 = vmatmul.mubr.bf16.gmra.mrb[8].mxu0 %v5012_v52  ;;  %4155 = vmatpush1.bf16.msra.mxu1 %v5013_v53 }
 0x114   :  { %3531 = vmatpush1.bf16.msra.mxu0 %v5013_v53  ;;  %4140 = vmatprep.subr.bf16.mxu1 %v5018_v54 }
 0x115   :  { %3532 = vmatprep.subr.bf16.mxu0 %v5018_v54  ;;  %3019 = vmatprep.mubr.bf16.mxu1 %v5019_v55 }
 0x116   :  { %3471 = vmatprep.mubr.bf16.mxu0 %v5021_v56 }
 0x117   :  { %4156 = vmatpush1.bf16.msra.mxu1 %v5016_v57 }
 0x118   :  { %3533 = vmatpush1.bf16.msra.mxu0 %v5016_v57  ;;  %4141 = vmatprep.subr.bf16.mxu1 %v5027_v58 }
 0x119   :  { %3534 = vmatprep.subr.bf16.mxu0 %v5027_v58 }
 0x11a   :  { %3020 = vmatmul.mubr.bf16.gmra.mrb[12].mxu1 %v5023_v59  ;;  %v448_v59 = vlaneseq }
 0x11b   :  { %3472 = vmatmul.mubr.bf16.gmra.mrb[12].mxu0 %v5024_v60  ;;  %4157 = vmatpush1.bf16.msra.mxu1 %v5025_v61 }
 0x11c   :  { %3535 = vmatpush1.bf16.msra.mxu0 %v5025_v61  ;;  %4142 = vmatprep.subr.bf16.mxu1 %v5030_v62  ;;  %v449_v61 = vshrl.u32 %v448_v59, 7 }
 0x11d   :  { %3536 = vmatprep.subr.bf16.mxu0 %v5030_v62  ;;  %3029 = vmatprep.mubr.bf16.mxu1 %v5031_v63 }
 0x11e   :  { %3481 = vmatprep.mubr.bf16.mxu0 %v5033_v0 }
 0x11f   :  { %4158 = vmatpush1.bf16.msra.mxu1 %v5028_v1 }
 0x120   :  { %3537 = vmatpush1.bf16.msra.mxu0 %v5028_v1  ;;  %4143 = vmatprep.subr.bf16.mxu1 %v5039_v2  ;;  %v450_v1 = vsub.s32 0, %v449_v61 }
 0x121   :  { %3538 = vmatprep.subr.bf16.mxu0 %v5039_v2 }
 0x122   :  { %3030 = vmatmul.mubr.bf16.gmra.mrb[16].mxu1 %v5035_v3  ;;  %v446_v3 = vld [vmem:[%s6649_s2] sm:$0x3] }
 0x123   :  { %3482 = vmatmul.mubr.bf16.gmra.mrb[16].mxu0 %v5036_v4  ;;  %4159 = vmatpush1.bf16.msra.mxu1 %v5037_v5  ;;  %v454_v4 = vsub.s32 1, %v449_v61 }
 0x124   :  { %3539 = vmatpush1.bf16.msra.mxu0 %v5037_v5  ;;  %4144 = vmatprep.subr.bf16.mxu1 %v5042_v6  ;;  %v6454_v5 = vrot.slane %v446_v3, %v450_v1 }
 0x125   :  { %3540 = vmatprep.subr.bf16.mxu0 %v5042_v6  ;;  %3039 = vmatprep.mubr.bf16.mxu1 %v5043_v7  ;;  %v6456_v6 = vrot.slane %v446_v3, %v454_v4 }
 0x126   :  { %3491 = vmatprep.mubr.bf16.mxu0 %v5045_v8 }
 0x127   :  { %4160 = vmatpush1.bf16.msra.mxu1 %v5040_v9 }
 0x128   :  { %3541 = vmatpush1.bf16.msra.mxu0 %v5040_v9  ;;  %4145 = vmatprep.subr.bf16.mxu1 %v5051_v10 }
 0x129   :  { %3542 = vmatprep.subr.bf16.mxu0 %v5051_v10 }
 0x12a   :  { %3040 = vmatmul.mubr.bf16.gmra.mrb[20].mxu1 %v5047_v11 }
 0x12b   :  { %3492 = vmatmul.mubr.bf16.gmra.mrb[20].mxu0 %v5048_v12  ;;  %4161 = vmatpush1.bf16.msra.mxu1 %v5049_v13 }
 0x12c   :  { %3543 = vmatpush1.bf16.msra.mxu0 %v5049_v13  ;;  %4146 = vmatprep.subr.bf16.mxu1 %v5054_v14 }
 0x12d   :  { %3544 = vmatprep.subr.bf16.mxu0 %v5054_v14  ;;  %3049 = vmatprep.mubr.bf16.mxu1 %v5055_v15 }
 0x12e   :  { %3501 = vmatprep.mubr.bf16.mxu0 %v5057_v16 }
 0x12f   :  { %4162 = vmatpush1.bf16.msra.mxu1 %v5052_v17 }
 0x130   :  { %3545 = vmatpush1.bf16.msra.mxu0 %v5052_v17  ;;  %4147 = vmatprep.subr.bf16.mxu1 %v5063_v18 }
 0x131   :  { %3546 = vmatprep.subr.bf16.mxu0 %v5063_v18 }
 0x132   :  { %3050 = vmatmul.mubr.bf16.gmra.mrb[24].mxu1 %v5059_v19 }
 0x133   :  { %3502 = vmatmul.mubr.bf16.gmra.mrb[24].mxu0 %v5060_v20  ;;  %4163 = vmatpush1.bf16.msra.mxu1 %v5061_v21 }
 0x134   :  { %3547 = vmatpush1.bf16.msra.mxu0 %v5061_v21  ;;  %4148 = vmatprep.subr.bf16.mxu1 %v5066_v22 }
 0x135   :  { %3548 = vmatprep.subr.bf16.mxu0 %v5066_v22  ;;  %3059 = vmatprep.mubr.bf16.mxu1 %v5067_v23 }
 0x136   :  { %3511 = vmatprep.mubr.bf16.mxu0 %v5069_v24 }
 0x137   :  { %4164 = vmatpush1.bf16.msra.mxu1 %v5064_v25 }
 0x138   :  { %3549 = vmatpush1.bf16.msra.mxu0 %v5064_v25  ;;  %4149 = vmatprep.subr.bf16.mxu1 %v5075_v26 }
 0x139   :  { %3550 = vmatprep.subr.bf16.mxu0 %v5075_v26 }
 0x13a   :  { %3060 = vmatmul.mubr.bf16.gmra.mrb[28].mxu1 %v5071_v27 }
 0x13b   :  { %3512 = vmatmul.mubr.bf16.gmra.mrb[28].mxu0 %v5072_v28  ;;  %4165 = vmatpush1.bf16.msra.mxu1 %v5073_v29 }
 0x13c   :  { %3551 = vmatpush1.bf16.msra.mxu0 %v5073_v29  ;;  %4150 = vmatprep.subr.bf16.mxu1 %v5078_v30 }
 0x13d   :  { %3552 = vmatprep.subr.bf16.mxu0 %v5078_v30  ;;  %3554 = vmatprep.mubr.bf16.mxu0 %v5081_v31 }
 0x13e   :  { %3594 = vmatprep.mubr.bf16.mxu1 %v5084_v32 }
 0x13f   :  { %4166 = vmatpush1.bf16.msra.mxu1 %v5076_v33 }
 0x140   :  { %3553 = vmatpush1.bf16.msra.mxu0 %v5076_v33 }
 0x142   :  { %3595 = vmatmul.mubr.bf16.vlgmr.msra.gmra.mrb[32].mxu1 %v5082_v35 }
 0x143   :  { %3555 = vmatmul.mubr.bf16.vlgmr.msra.gmra.mrb[0].mxu0 %v5079_v34  ;;  %3604 = vmatprep.mubr.bf16.mxu1 %v5087_v37 }
 0x144   :  { %3564 = vmatprep.mubr.bf16.mxu0 %v5085_v36 }
 0x14a   :  { %3605 = vmatmul.mubr.bf16.gmra.mrb[36].mxu1 %v5090_v39 }
 0x14b   :  { %3565 = vmatmul.mubr.bf16.gmra.mrb[4].mxu0 %v5089_v38  ;;  %3614 = vmatprep.mubr.bf16.mxu1 %v5093_v41 }
 0x14c   :  { %3574 = vmatprep.mubr.bf16.mxu0 %v5091_v40 }
 0x152   :  { %3615 = vmatmul.mubr.bf16.gmra.mrb[40].mxu1 %v5096_v43 }
 0x153   :  { %3575 = vmatmul.mubr.bf16.gmra.mrb[8].mxu0 %v5095_v42  ;;  %3624 = vmatprep.mubr.bf16.mxu1 %v5099_v45 }
 0x154   :  { %3584 = vmatprep.mubr.bf16.mxu0 %v5097_v44 }
 0x15a   :  { %3625 = vmatmul.mubr.bf16.gmra.mrb[44].mxu1 %v5102_v47 }
 0x15b   :  { %3585 = vmatmul.mubr.bf16.gmra.mrb[12].mxu0 %v5101_v46 }
 0x1d5   :  { %v6419_v48 = vpop.f32.mrb[0].mxu1 }
 0x1d6   :  { %v6421_v49 = vpop.f32.mrb[1].mxu1 }
 0x1d7   :  { %v6423_v50 = vpop.f32.mrb[2].mxu1 }
 0x1d8   :  { %v6425_v51 = vpop.f32.mrb[3].mxu1 }
 0x1dd   :  { %v6427_v52 = vpop.f32.mrb[4].mxu1 }
 0x1de   :  { %v6429_v53 = vpop.f32.mrb[5].mxu1 }
 0x1df   :  { %v6431_v54 = vpop.f32.mrb[6].mxu1 }
 0x1e0   :  { %v6433_v55 = vpop.f32.mrb[7].mxu1 }
 0x1e5   :  { %v6435_v56 = vpop.f32.mrb[8].mxu1 }
 0x1e6   :  { %v6437_v57 = vpop.f32.mrb[9].mxu1 }
 0x1e7   :  { %v6439_v58 = vpop.f32.mrb[10].mxu1 }
 0x1e8   :  { %v6441_v60 = vpop.f32.mrb[11].mxu1 }
 0x1ed   :  { %v6443_v62 = vpop.f32.mrb[12].mxu1 }
 0x1ee   :  { %v6445_v63 = vpop.f32.mrb[13].mxu1 }
 0x1ef   :  { %v6447_v0 = vpop.f32.mrb[14].mxu1 }
 0x1f0   :  { %v6449_v2 = vpop.f32.mrb[15].mxu1 }
 0x1f5   :  { %v3031_v7 = vpop.f32.mrb[16].mxu1 }
 0x1f6   :  { %v3483_v8 = vpop.f32.mrb[16].mxu0  ;;  %v4199_v9 = vadd.f32 %v3031_v7, %v6454_v5  ;;  %v3033_v10 = vpop.f32.mrb[17].mxu1 }
 0x1f7   :  { %v3485_v11 = vpop.f32.mrb[17].mxu0  ;;  %v4202_v12 = vadd.f32 %v3033_v10, %v6456_v6  ;;  %v3035_v13 = vpop.f32.mrb[18].mxu1 }
 0x1f8   :  { %v3487_v14 = vpop.f32.mrb[18].mxu0  ;;  %v4200_v15 = vadd.f32 %v4199_v9, %v3483_v8  ;;  %v4205_v16 = vadd.f32 %v3035_v13, %v6454_v5  ;;  %v3037_v17 = vpop.f32.mrb[19].mxu1 }
 0x1f9   :  { %v3489_v18 = vpop.f32.mrb[19].mxu0  ;;  %v6461_v19 = vadd.f32 %v4202_v12, %v3485_v11  ;;  %v4208_v20 = vadd.f32 %v3037_v17, %v6456_v6 }
 0x1fa   :  { %v6464_v21 = vadd.f32 %v4205_v16, %v3487_v14 }
 0x1fb   :  { %v6466_v22 = vadd.f32 %v4208_v20, %v3489_v18 }
 0x1fd   :  { %v3041_v23 = vpop.f32.mrb[20].mxu1 }
 0x1fe   :  { %v3493_v24 = vpop.f32.mrb[20].mxu0  ;;  %v4211_v25 = vadd.f32 %v3041_v23, %v6454_v5  ;;  %v3043_v26 = vpop.f32.mrb[21].mxu1 }
 0x1ff   :  { %v3495_v27 = vpop.f32.mrb[21].mxu0  ;;  %v4214_v28 = vadd.f32 %v3043_v26, %v6456_v6  ;;  %v3045_v29 = vpop.f32.mrb[22].mxu1 }
 0x200   :  { %v3497_v30 = vpop.f32.mrb[22].mxu0  ;;  %v6470_v31 = vadd.f32 %v4211_v25, %v3493_v24  ;;  %v4217_v32 = vadd.f32 %v3045_v29, %v6454_v5  ;;  %v3047_v33 = vpop.f32.mrb[23].mxu1  ;;  %v4167_v29 = vadd.f32 %v6419_v48, %v6454_v5 }
 0x201   :  { %v3499_v34 = vpop.f32.mrb[23].mxu0  ;;  %v6473_v35 = vadd.f32 %v4214_v28, %v3495_v27  ;;  %v4220_v36 = vadd.f32 %v3047_v33, %v6456_v6 }
 0x202   :  { %v6476_v37 = vadd.f32 %v4217_v32, %v3497_v30  ;;  %v4169_v30 = vadd.f32 %v6421_v49, %v6456_v6 }
 0x203   :  { %v6478_v38 = vadd.f32 %v4220_v36, %v3499_v34  ;;  %v4171_v34 = vadd.f32 %v6423_v50, %v6454_v5 }
 0x205   :  { %v3051_v39 = vpop.f32.mrb[24].mxu1 }
 0x206   :  { %v3503_v40 = vpop.f32.mrb[24].mxu0  ;;  %v4223_v41 = vadd.f32 %v3051_v39, %v6454_v5  ;;  %v3053_v42 = vpop.f32.mrb[25].mxu1 }
 0x207   :  { %v3505_v43 = vpop.f32.mrb[25].mxu0  ;;  %v4226_v44 = vadd.f32 %v3053_v42, %v6456_v6  ;;  %v3055_v45 = vpop.f32.mrb[26].mxu1  ;;  %v4173_v42 = vadd.f32 %v6425_v51, %v6456_v6 }
 0x208   :  { %v3507_v46 = vpop.f32.mrb[26].mxu0  ;;  %v6482_v47 = vadd.f32 %v4223_v41, %v3503_v40  ;;  %v4229_v59 = vadd.f32 %v3055_v45, %v6454_v5  ;;  %v3057_v61 = vpop.f32.mrb[27].mxu1 }
 0x209   :  { %v3509_v1 = vpop.f32.mrb[27].mxu0  ;;  %v6485_v3 = vadd.f32 %v4226_v44, %v3505_v43  ;;  %v4232_v4 = vadd.f32 %v3057_v61, %v6456_v6 }
 0x20a   :  { %v6488_v7 = vadd.f32 %v4229_v59, %v3507_v46 }
 0x20b   :  { %v6490_v8 = vadd.f32 %v4232_v4, %v3509_v1 }
 0x20d   :  { %v3061_v9 = vpop.f32.mrb[28].mxu1 }
 0x20e   :  { %v3513_v10 = vpop.f32.mrb[28].mxu0  ;;  %v4235_v11 = vadd.f32 %v3061_v9, %v6454_v5  ;;  %v3063_v12 = vpop.f32.mrb[29].mxu1 }
 0x20f   :  { %v3515_v13 = vpop.f32.mrb[29].mxu0  ;;  %v4238_v14 = vadd.f32 %v3063_v12, %v6456_v6  ;;  %v3065_v16 = vpop.f32.mrb[30].mxu1  ;;  %v4177_v12 = vadd.f32 %v6429_v53, %v6456_v6  ;;  %v4181_v53 = vadd.f32 %v6433_v55, %v6456_v6 }
 0x210   :  { %v3517_v17 = vpop.f32.mrb[30].mxu0  ;;  %v6494_v18 = vadd.f32 %v4235_v11, %v3513_v10  ;;  %v4241_v20 = vadd.f32 %v3065_v16, %v6454_v5  ;;  %v3067_v23 = vpop.f32.mrb[31].mxu1  ;;  %v4175_v11 = vadd.f32 %v6427_v52, %v6454_v5 }
 0x211   :  { %v3519_v24 = vpop.f32.mrb[31].mxu0  ;;  %v6497_v25 = vadd.f32 %v4238_v14, %v3515_v13  ;;  %v4244_v26 = vadd.f32 %v3067_v23, %v6456_v6  ;;  %v4179_v14 = vadd.f32 %v6431_v54, %v6454_v5 }
 0x212   :  { %v6500_v27 = vadd.f32 %v4241_v20, %v3517_v17 }
 0x213   :  { %v6502_v28 = vadd.f32 %v4244_v26, %v3519_v24 }
 0x215   :  { %v3596_v33 = vpop.f32.mrb[32].mxu1 }
 0x216   :  { %v3556_v32 = vpop.f32.mrb[0].mxu0  ;;  %v4201_v39 = vadd.f32 %v4200_v15, %v3596_v33  ;;  %v3598_v41 = vpop.f32.mrb[33].mxu1 }
 0x217   :  { %v4168_v36 = vadd.f32 %v4167_v29, %v3556_v32  ;;  %v3558_v40 = vpop.f32.mrb[1].mxu0  ;;  %v4204_v44 = vadd.f32 %v6461_v19, %v3598_v41  ;;  %v3600_v48 = vpop.f32.mrb[34].mxu1 }
 0x218   :  { %v4170_v43 = vadd.f32 %v4169_v30, %v3558_v40  ;;  %v3560_v45 = vpop.f32.mrb[2].mxu0  ;;  %v3651_v59 = vmax.f32 %v4201_v39, 0.0  ;;  %v4207_v61 = vadd.f32 %v6464_v21, %v3600_v48  ;;  %v3602_v4 = vpop.f32.mrb[35].mxu1  ;;  %v4187_v48 = vadd.f32 %v6439_v58, %v6454_v5 }
 0x219   :  { %v3635_v46 = vmax.f32 %v4168_v36, 0.0  ;;  %v4172_v49 = vadd.f32 %v4171_v34, %v3560_v45  ;;  %v3562_v1 = vpop.f32.mrb[3].mxu0  ;;  %v3652_v9 = vmax.f32 %v4204_v44, 0.0  ;;  %v4210_v10 = vadd.f32 %v6466_v22, %v3602_v4 }
 0x21a   :  { %v3636_v50 = vmax.f32 %v4170_v43, 0.0  ;;  %v4174_v15 = vadd.f32 %v4173_v42, %v3562_v1  ;;  %3683 = vst [vmem:[%s6650_s3 + $0x80] sm:$0xff] %v3651_v59  ;;  %v3653_v19 = vmax.f32 %v4207_v61, 0.0  ;;  %v4183_v43 = vadd.f32 %v6435_v56, %v6454_v5 }
 0x21b   :  { %3667 = vst [vmem:[%s6650_s3] sm:$0xff] %v3635_v46  ;;  %v3637_v51 = vmax.f32 %v4172_v49, 0.0  ;;  %3684 = vst [vmem:[%s6650_s3 + $0x88] sm:$0xff] %v3652_v9  ;;  %v3654_v22 = vmax.f32 %v4210_v10, 0.0  ;;  %v4185_v44 = vadd.f32 %v6437_v57, %v6456_v6  ;;  %v4189_v57 = vadd.f32 %v6441_v60, %v6456_v6 }
 0x21c   :  { %3668 = vst [vmem:[%s6650_s3 + $0x8] sm:$0xff] %v3636_v50  ;;  %v3638_v21 = vmax.f32 %v4174_v15, 0.0  ;;  %3685 = vst [vmem:[%s6650_s3 + $0x90] sm:$0xff] %v3653_v19 }
 0x21d   :  { %3669 = vst [vmem:[%s6650_s3 + $0x10] sm:$0xff] %v3637_v51  ;;  %3686 = vst [vmem:[%s6650_s3 + $0x98] sm:$0xff] %v3654_v22  ;;  %v3606_v13 = vpop.f32.mrb[36].mxu1 }
 0x21e   :  { %3670 = vst [vmem:[%s6650_s3 + $0x18] sm:$0xff] %v3638_v21  ;;  %v3566_v52 = vpop.f32.mrb[4].mxu0  ;;  %v4213_v17 = vadd.f32 %v6470_v31, %v3606_v13  ;;  %v3608_v23 = vpop.f32.mrb[37].mxu1  ;;  %v4193_v13 = vadd.f32 %v6445_v63, %v6456_v6  ;;  %v4197_v63 = vadd.f32 %v6449_v2, %v6456_v6 }
 0x21f   :  { %v4176_v16 = vadd.f32 %v4175_v11, %v3566_v52  ;;  %v3568_v20 = vpop.f32.mrb[5].mxu0  ;;  %v4216_v26 = vadd.f32 %v6473_v35, %v3608_v23  ;;  %v3610_v30 = vpop.f32.mrb[38].mxu1  ;;  %v4191_v52 = vadd.f32 %v6443_v62, %v6454_v5 }
 0x220   :  { %v4178_v24 = vadd.f32 %v4177_v12, %v3568_v20  ;;  %v3570_v29 = vpop.f32.mrb[6].mxu0  ;;  %v3655_v33 = vmax.f32 %v4213_v17, 0.0  ;;  %v4219_v36 = vadd.f32 %v6476_v37, %v3610_v30  ;;  %v3612_v54 = vpop.f32.mrb[39].mxu1 }
 0x221   :  { %v3639_v32 = vmax.f32 %v4176_v16, 0.0  ;;  %v4180_v34 = vadd.f32 %v4179_v14, %v3570_v29  ;;  %v3572_v39 = vpop.f32.mrb[7].mxu0  ;;  %v3656_v41 = vmax.f32 %v4216_v26, 0.0  ;;  %v4222_v42 = vadd.f32 %v6478_v38, %v3612_v54 }
 0x222   :  { %v3640_v40 = vmax.f32 %v4178_v24, 0.0  ;;  %v4182_v31 = vadd.f32 %v4181_v53, %v3572_v39  ;;  %3687 = vst [vmem:[%s6650_s3 + $0xa0] sm:$0xff] %v3655_v33  ;;  %v3657_v35 = vmax.f32 %v4219_v36, 0.0  ;;  %v4195_v16 = vadd.f32 %v6447_v0, %v6454_v5 }
 0x223   :  { %3671 = vst [vmem:[%s6650_s3 + $0x20] sm:$0xff] %v3639_v32  ;;  %v3641_v55 = vmax.f32 %v4180_v34, 0.0  ;;  %3688 = vst [vmem:[%s6650_s3 + $0xa8] sm:$0xff] %v3656_v41  ;;  %v3658_v38 = vmax.f32 %v4222_v42, 0.0 }
 0x224   :  { %3672 = vst [vmem:[%s6650_s3 + $0x28] sm:$0xff] %v3640_v40  ;;  %v3642_v37 = vmax.f32 %v4182_v31, 0.0  ;;  %3689 = vst [vmem:[%s6650_s3 + $0xb0] sm:$0xff] %v3657_v35 }
 0x225   :  { %3673 = vst [vmem:[%s6650_s3 + $0x30] sm:$0xff] %v3641_v55  ;;  %3690 = vst [vmem:[%s6650_s3 + $0xb8] sm:$0xff] %v3658_v38  ;;  %v3616_v45 = vpop.f32.mrb[40].mxu1 }
 0x226   :  { %3674 = vst [vmem:[%s6650_s3 + $0x38] sm:$0xff] %v3642_v37  ;;  %v3576_v56 = vpop.f32.mrb[8].mxu0  ;;  %v4225_v59 = vadd.f32 %v6482_v47, %v3616_v45  ;;  %v3618_v61 = vpop.f32.mrb[41].mxu1 }
 0x227   :  { %v4184_v46 = vadd.f32 %v4183_v43, %v3576_v56  ;;  %v3578_v49 = vpop.f32.mrb[9].mxu0  ;;  %v4228_v4 = vadd.f32 %v6485_v3, %v3618_v61  ;;  %v3620_v9 = vpop.f32.mrb[42].mxu1 }
 0x228   :  { %v4186_v1 = vadd.f32 %v4185_v44, %v3578_v49  ;;  %v3580_v50 = vpop.f32.mrb[10].mxu0  ;;  %v3659_v10 = vmax.f32 %v4225_v59, 0.0  ;;  %v4231_v19 = vadd.f32 %v6488_v7, %v3620_v9  ;;  %v3622_v58 = vpop.f32.mrb[43].mxu1 }
 0x229   :  { %v3643_v15 = vmax.f32 %v4184_v46, 0.0  ;;  %v4188_v51 = vadd.f32 %v4187_v48, %v3580_v50  ;;  %v3582_v21 = vpop.f32.mrb[11].mxu0  ;;  %v3660_v11 = vmax.f32 %v4228_v4, 0.0  ;;  %v4234_v12 = vadd.f32 %v6490_v8, %v3622_v58 }
 0x22a   :  { %v3644_v22 = vmax.f32 %v4186_v1, 0.0  ;;  %v4190_v47 = vadd.f32 %v4189_v57, %v3582_v21  ;;  %3691 = vst [vmem:[%s6650_s3 + $0xc0] sm:$0xff] %v3659_v10  ;;  %v3661_v3 = vmax.f32 %v4231_v19, 0.0 }
 0x22b   :  { %3675 = vst [vmem:[%s6650_s3 + $0x40] sm:$0xff] %v3643_v15  ;;  %v3645_v60 = vmax.f32 %v4188_v51, 0.0  ;;  %3692 = vst [vmem:[%s6650_s3 + $0xc8] sm:$0xff] %v3660_v11  ;;  %v3662_v8 = vmax.f32 %v4234_v12, 0.0 }
 0x22c   :  { %3676 = vst [vmem:[%s6650_s3 + $0x48] sm:$0xff] %v3644_v22  ;;  %v3646_v7 = vmax.f32 %v4190_v47, 0.0  ;;  %3693 = vst [vmem:[%s6650_s3 + $0xd0] sm:$0xff] %v3661_v3 }
 0x22d   :  { %3677 = vst [vmem:[%s6650_s3 + $0x50] sm:$0xff] %v3645_v60  ;;  %3694 = vst [vmem:[%s6650_s3 + $0xd8] sm:$0xff] %v3662_v8  ;;  %v3626_v14 = vpop.f32.mrb[44].mxu1 }
 0x22e   :  { %3678 = vst [vmem:[%s6650_s3 + $0x58] sm:$0xff] %v3646_v7  ;;  %v3586_v62 = vpop.f32.mrb[12].mxu0  ;;  %v4237_v20 = vadd.f32 %v6494_v18, %v3626_v14  ;;  %v3628_v53 = vpop.f32.mrb[45].mxu1 }
 0x22f   :  { %v4192_v17 = vadd.f32 %v4191_v52, %v3586_v62  ;;  %v3588_v23 = vpop.f32.mrb[13].mxu0  ;;  %v4240_v26 = vadd.f32 %v6497_v25, %v3628_v53  ;;  %v3630_v30 = vpop.f32.mrb[46].mxu1 }
 0x230   :  { %v4194_v24 = vadd.f32 %v4193_v13, %v3588_v23  ;;  %v3590_v29 = vpop.f32.mrb[14].mxu0  ;;  %v3663_v33 = vmax.f32 %v4237_v20, 0.0  ;;  %v4243_v36 = vadd.f32 %v6500_v27, %v3630_v30  ;;  %v3632_v0 = vpop.f32.mrb[47].mxu1 }
 0x231   :  { %v3647_v32 = vmax.f32 %v4192_v17, 0.0  ;;  %v4196_v34 = vadd.f32 %v4195_v16, %v3590_v29  ;;  %v3592_v39 = vpop.f32.mrb[15].mxu0  ;;  %v3664_v54 = vmax.f32 %v4240_v26, 0.0  ;;  %v4246_v40 = vadd.f32 %v6502_v28, %v3632_v0 }
 0x232   :  { %v3648_v5 = vmax.f32 %v4194_v24, 0.0  ;;  %v4198_v18 = vadd.f32 %v4197_v63, %v3592_v39  ;;  %3695 = vst [vmem:[%s6650_s3 + $0xe0] sm:$0xff] %v3663_v33  ;;  %v3665_v6 = vmax.f32 %v4243_v36, 0.0 }
 0x233   :  { %3679 = vst [vmem:[%s6650_s3 + $0x60] sm:$0xff] %v3647_v32  ;;  %v3649_v2 = vmax.f32 %v4196_v34, 0.0  ;;  %3696 = vst [vmem:[%s6650_s3 + $0xe8] sm:$0xff] %v3664_v54  ;;  %v3666_v27 = vmax.f32 %v4246_v40, 0.0 }
 0x234   :  { %3680 = vst [vmem:[%s6650_s3 + $0x68] sm:$0xff] %v3648_v5  ;;  %v3650_v25 = vmax.f32 %v4198_v18, 0.0  ;;  %3697 = vst [vmem:[%s6650_s3 + $0xf0] sm:$0xff] %v3665_v6 }
 0x235   :  { %3681 = vst [vmem:[%s6650_s3 + $0x70] sm:$0xff] %v3649_v2  ;;  %3698 = vst [vmem:[%s6650_s3 + $0xf8] sm:$0xff] %v3666_v27 }
 0x236   :  { %3682 = vst [vmem:[%s6650_s3 + $0x78] sm:$0xff] %v3650_v25 }

// kernel: dqn_forward.9
= control target key start
LH: loop header
LB: loop body
LE: loop exit
PB: predicated region body
PF: predicated region fallthrough
CT: control target
= control target key end

     0   :  { %vm15534_vm0 = vmmov 0   ;;  %s19256_s1 = inlined_call_operand.vmem [shape: bf16[16384,128], index: 1, kind: input, shape index: {}]   ;;  %s19257_s0 = inlined_call_operand.vmem [shape: bf16[16,16384], index: 0, kind: input, shape index: {}]   ;;  %s19258_s2 = inlined_call_operand.vmem [shape: f32[1,128], index: 2, kind: input, shape index: {}]   ;;  %s19259_s3 = inlined_call_operand.vmem [shape: bf16[128,128], index: 3, kind: input, shape index: {}]   ;;  %s19260_s5 = inlined_call_operand.vmem [shape: bf16[128,128], index: 5, kind: input, shape index: {}]   ;;  %s19261_s4 = inlined_call_operand.vmem [shape: f32[1,128], index: 4, kind: input, shape index: {}]   ;;  %s19262_s6 = inlined_call_operand.vmem [shape: f32[1,128], index: 6, kind: input, shape index: {}]   ;;  %s19263_s7 = inlined_call_operand.vmem [shape: f32[16,128], index: 7, kind: output, shape index: {}]  }
   0x1   :  { %v14493_v0 = vld [vmem:[%s19256_s1 + $0x40] sm:$0xff]   ;;  %v14497_v4 = vld [vmem:[%s19256_s1 + $0x48] sm:$0xff]   ;;  %v14501_v8 = vld [vmem:[%s19256_s1 + $0x50] sm:$0xff]  }
   0x2   :  { %v14494_v1 = vld [vmem:[%s19256_s1 + $0xc0] sm:$0xff]   ;;  %13025 = vmatprep.subr.bf16.mxu0 %v14493_v0  ;;  %v14498_v5 = vld [vmem:[%s19256_s1 + $0xc8] sm:$0xff]   ;;  %v14502_v9 = vld [vmem:[%s19256_s1 + $0xd0] sm:$0xff]  }
   0x3   :  { %v14495_v2 = vld [vmem:[%s19256_s1] sm:$0xff]   ;;  %13047 = vmatprep.subr.bf16.mxu1 %v14494_v1  ;;  %v14499_v6 = vld [vmem:[%s19256_s1 + $0x8] sm:$0xff]   ;;  %v14503_v10 = vld [vmem:[%s19256_s1 + $0x10] sm:$0xff]  }
   0x4   :  { %v14496_v3 = vld [vmem:[%s19256_s1 + $0x80] sm:$0xff]   ;;  %13026 = vmatpush3.bf16.msra.mxu0 %v14495_v2  ;;  %v14500_v7 = vld [vmem:[%s19256_s1 + $0x88] sm:$0xff]   ;;  %v14504_v11 = vld [vmem:[%s19256_s1 + $0x90] sm:$0xff]  }
   0x5   :  { %13048 = vmatpush3.bf16.msra.mxu1 %v14496_v3  ;;  %13027 = vmatprep.subr.bf16.mxu0 %v14497_v4  ;;  %v14505_v12 = vld [vmem:[%s19256_s1 + $0x58] sm:$0xff]   ;;  %v14509_v16 = vld [vmem:[%s19256_s1 + $0x60] sm:$0xff]   ;;  %v14513_v20 = vld [vmem:[%s19256_s1 + $0x68] sm:$0xff]  }
   0x6   :  { %13049 = vmatprep.subr.bf16.mxu1 %v14498_v5  ;;  %v14506_v13 = vld [vmem:[%s19256_s1 + $0xd8] sm:$0xff]   ;;  %v14510_v17 = vld [vmem:[%s19256_s1 + $0xe0] sm:$0xff]   ;;  %v14514_v21 = vld [vmem:[%s19256_s1 + $0xe8] sm:$0xff]  }
   0x7   :  { %v14507_v14 = vld [vmem:[%s19256_s1 + $0x18] sm:$0xff]   ;;  %v14511_v18 = vld [vmem:[%s19256_s1 + $0x20] sm:$0xff]   ;;  %v14515_v22 = vld [vmem:[%s19256_s1 + $0x28] sm:$0xff]  }
   0x8   :  { %13028 = vmatpush3.bf16.msra.mxu0 %v14499_v6  ;;  %v14508_v15 = vld [vmem:[%s19256_s1 + $0x98] sm:$0xff]   ;;  %v14512_v19 = vld [vmem:[%s19256_s1 + $0xa0] sm:$0xff]   ;;  %v14516_v23 = vld [vmem:[%s19256_s1 + $0xa8] sm:$0xff]  }
   0x9   :  { %13050 = vmatpush3.bf16.msra.mxu1 %v14500_v7  ;;  %13029 = vmatprep.subr.bf16.mxu0 %v14501_v8  ;;  %v14517_v24 = vld [vmem:[%s19256_s1 + $0x70] sm:$0xff]   ;;  %v14521_v28 = vld [vmem:[%s19256_s1 + $0x78] sm:$0xff]   ;;  %v27_v32 = vld [vmem:[%s19257_s0] sm:$0xff] }
   0xa   :  { %13051 = vmatprep.subr.bf16.mxu1 %v14502_v9  ;;  %v14518_v25 = vld [vmem:[%s19256_s1 + $0xf0] sm:$0xff]   ;;  %v14522_v29 = vld [vmem:[%s19256_s1 + $0xf8] sm:$0xff]   ;;  %v91_v33 = vld [vmem:[%s19257_s0 + $0x200] sm:$0xff] }
   0xb   :  { %v14519_v26 = vld [vmem:[%s19256_s1 + $0x30] sm:$0xff]   ;;  %v14523_v30 = vld [vmem:[%s19256_s1 + $0x38] sm:$0xff]   ;;  %v28_v34 = vld [vmem:[%s19257_s0 + $0x8] sm:$0xff]  ;;  %v11855_v35 = vcombine.low %v27_v32, %v91_v33  ;;  %v11856_v36 = vcombine.high %v27_v32, %v91_v33 }
   0xc   :  { %13030 = vmatpush3.bf16.msra.mxu0 %v14503_v10  ;;  %v14520_v27 = vld [vmem:[%s19256_s1 + $0xb0] sm:$0xff]   ;;  %v14524_v31 = vld [vmem:[%s19256_s1 + $0xb8] sm:$0xff]   ;;  %v92_v37 = vld [vmem:[%s19257_s0 + $0x208] sm:$0xff] }
   0xd   :  { %13052 = vmatpush3.bf16.msra.mxu1 %v14504_v11  ;;  %13031 = vmatprep.subr.bf16.mxu0 %v14505_v12  ;;  %v11857_v38 = vcombine.low %v28_v34, %v92_v37  ;;  %v11858_v39 = vcombine.high %v28_v34, %v92_v37  ;;  %v14525_v40 = vld [vmem:[%s19256_s1 + $0x140] sm:$0xff]   ;;  %v14529_v44 = vld [vmem:[%s19256_s1 + $0x148] sm:$0xff]   ;;  %v14533_v48 = vld [vmem:[%s19256_s1 + $0x150] sm:$0xff]  }
   0xe   :  { %13053 = vmatprep.subr.bf16.mxu1 %v14506_v13  ;;  %9026 = vmatprep.mubr.bf16.mxu0 %v11856_v36  ;;  %v14526_v41 = vld [vmem:[%s19256_s1 + $0x1c0] sm:$0xff]   ;;  %v14530_v45 = vld [vmem:[%s19256_s1 + $0x1c8] sm:$0xff]   ;;  %v14534_v49 = vld [vmem:[%s19256_s1 + $0x1d0] sm:$0xff]  }
   0xf   :  { %9067 = vmatprep.mubr.bf16.mxu1 %v11858_v39  ;;  %v14527_v42 = vld [vmem:[%s19256_s1 + $0x100] sm:$0xff]   ;;  %v14531_v46 = vld [vmem:[%s19256_s1 + $0x108] sm:$0xff]   ;;  %v14535_v50 = vld [vmem:[%s19256_s1 + $0x110] sm:$0xff]  }
  0x10   :  { %13032 = vmatpush3.bf16.msra.mxu0 %v14507_v14  ;;  %v14528_v43 = vld [vmem:[%s19256_s1 + $0x180] sm:$0xff]   ;;  %v14532_v47 = vld [vmem:[%s19256_s1 + $0x188] sm:$0xff]   ;;  %v14536_v51 = vld [vmem:[%s19256_s1 + $0x190] sm:$0xff]  }
  0x11   :  { %13054 = vmatpush3.bf16.msra.mxu1 %v14508_v15  ;;  %13033 = vmatprep.subr.bf16.mxu0 %v14509_v16  ;;  %v14537_v52 = vld [vmem:[%s19256_s1 + $0x158] sm:$0xff]   ;;  %v14541_v56 = vld [vmem:[%s19256_s1 + $0x160] sm:$0xff]   ;;  %v14545_v60 = vld [vmem:[%s19256_s1 + $0x168] sm:$0xff]  }
  0x12   :  { %13055 = vmatprep.subr.bf16.mxu1 %v14510_v17  ;;  %v14538_v53 = vld [vmem:[%s19256_s1 + $0x1d8] sm:$0xff]   ;;  %v14542_v57 = vld [vmem:[%s19256_s1 + $0x1e0] sm:$0xff]   ;;  %v14546_v61 = vld [vmem:[%s19256_s1 + $0x1e8] sm:$0xff]  }
  0x13   :  { %v14539_v54 = vld [vmem:[%s19256_s1 + $0x118] sm:$0xff]   ;;  %v14543_v58 = vld [vmem:[%s19256_s1 + $0x120] sm:$0xff]   ;;  %v14547_v62 = vld [vmem:[%s19256_s1 + $0x128] sm:$0xff]  }
  0x14   :  { %13034 = vmatpush3.bf16.msra.mxu0 %v14511_v18  ;;  %v14540_v55 = vld [vmem:[%s19256_s1 + $0x198] sm:$0xff]   ;;  %v14544_v59 = vld [vmem:[%s19256_s1 + $0x1a0] sm:$0xff]   ;;  %v14548_v63 = vld [vmem:[%s19256_s1 + $0x1a8] sm:$0xff]  }
  0x15   :  { %13056 = vmatpush3.bf16.msra.mxu1 %v14512_v19  ;;  %13035 = vmatprep.subr.bf16.mxu0 %v14513_v20  ;;  %v14549_v0 = vld [vmem:[%s19256_s1 + $0x170] sm:$0xff]   ;;  %v14553_v4 = vld [vmem:[%s19256_s1 + $0x178] sm:$0xff]   ;;  %v14557_v16 = vld [vmem:[%s19256_s1 + $0x240] sm:$0xff]  }
  0x16   :  { %13057 = vmatprep.subr.bf16.mxu1 %v14514_v21  ;;  %v14550_v1 = vld [vmem:[%s19256_s1 + $0x1f0] sm:$0xff]   ;;  %v14554_v5 = vld [vmem:[%s19256_s1 + $0x1f8] sm:$0xff]   ;;  %v14558_v17 = vld [vmem:[%s19256_s1 + $0x2c0] sm:$0xff]  }
  0x17   :  { %v14551_v2 = vld [vmem:[%s19256_s1 + $0x130] sm:$0xff]   ;;  %v14555_v6 = vld [vmem:[%s19256_s1 + $0x138] sm:$0xff]   ;;  %v14559_v18 = vld [vmem:[%s19256_s1 + $0x200] sm:$0xff]  }
  0x18   :  { %13036 = vmatpush3.bf16.msra.mxu0 %v14515_v22  ;;  %v14552_v3 = vld [vmem:[%s19256_s1 + $0x1b0] sm:$0xff]   ;;  %v14556_v7 = vld [vmem:[%s19256_s1 + $0x1b8] sm:$0xff]   ;;  %v14560_v19 = vld [vmem:[%s19256_s1 + $0x280] sm:$0xff]  }
  0x19   :  { %13058 = vmatpush3.bf16.msra.mxu1 %v14516_v23  ;;  %13037 = vmatprep.subr.bf16.mxu0 %v14517_v24  ;;  %v29_v8 = vld [vmem:[%s19257_s0 + $0x10] sm:$0xff]  ;;  %v30_v12 = vld [vmem:[%s19257_s0 + $0x18] sm:$0xff]  ;;  %v14561_v20 = vld [vmem:[%s19256_s1 + $0x248] sm:$0xff]  }
  0x1a   :  { %13059 = vmatprep.subr.bf16.mxu1 %v14518_v25  ;;  %v93_v9 = vld [vmem:[%s19257_s0 + $0x210] sm:$0xff]  ;;  %v94_v13 = vld [vmem:[%s19257_s0 + $0x218] sm:$0xff]  ;;  %v14562_v21 = vld [vmem:[%s19256_s1 + $0x2c8] sm:$0xff]  }
  0x1b   :  { %v11859_v10 = vcombine.low %v29_v8, %v93_v9  ;;  %v11860_v11 = vcombine.high %v29_v8, %v93_v9  ;;  %v11861_v14 = vcombine.low %v30_v12, %v94_v13  ;;  %v11862_v15 = vcombine.high %v30_v12, %v94_v13  ;;  %v14563_v22 = vld [vmem:[%s19256_s1 + $0x208] sm:$0xff]   ;;  %v14565_v24 = vld [vmem:[%s19256_s1 + $0x250] sm:$0xff]   ;;  %v14573_v32 = vld [vmem:[%s19256_s1 + $0x260] sm:$0xff]  }
  0x1c   :  { %13038 = vmatpush3.bf16.msra.mxu0 %v14519_v26  ;;  %v14564_v23 = vld [vmem:[%s19256_s1 + $0x288] sm:$0xff]   ;;  %v14566_v25 = vld [vmem:[%s19256_s1 + $0x2d0] sm:$0xff]   ;;  %v14574_v33 = vld [vmem:[%s19256_s1 + $0x2e0] sm:$0xff]  }
  0x1d   :  { %13060 = vmatpush3.bf16.msra.mxu1 %v14520_v27  ;;  %13039 = vmatprep.subr.bf16.mxu0 %v14521_v28  ;;  %v14567_v26 = vld [vmem:[%s19256_s1 + $0x210] sm:$0xff]   ;;  %v14569_v28 = vld [vmem:[%s19256_s1 + $0x258] sm:$0xff]   ;;  %v14575_v34 = vld [vmem:[%s19256_s1 + $0x220] sm:$0xff]  }
  0x1e   :  { %13061 = vmatprep.subr.bf16.mxu1 %v14522_v29  ;;  %v14568_v27 = vld [vmem:[%s19256_s1 + $0x290] sm:$0xff]   ;;  %v14570_v29 = vld [vmem:[%s19256_s1 + $0x2d8] sm:$0xff]   ;;  %v14577_v36 = vld [vmem:[%s19256_s1 + $0x268] sm:$0xff]  }
  0x1f   :  { %v14578_v37 = vld [vmem:[%s19256_s1 + $0x2e8] sm:$0xff]   ;;  %v14605_v8 = vld [vmem:[%s19256_s1 + $0x360] sm:$0xff]  }
  0x20   :  { %13040 = vmatpush3.bf16.msra.mxu0 %v14523_v30  ;;  %v14571_v30 = vld [vmem:[%s19256_s1 + $0x218] sm:$0xff]   ;;  %v14580_v39 = vld [vmem:[%s19256_s1 + $0x2a8] sm:$0xff]   ;;  %v14606_v9 = vld [vmem:[%s19256_s1 + $0x3e0] sm:$0xff]  }
  0x21   :  { %13062 = vmatpush3.bf16.msra.mxu1 %v14524_v31  ;;  %13069 = vmatprep.subr.bf16.mxu0 %v14525_v40  ;;  %v14572_v31 = vld [vmem:[%s19256_s1 + $0x298] sm:$0xff]   ;;  %v14581_v40 = vld [vmem:[%s19256_s1 + $0x270] sm:$0xff]   ;;  %v14609_v12 = vld [vmem:[%s19256_s1 + $0x368] sm:$0xff]  }
  0x22   :  { %13091 = vmatprep.subr.bf16.mxu1 %v14526_v41  ;;  %v14582_v41 = vld [vmem:[%s19256_s1 + $0x2f0] sm:$0xff]   ;;  %v14610_v13 = vld [vmem:[%s19256_s1 + $0x3e8] sm:$0xff]  }
  0x23   :  { %9027 = vmatmul.mubr.bf16.vlgmr.msra.gmra.mrb[0].mxu0 %v11855_v35  ;;  %v14576_v35 = vld [vmem:[%s19256_s1 + $0x2a0] sm:$0xff]  }
  0x24   :  { %9068 = vmatmul.mubr.bf16.vlgmr.msra.gmra.mrb[0].mxu1 %v11857_v38  ;;  %13070 = vmatpush3.bf16.msra.mxu0 %v14527_v42  ;;  %v14579_v38 = vld [vmem:[%s19256_s1 + $0x228] sm:$0xff]   ;;  %v14583_v42 = vld [vmem:[%s19256_s1 + $0x230] sm:$0xff]  }
  0x25   :  { %13092 = vmatpush3.bf16.msra.mxu1 %v14528_v43  ;;  %13071 = vmatprep.subr.bf16.mxu0 %v14529_v44  ;;  %v14584_v43 = vld [vmem:[%s19256_s1 + $0x2b0] sm:$0xff]   ;;  %v14585_v44 = vld [vmem:[%s19256_s1 + $0x278] sm:$0xff]  }
  0x26   :  { %13093 = vmatprep.subr.bf16.mxu1 %v14530_v45  ;;  %9108 = vmatprep.mubr.bf16.mxu0 %v11860_v11  ;;  %v14586_v45 = vld [vmem:[%s19256_s1 + $0x2f8] sm:$0xff]   ;;  %v14608_v11 = vld [vmem:[%s19256_s1 + $0x3a0] sm:$0xff]  }
  0x27   :  { %9149 = vmatprep.mubr.bf16.mxu1 %v11862_v15  ;;  %v14612_v15 = vld [vmem:[%s19256_s1 + $0x3a8] sm:$0xff]  }
  0x28   :  { %13072 = vmatpush3.bf16.msra.mxu0 %v14531_v46  ;;  %v14587_v46 = vld [vmem:[%s19256_s1 + $0x238] sm:$0xff]  }
  0x29   :  { %13094 = vmatpush3.bf16.msra.mxu1 %v14532_v47  ;;  %13073 = vmatprep.subr.bf16.mxu0 %v14533_v48  ;;  %v14588_v47 = vld [vmem:[%s19256_s1 + $0x2b8] sm:$0xff]   ;;  %v31_v48 = vld [vmem:[%s19257_s0 + $0x20] sm:$0xff] }
  0x2a   :  { %13095 = vmatprep.subr.bf16.mxu1 %v14534_v49  ;;  %v95_v49 = vld [vmem:[%s19257_s0 + $0x220] sm:$0xff] }
  0x2c   :  { %13074 = vmatpush3.bf16.msra.mxu0 %v14535_v50  ;;  %v32_v50 = vld [vmem:[%s19257_s0 + $0x28] sm:$0xff] }
  0x2d   :  { %13096 = vmatpush3.bf16.msra.mxu1 %v14536_v51  ;;  %13075 = vmatprep.subr.bf16.mxu0 %v14537_v52  ;;  %v96_v51 = vld [vmem:[%s19257_s0 + $0x228] sm:$0xff]  ;;  %v11863_v52 = vcombine.low %v31_v48, %v95_v49 }
  0x2e   :  { %13097 = vmatprep.subr.bf16.mxu1 %v14538_v53  ;;  %v11864_v53 = vcombine.high %v31_v48, %v95_v49  ;;  %v14637_v48 = vld [vmem:[%s19256_s1 + $0x460] sm:$0xff]  }
  0x2f   :  { %v14638_v49 = vld [vmem:[%s19256_s1 + $0x4e0] sm:$0xff]  }
  0x30   :  { %13076 = vmatpush3.bf16.msra.mxu0 %v14539_v54  ;;  %v11865_v54 = vcombine.low %v32_v50, %v96_v51 }
  0x31   :  { %13098 = vmatpush3.bf16.msra.mxu1 %v14540_v55  ;;  %13077 = vmatprep.subr.bf16.mxu0 %v14541_v56  ;;  %v11866_v55 = vcombine.high %v32_v50, %v96_v51  ;;  %v14589_v56 = vld [vmem:[%s19256_s1 + $0x340] sm:$0xff]  }
  0x32   :  { %13099 = vmatprep.subr.bf16.mxu1 %v14542_v57  ;;  %v14590_v57 = vld [vmem:[%s19256_s1 + $0x3c0] sm:$0xff]  }
  0x33   :  { %v14639_v50 = vld [vmem:[%s19256_s1 + $0x420] sm:$0xff]  }
  0x34   :  { %13078 = vmatpush3.bf16.msra.mxu0 %v14543_v58  ;;  %v14591_v58 = vld [vmem:[%s19256_s1 + $0x300] sm:$0xff]  }
  0x35   :  { %13100 = vmatpush3.bf16.msra.mxu1 %v14544_v59  ;;  %13079 = vmatprep.subr.bf16.mxu0 %v14545_v60  ;;  %v14592_v59 = vld [vmem:[%s19256_s1 + $0x380] sm:$0xff]   ;;  %v14593_v60 = vld [vmem:[%s19256_s1 + $0x348] sm:$0xff]  }
  0x36   :  { %13101 = vmatprep.subr.bf16.mxu1 %v14546_v61  ;;  %v14594_v61 = vld [vmem:[%s19256_s1 + $0x3c8] sm:$0xff]   ;;  %v14640_v51 = vld [vmem:[%s19256_s1 + $0x4a0] sm:$0xff]  }
  0x38   :  { %13080 = vmatpush3.bf16.msra.mxu0 %v14547_v62  ;;  %v14595_v62 = vld [vmem:[%s19256_s1 + $0x308] sm:$0xff]  }
  0x39   :  { %13102 = vmatpush3.bf16.msra.mxu1 %v14548_v63  ;;  %13081 = vmatprep.subr.bf16.mxu0 %v14549_v0  ;;  %v14596_v63 = vld [vmem:[%s19256_s1 + $0x388] sm:$0xff]   ;;  %v14597_v0 = vld [vmem:[%s19256_s1 + $0x350] sm:$0xff]  }
  0x3a   :  { %13103 = vmatprep.subr.bf16.mxu1 %v14550_v1  ;;  %v14598_v1 = vld [vmem:[%s19256_s1 + $0x3d0] sm:$0xff]  }
  0x3c   :  { %13082 = vmatpush3.bf16.msra.mxu0 %v14551_v2  ;;  %v14599_v2 = vld [vmem:[%s19256_s1 + $0x310] sm:$0xff]  }
  0x3d   :  { %13104 = vmatpush3.bf16.msra.mxu1 %v14552_v3  ;;  %13083 = vmatprep.subr.bf16.mxu0 %v14553_v4  ;;  %v14600_v3 = vld [vmem:[%s19256_s1 + $0x390] sm:$0xff]   ;;  %v14601_v4 = vld [vmem:[%s19256_s1 + $0x358] sm:$0xff]  }
  0x3e   :  { %13105 = vmatprep.subr.bf16.mxu1 %v14554_v5  ;;  %v14602_v5 = vld [vmem:[%s19256_s1 + $0x3d8] sm:$0xff]  }
  0x40   :  { %13084 = vmatpush3.bf16.msra.mxu0 %v14555_v6  ;;  %v14603_v6 = vld [vmem:[%s19256_s1 + $0x318] sm:$0xff]  }
  0x41   :  { %13106 = vmatpush3.bf16.msra.mxu1 %v14556_v7  ;;  %13113 = vmatprep.subr.bf16.mxu0 %v14557_v16  ;;  %v14604_v7 = vld [vmem:[%s19256_s1 + $0x398] sm:$0xff]   ;;  %v14613_v16 = vld [vmem:[%s19256_s1 + $0x370] sm:$0xff]  }
  0x42   :  { %13135 = vmatprep.subr.bf16.mxu1 %v14558_v17  ;;  %v14614_v17 = vld [vmem:[%s19256_s1 + $0x3f0] sm:$0xff]  }
  0x43   :  { %9109 = vmatmul.mubr.bf16.vlgmr.msra.gmra.mrb[4].mxu0 %v11859_v10  ;;  %v14607_v10 = vld [vmem:[%s19256_s1 + $0x320] sm:$0xff]  }
  0x44   :  { %9150 = vmatmul.mubr.bf16.vlgmr.msra.gmra.mrb[4].mxu1 %v11861_v14  ;;  %13114 = vmatpush3.bf16.msra.mxu0 %v14559_v18  ;;  %v14611_v14 = vld [vmem:[%s19256_s1 + $0x328] sm:$0xff]   ;;  %v14615_v18 = vld [vmem:[%s19256_s1 + $0x330] sm:$0xff]  }
  0x45   :  { %13136 = vmatpush3.bf16.msra.mxu1 %v14560_v19  ;;  %13115 = vmatprep.subr.bf16.mxu0 %v14561_v20  ;;  %v14616_v19 = vld [vmem:[%s19256_s1 + $0x3b0] sm:$0xff]   ;;  %v14617_v20 = vld [vmem:[%s19256_s1 + $0x378] sm:$0xff]  }
  0x46   :  { %13137 = vmatprep.subr.bf16.mxu1 %v14562_v21  ;;  %9190 = vmatprep.mubr.bf16.mxu0 %v11864_v53  ;;  %v14618_v21 = vld [vmem:[%s19256_s1 + $0x3f8] sm:$0xff]   ;;  %v14642_v53 = vld [vmem:[%s19256_s1 + $0x4e8] sm:$0xff]  }
  0x47   :  { %9231 = vmatprep.mubr.bf16.mxu1 %v11866_v55  ;;  %v14644_v55 = vld [vmem:[%s19256_s1 + $0x4a8] sm:$0xff]  }
  0x48   :  { %13116 = vmatpush3.bf16.msra.mxu0 %v14563_v22  ;;  %v14619_v22 = vld [vmem:[%s19256_s1 + $0x338] sm:$0xff]  }
  0x49   :  { %13138 = vmatpush3.bf16.msra.mxu1 %v14564_v23  ;;  %13117 = vmatprep.subr.bf16.mxu0 %v14565_v24  ;;  %v14620_v23 = vld [vmem:[%s19256_s1 + $0x3b8] sm:$0xff]   ;;  %v33_v24 = vld [vmem:[%s19257_s0 + $0x30] sm:$0xff] }
  0x4a   :  { %13139 = vmatprep.subr.bf16.mxu1 %v14566_v25  ;;  %v97_v25 = vld [vmem:[%s19257_s0 + $0x230] sm:$0xff] }
  0x4c   :  { %13118 = vmatpush3.bf16.msra.mxu0 %v14567_v26  ;;  %v34_v26 = vld [vmem:[%s19257_s0 + $0x38] sm:$0xff] }
  0x4d   :  { %13140 = vmatpush3.bf16.msra.mxu1 %v14568_v27  ;;  %13119 = vmatprep.subr.bf16.mxu0 %v14569_v28  ;;  %v11867_v27 = vcombine.low %v33_v24, %v97_v25  ;;  %v11868_v28 = vcombine.high %v33_v24, %v97_v25  ;;  %v14669_v24 = vld [vmem:[%s19256_s1 + $0x560] sm:$0xff]  }
  0x4e   :  { %13141 = vmatprep.subr.bf16.mxu1 %v14570_v29  ;;  %v98_v29 = vld [vmem:[%s19257_s0 + $0x238] sm:$0xff]  ;;  %v14670_v25 = vld [vmem:[%s19256_s1 + $0x5e0] sm:$0xff]  }
  0x50   :  { %13120 = vmatpush3.bf16.msra.mxu0 %v14571_v30  ;;  %v11869_v30 = vcombine.low %v34_v26, %v98_v29 }
  0x51   :  { %13142 = vmatpush3.bf16.msra.mxu1 %v14572_v31  ;;  %13121 = vmatprep.subr.bf16.mxu0 %v14573_v32  ;;  %v11870_v31 = vcombine.high %v34_v26, %v98_v29  ;;  %v14621_v32 = vld [vmem:[%s19256_s1 + $0x440] sm:$0xff]   ;;  %v14674_v29 = vld [vmem:[%s19256_s1 + $0x5e8] sm:$0xff]  }
  0x52   :  { %13143 = vmatprep.subr.bf16.mxu1 %v14574_v33  ;;  %v14622_v33 = vld [vmem:[%s19256_s1 + $0x4c0] sm:$0xff]  }
  0x53   :  { %v14671_v26 = vld [vmem:[%s19256_s1 + $0x520] sm:$0xff]  }
  0x54   :  { %13122 = vmatpush3.bf16.msra.mxu0 %v14575_v34  ;;  %v14623_v34 = vld [vmem:[%s19256_s1 + $0x400] sm:$0xff]  }
  0x55   :  { %13144 = vmatpush3.bf16.msra.mxu1 %v14576_v35  ;;  %13123 = vmatprep.subr.bf16.mxu0 %v14577_v36  ;;  %v14624_v35 = vld [vmem:[%s19256_s1 + $0x480] sm:$0xff]   ;;  %v14625_v36 = vld [vmem:[%s19256_s1 + $0x448] sm:$0xff]  }
  0x56   :  { %13145 = vmatprep.subr.bf16.mxu1 %v14578_v37  ;;  %v14626_v37 = vld [vmem:[%s19256_s1 + $0x4c8] sm:$0xff]  }
  0x58   :  { %13124 = vmatpush3.bf16.msra.mxu0 %v14579_v38  ;;  %v14627_v38 = vld [vmem:[%s19256_s1 + $0x408] sm:$0xff]  }
  0x59   :  { %13146 = vmatpush3.bf16.msra.mxu1 %v14580_v39  ;;  %13125 = vmatprep.subr.bf16.mxu0 %v14581_v40  ;;  %v14628_v39 = vld [vmem:[%s19256_s1 + $0x488] sm:$0xff]   ;;  %v14629_v40 = vld [vmem:[%s19256_s1 + $0x450] sm:$0xff]  }
  0x5a   :  { %13147 = vmatprep.subr.bf16.mxu1 %v14582_v41  ;;  %v14630_v41 = vld [vmem:[%s19256_s1 + $0x4d0] sm:$0xff]  }
  0x5c   :  { %13126 = vmatpush3.bf16.msra.mxu0 %v14583_v42  ;;  %v14631_v42 = vld [vmem:[%s19256_s1 + $0x410] sm:$0xff]  }
  0x5d   :  { %13148 = vmatpush3.bf16.msra.mxu1 %v14584_v43  ;;  %13127 = vmatprep.subr.bf16.mxu0 %v14585_v44  ;;  %v14632_v43 = vld [vmem:[%s19256_s1 + $0x490] sm:$0xff]   ;;  %v14633_v44 = vld [vmem:[%s19256_s1 + $0x458] sm:$0xff]  }
  0x5e   :  { %13149 = vmatprep.subr.bf16.mxu1 %v14586_v45  ;;  %v14634_v45 = vld [vmem:[%s19256_s1 + $0x4d8] sm:$0xff]  }
  0x60   :  { %13128 = vmatpush3.bf16.msra.mxu0 %v14587_v46  ;;  %v14635_v46 = vld [vmem:[%s19256_s1 + $0x418] sm:$0xff]  }
  0x61   :  { %13150 = vmatpush3.bf16.msra.mxu1 %v14588_v47  ;;  %13157 = vmatprep.subr.bf16.mxu0 %v14589_v56  ;;  %v14636_v47 = vld [vmem:[%s19256_s1 + $0x498] sm:$0xff]   ;;  %v14645_v56 = vld [vmem:[%s19256_s1 + $0x470] sm:$0xff]  }
  0x62   :  { %13179 = vmatprep.subr.bf16.mxu1 %v14590_v57  ;;  %v14646_v57 = vld [vmem:[%s19256_s1 + $0x4f0] sm:$0xff]  }
  0x63   :  { %9191 = vmatmul.mubr.bf16.vlgmr.msra.gmra.mrb[8].mxu0 %v11863_v52  ;;  %v14641_v52 = vld [vmem:[%s19256_s1 + $0x468] sm:$0xff]  }
  0x64   :  { %9232 = vmatmul.mubr.bf16.vlgmr.msra.gmra.mrb[8].mxu1 %v11865_v54  ;;  %13158 = vmatpush3.bf16.msra.mxu0 %v14591_v58  ;;  %v14643_v54 = vld [vmem:[%s19256_s1 + $0x428] sm:$0xff]   ;;  %v14647_v58 = vld [vmem:[%s19256_s1 + $0x430] sm:$0xff]  }
  0x65   :  { %13180 = vmatpush3.bf16.msra.mxu1 %v14592_v59  ;;  %13159 = vmatprep.subr.bf16.mxu0 %v14593_v60  ;;  %v14648_v59 = vld [vmem:[%s19256_s1 + $0x4b0] sm:$0xff]   ;;  %v14649_v60 = vld [vmem:[%s19256_s1 + $0x478] sm:$0xff]  }
  0x66   :  { %13181 = vmatprep.subr.bf16.mxu1 %v14594_v61  ;;  %9272 = vmatprep.mubr.bf16.mxu0 %v11868_v28  ;;  %v14650_v61 = vld [vmem:[%s19256_s1 + $0x4f8] sm:$0xff]   ;;  %v14673_v28 = vld [vmem:[%s19256_s1 + $0x568] sm:$0xff]  }
  0x67   :  { %9313 = vmatprep.mubr.bf16.mxu1 %v11870_v31  ;;  %v14676_v31 = vld [vmem:[%s19256_s1 + $0x5a8] sm:$0xff]  }
  0x68   :  { %13160 = vmatpush3.bf16.msra.mxu0 %v14595_v62  ;;  %v14651_v62 = vld [vmem:[%s19256_s1 + $0x438] sm:$0xff]  }
  0x69   :  { %13182 = vmatpush3.bf16.msra.mxu1 %v14596_v63  ;;  %13161 = vmatprep.subr.bf16.mxu0 %v14597_v0  ;;  %v14652_v63 = vld [vmem:[%s19256_s1 + $0x4b8] sm:$0xff]   ;;  %v35_v0 = vld [vmem:[%s19257_s0 + $0x40] sm:$0xff] }
  0x6a   :  { %13183 = vmatprep.subr.bf16.mxu1 %v14598_v1  ;;  %v99_v1 = vld [vmem:[%s19257_s0 + $0x240] sm:$0xff] }
  0x6c   :  { %13162 = vmatpush3.bf16.msra.mxu0 %v14599_v2  ;;  %v11871_v2 = vcombine.low %v35_v0, %v99_v1 }
  0x6d   :  { %13184 = vmatpush3.bf16.msra.mxu1 %v14600_v3  ;;  %13163 = vmatprep.subr.bf16.mxu0 %v14601_v4  ;;  %v11872_v3 = vcombine.high %v35_v0, %v99_v1  ;;  %v36_v4 = vld [vmem:[%s19257_s0 + $0x48] sm:$0xff]  ;;  %v14701_v0 = vld [vmem:[%s19256_s1 + $0x660] sm:$0xff]  }
  0x6e   :  { %13185 = vmatprep.subr.bf16.mxu1 %v14602_v5  ;;  %v100_v5 = vld [vmem:[%s19257_s0 + $0x248] sm:$0xff]  ;;  %v14702_v1 = vld [vmem:[%s19256_s1 + $0x6e0] sm:$0xff]  }
  0x70   :  { %13164 = vmatpush3.bf16.msra.mxu0 %v14603_v6  ;;  %v11873_v6 = vcombine.low %v36_v4, %v100_v5 }
  0x71   :  { %13186 = vmatpush3.bf16.msra.mxu1 %v14604_v7  ;;  %13165 = vmatprep.subr.bf16.mxu0 %v14605_v8  ;;  %v11874_v7 = vcombine.high %v36_v4, %v100_v5  ;;  %v14653_v8 = vld [vmem:[%s19256_s1 + $0x540] sm:$0xff]   ;;  %v14705_v4 = vld [vmem:[%s19256_s1 + $0x668] sm:$0xff]  }
  0x72   :  { %13187 = vmatprep.subr.bf16.mxu1 %v14606_v9  ;;  %v14654_v9 = vld [vmem:[%s19256_s1 + $0x5c0] sm:$0xff]   ;;  %v14706_v5 = vld [vmem:[%s19256_s1 + $0x6e8] sm:$0xff]  }
  0x74   :  { %13166 = vmatpush3.bf16.msra.mxu0 %v14607_v10  ;;  %v14655_v10 = vld [vmem:[%s19256_s1 + $0x500] sm:$0xff]  }
  0x75   :  { %13188 = vmatpush3.bf16.msra.mxu1 %v14608_v11  ;;  %13167 = vmatprep.subr.bf16.mxu0 %v14609_v12  ;;  %v14656_v11 = vld [vmem:[%s19256_s1 + $0x580] sm:$0xff]   ;;  %v14657_v12 = vld [vmem:[%s19256_s1 + $0x548] sm:$0xff]  }
  0x76   :  { %13189 = vmatprep.subr.bf16.mxu1 %v14610_v13  ;;  %v14658_v13 = vld [vmem:[%s19256_s1 + $0x5c8] sm:$0xff]  }
  0x78   :  { %13168 = vmatpush3.bf16.msra.mxu0 %v14611_v14  ;;  %v14659_v14 = vld [vmem:[%s19256_s1 + $0x508] sm:$0xff]  }
  0x79   :  { %13190 = vmatpush3.bf16.msra.mxu1 %v14612_v15  ;;  %13169 = vmatprep.subr.bf16.mxu0 %v14613_v16  ;;  %v14660_v15 = vld [vmem:[%s19256_s1 + $0x588] sm:$0xff]   ;;  %v14661_v16 = vld [vmem:[%s19256_s1 + $0x550] sm:$0xff]  }
  0x7a   :  { %13191 = vmatprep.subr.bf16.mxu1 %v14614_v17  ;;  %v14662_v17 = vld [vmem:[%s19256_s1 + $0x5d0] sm:$0xff]  }
  0x7c   :  { %13170 = vmatpush3.bf16.msra.mxu0 %v14615_v18  ;;  %v14663_v18 = vld [vmem:[%s19256_s1 + $0x510] sm:$0xff]  }
  0x7d   :  { %13192 = vmatpush3.bf16.msra.mxu1 %v14616_v19  ;;  %13171 = vmatprep.subr.bf16.mxu0 %v14617_v20  ;;  %v14664_v19 = vld [vmem:[%s19256_s1 + $0x590] sm:$0xff]   ;;  %v14665_v20 = vld [vmem:[%s19256_s1 + $0x558] sm:$0xff]  }
  0x7e   :  { %13193 = vmatprep.subr.bf16.mxu1 %v14618_v21  ;;  %v14666_v21 = vld [vmem:[%s19256_s1 + $0x5d8] sm:$0xff]  }
  0x80   :  { %13172 = vmatpush3.bf16.msra.mxu0 %v14619_v22  ;;  %v14667_v22 = vld [vmem:[%s19256_s1 + $0x518] sm:$0xff]  }
  0x81   :  { %13194 = vmatpush3.bf16.msra.mxu1 %v14620_v23  ;;  %13201 = vmatprep.subr.bf16.mxu0 %v14621_v32  ;;  %v14668_v23 = vld [vmem:[%s19256_s1 + $0x598] sm:$0xff]   ;;  %v14677_v32 = vld [vmem:[%s19256_s1 + $0x570] sm:$0xff]  }
  0x82   :  { %13223 = vmatprep.subr.bf16.mxu1 %v14622_v33  ;;  %v14678_v33 = vld [vmem:[%s19256_s1 + $0x5f0] sm:$0xff]  }
  0x83   :  { %9273 = vmatmul.mubr.bf16.vlgmr.msra.gmra.mrb[12].mxu0 %v11867_v27  ;;  %v14672_v27 = vld [vmem:[%s19256_s1 + $0x5a0] sm:$0xff]  }
  0x84   :  { %9314 = vmatmul.mubr.bf16.vlgmr.msra.gmra.mrb[12].mxu1 %v11869_v30  ;;  %13202 = vmatpush3.bf16.msra.mxu0 %v14623_v34  ;;  %v14675_v30 = vld [vmem:[%s19256_s1 + $0x528] sm:$0xff]   ;;  %v14679_v34 = vld [vmem:[%s19256_s1 + $0x530] sm:$0xff]  }
  0x85   :  { %13224 = vmatpush3.bf16.msra.mxu1 %v14624_v35  ;;  %13203 = vmatprep.subr.bf16.mxu0 %v14625_v36  ;;  %v14680_v35 = vld [vmem:[%s19256_s1 + $0x5b0] sm:$0xff]   ;;  %v14681_v36 = vld [vmem:[%s19256_s1 + $0x578] sm:$0xff]  }
  0x86   :  { %13225 = vmatprep.subr.bf16.mxu1 %v14626_v37  ;;  %9354 = vmatprep.mubr.bf16.mxu0 %v11872_v3  ;;  %v14682_v37 = vld [vmem:[%s19256_s1 + $0x5f8] sm:$0xff]   ;;  %v14704_v3 = vld [vmem:[%s19256_s1 + $0x6a0] sm:$0xff]  }
  0x87   :  { %9395 = vmatprep.mubr.bf16.mxu1 %v11874_v7  ;;  %v14708_v7 = vld [vmem:[%s19256_s1 + $0x6a8] sm:$0xff]  }
  0x88   :  { %13204 = vmatpush3.bf16.msra.mxu0 %v14627_v38  ;;  %v14683_v38 = vld [vmem:[%s19256_s1 + $0x538] sm:$0xff]  }
  0x89   :  { %13226 = vmatpush3.bf16.msra.mxu1 %v14628_v39  ;;  %13205 = vmatprep.subr.bf16.mxu0 %v14629_v40  ;;  %v14684_v39 = vld [vmem:[%s19256_s1 + $0x5b8] sm:$0xff]   ;;  %v37_v40 = vld [vmem:[%s19257_s0 + $0x50] sm:$0xff] }
  0x8a   :  { %13227 = vmatprep.subr.bf16.mxu1 %v14630_v41  ;;  %v101_v41 = vld [vmem:[%s19257_s0 + $0x250] sm:$0xff] }
  0x8c   :  { %13206 = vmatpush3.bf16.msra.mxu0 %v14631_v42  ;;  %v38_v42 = vld [vmem:[%s19257_s0 + $0x58] sm:$0xff] }
  0x8d   :  { %13228 = vmatpush3.bf16.msra.mxu1 %v14632_v43  ;;  %13207 = vmatprep.subr.bf16.mxu0 %v14633_v44  ;;  %v102_v43 = vld [vmem:[%s19257_s0 + $0x258] sm:$0xff]  ;;  %v11875_v44 = vcombine.low %v37_v40, %v101_v41 }
  0x8e   :  { %13229 = vmatprep.subr.bf16.mxu1 %v14634_v45  ;;  %v11876_v45 = vcombine.high %v37_v40, %v101_v41  ;;  %v14732_v41 = vld [vmem:[%s19256_s1 + $0x798] sm:$0xff]  }
  0x90   :  { %13208 = vmatpush3.bf16.msra.mxu0 %v14635_v46  ;;  %v11877_v46 = vcombine.low %v38_v42, %v102_v43 }
  0x91   :  { %13230 = vmatpush3.bf16.msra.mxu1 %v14636_v47  ;;  %13209 = vmatprep.subr.bf16.mxu0 %v14637_v48  ;;  %v11878_v47 = vcombine.high %v38_v42, %v102_v43  ;;  %v14685_v48 = vld [vmem:[%s19256_s1 + $0x640] sm:$0xff]  }
  0x92   :  { %13231 = vmatprep.subr.bf16.mxu1 %v14638_v49  ;;  %v14686_v49 = vld [vmem:[%s19256_s1 + $0x6c0] sm:$0xff]  }
  0x93   :  { %v14733_v43 = vld [vmem:[%s19256_s1 + $0x760] sm:$0xff]  }
  0x94   :  { %13210 = vmatpush3.bf16.msra.mxu0 %v14639_v50  ;;  %v14687_v50 = vld [vmem:[%s19256_s1 + $0x600] sm:$0xff]  }
  0x95   :  { %13232 = vmatpush3.bf16.msra.mxu1 %v14640_v51  ;;  %13211 = vmatprep.subr.bf16.mxu0 %v14641_v52  ;;  %v14688_v51 = vld [vmem:[%s19256_s1 + $0x680] sm:$0xff]   ;;  %v14689_v52 = vld [vmem:[%s19256_s1 + $0x648] sm:$0xff]  }
  0x96   :  { %13233 = vmatprep.subr.bf16.mxu1 %v14642_v53  ;;  %v14690_v53 = vld [vmem:[%s19256_s1 + $0x6c8] sm:$0xff]  }
  0x98   :  { %13212 = vmatpush3.bf16.msra.mxu0 %v14643_v54  ;;  %v14691_v54 = vld [vmem:[%s19256_s1 + $0x608] sm:$0xff]  }
  0x99   :  { %13234 = vmatpush3.bf16.msra.mxu1 %v14644_v55  ;;  %13213 = vmatprep.subr.bf16.mxu0 %v14645_v56  ;;  %v14692_v55 = vld [vmem:[%s19256_s1 + $0x688] sm:$0xff]   ;;  %v14693_v56 = vld [vmem:[%s19256_s1 + $0x650] sm:$0xff]  }
  0x9a   :  { %13235 = vmatprep.subr.bf16.mxu1 %v14646_v57  ;;  %v14694_v57 = vld [vmem:[%s19256_s1 + $0x6d0] sm:$0xff]  }
  0x9c   :  { %13214 = vmatpush3.bf16.msra.mxu0 %v14647_v58  ;;  %v14695_v58 = vld [vmem:[%s19256_s1 + $0x610] sm:$0xff]  }
  0x9d   :  { %13236 = vmatpush3.bf16.msra.mxu1 %v14648_v59  ;;  %13215 = vmatprep.subr.bf16.mxu0 %v14649_v60  ;;  %v14696_v59 = vld [vmem:[%s19256_s1 + $0x690] sm:$0xff]   ;;  %v14697_v60 = vld [vmem:[%s19256_s1 + $0x658] sm:$0xff]  }
  0x9e   :  { %13237 = vmatprep.subr.bf16.mxu1 %v14650_v61  ;;  %v14698_v61 = vld [vmem:[%s19256_s1 + $0x6d8] sm:$0xff]  }
  0xa0   :  { %13216 = vmatpush3.bf16.msra.mxu0 %v14651_v62  ;;  %v14699_v62 = vld [vmem:[%s19256_s1 + $0x618] sm:$0xff]  }
  0xa1   :  { %13238 = vmatpush3.bf16.msra.mxu1 %v14652_v63  ;;  %13245 = vmatprep.subr.bf16.mxu0 %v14653_v8  ;;  %v14700_v63 = vld [vmem:[%s19256_s1 + $0x698] sm:$0xff]   ;;  %v14709_v8 = vld [vmem:[%s19256_s1 + $0x670] sm:$0xff]  }
  0xa2   :  { %13267 = vmatprep.subr.bf16.mxu1 %v14654_v9  ;;  %v14710_v9 = vld [vmem:[%s19256_s1 + $0x6f0] sm:$0xff]  }
  0xa3   :  { %9355 = vmatmul.mubr.bf16.vlgmr.msra.gmra.mrb[16].mxu0 %v11871_v2  ;;  %v14703_v2 = vld [vmem:[%s19256_s1 + $0x620] sm:$0xff]  }
  0xa4   :  { %9396 = vmatmul.mubr.bf16.vlgmr.msra.gmra.mrb[16].mxu1 %v11873_v6  ;;  %13246 = vmatpush3.bf16.msra.mxu0 %v14655_v10  ;;  %v14707_v6 = vld [vmem:[%s19256_s1 + $0x628] sm:$0xff]   ;;  %v14711_v10 = vld [vmem:[%s19256_s1 + $0x630] sm:$0xff]  }
  0xa5   :  { %13268 = vmatpush3.bf16.msra.mxu1 %v14656_v11  ;;  %13247 = vmatprep.subr.bf16.mxu0 %v14657_v12  ;;  %v14712_v11 = vld [vmem:[%s19256_s1 + $0x6b0] sm:$0xff]   ;;  %v14713_v12 = vld [vmem:[%s19256_s1 + $0x678] sm:$0xff]  }
  0xa6   :  { %13269 = vmatprep.subr.bf16.mxu1 %v14658_v13  ;;  %9436 = vmatprep.mubr.bf16.mxu0 %v11876_v45  ;;  %v14714_v13 = vld [vmem:[%s19256_s1 + $0x6f8] sm:$0xff]  }
  0xa7   :  { %9477 = vmatprep.mubr.bf16.mxu1 %v11878_v47 }
  0xa8   :  { %13248 = vmatpush3.bf16.msra.mxu0 %v14659_v14  ;;  %v14715_v14 = vld [vmem:[%s19256_s1 + $0x638] sm:$0xff]  }
  0xa9   :  { %13270 = vmatpush3.bf16.msra.mxu1 %v14660_v15  ;;  %13249 = vmatprep.subr.bf16.mxu0 %v14661_v16  ;;  %v14716_v15 = vld [vmem:[%s19256_s1 + $0x6b8] sm:$0xff]   ;;  %v39_v16 = vld [vmem:[%s19257_s0 + $0x60] sm:$0xff] }
  0xaa   :  { %13271 = vmatprep.subr.bf16.mxu1 %v14662_v17  ;;  %v103_v17 = vld [vmem:[%s19257_s0 + $0x260] sm:$0xff] }
  0xac   :  { %13250 = vmatpush3.bf16.msra.mxu0 %v14663_v18  ;;  %v40_v18 = vld [vmem:[%s19257_s0 + $0x68] sm:$0xff] }
  0xad   :  { %13272 = vmatpush3.bf16.msra.mxu1 %v14664_v19  ;;  %13251 = vmatprep.subr.bf16.mxu0 %v14665_v20  ;;  %v11879_v19 = vcombine.low %v39_v16, %v103_v17  ;;  %v11880_v20 = vcombine.high %v39_v16, %v103_v17  ;;  %v14749_v17 = vld [vmem:[%s19256_s1 + $0x840] sm:$0xff]  }
  0xae   :  { %13273 = vmatprep.subr.bf16.mxu1 %v14666_v21  ;;  %v104_v21 = vld [vmem:[%s19257_s0 + $0x268] sm:$0xff] }
  0xb0   :  { %13252 = vmatpush3.bf16.msra.mxu0 %v14667_v22  ;;  %v11881_v22 = vcombine.low %v40_v18, %v104_v21 }
  0xb1   :  { %13274 = vmatpush3.bf16.msra.mxu1 %v14668_v23  ;;  %13253 = vmatprep.subr.bf16.mxu0 %v14669_v24  ;;  %v11882_v23 = vcombine.high %v40_v18, %v104_v21  ;;  %v14717_v24 = vld [vmem:[%s19256_s1 + $0x740] sm:$0xff]   ;;  %v14753_v21 = vld [vmem:[%s19256_s1 + $0x848] sm:$0xff]  }
  0xb2   :  { %13275 = vmatprep.subr.bf16.mxu1 %v14670_v25  ;;  %v14718_v25 = vld [vmem:[%s19256_s1 + $0x7c0] sm:$0xff]  }
  0xb3   :  { %v14750_v18 = vld [vmem:[%s19256_s1 + $0x8c0] sm:$0xff]  }
  0xb4   :  { %13254 = vmatpush3.bf16.msra.mxu0 %v14671_v26  ;;  %v14719_v26 = vld [vmem:[%s19256_s1 + $0x700] sm:$0xff]  }
  0xb5   :  { %13276 = vmatpush3.bf16.msra.mxu1 %v14672_v27  ;;  %13255 = vmatprep.subr.bf16.mxu0 %v14673_v28  ;;  %v14720_v27 = vld [vmem:[%s19256_s1 + $0x780] sm:$0xff]   ;;  %v14721_v28 = vld [vmem:[%s19256_s1 + $0x748] sm:$0xff]  }
  0xb6   :  { %13277 = vmatprep.subr.bf16.mxu1 %v14674_v29  ;;  %v14722_v29 = vld [vmem:[%s19256_s1 + $0x7c8] sm:$0xff]  }
  0xb8   :  { %13256 = vmatpush3.bf16.msra.mxu0 %v14675_v30  ;;  %v14723_v30 = vld [vmem:[%s19256_s1 + $0x708] sm:$0xff]  }
  0xb9   :  { %13278 = vmatpush3.bf16.msra.mxu1 %v14676_v31  ;;  %13257 = vmatprep.subr.bf16.mxu0 %v14677_v32  ;;  %v14724_v31 = vld [vmem:[%s19256_s1 + $0x788] sm:$0xff]   ;;  %v14725_v32 = vld [vmem:[%s19256_s1 + $0x750] sm:$0xff]  }
  0xba   :  { %13279 = vmatprep.subr.bf16.mxu1 %v14678_v33  ;;  %v14726_v33 = vld [vmem:[%s19256_s1 + $0x7d0] sm:$0xff]  }
  0xbc   :  { %13258 = vmatpush3.bf16.msra.mxu0 %v14679_v34  ;;  %v14727_v34 = vld [vmem:[%s19256_s1 + $0x710] sm:$0xff]  }
  0xbd   :  { %13280 = vmatpush3.bf16.msra.mxu1 %v14680_v35  ;;  %13259 = vmatprep.subr.bf16.mxu0 %v14681_v36  ;;  %v14728_v35 = vld [vmem:[%s19256_s1 + $0x790] sm:$0xff]   ;;  %v14729_v36 = vld [vmem:[%s19256_s1 + $0x758] sm:$0xff]  }
  0xbe   :  { %13281 = vmatprep.subr.bf16.mxu1 %v14682_v37  ;;  %v14730_v37 = vld [vmem:[%s19256_s1 + $0x7d8] sm:$0xff]  }
  0xc0   :  { %13260 = vmatpush3.bf16.msra.mxu0 %v14683_v38 }
  0xc1   :  { %13282 = vmatpush3.bf16.msra.mxu1 %v14684_v39  ;;  %13289 = vmatprep.subr.bf16.mxu0 %v14685_v48  ;;  %v14731_v39 = vld [vmem:[%s19256_s1 + $0x718] sm:$0xff]  }
  0xc2   :  { %13311 = vmatprep.subr.bf16.mxu1 %v14686_v49  ;;  %v14735_v49 = vld [vmem:[%s19256_s1 + $0x720] sm:$0xff]  }
  0xc3   :  { %9437 = vmatmul.mubr.bf16.vlgmr.msra.gmra.mrb[20].mxu0 %v11875_v44 }
  0xc4   :  { %9478 = vmatmul.mubr.bf16.vlgmr.msra.gmra.mrb[20].mxu1 %v11877_v46  ;;  %13290 = vmatpush3.bf16.msra.mxu0 %v14687_v50  ;;  %v14734_v46 = vld [vmem:[%s19256_s1 + $0x7e0] sm:$0xff]  }
  0xc5   :  { %13312 = vmatpush3.bf16.msra.mxu1 %v14688_v51  ;;  %13291 = vmatprep.subr.bf16.mxu0 %v14689_v52  ;;  %v14736_v51 = vld [vmem:[%s19256_s1 + $0x7a0] sm:$0xff]  }
  0xc6   :  { %13313 = vmatprep.subr.bf16.mxu1 %v14690_v53  ;;  %9518 = vmatprep.mubr.bf16.mxu0 %v11880_v20  ;;  %v11854_v52 = vld [vmem:[%s19258_s2] ss:$0 sm:$0xff] }
  0xc7   :  { %9559 = vmatprep.mubr.bf16.mxu1 %v11882_v23  ;;  %v14752_v20 = vld [vmem:[%s19256_s1 + $0x880] sm:$0xff]   ;;  %v14755_v23 = vld [vmem:[%s19256_s1 + $0x808] sm:$0xff]  }
  0xc8   :  { %13292 = vmatpush3.bf16.msra.mxu0 %v14691_v54 }
  0xc9   :  { %13314 = vmatpush3.bf16.msra.mxu1 %v14692_v55  ;;  %13293 = vmatprep.subr.bf16.mxu0 %v14693_v56  ;;  %v14737_v55 = vld [vmem:[%s19256_s1 + $0x768] sm:$0xff]  }
  0xca   :  { %13315 = vmatprep.subr.bf16.mxu1 %v14694_v57 }
  0xcc   :  { %13294 = vmatpush3.bf16.msra.mxu0 %v14695_v58  ;;  %v14738_v58 = vld [vmem:[%s19256_s1 + $0x7e8] sm:$0xff]  }
  0xcd   :  { %13316 = vmatpush3.bf16.msra.mxu1 %v14696_v59  ;;  %13295 = vmatprep.subr.bf16.mxu0 %v14697_v60 }
  0xce   :  { %13317 = vmatprep.subr.bf16.mxu1 %v14698_v61  ;;  %v14739_v61 = vld [vmem:[%s19256_s1 + $0x728] sm:$0xff]  }
  0xd0   :  { %13296 = vmatpush3.bf16.msra.mxu0 %v14699_v62 }
  0xd1   :  { %13318 = vmatpush3.bf16.msra.mxu1 %v14700_v63  ;;  %13297 = vmatprep.subr.bf16.mxu0 %v14701_v0  ;;  %v14740_v63 = vld [vmem:[%s19256_s1 + $0x7a8] sm:$0xff]  }
  0xd2   :  { %13319 = vmatprep.subr.bf16.mxu1 %v14702_v1  ;;  %v14741_v1 = vld [vmem:[%s19256_s1 + $0x770] sm:$0xff]  }
  0xd4   :  { %13298 = vmatpush3.bf16.msra.mxu0 %v14703_v2  ;;  %v14742_v2 = vld [vmem:[%s19256_s1 + $0x7f0] sm:$0xff]  }
  0xd5   :  { %13320 = vmatpush3.bf16.msra.mxu1 %v14704_v3  ;;  %13299 = vmatprep.subr.bf16.mxu0 %v14705_v4  ;;  %v14743_v3 = vld [vmem:[%s19256_s1 + $0x730] sm:$0xff]  }
  0xd6   :  { %13321 = vmatprep.subr.bf16.mxu1 %v14706_v5  ;;  %v14744_v4 = vld [vmem:[%s19256_s1 + $0x7b0] sm:$0xff]   ;;  %v14745_v5 = vld [vmem:[%s19256_s1 + $0x778] sm:$0xff]  }
  0xd8   :  { %13300 = vmatpush3.bf16.msra.mxu0 %v14707_v6  ;;  %v14746_v6 = vld [vmem:[%s19256_s1 + $0x7f8] sm:$0xff]  }
  0xd9   :  { %13322 = vmatpush3.bf16.msra.mxu1 %v14708_v7  ;;  %13301 = vmatprep.subr.bf16.mxu0 %v14709_v8  ;;  %v14747_v7 = vld [vmem:[%s19256_s1 + $0x738] sm:$0xff]  }
  0xda   :  { %13323 = vmatprep.subr.bf16.mxu1 %v14710_v9  ;;  %v14748_v8 = vld [vmem:[%s19256_s1 + $0x7b8] sm:$0xff]   ;;  %v41_v9 = vld [vmem:[%s19257_s0 + $0x70] sm:$0xff] }
  0xdc   :  { %13302 = vmatpush3.bf16.msra.mxu0 %v14711_v10  ;;  %v105_v10 = vld [vmem:[%s19257_s0 + $0x270] sm:$0xff] }
  0xdd   :  { %13324 = vmatpush3.bf16.msra.mxu1 %v14712_v11  ;;  %13303 = vmatprep.subr.bf16.mxu0 %v14713_v12  ;;  %v42_v11 = vld [vmem:[%s19257_s0 + $0x78] sm:$0xff] }
  0xde   :  { %13325 = vmatprep.subr.bf16.mxu1 %v14714_v13  ;;  %v106_v12 = vld [vmem:[%s19257_s0 + $0x278] sm:$0xff]  ;;  %v11883_v13 = vcombine.low %v41_v9, %v105_v10 }
  0xdf   :  { %v11886_v16 = vcombine.high %v42_v11, %v106_v12 }
  0xe0   :  { %13304 = vmatpush3.bf16.msra.mxu0 %v14715_v14  ;;  %v11884_v14 = vcombine.high %v41_v9, %v105_v10  ;;  %v14781_v9 = vld [vmem:[%s19256_s1 + $0x940] sm:$0xff]  }
  0xe1   :  { %13326 = vmatpush3.bf16.msra.mxu1 %v14716_v15  ;;  %13333 = vmatprep.subr.bf16.mxu0 %v14717_v24  ;;  %v11885_v15 = vcombine.low %v42_v11, %v106_v12  ;;  %v14756_v24 = vld [vmem:[%s19256_s1 + $0x888] sm:$0xff]   ;;  %v14782_v10 = vld [vmem:[%s19256_s1 + $0x9c0] sm:$0xff]  }
  0xe2   :  { %13355 = vmatprep.subr.bf16.mxu1 %v14718_v25  ;;  %v14757_v25 = vld [vmem:[%s19256_s1 + $0x850] sm:$0xff]   ;;  %v14783_v11 = vld [vmem:[%s19256_s1 + $0x900] sm:$0xff]  }
  0xe3   :  { %9519 = vmatmul.mubr.bf16.vlgmr.msra.gmra.mrb[24].mxu0 %v11879_v19  ;;  %v14751_v19 = vld [vmem:[%s19256_s1 + $0x800] sm:$0xff]  }
  0xe4   :  { %9560 = vmatmul.mubr.bf16.vlgmr.msra.gmra.mrb[24].mxu1 %v11881_v22  ;;  %13334 = vmatpush3.bf16.msra.mxu0 %v14719_v26  ;;  %v14754_v22 = vld [vmem:[%s19256_s1 + $0x8c8] sm:$0xff]   ;;  %v14758_v26 = vld [vmem:[%s19256_s1 + $0x8d0] sm:$0xff]   ;;  %v14784_v12 = vld [vmem:[%s19256_s1 + $0x980] sm:$0xff]  }
  0xe5   :  { %13356 = vmatpush3.bf16.msra.mxu1 %v14720_v27  ;;  %13335 = vmatprep.subr.bf16.mxu0 %v14721_v28  ;;  %v14759_v27 = vld [vmem:[%s19256_s1 + $0x810] sm:$0xff]  }
  0xe6   :  { %13357 = vmatprep.subr.bf16.mxu1 %v14722_v29  ;;  %9600 = vmatprep.mubr.bf16.mxu0 %v11884_v14  ;;  %v14760_v28 = vld [vmem:[%s19256_s1 + $0x890] sm:$0xff]   ;;  %v14761_v29 = vld [vmem:[%s19256_s1 + $0x858] sm:$0xff]   ;;  %v14786_v14 = vld [vmem:[%s19256_s1 + $0x9c8] sm:$0xff]  }
  0xe7   :  { %9641 = vmatprep.mubr.bf16.mxu1 %v11886_v16  ;;  %v14788_v16 = vld [vmem:[%s19256_s1 + $0x988] sm:$0xff]  }
  0xe8   :  { %13336 = vmatpush3.bf16.msra.mxu0 %v14723_v30  ;;  %v14762_v30 = vld [vmem:[%s19256_s1 + $0x8d8] sm:$0xff]  }
  0xe9   :  { %13358 = vmatpush3.bf16.msra.mxu1 %v14724_v31  ;;  %13337 = vmatprep.subr.bf16.mxu0 %v14725_v32  ;;  %v14763_v32 = vld [vmem:[%s19256_s1 + $0x818] sm:$0xff]  }
  0xea   :  { %13359 = vmatprep.subr.bf16.mxu1 %v14726_v33 }
  0xec   :  { %13338 = vmatpush3.bf16.msra.mxu0 %v14727_v34  ;;  %v14764_v34 = vld [vmem:[%s19256_s1 + $0x898] sm:$0xff]  }
  0xed   :  { %13360 = vmatpush3.bf16.msra.mxu1 %v14728_v35  ;;  %13339 = vmatprep.subr.bf16.mxu0 %v14729_v36  ;;  %v14765_v36 = vld [vmem:[%s19256_s1 + $0x860] sm:$0xff]  }
  0xee   :  { %13361 = vmatprep.subr.bf16.mxu1 %v14730_v37 }
  0xf0   :  { %13340 = vmatpush3.bf16.msra.mxu0 %v14731_v39  ;;  %v14766_v39 = vld [vmem:[%s19256_s1 + $0x8e0] sm:$0xff]  }
  0xf1   :  { %13362 = vmatpush3.bf16.msra.mxu1 %v14732_v41  ;;  %13341 = vmatprep.subr.bf16.mxu0 %v14733_v43 }
  0xf2   :  { %13363 = vmatprep.subr.bf16.mxu1 %v14734_v46 }
  0xf4   :  { %13342 = vmatpush3.bf16.msra.mxu0 %v14735_v49 }
  0xf5   :  { %13364 = vmatpush3.bf16.msra.mxu1 %v14736_v51  ;;  %13343 = vmatprep.subr.bf16.mxu0 %v14737_v55  ;;  %v14770_v51 = vld [vmem:[%s19256_s1 + $0x8e8] sm:$0xff]  }
  0xf6   :  { %v13041_v38 = vpop.f32.mrb[0].mxu0  ;;  %13365 = vmatprep.subr.bf16.mxu1 %v14738_v58  ;;  %v14772_v55 = vld [vmem:[%s19256_s1 + $0x8a8] sm:$0xff]   ;;  %v14774_v58 = vld [vmem:[%s19256_s1 + $0x8f0] sm:$0xff]  }
  0xf7   :  { %v13063_v40 = vpop.f32.mrb[0].mxu1  ;;  %v13042_v42 = vpop.f32.mrb[1].mxu0 }
  0xf8   :  { %v13043_v44 = vadd.f32 %v13042_v42, %v13041_v38  ;;  %v13064_v45 = vpop.f32.mrb[1].mxu1  ;;  %v13044_v48 = vpop.f32.mrb[2].mxu0  ;;  %13344 = vmatpush3.bf16.msra.mxu0 %v14739_v61  ;;  %v14767_v42 = vld [vmem:[%s19256_s1 + $0x820] sm:$0xff]   ;;  %v14777_v61 = vld [vmem:[%s19256_s1 + $0x878] sm:$0xff]  }
  0xf9   :  { %v13065_v47 = vadd.f32 %v13064_v45, %v13063_v40  ;;  %v13066_v50 = vpop.f32.mrb[2].mxu1  ;;  %v13045_v53 = vpop.f32.mrb[3].mxu0  ;;  %13366 = vmatpush3.bf16.msra.mxu1 %v14740_v63  ;;  %13345 = vmatprep.subr.bf16.mxu0 %v14741_v1  ;;  %v14768_v45 = vld [vmem:[%s19256_s1 + $0x8a0] sm:$0xff]   ;;  %v14779_v63 = vld [vmem:[%s19256_s1 + $0x838] sm:$0xff]  }
  0xfa   :  { %v9029_v54 = vadd.f32 %v13043_v44, %v11854_v52  ;;  %v13046_v56 = vadd.f32 %v13045_v53, %v13044_v48  ;;  %v13067_v57 = vpop.f32.mrb[3].mxu1  ;;  %13367 = vmatprep.subr.bf16.mxu1 %v14742_v2  ;;  %v14769_v48 = vld [vmem:[%s19256_s1 + $0x868] sm:$0xff]   ;;  %v43_v1 = vld [vmem:[%s19257_s0 + $0x80] sm:$0xff] }
  0xfb   :  { %v13068_v59 = vadd.f32 %v13067_v57, %v13066_v50  ;;  %v14771_v53 = vld [vmem:[%s19256_s1 + $0x828] sm:$0xff]   ;;  %v14773_v57 = vld [vmem:[%s19256_s1 + $0x870] sm:$0xff]   ;;  %v107_v2 = vld [vmem:[%s19257_s0 + $0x280] sm:$0xff] }
  0xfc   :  { %v16400_v60 = vadd.f32 %v13065_v47, %v9029_v54  ;;  %v9032_v62 = vadd.f32 %v13046_v56, %v11854_v52  ;;  %13346 = vmatpush3.bf16.msra.mxu0 %v14743_v3  ;;  %v44_v3 = vld [vmem:[%s19257_s0 + $0x88] sm:$0xff] }
  0xfd   :  { %13368 = vmatpush3.bf16.msra.mxu1 %v14744_v4  ;;  %13347 = vmatprep.subr.bf16.mxu0 %v14745_v5  ;;  %v11887_v4 = vcombine.low %v43_v1, %v107_v2  ;;  %v11888_v5 = vcombine.high %v43_v1, %v107_v2  ;;  %v14813_v1 = vld [vmem:[%s19256_s1 + $0xa40] sm:$0xff]  }
  0xfe   :  { %v16408_v0 = vadd.f32 %v13068_v59, %v9032_v62  ;;  %13369 = vmatprep.subr.bf16.mxu1 %v14746_v6  ;;  %v14775_v59 = vld [vmem:[%s19256_s1 + $0x830] sm:$0xff]   ;;  %v14778_v62 = vld [vmem:[%s19256_s1 + $0x8f8] sm:$0xff]   ;;  %v108_v6 = vld [vmem:[%s19257_s0 + $0x288] sm:$0xff] }
  0xff   :  { %v14814_v2 = vld [vmem:[%s19256_s1 + $0xac0] sm:$0xff]  }
 0x100   :  { %13348 = vmatpush3.bf16.msra.mxu0 %v14747_v7  ;;  %v11889_v7 = vcombine.low %v44_v3, %v108_v6 }
 0x101   :  { %13370 = vmatpush3.bf16.msra.mxu1 %v14748_v8  ;;  %13377 = vmatprep.subr.bf16.mxu0 %v14749_v17  ;;  %v11890_v8 = vcombine.high %v44_v3, %v108_v6  ;;  %v14789_v17 = vld [vmem:[%s19256_s1 + $0x950] sm:$0xff]   ;;  %v14815_v3 = vld [vmem:[%s19256_s1 + $0xa00] sm:$0xff]   ;;  %v14818_v6 = vld [vmem:[%s19256_s1 + $0xac8] sm:$0xff]  }
 0x102   :  { %13399 = vmatprep.subr.bf16.mxu1 %v14750_v18  ;;  %v14790_v18 = vld [vmem:[%s19256_s1 + $0x9d0] sm:$0xff]  }
 0x103   :  { %9601 = vmatmul.mubr.bf16.vlgmr.msra.gmra.mrb[28].mxu0 %v11883_v13  ;;  %v14785_v13 = vld [vmem:[%s19256_s1 + $0x948] sm:$0xff]  }
 0x104   :  { %9642 = vmatmul.mubr.bf16.vlgmr.msra.gmra.mrb[28].mxu1 %v11885_v15  ;;  %13378 = vmatpush3.bf16.msra.mxu0 %v14751_v19  ;;  %v14787_v15 = vld [vmem:[%s19256_s1 + $0x908] sm:$0xff]   ;;  %v14791_v19 = vld [vmem:[%s19256_s1 + $0x910] sm:$0xff]  }
 0x105   :  { %13400 = vmatpush3.bf16.msra.mxu1 %v14752_v20  ;;  %13379 = vmatprep.subr.bf16.mxu0 %v14753_v21  ;;  %v14792_v20 = vld [vmem:[%s19256_s1 + $0x990] sm:$0xff]   ;;  %v14793_v21 = vld [vmem:[%s19256_s1 + $0x958] sm:$0xff]  }
 0x106   :  { %13401 = vmatprep.subr.bf16.mxu1 %v14754_v22  ;;  %9682 = vmatprep.mubr.bf16.mxu0 %v11888_v5  ;;  %v14794_v22 = vld [vmem:[%s19256_s1 + $0x9d8] sm:$0xff]   ;;  %v14817_v5 = vld [vmem:[%s19256_s1 + $0xa48] sm:$0xff]  }
 0x107   :  { %9723 = vmatprep.mubr.bf16.mxu1 %v11890_v8  ;;  %v14820_v8 = vld [vmem:[%s19256_s1 + $0xa88] sm:$0xff]  }
 0x108   :  { %13380 = vmatpush3.bf16.msra.mxu0 %v14755_v23 }
 0x109   :  { %13402 = vmatpush3.bf16.msra.mxu1 %v14756_v24  ;;  %13381 = vmatprep.subr.bf16.mxu0 %v14757_v25  ;;  %v14795_v24 = vld [vmem:[%s19256_s1 + $0x918] sm:$0xff]  }
 0x10a   :  { %13403 = vmatprep.subr.bf16.mxu1 %v14758_v26  ;;  %v14796_v26 = vld [vmem:[%s19256_s1 + $0x998] sm:$0xff]  }
 0x10c   :  { %13382 = vmatpush3.bf16.msra.mxu0 %v14759_v27 }
 0x10d   :  { %13404 = vmatpush3.bf16.msra.mxu1 %v14760_v28  ;;  %13383 = vmatprep.subr.bf16.mxu0 %v14761_v29  ;;  %v14797_v28 = vld [vmem:[%s19256_s1 + $0x960] sm:$0xff]  }
 0x10e   :  { %13405 = vmatprep.subr.bf16.mxu1 %v14762_v30 }
 0x110   :  { %13384 = vmatpush3.bf16.msra.mxu0 %v14763_v32 }
 0x111   :  { %13406 = vmatpush3.bf16.msra.mxu1 %v14764_v34  ;;  %13385 = vmatprep.subr.bf16.mxu0 %v14765_v36  ;;  %v14799_v34 = vld [vmem:[%s19256_s1 + $0x920] sm:$0xff]  }
 0x112   :  { %13407 = vmatprep.subr.bf16.mxu1 %v14766_v39 }
 0x114   :  { %13386 = vmatpush3.bf16.msra.mxu0 %v14767_v42 }
 0x115   :  { %13408 = vmatpush3.bf16.msra.mxu1 %v14768_v45  ;;  %13387 = vmatprep.subr.bf16.mxu0 %v14769_v48  ;;  %v14803_v45 = vld [vmem:[%s19256_s1 + $0x928] sm:$0xff]  }
 0x116   :  { %v13085_v31 = vpop.f32.mrb[4].mxu0  ;;  %13409 = vmatprep.subr.bf16.mxu1 %v14770_v51  ;;  %v14807_v51 = vld [vmem:[%s19256_s1 + $0x930] sm:$0xff]  }
 0x117   :  { %v13107_v33 = vpop.f32.mrb[4].mxu1  ;;  %v13086_v35 = vpop.f32.mrb[5].mxu0 }
 0x118   :  { %v13087_v37 = vadd.f32 %v13086_v35, %v13085_v31  ;;  %v13108_v38 = vpop.f32.mrb[5].mxu1  ;;  %v13088_v41 = vpop.f32.mrb[6].mxu0  ;;  %13388 = vmatpush3.bf16.msra.mxu0 %v14771_v53  ;;  %v14798_v31 = vld [vmem:[%s19256_s1 + $0x9e0] sm:$0xff]   ;;  %v14809_v53 = vld [vmem:[%s19256_s1 + $0x978] sm:$0xff]  }
 0x119   :  { %v13109_v40 = vadd.f32 %v13108_v38, %v13107_v33  ;;  %v13110_v44 = vpop.f32.mrb[6].mxu1  ;;  %v13089_v46 = vpop.f32.mrb[7].mxu0  ;;  %13410 = vmatpush3.bf16.msra.mxu1 %v14772_v55  ;;  %13389 = vmatprep.subr.bf16.mxu0 %v14773_v57  ;;  %v14811_v55 = vld [vmem:[%s19256_s1 + $0x938] sm:$0xff]   ;;  %v45_v57 = vld [vmem:[%s19257_s0 + $0x90] sm:$0xff] }
 0x11a   :  { %v9111_v43 = vadd.f32 %v13087_v37, %v16400_v60  ;;  %v13090_v49 = vadd.f32 %v13089_v46, %v13088_v41  ;;  %v13111_v50 = vpop.f32.mrb[7].mxu1  ;;  %13411 = vmatprep.subr.bf16.mxu1 %v14774_v58  ;;  %v14776_v60 = vld [vmem:[%s19256_s1 + $0x8b0] sm:$0xff]   ;;  %v14800_v37 = vld [vmem:[%s19256_s1 + $0x9a0] sm:$0xff]  }
 0x11b   :  { %v13112_v52 = vadd.f32 %v13111_v50, %v13110_v44  ;;  %v14806_v50 = vld [vmem:[%s19256_s1 + $0x9f0] sm:$0xff]  }
 0x11c   :  { %v16507_v47 = vadd.f32 %v13109_v40, %v9111_v43  ;;  %v9114_v54 = vadd.f32 %v13090_v49, %v16408_v0  ;;  %13390 = vmatpush3.bf16.msra.mxu0 %v14775_v59  ;;  %v14780_v0 = vld [vmem:[%s19256_s1 + $0x8b8] sm:$0xff]   ;;  %v14801_v40 = vld [vmem:[%s19256_s1 + $0x968] sm:$0xff]   ;;  %v14805_v49 = vld [vmem:[%s19256_s1 + $0x970] sm:$0xff]  }
 0x11d   :  { %13412 = vmatpush3.bf16.msra.mxu1 %v14776_v60  ;;  %13391 = vmatprep.subr.bf16.mxu0 %v14777_v61  ;;  %v14802_v43 = vld [vmem:[%s19256_s1 + $0x9e8] sm:$0xff]   ;;  %v109_v58 = vld [vmem:[%s19257_s0 + $0x290] sm:$0xff]  ;;  %v46_v61 = vld [vmem:[%s19257_s0 + $0x98] sm:$0xff] }
 0x11e   :  { %v16522_v56 = vadd.f32 %v13112_v52, %v9114_v54  ;;  %13413 = vmatprep.subr.bf16.mxu1 %v14778_v62  ;;  %v14808_v52 = vld [vmem:[%s19256_s1 + $0x9b0] sm:$0xff]   ;;  %v14810_v54 = vld [vmem:[%s19256_s1 + $0x9f8] sm:$0xff]   ;;  %v11891_v59 = vcombine.low %v45_v57, %v109_v58  ;;  %v11892_v60 = vcombine.high %v45_v57, %v109_v58  ;;  %v14845_v57 = vld [vmem:[%s19256_s1 + $0xb40] sm:$0xff]  }
 0x11f   :  { %v110_v62 = vld [vmem:[%s19257_s0 + $0x298] sm:$0xff]  ;;  %v14846_v58 = vld [vmem:[%s19256_s1 + $0xbc0] sm:$0xff]  }
 0x120   :  { %13392 = vmatpush3.bf16.msra.mxu0 %v14779_v63  ;;  %v11893_v63 = vcombine.low %v46_v61, %v110_v62 }
 0x121   :  { %13414 = vmatpush3.bf16.msra.mxu1 %v14780_v0  ;;  %13421 = vmatprep.subr.bf16.mxu0 %v14781_v9  ;;  %v11894_v0 = vcombine.high %v46_v61, %v110_v62  ;;  %v14821_v9 = vld [vmem:[%s19256_s1 + $0xa50] sm:$0xff]   ;;  %v14849_v61 = vld [vmem:[%s19256_s1 + $0xb48] sm:$0xff]  }
 0x122   :  { %13443 = vmatprep.subr.bf16.mxu1 %v14782_v10  ;;  %v14822_v10 = vld [vmem:[%s19256_s1 + $0xad0] sm:$0xff]   ;;  %v14850_v62 = vld [vmem:[%s19256_s1 + $0xbc8] sm:$0xff]  }
 0x123   :  { %9683 = vmatmul.mubr.bf16.vlgmr.msra.gmra.mrb[32].mxu0 %v11887_v4  ;;  %v14816_v4 = vld [vmem:[%s19256_s1 + $0xa80] sm:$0xff]  }
 0x124   :  { %9724 = vmatmul.mubr.bf16.vlgmr.msra.gmra.mrb[32].mxu1 %v11889_v7  ;;  %13422 = vmatpush3.bf16.msra.mxu0 %v14783_v11  ;;  %v14819_v7 = vld [vmem:[%s19256_s1 + $0xa08] sm:$0xff]   ;;  %v14823_v11 = vld [vmem:[%s19256_s1 + $0xa10] sm:$0xff]  }
 0x125   :  { %13444 = vmatpush3.bf16.msra.mxu1 %v14784_v12  ;;  %13423 = vmatprep.subr.bf16.mxu0 %v14785_v13  ;;  %v14824_v12 = vld [vmem:[%s19256_s1 + $0xa90] sm:$0xff]   ;;  %v14825_v13 = vld [vmem:[%s19256_s1 + $0xa58] sm:$0xff]  }
 0x126   :  { %13445 = vmatprep.subr.bf16.mxu1 %v14786_v14  ;;  %9764 = vmatprep.mubr.bf16.mxu0 %v11892_v60  ;;  %v14826_v14 = vld [vmem:[%s19256_s1 + $0xad8] sm:$0xff]   ;;  %v14848_v60 = vld [vmem:[%s19256_s1 + $0xb80] sm:$0xff]  }
 0x127   :  { %9805 = vmatprep.mubr.bf16.mxu1 %v11894_v0  ;;  %v14852_v0 = vld [vmem:[%s19256_s1 + $0xb88] sm:$0xff]  }
 0x128   :  { %13424 = vmatpush3.bf16.msra.mxu0 %v14787_v15 }
 0x129   :  { %13446 = vmatpush3.bf16.msra.mxu1 %v14788_v16  ;;  %13425 = vmatprep.subr.bf16.mxu0 %v14789_v17  ;;  %v14827_v16 = vld [vmem:[%s19256_s1 + $0xa18] sm:$0xff]  }
 0x12a   :  { %13447 = vmatprep.subr.bf16.mxu1 %v14790_v18  ;;  %v14828_v18 = vld [vmem:[%s19256_s1 + $0xa98] sm:$0xff]  }
 0x12c   :  { %13426 = vmatpush3.bf16.msra.mxu0 %v14791_v19 }
 0x12d   :  { %13448 = vmatpush3.bf16.msra.mxu1 %v14792_v20  ;;  %13427 = vmatprep.subr.bf16.mxu0 %v14793_v21  ;;  %v14829_v20 = vld [vmem:[%s19256_s1 + $0xa60] sm:$0xff]  }
 0x12e   :  { %13449 = vmatprep.subr.bf16.mxu1 %v14794_v22 }
 0x130   :  { %13428 = vmatpush3.bf16.msra.mxu0 %v14795_v24 }
 0x131   :  { %13450 = vmatpush3.bf16.msra.mxu1 %v14796_v26  ;;  %13429 = vmatprep.subr.bf16.mxu0 %v14797_v28  ;;  %v14831_v26 = vld [vmem:[%s19256_s1 + $0xa20] sm:$0xff]  }
 0x132   :  { %13451 = vmatprep.subr.bf16.mxu1 %v14798_v31 }
 0x134   :  { %13430 = vmatpush3.bf16.msra.mxu0 %v14799_v34 }
 0x135   :  { %13452 = vmatpush3.bf16.msra.mxu1 %v14800_v37  ;;  %13431 = vmatprep.subr.bf16.mxu0 %v14801_v40  ;;  %v14835_v37 = vld [vmem:[%s19256_s1 + $0xa28] sm:$0xff]  }
 0x136   :  { %v13129_v23 = vpop.f32.mrb[8].mxu0  ;;  %13453 = vmatprep.subr.bf16.mxu1 %v14802_v43  ;;  %v14839_v43 = vld [vmem:[%s19256_s1 + $0xa30] sm:$0xff]  }
 0x137   :  { %v13151_v25 = vpop.f32.mrb[8].mxu1  ;;  %v13130_v27 = vpop.f32.mrb[9].mxu0 }
 0x138   :  { %v13131_v29 = vadd.f32 %v13130_v27, %v13129_v23  ;;  %v13152_v30 = vpop.f32.mrb[9].mxu1  ;;  %v13132_v33 = vpop.f32.mrb[10].mxu0  ;;  %13432 = vmatpush3.bf16.msra.mxu0 %v14803_v45  ;;  %v14830_v23 = vld [vmem:[%s19256_s1 + $0xae0] sm:$0xff]   ;;  %v14841_v45 = vld [vmem:[%s19256_s1 + $0xa78] sm:$0xff]  }
 0x139   :  { %v13153_v32 = vadd.f32 %v13152_v30, %v13151_v25  ;;  %v13154_v36 = vpop.f32.mrb[10].mxu1  ;;  %v13133_v38 = vpop.f32.mrb[11].mxu0  ;;  %13433 = vmatprep.subr.bf16.mxu0 %v14805_v49  ;;  %v47_v49 = vld [vmem:[%s19257_s0 + $0xa0] sm:$0xff] }
 0x13a   :  { %v9193_v35 = vadd.f32 %v13131_v29, %v16507_v47  ;;  %v13134_v41 = vadd.f32 %v13133_v38, %v13132_v33  ;;  %v13155_v42 = vpop.f32.mrb[11].mxu1  ;;  %v14804_v47 = vld [vmem:[%s19256_s1 + $0x9a8] sm:$0xff]   ;;  %v14832_v29 = vld [vmem:[%s19256_s1 + $0xaa0] sm:$0xff]  }
 0x13b   :  { %v13156_v44 = vadd.f32 %v13155_v42, %v13154_v36  ;;  %13454 = vmatpush3.bf16.msra.mxu1 %v14804_v47  ;;  %v14838_v42 = vld [vmem:[%s19256_s1 + $0xaf0] sm:$0xff]   ;;  %v14843_v47 = vld [vmem:[%s19256_s1 + $0xa38] sm:$0xff]  }
 0x13c   :  { %v16621_v39 = vadd.f32 %v13153_v32, %v9193_v35  ;;  %v9196_v46 = vadd.f32 %v13134_v41, %v16522_v56  ;;  %13455 = vmatprep.subr.bf16.mxu1 %v14806_v50  ;;  %13434 = vmatpush3.bf16.msra.mxu0 %v14807_v51  ;;  %v14812_v56 = vld [vmem:[%s19256_s1 + $0x9b8] sm:$0xff]   ;;  %v14833_v32 = vld [vmem:[%s19256_s1 + $0xa68] sm:$0xff]   ;;  %v14837_v41 = vld [vmem:[%s19256_s1 + $0xa70] sm:$0xff]  }
 0x13d   :  { %13435 = vmatprep.subr.bf16.mxu0 %v14809_v53  ;;  %v14834_v35 = vld [vmem:[%s19256_s1 + $0xae8] sm:$0xff]   ;;  %v111_v50 = vld [vmem:[%s19257_s0 + $0x2a0] sm:$0xff] }
 0x13e   :  { %v16636_v48 = vadd.f32 %v13156_v44, %v9196_v46  ;;  %v14840_v44 = vld [vmem:[%s19256_s1 + $0xab0] sm:$0xff]   ;;  %v14842_v46 = vld [vmem:[%s19256_s1 + $0xaf8] sm:$0xff]   ;;  %v48_v51 = vld [vmem:[%s19257_s0 + $0xa8] sm:$0xff]  ;;  %v11895_v53 = vcombine.low %v47_v49, %v111_v50 }
 0x13f   :  { %13456 = vmatpush3.bf16.msra.mxu1 %v14808_v52  ;;  %v112_v52 = vld [vmem:[%s19257_s0 + $0x2a8] sm:$0xff] }
 0x140   :  { %13457 = vmatprep.subr.bf16.mxu1 %v14810_v54  ;;  %13436 = vmatpush3.bf16.msra.mxu0 %v14811_v55  ;;  %v11896_v54 = vcombine.high %v47_v49, %v111_v50  ;;  %v11897_v55 = vcombine.low %v48_v51, %v112_v52  ;;  %v14877_v49 = vld [vmem:[%s19256_s1 + $0xc40] sm:$0xff]  }
 0x141   :  { %13465 = vmatprep.subr.bf16.mxu0 %v14813_v1  ;;  %v14853_v1 = vld [vmem:[%s19256_s1 + $0xb50] sm:$0xff]   ;;  %v14878_v50 = vld [vmem:[%s19256_s1 + $0xcc0] sm:$0xff]  }
 0x143   :  { %13458 = vmatpush3.bf16.msra.mxu1 %v14812_v56  ;;  %9765 = vmatmul.mubr.bf16.vlgmr.msra.gmra.mrb[36].mxu0 %v11891_v59  ;;  %v11898_v56 = vcombine.high %v48_v51, %v112_v52  ;;  %v14847_v59 = vld [vmem:[%s19256_s1 + $0xb00] sm:$0xff]  }
 0x144   :  { %13487 = vmatprep.subr.bf16.mxu1 %v14814_v2  ;;  %13466 = vmatpush3.bf16.msra.mxu0 %v14815_v3  ;;  %v14854_v2 = vld [vmem:[%s19256_s1 + $0xbd0] sm:$0xff]   ;;  %v14879_v51 = vld [vmem:[%s19256_s1 + $0xc00] sm:$0xff]  }
 0x145   :  { %13467 = vmatprep.subr.bf16.mxu0 %v14817_v5  ;;  %9846 = vmatprep.mubr.bf16.mxu0 %v11896_v54  ;;  %v14855_v3 = vld [vmem:[%s19256_s1 + $0xb10] sm:$0xff]   ;;  %v14857_v5 = vld [vmem:[%s19256_s1 + $0xb58] sm:$0xff]   ;;  %v14880_v52 = vld [vmem:[%s19256_s1 + $0xc80] sm:$0xff]  }
 0x146   :  { %9806 = vmatmul.mubr.bf16.vlgmr.msra.gmra.mrb[36].mxu1 %v11893_v63  ;;  %v14851_v63 = vld [vmem:[%s19256_s1 + $0xb08] sm:$0xff]  }
 0x147   :  { %13488 = vmatpush3.bf16.msra.mxu1 %v14816_v4  ;;  %9887 = vmatprep.mubr.bf16.mxu1 %v11898_v56  ;;  %v14856_v4 = vld [vmem:[%s19256_s1 + $0xb90] sm:$0xff]   ;;  %v14882_v54 = vld [vmem:[%s19256_s1 + $0xcc8] sm:$0xff]  }
 0x148   :  { %13489 = vmatprep.subr.bf16.mxu1 %v14818_v6  ;;  %13468 = vmatpush3.bf16.msra.mxu0 %v14819_v7  ;;  %v14858_v6 = vld [vmem:[%s19256_s1 + $0xbd8] sm:$0xff]   ;;  %v14884_v56 = vld [vmem:[%s19256_s1 + $0xc88] sm:$0xff]  }
 0x149   :  { %13469 = vmatprep.subr.bf16.mxu0 %v14821_v9 }
 0x14b   :  { %13490 = vmatpush3.bf16.msra.mxu1 %v14820_v8  ;;  %v14859_v8 = vld [vmem:[%s19256_s1 + $0xb18] sm:$0xff]  }
 0x14c   :  { %13491 = vmatprep.subr.bf16.mxu1 %v14822_v10  ;;  %13470 = vmatpush3.bf16.msra.mxu0 %v14823_v11  ;;  %v14860_v10 = vld [vmem:[%s19256_s1 + $0xb98] sm:$0xff]  }
 0x14d   :  { %13471 = vmatprep.subr.bf16.mxu0 %v14825_v13 }
 0x14f   :  { %13492 = vmatpush3.bf16.msra.mxu1 %v14824_v12  ;;  %v14861_v12 = vld [vmem:[%s19256_s1 + $0xb60] sm:$0xff]  }
 0x150   :  { %13493 = vmatprep.subr.bf16.mxu1 %v14826_v14  ;;  %13472 = vmatpush3.bf16.msra.mxu0 %v14827_v16 }
 0x151   :  { %13473 = vmatprep.subr.bf16.mxu0 %v14829_v20 }
 0x153   :  { %13494 = vmatpush3.bf16.msra.mxu1 %v14828_v18  ;;  %v14863_v18 = vld [vmem:[%s19256_s1 + $0xb20] sm:$0xff]  }
 0x154   :  { %13495 = vmatprep.subr.bf16.mxu1 %v14830_v23  ;;  %13474 = vmatpush3.bf16.msra.mxu0 %v14831_v26 }
 0x155   :  { %13475 = vmatprep.subr.bf16.mxu0 %v14833_v32 }
 0x156   :  { %v13173_v15 = vpop.f32.mrb[12].mxu0 }
 0x157   :  { %v13195_v17 = vpop.f32.mrb[12].mxu1  ;;  %v13174_v19 = vpop.f32.mrb[13].mxu0  ;;  %13496 = vmatpush3.bf16.msra.mxu1 %v14832_v29  ;;  %v14867_v29 = vld [vmem:[%s19256_s1 + $0xb28] sm:$0xff]  }
 0x158   :  { %v13175_v21 = vadd.f32 %v13174_v19, %v13173_v15  ;;  %v13196_v22 = vpop.f32.mrb[13].mxu1  ;;  %v13176_v25 = vpop.f32.mrb[14].mxu0  ;;  %13497 = vmatprep.subr.bf16.mxu1 %v14834_v35  ;;  %13476 = vmatpush3.bf16.msra.mxu0 %v14835_v37  ;;  %v14862_v15 = vld [vmem:[%s19256_s1 + $0xbe0] sm:$0xff]   ;;  %v14871_v35 = vld [vmem:[%s19256_s1 + $0xb30] sm:$0xff]   ;;  %v14873_v37 = vld [vmem:[%s19256_s1 + $0xb78] sm:$0xff]  }
 0x159   :  { %v13197_v24 = vadd.f32 %v13196_v22, %v13195_v17  ;;  %v13198_v28 = vpop.f32.mrb[14].mxu1  ;;  %v13177_v30 = vpop.f32.mrb[15].mxu0  ;;  %13477 = vmatprep.subr.bf16.mxu0 %v14837_v41  ;;  %v49_v41 = vld [vmem:[%s19257_s0 + $0xb0] sm:$0xff] }
 0x15a   :  { %v9275_v27 = vadd.f32 %v13175_v21, %v16621_v39  ;;  %v13178_v33 = vadd.f32 %v13177_v30, %v13176_v25  ;;  %v13199_v34 = vpop.f32.mrb[15].mxu1  ;;  %v14836_v39 = vld [vmem:[%s19256_s1 + $0xaa8] sm:$0xff]   ;;  %v14864_v21 = vld [vmem:[%s19256_s1 + $0xba0] sm:$0xff]  }
 0x15b   :  { %v13200_v36 = vadd.f32 %v13199_v34, %v13198_v28  ;;  %13498 = vmatpush3.bf16.msra.mxu1 %v14836_v39  ;;  %v14870_v34 = vld [vmem:[%s19256_s1 + $0xbf0] sm:$0xff]   ;;  %v14875_v39 = vld [vmem:[%s19256_s1 + $0xb38] sm:$0xff]  }
 0x15c   :  { %v16735_v31 = vadd.f32 %v13197_v24, %v9275_v27  ;;  %v9278_v38 = vadd.f32 %v13178_v33, %v16636_v48  ;;  %13499 = vmatprep.subr.bf16.mxu1 %v14838_v42  ;;  %13478 = vmatpush3.bf16.msra.mxu0 %v14839_v43  ;;  %v14844_v48 = vld [vmem:[%s19256_s1 + $0xab8] sm:$0xff]   ;;  %v14865_v24 = vld [vmem:[%s19256_s1 + $0xb68] sm:$0xff]   ;;  %v14869_v33 = vld [vmem:[%s19256_s1 + $0xb70] sm:$0xff]  }
 0x15d   :  { %13479 = vmatprep.subr.bf16.mxu0 %v14841_v45  ;;  %v14866_v27 = vld [vmem:[%s19256_s1 + $0xbe8] sm:$0xff]   ;;  %v113_v42 = vld [vmem:[%s19257_s0 + $0x2b0] sm:$0xff]  ;;  %v50_v43 = vld [vmem:[%s19257_s0 + $0xb8] sm:$0xff] }
 0x15e   :  { %v16750_v40 = vadd.f32 %v13200_v36, %v9278_v38  ;;  %v14872_v36 = vld [vmem:[%s19256_s1 + $0xbb0] sm:$0xff]   ;;  %v14874_v38 = vld [vmem:[%s19256_s1 + $0xbf8] sm:$0xff]   ;;  %v11900_v45 = vcombine.high %v49_v41, %v113_v42 }
 0x15f   :  { %13500 = vmatpush3.bf16.msra.mxu1 %v14840_v44  ;;  %v11899_v44 = vcombine.low %v49_v41, %v113_v42  ;;  %v14909_v41 = vld [vmem:[%s19256_s1 + $0xd40] sm:$0xff]  }
 0x160   :  { %13501 = vmatprep.subr.bf16.mxu1 %v14842_v46  ;;  %13480 = vmatpush3.bf16.msra.mxu0 %v14843_v47  ;;  %v114_v46 = vld [vmem:[%s19257_s0 + $0x2b8] sm:$0xff]  ;;  %v14910_v42 = vld [vmem:[%s19256_s1 + $0xdc0] sm:$0xff]  }
 0x161   :  { %13509 = vmatprep.subr.bf16.mxu0 %v14845_v57  ;;  %v11901_v47 = vcombine.low %v50_v43, %v114_v46  ;;  %v14885_v57 = vld [vmem:[%s19256_s1 + $0xc50] sm:$0xff]  }
 0x163   :  { %13502 = vmatpush3.bf16.msra.mxu1 %v14844_v48  ;;  %9847 = vmatmul.mubr.bf16.vlgmr.msra.gmra.mrb[40].mxu0 %v11895_v53  ;;  %v11902_v48 = vcombine.high %v50_v43, %v114_v46  ;;  %v14881_v53 = vld [vmem:[%s19256_s1 + $0xc48] sm:$0xff]   ;;  %v14911_v43 = vld [vmem:[%s19256_s1 + $0xd00] sm:$0xff]  }
 0x164   :  { %13531 = vmatprep.subr.bf16.mxu1 %v14846_v58  ;;  %13510 = vmatpush3.bf16.msra.mxu0 %v14847_v59  ;;  %v14886_v58 = vld [vmem:[%s19256_s1 + $0xcd0] sm:$0xff]   ;;  %v14914_v46 = vld [vmem:[%s19256_s1 + $0xdc8] sm:$0xff]  }
 0x165   :  { %13511 = vmatprep.subr.bf16.mxu0 %v14849_v61  ;;  %9928 = vmatprep.mubr.bf16.mxu0 %v11900_v45  ;;  %v14887_v59 = vld [vmem:[%s19256_s1 + $0xc10] sm:$0xff]   ;;  %v14889_v61 = vld [vmem:[%s19256_s1 + $0xc58] sm:$0xff]   ;;  %v14913_v45 = vld [vmem:[%s19256_s1 + $0xd48] sm:$0xff]  }
 0x166   :  { %9888 = vmatmul.mubr.bf16.vlgmr.msra.gmra.mrb[40].mxu1 %v11897_v55  ;;  %v14883_v55 = vld [vmem:[%s19256_s1 + $0xc08] sm:$0xff]  }
 0x167   :  { %13532 = vmatpush3.bf16.msra.mxu1 %v14848_v60  ;;  %9969 = vmatprep.mubr.bf16.mxu1 %v11902_v48  ;;  %v14888_v60 = vld [vmem:[%s19256_s1 + $0xc90] sm:$0xff]   ;;  %v14916_v48 = vld [vmem:[%s19256_s1 + $0xd88] sm:$0xff]  }
 0x168   :  { %13533 = vmatprep.subr.bf16.mxu1 %v14850_v62  ;;  %13512 = vmatpush3.bf16.msra.mxu0 %v14851_v63  ;;  %v14890_v62 = vld [vmem:[%s19256_s1 + $0xcd8] sm:$0xff]  }
 0x169   :  { %13513 = vmatprep.subr.bf16.mxu0 %v14853_v1 }
 0x16b   :  { %13534 = vmatpush3.bf16.msra.mxu1 %v14852_v0  ;;  %v14891_v0 = vld [vmem:[%s19256_s1 + $0xc18] sm:$0xff]  }
 0x16c   :  { %13535 = vmatprep.subr.bf16.mxu1 %v14854_v2  ;;  %13514 = vmatpush3.bf16.msra.mxu0 %v14855_v3  ;;  %v14892_v2 = vld [vmem:[%s19256_s1 + $0xc98] sm:$0xff]  }
 0x16d   :  { %13515 = vmatprep.subr.bf16.mxu0 %v14857_v5 }
 0x16f   :  { %13536 = vmatpush3.bf16.msra.mxu1 %v14856_v4  ;;  %v14893_v4 = vld [vmem:[%s19256_s1 + $0xc60] sm:$0xff]  }
 0x170   :  { %13537 = vmatprep.subr.bf16.mxu1 %v14858_v6  ;;  %13516 = vmatpush3.bf16.msra.mxu0 %v14859_v8 }
 0x171   :  { %13517 = vmatprep.subr.bf16.mxu0 %v14861_v12 }
 0x173   :  { %13538 = vmatpush3.bf16.msra.mxu1 %v14860_v10  ;;  %v14895_v10 = vld [vmem:[%s19256_s1 + $0xc20] sm:$0xff]  }
 0x174   :  { %13539 = vmatprep.subr.bf16.mxu1 %v14862_v15  ;;  %13518 = vmatpush3.bf16.msra.mxu0 %v14863_v18 }
 0x175   :  { %13519 = vmatprep.subr.bf16.mxu0 %v14865_v24 }
 0x176   :  { %v13217_v7 = vpop.f32.mrb[16].mxu0 }
 0x177   :  { %v13239_v9 = vpop.f32.mrb[16].mxu1  ;;  %v13218_v11 = vpop.f32.mrb[17].mxu0  ;;  %13540 = vmatpush3.bf16.msra.mxu1 %v14864_v21  ;;  %v14899_v21 = vld [vmem:[%s19256_s1 + $0xc28] sm:$0xff]  }
 0x178   :  { %v13219_v13 = vadd.f32 %v13218_v11, %v13217_v7  ;;  %v13240_v14 = vpop.f32.mrb[17].mxu1  ;;  %v13220_v17 = vpop.f32.mrb[18].mxu0  ;;  %13541 = vmatprep.subr.bf16.mxu1 %v14866_v27  ;;  %13520 = vmatpush3.bf16.msra.mxu0 %v14867_v29  ;;  %v14894_v7 = vld [vmem:[%s19256_s1 + $0xce0] sm:$0xff]   ;;  %v14903_v27 = vld [vmem:[%s19256_s1 + $0xc30] sm:$0xff]   ;;  %v14905_v29 = vld [vmem:[%s19256_s1 + $0xc78] sm:$0xff]  }
 0x179   :  { %v13241_v16 = vadd.f32 %v13240_v14, %v13239_v9  ;;  %v13242_v20 = vpop.f32.mrb[18].mxu1  ;;  %v13221_v22 = vpop.f32.mrb[19].mxu0  ;;  %13521 = vmatprep.subr.bf16.mxu0 %v14869_v33  ;;  %v51_v33 = vld [vmem:[%s19257_s0 + $0xc0] sm:$0xff] }
 0x17a   :  { %v9357_v19 = vadd.f32 %v13219_v13, %v16735_v31  ;;  %v13222_v25 = vadd.f32 %v13221_v22, %v13220_v17  ;;  %v13243_v26 = vpop.f32.mrb[19].mxu1  ;;  %v14868_v31 = vld [vmem:[%s19256_s1 + $0xba8] sm:$0xff]   ;;  %v14896_v13 = vld [vmem:[%s19256_s1 + $0xca0] sm:$0xff]  }
 0x17b   :  { %v13244_v28 = vadd.f32 %v13243_v26, %v13242_v20  ;;  %13542 = vmatpush3.bf16.msra.mxu1 %v14868_v31  ;;  %v14902_v26 = vld [vmem:[%s19256_s1 + $0xcf0] sm:$0xff]   ;;  %v14907_v31 = vld [vmem:[%s19256_s1 + $0xc38] sm:$0xff]  }
 0x17c   :  { %v16849_v23 = vadd.f32 %v13241_v16, %v9357_v19  ;;  %v9360_v30 = vadd.f32 %v13222_v25, %v16750_v40  ;;  %13543 = vmatprep.subr.bf16.mxu1 %v14870_v34  ;;  %13522 = vmatpush3.bf16.msra.mxu0 %v14871_v35  ;;  %v14876_v40 = vld [vmem:[%s19256_s1 + $0xbb8] sm:$0xff]   ;;  %v14897_v16 = vld [vmem:[%s19256_s1 + $0xc68] sm:$0xff]   ;;  %v14901_v25 = vld [vmem:[%s19256_s1 + $0xc70] sm:$0xff]  }
 0x17d   :  { %13523 = vmatprep.subr.bf16.mxu0 %v14873_v37  ;;  %v14898_v19 = vld [vmem:[%s19256_s1 + $0xce8] sm:$0xff]   ;;  %v115_v34 = vld [vmem:[%s19257_s0 + $0x2c0] sm:$0xff] }
 0x17e   :  { %v16864_v32 = vadd.f32 %v13244_v28, %v9360_v30  ;;  %v14904_v28 = vld [vmem:[%s19256_s1 + $0xcb0] sm:$0xff]   ;;  %v14906_v30 = vld [vmem:[%s19256_s1 + $0xcf8] sm:$0xff]   ;;  %v11903_v35 = vcombine.low %v51_v33, %v115_v34  ;;  %v52_v37 = vld [vmem:[%s19257_s0 + $0xc8] sm:$0xff] }
 0x17f   :  { %13544 = vmatpush3.bf16.msra.mxu1 %v14872_v36  ;;  %v11904_v36 = vcombine.high %v51_v33, %v115_v34  ;;  %v14941_v33 = vld [vmem:[%s19256_s1 + $0xe40] sm:$0xff]  }
 0x180   :  { %13545 = vmatprep.subr.bf16.mxu1 %v14874_v38  ;;  %13524 = vmatpush3.bf16.msra.mxu0 %v14875_v39  ;;  %v116_v38 = vld [vmem:[%s19257_s0 + $0x2c8] sm:$0xff]  ;;  %v14942_v34 = vld [vmem:[%s19256_s1 + $0xec0] sm:$0xff]  }
 0x181   :  { %13553 = vmatprep.subr.bf16.mxu0 %v14877_v49  ;;  %v11905_v39 = vcombine.low %v52_v37, %v116_v38  ;;  %v14917_v49 = vld [vmem:[%s19256_s1 + $0xd50] sm:$0xff]  }
 0x183   :  { %13546 = vmatpush3.bf16.msra.mxu1 %v14876_v40  ;;  %9929 = vmatmul.mubr.bf16.vlgmr.msra.gmra.mrb[44].mxu0 %v11899_v44  ;;  %v11906_v40 = vcombine.high %v52_v37, %v116_v38  ;;  %v14912_v44 = vld [vmem:[%s19256_s1 + $0xd80] sm:$0xff]   ;;  %v14945_v37 = vld [vmem:[%s19256_s1 + $0xe48] sm:$0xff]  }
 0x184   :  { %13575 = vmatprep.subr.bf16.mxu1 %v14878_v50  ;;  %13554 = vmatpush3.bf16.msra.mxu0 %v14879_v51  ;;  %v14918_v50 = vld [vmem:[%s19256_s1 + $0xdd0] sm:$0xff]   ;;  %v14946_v38 = vld [vmem:[%s19256_s1 + $0xec8] sm:$0xff]  }
 0x185   :  { %13555 = vmatprep.subr.bf16.mxu0 %v14881_v53  ;;  %10010 = vmatprep.mubr.bf16.mxu0 %v11904_v36  ;;  %v14919_v51 = vld [vmem:[%s19256_s1 + $0xd10] sm:$0xff]   ;;  %v14921_v53 = vld [vmem:[%s19256_s1 + $0xd58] sm:$0xff]   ;;  %v14944_v36 = vld [vmem:[%s19256_s1 + $0xe80] sm:$0xff]  }
 0x186   :  { %9970 = vmatmul.mubr.bf16.vlgmr.msra.gmra.mrb[44].mxu1 %v11901_v47  ;;  %v14915_v47 = vld [vmem:[%s19256_s1 + $0xd08] sm:$0xff]  }
 0x187   :  { %13576 = vmatpush3.bf16.msra.mxu1 %v14880_v52  ;;  %10051 = vmatprep.mubr.bf16.mxu1 %v11906_v40  ;;  %v14920_v52 = vld [vmem:[%s19256_s1 + $0xd90] sm:$0xff]   ;;  %v14948_v40 = vld [vmem:[%s19256_s1 + $0xe88] sm:$0xff]  }
 0x188   :  { %13577 = vmatprep.subr.bf16.mxu1 %v14882_v54  ;;  %13556 = vmatpush3.bf16.msra.mxu0 %v14883_v55  ;;  %v14922_v54 = vld [vmem:[%s19256_s1 + $0xdd8] sm:$0xff]  }
 0x189   :  { %13557 = vmatprep.subr.bf16.mxu0 %v14885_v57 }
 0x18b   :  { %13578 = vmatpush3.bf16.msra.mxu1 %v14884_v56  ;;  %v14923_v56 = vld [vmem:[%s19256_s1 + $0xd18] sm:$0xff]  }
 0x18c   :  { %13579 = vmatprep.subr.bf16.mxu1 %v14886_v58  ;;  %13558 = vmatpush3.bf16.msra.mxu0 %v14887_v59  ;;  %v14924_v58 = vld [vmem:[%s19256_s1 + $0xd98] sm:$0xff]  }
 0x18d   :  { %13559 = vmatprep.subr.bf16.mxu0 %v14889_v61 }
 0x18f   :  { %13580 = vmatpush3.bf16.msra.mxu1 %v14888_v60  ;;  %v14925_v60 = vld [vmem:[%s19256_s1 + $0xd60] sm:$0xff]  }
 0x190   :  { %13581 = vmatprep.subr.bf16.mxu1 %v14890_v62  ;;  %13560 = vmatpush3.bf16.msra.mxu0 %v14891_v0 }
 0x191   :  { %13561 = vmatprep.subr.bf16.mxu0 %v14893_v4 }
 0x193   :  { %13582 = vmatpush3.bf16.msra.mxu1 %v14892_v2  ;;  %v14927_v2 = vld [vmem:[%s19256_s1 + $0xd20] sm:$0xff]  }
 0x194   :  { %13583 = vmatprep.subr.bf16.mxu1 %v14894_v7  ;;  %13562 = vmatpush3.bf16.msra.mxu0 %v14895_v10 }
 0x195   :  { %13563 = vmatprep.subr.bf16.mxu0 %v14897_v16 }
 0x196   :  { %v13261_v63 = vpop.f32.mrb[20].mxu0 }
 0x197   :  { %v13283_v1 = vpop.f32.mrb[20].mxu1  ;;  %v13262_v3 = vpop.f32.mrb[21].mxu0  ;;  %13584 = vmatpush3.bf16.msra.mxu1 %v14896_v13  ;;  %v14931_v13 = vld [vmem:[%s19256_s1 + $0xd28] sm:$0xff]  }
 0x198   :  { %v13263_v5 = vadd.f32 %v13262_v3, %v13261_v63  ;;  %v13284_v6 = vpop.f32.mrb[21].mxu1  ;;  %v13264_v9 = vpop.f32.mrb[22].mxu0  ;;  %13585 = vmatprep.subr.bf16.mxu1 %v14898_v19  ;;  %13564 = vmatpush3.bf16.msra.mxu0 %v14899_v21  ;;  %v14926_v63 = vld [vmem:[%s19256_s1 + $0xde0] sm:$0xff]   ;;  %v14935_v19 = vld [vmem:[%s19256_s1 + $0xd30] sm:$0xff]   ;;  %v14937_v21 = vld [vmem:[%s19256_s1 + $0xd78] sm:$0xff]  }
 0x199   :  { %v13285_v8 = vadd.f32 %v13284_v6, %v13283_v1  ;;  %v13286_v12 = vpop.f32.mrb[22].mxu1  ;;  %v13265_v14 = vpop.f32.mrb[23].mxu0  ;;  %13565 = vmatprep.subr.bf16.mxu0 %v14901_v25  ;;  %v53_v25 = vld [vmem:[%s19257_s0 + $0xd0] sm:$0xff] }
 0x19a   :  { %v9439_v11 = vadd.f32 %v13263_v5, %v16849_v23  ;;  %v13266_v17 = vadd.f32 %v13265_v14, %v13264_v9  ;;  %v13287_v18 = vpop.f32.mrb[23].mxu1  ;;  %v14900_v23 = vld [vmem:[%s19256_s1 + $0xca8] sm:$0xff]   ;;  %v14928_v5 = vld [vmem:[%s19256_s1 + $0xda0] sm:$0xff]  }
 0x19b   :  { %v13288_v20 = vadd.f32 %v13287_v18, %v13286_v12  ;;  %13586 = vmatpush3.bf16.msra.mxu1 %v14900_v23  ;;  %v14934_v18 = vld [vmem:[%s19256_s1 + $0xdf0] sm:$0xff]   ;;  %v14939_v23 = vld [vmem:[%s19256_s1 + $0xd38] sm:$0xff]  }
 0x19c   :  { %v16963_v15 = vadd.f32 %v13285_v8, %v9439_v11  ;;  %v9442_v22 = vadd.f32 %v13266_v17, %v16864_v32  ;;  %13587 = vmatprep.subr.bf16.mxu1 %v14902_v26  ;;  %13566 = vmatpush3.bf16.msra.mxu0 %v14903_v27  ;;  %v14908_v32 = vld [vmem:[%s19256_s1 + $0xcb8] sm:$0xff]   ;;  %v14929_v8 = vld [vmem:[%s19256_s1 + $0xd68] sm:$0xff]   ;;  %v14933_v17 = vld [vmem:[%s19256_s1 + $0xd70] sm:$0xff]  }
 0x19d   :  { %13567 = vmatprep.subr.bf16.mxu0 %v14905_v29  ;;  %v14930_v11 = vld [vmem:[%s19256_s1 + $0xde8] sm:$0xff]   ;;  %v117_v26 = vld [vmem:[%s19257_s0 + $0x2d0] sm:$0xff]  ;;  %v54_v27 = vld [vmem:[%s19257_s0 + $0xd8] sm:$0xff] }
 0x19e   :  { %v16978_v24 = vadd.f32 %v13288_v20, %v9442_v22  ;;  %v14936_v20 = vld [vmem:[%s19256_s1 + $0xdb0] sm:$0xff]   ;;  %v14938_v22 = vld [vmem:[%s19256_s1 + $0xdf8] sm:$0xff]   ;;  %v11907_v29 = vcombine.low %v53_v25, %v117_v26 }
 0x19f   :  { %13588 = vmatpush3.bf16.msra.mxu1 %v14904_v28  ;;  %v118_v28 = vld [vmem:[%s19257_s0 + $0x2d8] sm:$0xff] }
 0x1a0   :  { %13589 = vmatprep.subr.bf16.mxu1 %v14906_v30  ;;  %13568 = vmatpush3.bf16.msra.mxu0 %v14907_v31  ;;  %v11908_v30 = vcombine.high %v53_v25, %v117_v26  ;;  %v11909_v31 = vcombine.low %v54_v27, %v118_v28  ;;  %v14973_v25 = vld [vmem:[%s19256_s1 + $0xf40] sm:$0xff]  }
 0x1a1   :  { %13597 = vmatprep.subr.bf16.mxu0 %v14909_v41  ;;  %v14949_v41 = vld [vmem:[%s19256_s1 + $0xe50] sm:$0xff]   ;;  %v14974_v26 = vld [vmem:[%s19256_s1 + $0xfc0] sm:$0xff]  }
 0x1a3   :  { %13590 = vmatpush3.bf16.msra.mxu1 %v14908_v32  ;;  %10011 = vmatmul.mubr.bf16.vlgmr.msra.gmra.mrb[48].mxu0 %v11903_v35  ;;  %v11910_v32 = vcombine.high %v54_v27, %v118_v28  ;;  %v14943_v35 = vld [vmem:[%s19256_s1 + $0xe00] sm:$0xff]  }
 0x1a4   :  { %13619 = vmatprep.subr.bf16.mxu1 %v14910_v42  ;;  %13598 = vmatpush3.bf16.msra.mxu0 %v14911_v43  ;;  %v14950_v42 = vld [vmem:[%s19256_s1 + $0xed0] sm:$0xff]   ;;  %v14975_v27 = vld [vmem:[%s19256_s1 + $0xf00] sm:$0xff]  }
 0x1a5   :  { %13599 = vmatprep.subr.bf16.mxu0 %v14913_v45  ;;  %10092 = vmatprep.mubr.bf16.mxu0 %v11908_v30  ;;  %v14951_v43 = vld [vmem:[%s19256_s1 + $0xe10] sm:$0xff]   ;;  %v14953_v45 = vld [vmem:[%s19256_s1 + $0xe58] sm:$0xff]   ;;  %v14976_v28 = vld [vmem:[%s19256_s1 + $0xf80] sm:$0xff]  }
 0x1a6   :  { %10052 = vmatmul.mubr.bf16.vlgmr.msra.gmra.mrb[48].mxu1 %v11905_v39  ;;  %v14947_v39 = vld [vmem:[%s19256_s1 + $0xe08] sm:$0xff]  }
 0x1a7   :  { %13620 = vmatpush3.bf16.msra.mxu1 %v14912_v44  ;;  %10133 = vmatprep.mubr.bf16.mxu1 %v11910_v32  ;;  %v14952_v44 = vld [vmem:[%s19256_s1 + $0xe90] sm:$0xff]   ;;  %v14978_v30 = vld [vmem:[%s19256_s1 + $0xfc8] sm:$0xff]  }
 0x1a8   :  { %13621 = vmatprep.subr.bf16.mxu1 %v14914_v46  ;;  %13600 = vmatpush3.bf16.msra.mxu0 %v14915_v47  ;;  %v14954_v46 = vld [vmem:[%s19256_s1 + $0xed8] sm:$0xff]   ;;  %v14980_v32 = vld [vmem:[%s19256_s1 + $0xf88] sm:$0xff]  }
 0x1a9   :  { %13601 = vmatprep.subr.bf16.mxu0 %v14917_v49  ;;  %v14955_v47 = vld [vmem:[%s19256_s1 + $0xe18] sm:$0xff]  }
 0x1aa   :  { %v14956_v49 = vld [vmem:[%s19256_s1 + $0xe98] sm:$0xff]  }
 0x1ab   :  { %13622 = vmatpush3.bf16.msra.mxu1 %v14916_v48 }
 0x1ac   :  { %13623 = vmatprep.subr.bf16.mxu1 %v14918_v50  ;;  %13602 = vmatpush3.bf16.msra.mxu0 %v14919_v51  ;;  %v14957_v51 = vld [vmem:[%s19256_s1 + $0xe60] sm:$0xff]  }
 0x1ad   :  { %13603 = vmatprep.subr.bf16.mxu0 %v14921_v53  ;;  %v14958_v53 = vld [vmem:[%s19256_s1 + $0xee0] sm:$0xff]  }
 0x1af   :  { %13624 = vmatpush3.bf16.msra.mxu1 %v14920_v52 }
 0x1b0   :  { %13625 = vmatprep.subr.bf16.mxu1 %v14922_v54  ;;  %13604 = vmatpush3.bf16.msra.mxu0 %v14923_v56  ;;  %v14959_v56 = vld [vmem:[%s19256_s1 + $0xe20] sm:$0xff]  }
 0x1b1   :  { %13605 = vmatprep.subr.bf16.mxu0 %v14925_v60 }
 0x1b3   :  { %13626 = vmatpush3.bf16.msra.mxu1 %v14924_v58 }
 0x1b4   :  { %13627 = vmatprep.subr.bf16.mxu1 %v14926_v63  ;;  %13606 = vmatpush3.bf16.msra.mxu0 %v14927_v2 }
 0x1b5   :  { %13607 = vmatprep.subr.bf16.mxu0 %v14929_v8  ;;  %v14965_v8 = vld [vmem:[%s19256_s1 + $0xe70] sm:$0xff]  }
 0x1b6   :  { %v13305_v55 = vpop.f32.mrb[24].mxu0 }
 0x1b7   :  { %v13327_v57 = vpop.f32.mrb[24].mxu1  ;;  %v13306_v59 = vpop.f32.mrb[25].mxu0  ;;  %13628 = vmatpush3.bf16.msra.mxu1 %v14928_v5 }
 0x1b8   :  { %v13307_v61 = vadd.f32 %v13306_v59, %v13305_v55  ;;  %v13328_v62 = vpop.f32.mrb[25].mxu1  ;;  %v13308_v1 = vpop.f32.mrb[26].mxu0  ;;  %13629 = vmatprep.subr.bf16.mxu1 %v14930_v11  ;;  %13608 = vmatpush3.bf16.msra.mxu0 %v14931_v13  ;;  %v14960_v59 = vld [vmem:[%s19256_s1 + $0xea0] sm:$0xff]   ;;  %v14967_v11 = vld [vmem:[%s19256_s1 + $0xe30] sm:$0xff]   ;;  %v14969_v13 = vld [vmem:[%s19256_s1 + $0xe78] sm:$0xff]  }
 0x1b9   :  { %v13329_v0 = vadd.f32 %v13328_v62, %v13327_v57  ;;  %v13330_v4 = vpop.f32.mrb[26].mxu1  ;;  %v13309_v6 = vpop.f32.mrb[27].mxu0  ;;  %13609 = vmatprep.subr.bf16.mxu0 %v14933_v17  ;;  %v14961_v62 = vld [vmem:[%s19256_s1 + $0xe68] sm:$0xff]   ;;  %v55_v17 = vld [vmem:[%s19257_s0 + $0xe0] sm:$0xff] }
 0x1ba   :  { %v9521_v3 = vadd.f32 %v13307_v61, %v16963_v15  ;;  %v13310_v9 = vadd.f32 %v13309_v6, %v13308_v1  ;;  %v13331_v10 = vpop.f32.mrb[27].mxu1  ;;  %v14932_v15 = vld [vmem:[%s19256_s1 + $0xda8] sm:$0xff]  }
 0x1bb   :  { %v13332_v12 = vadd.f32 %v13331_v10, %v13330_v4  ;;  %13630 = vmatpush3.bf16.msra.mxu1 %v14932_v15  ;;  %v14962_v1 = vld [vmem:[%s19256_s1 + $0xee8] sm:$0xff]   ;;  %v14966_v10 = vld [vmem:[%s19256_s1 + $0xef0] sm:$0xff]   ;;  %v14971_v15 = vld [vmem:[%s19256_s1 + $0xe38] sm:$0xff]  }
 0x1bc   :  { %v17077_v7 = vadd.f32 %v13329_v0, %v9521_v3  ;;  %v9524_v14 = vadd.f32 %v13310_v9, %v16978_v24  ;;  %13631 = vmatprep.subr.bf16.mxu1 %v14934_v18  ;;  %13610 = vmatpush3.bf16.msra.mxu0 %v14935_v19  ;;  %v14940_v24 = vld [vmem:[%s19256_s1 + $0xdb8] sm:$0xff]   ;;  %v14963_v4 = vld [vmem:[%s19256_s1 + $0xe28] sm:$0xff]   ;;  %v119_v18 = vld [vmem:[%s19257_s0 + $0x2e0] sm:$0xff] }
 0x1bd   :  { %13611 = vmatprep.subr.bf16.mxu0 %v14937_v21  ;;  %v14964_v6 = vld [vmem:[%s19256_s1 + $0xea8] sm:$0xff]   ;;  %v11912_v21 = vcombine.high %v55_v17, %v119_v18 }
 0x1be   :  { %v17092_v16 = vadd.f32 %v13332_v12, %v9524_v14  ;;  %v14968_v12 = vld [vmem:[%s19256_s1 + $0xeb0] sm:$0xff]   ;;  %v14970_v14 = vld [vmem:[%s19256_s1 + $0xef8] sm:$0xff]   ;;  %v56_v19 = vld [vmem:[%s19257_s0 + $0xe8] sm:$0xff] }
 0x1bf   :  { %13632 = vmatpush3.bf16.msra.mxu1 %v14936_v20  ;;  %v11911_v20 = vcombine.low %v55_v17, %v119_v18  ;;  %v15005_v17 = vld [vmem:[%s19256_s1 + $0x1040] sm:$0xff]  }
 0x1c0   :  { %13633 = vmatprep.subr.bf16.mxu1 %v14938_v22  ;;  %13612 = vmatpush3.bf16.msra.mxu0 %v14939_v23  ;;  %v120_v22 = vld [vmem:[%s19257_s0 + $0x2e8] sm:$0xff]  ;;  %v15006_v18 = vld [vmem:[%s19256_s1 + $0x10c0] sm:$0xff]  }
 0x1c1   :  { %13641 = vmatprep.subr.bf16.mxu0 %v14941_v33  ;;  %v11913_v23 = vcombine.low %v56_v19, %v120_v22  ;;  %v14981_v33 = vld [vmem:[%s19256_s1 + $0xf50] sm:$0xff]  }
 0x1c3   :  { %13634 = vmatpush3.bf16.msra.mxu1 %v14940_v24  ;;  %10093 = vmatmul.mubr.bf16.vlgmr.msra.gmra.mrb[52].mxu0 %v11907_v29  ;;  %v11914_v24 = vcombine.high %v56_v19, %v120_v22  ;;  %v14977_v29 = vld [vmem:[%s19256_s1 + $0xf48] sm:$0xff]   ;;  %v15007_v19 = vld [vmem:[%s19256_s1 + $0x1000] sm:$0xff]  }
 0x1c4   :  { %13663 = vmatprep.subr.bf16.mxu1 %v14942_v34  ;;  %13642 = vmatpush3.bf16.msra.mxu0 %v14943_v35  ;;  %v14982_v34 = vld [vmem:[%s19256_s1 + $0xfd0] sm:$0xff]   ;;  %v15010_v22 = vld [vmem:[%s19256_s1 + $0x10c8] sm:$0xff]  }
 0x1c5   :  { %13643 = vmatprep.subr.bf16.mxu0 %v14945_v37  ;;  %10174 = vmatprep.mubr.bf16.mxu0 %v11912_v21  ;;  %v14983_v35 = vld [vmem:[%s19256_s1 + $0xf10] sm:$0xff]   ;;  %v14985_v37 = vld [vmem:[%s19256_s1 + $0xf58] sm:$0xff]   ;;  %v15009_v21 = vld [vmem:[%s19256_s1 + $0x1048] sm:$0xff]  }
 0x1c6   :  { %10134 = vmatmul.mubr.bf16.vlgmr.msra.gmra.mrb[52].mxu1 %v11909_v31  ;;  %v14979_v31 = vld [vmem:[%s19256_s1 + $0xf08] sm:$0xff]  }
 0x1c7   :  { %13664 = vmatpush3.bf16.msra.mxu1 %v14944_v36  ;;  %10215 = vmatprep.mubr.bf16.mxu1 %v11914_v24  ;;  %v14984_v36 = vld [vmem:[%s19256_s1 + $0xf90] sm:$0xff]   ;;  %v15012_v24 = vld [vmem:[%s19256_s1 + $0x1088] sm:$0xff]  }
 0x1c8   :  { %13665 = vmatprep.subr.bf16.mxu1 %v14946_v38  ;;  %13644 = vmatpush3.bf16.msra.mxu0 %v14947_v39  ;;  %v14986_v38 = vld [vmem:[%s19256_s1 + $0xfd8] sm:$0xff]  }
 0x1c9   :  { %13645 = vmatprep.subr.bf16.mxu0 %v14949_v41 }
 0x1cb   :  { %13666 = vmatpush3.bf16.msra.mxu1 %v14948_v40  ;;  %v14987_v40 = vld [vmem:[%s19256_s1 + $0xf18] sm:$0xff]  }
 0x1cc   :  { %13667 = vmatprep.subr.bf16.mxu1 %v14950_v42  ;;  %13646 = vmatpush3.bf16.msra.mxu0 %v14951_v43  ;;  %v14988_v42 = vld [vmem:[%s19256_s1 + $0xf98] sm:$0xff]  }
 0x1cd   :  { %13647 = vmatprep.subr.bf16.mxu0 %v14953_v45 }
 0x1cf   :  { %13668 = vmatpush3.bf16.msra.mxu1 %v14952_v44  ;;  %v14989_v44 = vld [vmem:[%s19256_s1 + $0xf60] sm:$0xff]  }
 0x1d0   :  { %13669 = vmatprep.subr.bf16.mxu1 %v14954_v46  ;;  %13648 = vmatpush3.bf16.msra.mxu0 %v14955_v47  ;;  %v14990_v47 = vld [vmem:[%s19256_s1 + $0xfe0] sm:$0xff]  }
 0x1d1   :  { %13649 = vmatprep.subr.bf16.mxu0 %v14957_v51 }
 0x1d3   :  { %13670 = vmatpush3.bf16.msra.mxu1 %v14956_v49 }
 0x1d4   :  { %13671 = vmatprep.subr.bf16.mxu1 %v14958_v53  ;;  %13650 = vmatpush3.bf16.msra.mxu0 %v14959_v56  ;;  %v14992_v53 = vld [vmem:[%s19256_s1 + $0xfa0] sm:$0xff]   ;;  %v14993_v56 = vld [vmem:[%s19256_s1 + $0xf68] sm:$0xff]  }
 0x1d5   :  { %13651 = vmatprep.subr.bf16.mxu0 %v14961_v62 }
 0x1d6   :  { %v13349_v48 = vpop.f32.mrb[28].mxu0 }
 0x1d7   :  { %v13371_v50 = vpop.f32.mrb[28].mxu1  ;;  %v13350_v52 = vpop.f32.mrb[29].mxu0  ;;  %13672 = vmatpush3.bf16.msra.mxu1 %v14960_v59  ;;  %v14994_v59 = vld [vmem:[%s19256_s1 + $0xfe8] sm:$0xff]  }
 0x1d8   :  { %v13351_v54 = vadd.f32 %v13350_v52, %v13349_v48  ;;  %v13372_v55 = vpop.f32.mrb[29].mxu1  ;;  %v13352_v58 = vpop.f32.mrb[30].mxu0  ;;  %13673 = vmatprep.subr.bf16.mxu1 %v14962_v1  ;;  %13652 = vmatpush3.bf16.msra.mxu0 %v14963_v4  ;;  %v14997_v1 = vld [vmem:[%s19256_s1 + $0xf70] sm:$0xff]  }
 0x1d9   :  { %v13373_v57 = vadd.f32 %v13372_v55, %v13371_v50  ;;  %v13374_v61 = vpop.f32.mrb[30].mxu1  ;;  %v13353_v63 = vpop.f32.mrb[31].mxu0  ;;  %13653 = vmatprep.subr.bf16.mxu0 %v14965_v8  ;;  %v14991_v50 = vld [vmem:[%s19256_s1 + $0xf20] sm:$0xff]   ;;  %v15000_v4 = vld [vmem:[%s19256_s1 + $0xfb0] sm:$0xff]   ;;  %v15004_v8 = vld [vmem:[%s19256_s1 + $0xfb8] sm:$0xff]  }
 0x1da   :  { %v9603_v60 = vadd.f32 %v13351_v54, %v17077_v7  ;;  %v13354_v2 = vadd.f32 %v13353_v63, %v13352_v58  ;;  %v13375_v3 = vpop.f32.mrb[31].mxu1  ;;  %v14996_v63 = vld [vmem:[%s19256_s1 + $0xfa8] sm:$0xff]  }
 0x1db   :  { %v13376_v5 = vadd.f32 %v13375_v3, %v13374_v61  ;;  %13674 = vmatpush3.bf16.msra.mxu1 %v14964_v6  ;;  %v14995_v61 = vld [vmem:[%s19256_s1 + $0xf28] sm:$0xff]   ;;  %v14999_v3 = vld [vmem:[%s19256_s1 + $0xf30] sm:$0xff]   ;;  %v15002_v6 = vld [vmem:[%s19256_s1 + $0xff8] sm:$0xff]  }
 0x1dc   :  { %v17194_v0 = vadd.f32 %v13373_v57, %v9603_v60  ;;  %v9606_v7 = vadd.f32 %v13354_v2, %v17092_v16  ;;  %13675 = vmatprep.subr.bf16.mxu1 %v14966_v10  ;;  %13654 = vmatpush3.bf16.msra.mxu0 %v14967_v11  ;;  %v14972_v16 = vld [vmem:[%s19256_s1 + $0xeb8] sm:$0xff]   ;;  %v14998_v2 = vld [vmem:[%s19256_s1 + $0xff0] sm:$0xff]  }
 0x1dd   :  { %13655 = vmatprep.subr.bf16.mxu0 %v14969_v13  ;;  %v121_v10 = vld [vmem:[%s19257_s0 + $0x2f0] sm:$0xff]  ;;  %v58_v13 = vld [vmem:[%s19257_s0 + $0xf8] sm:$0xff] }
 0x1de   :  { %v17209_v9 = vadd.f32 %v13376_v5, %v9606_v7  ;;  %v15001_v5 = vld [vmem:[%s19256_s1 + $0xf78] sm:$0xff]  }
 0x1df   :  { %13676 = vmatpush3.bf16.msra.mxu1 %v14968_v12  ;;  %v15003_v7 = vld [vmem:[%s19256_s1 + $0xf38] sm:$0xff]  }
 0x1e0   :  { %13677 = vmatprep.subr.bf16.mxu1 %v14970_v14  ;;  %13656 = vmatpush3.bf16.msra.mxu0 %v14971_v15  ;;  %v122_v14 = vld [vmem:[%s19257_s0 + $0x2f8] sm:$0xff] }
 0x1e1   :  { %13685 = vmatprep.subr.bf16.mxu0 %v14973_v25  ;;  %v11917_v15 = vcombine.low %v58_v13, %v122_v14  ;;  %v15013_v25 = vld [vmem:[%s19256_s1 + $0x1050] sm:$0xff]  }
 0x1e3   :  { %13678 = vmatpush3.bf16.msra.mxu1 %v14972_v16  ;;  %10175 = vmatmul.mubr.bf16.vlgmr.msra.gmra.mrb[56].mxu0 %v11911_v20  ;;  %v11918_v16 = vcombine.high %v58_v13, %v122_v14  ;;  %v15008_v20 = vld [vmem:[%s19256_s1 + $0x1080] sm:$0xff]   ;;  %v15041_v13 = vld [vmem:[%s19256_s1 + $0x1148] sm:$0xff]  }
 0x1e4   :  { %13707 = vmatprep.subr.bf16.mxu1 %v14974_v26  ;;  %13686 = vmatpush3.bf16.msra.mxu0 %v14975_v27  ;;  %v15014_v26 = vld [vmem:[%s19256_s1 + $0x10d0] sm:$0xff]   ;;  %v15042_v14 = vld [vmem:[%s19256_s1 + $0x11c8] sm:$0xff]  }
 0x1e5   :  { %13687 = vmatprep.subr.bf16.mxu0 %v14977_v29  ;;  %v15015_v27 = vld [vmem:[%s19256_s1 + $0x1010] sm:$0xff]   ;;  %v15017_v29 = vld [vmem:[%s19256_s1 + $0x1058] sm:$0xff]  }
 0x1e6   :  { %10216 = vmatmul.mubr.bf16.vlgmr.msra.gmra.mrb[56].mxu1 %v11913_v23  ;;  %v15011_v23 = vld [vmem:[%s19256_s1 + $0x1008] sm:$0xff]  }
 0x1e7   :  { %13708 = vmatpush3.bf16.msra.mxu1 %v14976_v28  ;;  %10297 = vmatprep.mubr.bf16.mxu1 %v11918_v16  ;;  %v15016_v28 = vld [vmem:[%s19256_s1 + $0x1090] sm:$0xff]   ;;  %v15044_v16 = vld [vmem:[%s19256_s1 + $0x1188] sm:$0xff]  }
 0x1e8   :  { %13709 = vmatprep.subr.bf16.mxu1 %v14978_v30  ;;  %13688 = vmatpush3.bf16.msra.mxu0 %v14979_v31  ;;  %v15018_v30 = vld [vmem:[%s19256_s1 + $0x10d8] sm:$0xff]  }
 0x1e9   :  { %13689 = vmatprep.subr.bf16.mxu0 %v14981_v33 }
 0x1eb   :  { %13710 = vmatpush3.bf16.msra.mxu1 %v14980_v32  ;;  %v15019_v32 = vld [vmem:[%s19256_s1 + $0x1018] sm:$0xff]  }
 0x1ec   :  { %13711 = vmatprep.subr.bf16.mxu1 %v14982_v34  ;;  %13690 = vmatpush3.bf16.msra.mxu0 %v14983_v35  ;;  %v15020_v34 = vld [vmem:[%s19256_s1 + $0x1098] sm:$0xff]  }
 0x1ed   :  { %13691 = vmatprep.subr.bf16.mxu0 %v14985_v37 }
 0x1ef   :  { %13712 = vmatpush3.bf16.msra.mxu1 %v14984_v36  ;;  %v15021_v36 = vld [vmem:[%s19256_s1 + $0x1060] sm:$0xff]  }
 0x1f0   :  { %13713 = vmatprep.subr.bf16.mxu1 %v14986_v38  ;;  %13692 = vmatpush3.bf16.msra.mxu0 %v14987_v40 }
 0x1f1   :  { %13693 = vmatprep.subr.bf16.mxu0 %v14989_v44 }
 0x1f3   :  { %13714 = vmatpush3.bf16.msra.mxu1 %v14988_v42  ;;  %v15023_v42 = vld [vmem:[%s19256_s1 + $0x1020] sm:$0xff]  }
 0x1f4   :  { %13715 = vmatprep.subr.bf16.mxu1 %v14990_v47  ;;  %13694 = vmatpush3.bf16.msra.mxu0 %v14991_v50 }
 0x1f5   :  { %13695 = vmatprep.subr.bf16.mxu0 %v14993_v56 }
 0x1f6   :  { %v13393_v39 = vpop.f32.mrb[32].mxu0 }
 0x1f7   :  { %v13415_v41 = vpop.f32.mrb[32].mxu1  ;;  %v13394_v43 = vpop.f32.mrb[33].mxu0  ;;  %13716 = vmatpush3.bf16.msra.mxu1 %v14992_v53  ;;  %v15027_v53 = vld [vmem:[%s19256_s1 + $0x1028] sm:$0xff]  }
 0x1f8   :  { %v13395_v45 = vadd.f32 %v13394_v43, %v13393_v39  ;;  %v13416_v46 = vpop.f32.mrb[33].mxu1  ;;  %v13396_v49 = vpop.f32.mrb[34].mxu0  ;;  %13717 = vmatprep.subr.bf16.mxu1 %v14994_v59  ;;  %13696 = vmatpush3.bf16.msra.mxu0 %v14995_v61  ;;  %v15022_v39 = vld [vmem:[%s19256_s1 + $0x10e0] sm:$0xff]   ;;  %v15031_v59 = vld [vmem:[%s19256_s1 + $0x1030] sm:$0xff]   ;;  %v15033_v61 = vld [vmem:[%s19256_s1 + $0x1078] sm:$0xff]  }
 0x1f9   :  { %v13417_v48 = vadd.f32 %v13416_v46, %v13415_v41  ;;  %v13418_v52 = vpop.f32.mrb[34].mxu1  ;;  %v13397_v54 = vpop.f32.mrb[35].mxu0  ;;  %13697 = vmatprep.subr.bf16.mxu0 %v14997_v1  ;;  %v59_v1 = vld [vmem:[%s19257_s0 + $0x100] sm:$0xff] }
 0x1fa   :  { %v9685_v51 = vadd.f32 %v13395_v45, %v17194_v0  ;;  %v13398_v57 = vadd.f32 %v13397_v54, %v13396_v49  ;;  %v13419_v58 = vpop.f32.mrb[35].mxu1  ;;  %v15024_v45 = vld [vmem:[%s19256_s1 + $0x10a0] sm:$0xff]  }
 0x1fb   :  { %v13420_v60 = vadd.f32 %v13419_v58, %v13418_v52  ;;  %13718 = vmatpush3.bf16.msra.mxu1 %v14996_v63  ;;  %v15030_v58 = vld [vmem:[%s19256_s1 + $0x10f0] sm:$0xff]   ;;  %v15035_v63 = vld [vmem:[%s19256_s1 + $0x1038] sm:$0xff]  }
 0x1fc   :  { %v17305_v55 = vadd.f32 %v13417_v48, %v9685_v51  ;;  %v9688_v62 = vadd.f32 %v13398_v57, %v17209_v9  ;;  %13719 = vmatprep.subr.bf16.mxu1 %v14998_v2  ;;  %13698 = vmatpush3.bf16.msra.mxu0 %v14999_v3  ;;  %v57_v9 = vld [vmem:[%s19257_s0 + $0xf0] sm:$0xff]  ;;  %v15025_v48 = vld [vmem:[%s19256_s1 + $0x1068] sm:$0xff]   ;;  %v123_v2 = vld [vmem:[%s19257_s0 + $0x300] sm:$0xff] }
 0x1fd   :  { %13699 = vmatprep.subr.bf16.mxu0 %v15001_v5  ;;  %v11915_v11 = vcombine.low %v57_v9, %v121_v10  ;;  %v11916_v12 = vcombine.high %v57_v9, %v121_v10  ;;  %v15026_v51 = vld [vmem:[%s19256_s1 + $0x10e8] sm:$0xff]   ;;  %v15029_v57 = vld [vmem:[%s19256_s1 + $0x1070] sm:$0xff]   ;;  %v11919_v5 = vcombine.low %v59_v1, %v123_v2  ;;  %v15037_v9 = vld [vmem:[%s19256_s1 + $0x1140] sm:$0xff]  }
 0x1fe   :  { %v17320_v0 = vadd.f32 %v13420_v60, %v9688_v62  ;;  %v15032_v60 = vld [vmem:[%s19256_s1 + $0x10b0] sm:$0xff]   ;;  %v15034_v62 = vld [vmem:[%s19256_s1 + $0x10f8] sm:$0xff]   ;;  %v60_v3 = vld [vmem:[%s19257_s0 + $0x108] sm:$0xff] }
 0x1ff   :  { %13720 = vmatpush3.bf16.msra.mxu1 %v15000_v4  ;;  %10256 = vmatprep.mubr.bf16.mxu0 %v11916_v12  ;;  %v124_v4 = vld [vmem:[%s19257_s0 + $0x308] sm:$0xff]  ;;  %v15038_v10 = vld [vmem:[%s19256_s1 + $0x11c0] sm:$0xff]  }
 0x200   :  { %13721 = vmatprep.subr.bf16.mxu1 %v15002_v6  ;;  %13700 = vmatpush3.bf16.msra.mxu0 %v15003_v7  ;;  %v11920_v6 = vcombine.high %v59_v1, %v123_v2  ;;  %v11921_v7 = vcombine.low %v60_v3, %v124_v4  ;;  %v15040_v12 = vld [vmem:[%s19256_s1 + $0x1180] sm:$0xff]  }
 0x201   :  { %13729 = vmatprep.subr.bf16.mxu0 %v15005_v17  ;;  %v15045_v17 = vld [vmem:[%s19256_s1 + $0x1150] sm:$0xff]   ;;  %v15069_v1 = vld [vmem:[%s19256_s1 + $0x1240] sm:$0xff]  }
 0x202   :  { %v15070_v2 = vld [vmem:[%s19256_s1 + $0x12c0] sm:$0xff]  }
 0x203   :  { %13722 = vmatpush3.bf16.msra.mxu1 %v15004_v8  ;;  %10257 = vmatmul.mubr.bf16.vlgmr.msra.gmra.mrb[60].mxu0 %v11915_v11  ;;  %v11922_v8 = vcombine.high %v60_v3, %v124_v4  ;;  %v15039_v11 = vld [vmem:[%s19256_s1 + $0x1100] sm:$0xff]  }
 0x204   :  { %13751 = vmatprep.subr.bf16.mxu1 %v15006_v18  ;;  %13730 = vmatpush3.bf16.msra.mxu0 %v15007_v19  ;;  %v15046_v18 = vld [vmem:[%s19256_s1 + $0x11d0] sm:$0xff]   ;;  %v15071_v3 = vld [vmem:[%s19256_s1 + $0x1200] sm:$0xff]  }
 0x205   :  { %13731 = vmatprep.subr.bf16.mxu0 %v15009_v21  ;;  %10338 = vmatprep.mubr.bf16.mxu0 %v11920_v6  ;;  %v15047_v19 = vld [vmem:[%s19256_s1 + $0x1110] sm:$0xff]   ;;  %v15049_v21 = vld [vmem:[%s19256_s1 + $0x1158] sm:$0xff]   ;;  %v15072_v4 = vld [vmem:[%s19256_s1 + $0x1280] sm:$0xff]  }
 0x206   :  { %10298 = vmatmul.mubr.bf16.vlgmr.msra.gmra.mrb[60].mxu1 %v11917_v15  ;;  %v15043_v15 = vld [vmem:[%s19256_s1 + $0x1108] sm:$0xff]  }
 0x207   :  { %13752 = vmatpush3.bf16.msra.mxu1 %v15008_v20  ;;  %10379 = vmatprep.mubr.bf16.mxu1 %v11922_v8  ;;  %v15048_v20 = vld [vmem:[%s19256_s1 + $0x1190] sm:$0xff]   ;;  %v15074_v6 = vld [vmem:[%s19256_s1 + $0x12c8] sm:$0xff]  }
 0x208   :  { %13753 = vmatprep.subr.bf16.mxu1 %v15010_v22  ;;  %13732 = vmatpush3.bf16.msra.mxu0 %v15011_v23  ;;  %v15050_v22 = vld [vmem:[%s19256_s1 + $0x11d8] sm:$0xff]   ;;  %v15076_v8 = vld [vmem:[%s19256_s1 + $0x1288] sm:$0xff]  }
 0x209   :  { %13733 = vmatprep.subr.bf16.mxu0 %v15013_v25  ;;  %v15051_v23 = vld [vmem:[%s19256_s1 + $0x1118] sm:$0xff]  }
 0x20a   :  { %v15052_v25 = vld [vmem:[%s19256_s1 + $0x1198] sm:$0xff]  }
 0x20b   :  { %13754 = vmatpush3.bf16.msra.mxu1 %v15012_v24 }
 0x20c   :  { %13755 = vmatprep.subr.bf16.mxu1 %v15014_v26  ;;  %13734 = vmatpush3.bf16.msra.mxu0 %v15015_v27  ;;  %v15053_v27 = vld [vmem:[%s19256_s1 + $0x1160] sm:$0xff]  }
 0x20d   :  { %13735 = vmatprep.subr.bf16.mxu0 %v15017_v29  ;;  %v15054_v29 = vld [vmem:[%s19256_s1 + $0x11e0] sm:$0xff]  }
 0x20f   :  { %13756 = vmatpush3.bf16.msra.mxu1 %v15016_v28 }
 0x210   :  { %13757 = vmatprep.subr.bf16.mxu1 %v15018_v30  ;;  %13736 = vmatpush3.bf16.msra.mxu0 %v15019_v32  ;;  %v15055_v32 = vld [vmem:[%s19256_s1 + $0x1120] sm:$0xff]  }
 0x211   :  { %13737 = vmatprep.subr.bf16.mxu0 %v15021_v36 }
 0x213   :  { %13758 = vmatpush3.bf16.msra.mxu1 %v15020_v34 }
 0x214   :  { %13759 = vmatprep.subr.bf16.mxu1 %v15022_v39  ;;  %13738 = vmatpush3.bf16.msra.mxu0 %v15023_v42 }
 0x215   :  { %13739 = vmatprep.subr.bf16.mxu0 %v15025_v48  ;;  %v15061_v48 = vld [vmem:[%s19256_s1 + $0x1170] sm:$0xff]  }
 0x216   :  { %v13437_v31 = vpop.f32.mrb[36].mxu0 }
 0x217   :  { %v13438_v35 = vpop.f32.mrb[37].mxu0  ;;  %13760 = vmatpush3.bf16.msra.mxu1 %v15024_v45 }
 0x218   :  { %v13439_v37 = vadd.f32 %v13438_v35, %v13437_v31  ;;  %v13440_v41 = vpop.f32.mrb[38].mxu0  ;;  %13761 = vmatprep.subr.bf16.mxu1 %v15026_v51  ;;  %13740 = vmatpush3.bf16.msra.mxu0 %v15027_v53  ;;  %v15056_v35 = vld [vmem:[%s19256_s1 + $0x11a0] sm:$0xff]   ;;  %v15063_v51 = vld [vmem:[%s19256_s1 + $0x1130] sm:$0xff]   ;;  %v15065_v53 = vld [vmem:[%s19256_s1 + $0x1178] sm:$0xff]  }
 0x219   :  { %v13459_v33 = vpop.f32.mrb[36].mxu1  ;;  %v13441_v46 = vpop.f32.mrb[39].mxu0  ;;  %13741 = vmatprep.subr.bf16.mxu0 %v15029_v57  ;;  %v61_v57 = vld [vmem:[%s19257_s0 + $0x110] sm:$0xff] }
 0x21a   :  { %v13460_v38 = vpop.f32.mrb[37].mxu1  ;;  %v9767_v43 = vadd.f32 %v13439_v37, %v17305_v55  ;;  %v13442_v49 = vadd.f32 %v13441_v46, %v13440_v41  ;;  %v15028_v55 = vld [vmem:[%s19256_s1 + $0x10a8] sm:$0xff]  }
 0x21b   :  { %v13461_v40 = vadd.f32 %v13460_v38, %v13459_v33  ;;  %v13462_v44 = vpop.f32.mrb[38].mxu1  ;;  %13762 = vmatpush3.bf16.msra.mxu1 %v15028_v55  ;;  %v15057_v38 = vld [vmem:[%s19256_s1 + $0x1168] sm:$0xff]   ;;  %v15067_v55 = vld [vmem:[%s19256_s1 + $0x1138] sm:$0xff]  }
 0x21c   :  { %v13463_v50 = vpop.f32.mrb[39].mxu1  ;;  %v9770_v54 = vadd.f32 %v13442_v49, %v17320_v0  ;;  %13763 = vmatprep.subr.bf16.mxu1 %v15030_v58  ;;  %13742 = vmatpush3.bf16.msra.mxu0 %v15031_v59  ;;  %v15036_v0 = vld [vmem:[%s19256_s1 + $0x10b8] sm:$0xff]   ;;  %v15058_v41 = vld [vmem:[%s19256_s1 + $0x11e8] sm:$0xff]   ;;  %v125_v58 = vld [vmem:[%s19257_s0 + $0x310] sm:$0xff] }
 0x21d   :  { %v17419_v47 = vadd.f32 %v13461_v40, %v9767_v43  ;;  %v13464_v52 = vadd.f32 %v13463_v50, %v13462_v44  ;;  %13743 = vmatprep.subr.bf16.mxu0 %v15033_v61  ;;  %v15059_v44 = vld [vmem:[%s19256_s1 + $0x1128] sm:$0xff]   ;;  %v15062_v50 = vld [vmem:[%s19256_s1 + $0x11f0] sm:$0xff]   ;;  %v62_v59 = vld [vmem:[%s19257_s0 + $0x118] sm:$0xff]  ;;  %v11924_v61 = vcombine.high %v61_v57, %v125_v58 }
 0x21e   :  { %v15060_v46 = vld [vmem:[%s19256_s1 + $0x11a8] sm:$0xff]  }
 0x21f   :  { %v17434_v56 = vadd.f32 %v13464_v52, %v9770_v54  ;;  %13764 = vmatpush3.bf16.msra.mxu1 %v15032_v60  ;;  %v15064_v52 = vld [vmem:[%s19256_s1 + $0x11b0] sm:$0xff]   ;;  %v15066_v54 = vld [vmem:[%s19256_s1 + $0x11f8] sm:$0xff]   ;;  %v11923_v60 = vcombine.low %v61_v57, %v125_v58  ;;  %v15101_v57 = vld [vmem:[%s19256_s1 + $0x1340] sm:$0xff]  }
 0x220   :  { %13765 = vmatprep.subr.bf16.mxu1 %v15034_v62  ;;  %13744 = vmatpush3.bf16.msra.mxu0 %v15035_v63  ;;  %v126_v62 = vld [vmem:[%s19257_s0 + $0x318] sm:$0xff]  ;;  %v15102_v58 = vld [vmem:[%s19256_s1 + $0x13c0] sm:$0xff]  }
 0x221   :  { %13773 = vmatprep.subr.bf16.mxu0 %v15037_v9  ;;  %v11925_v63 = vcombine.low %v62_v59, %v126_v62  ;;  %v15077_v9 = vld [vmem:[%s19256_s1 + $0x1250] sm:$0xff]  }
 0x223   :  { %13766 = vmatpush3.bf16.msra.mxu1 %v15036_v0  ;;  %10339 = vmatmul.mubr.bf16.vlgmr.msra.gmra.mrb[64].mxu0 %v11919_v5  ;;  %v11926_v0 = vcombine.high %v62_v59, %v126_v62  ;;  %v15073_v5 = vld [vmem:[%s19256_s1 + $0x1248] sm:$0xff]   ;;  %v15103_v59 = vld [vmem:[%s19256_s1 + $0x1300] sm:$0xff]  }
 0x224   :  { %13795 = vmatprep.subr.bf16.mxu1 %v15038_v10  ;;  %13774 = vmatpush3.bf16.msra.mxu0 %v15039_v11  ;;  %v15078_v10 = vld [vmem:[%s19256_s1 + $0x12d0] sm:$0xff]   ;;  %v15106_v62 = vld [vmem:[%s19256_s1 + $0x13c8] sm:$0xff]  }
 0x225   :  { %13775 = vmatprep.subr.bf16.mxu0 %v15041_v13  ;;  %10420 = vmatprep.mubr.bf16.mxu0 %v11924_v61  ;;  %v15079_v11 = vld [vmem:[%s19256_s1 + $0x1210] sm:$0xff]   ;;  %v15081_v13 = vld [vmem:[%s19256_s1 + $0x1258] sm:$0xff]   ;;  %v15105_v61 = vld [vmem:[%s19256_s1 + $0x1348] sm:$0xff]  }
 0x226   :  { %10380 = vmatmul.mubr.bf16.vlgmr.msra.gmra.mrb[64].mxu1 %v11921_v7  ;;  %v15075_v7 = vld [vmem:[%s19256_s1 + $0x1208] sm:$0xff]  }
 0x227   :  { %13796 = vmatpush3.bf16.msra.mxu1 %v15040_v12  ;;  %10461 = vmatprep.mubr.bf16.mxu1 %v11926_v0  ;;  %v15080_v12 = vld [vmem:[%s19256_s1 + $0x1290] sm:$0xff]   ;;  %v15108_v0 = vld [vmem:[%s19256_s1 + $0x1388] sm:$0xff]  }
 0x228   :  { %13797 = vmatprep.subr.bf16.mxu1 %v15042_v14  ;;  %13776 = vmatpush3.bf16.msra.mxu0 %v15043_v15  ;;  %v15082_v14 = vld [vmem:[%s19256_s1 + $0x12d8] sm:$0xff]  }
 0x229   :  { %13777 = vmatprep.subr.bf16.mxu0 %v15045_v17 }
 0x22b   :  { %13798 = vmatpush3.bf16.msra.mxu1 %v15044_v16  ;;  %v15083_v16 = vld [vmem:[%s19256_s1 + $0x1218] sm:$0xff]  }
 0x22c   :  { %13799 = vmatprep.subr.bf16.mxu1 %v15046_v18  ;;  %13778 = vmatpush3.bf16.msra.mxu0 %v15047_v19  ;;  %v15084_v18 = vld [vmem:[%s19256_s1 + $0x1298] sm:$0xff]  }
 0x22d   :  { %13779 = vmatprep.subr.bf16.mxu0 %v15049_v21 }
 0x22f   :  { %13800 = vmatpush3.bf16.msra.mxu1 %v15048_v20  ;;  %v15085_v20 = vld [vmem:[%s19256_s1 + $0x1260] sm:$0xff]  }
 0x230   :  { %13801 = vmatprep.subr.bf16.mxu1 %v15050_v22  ;;  %13780 = vmatpush3.bf16.msra.mxu0 %v15051_v23  ;;  %v15086_v23 = vld [vmem:[%s19256_s1 + $0x12e0] sm:$0xff]  }
 0x231   :  { %13781 = vmatprep.subr.bf16.mxu0 %v15053_v27 }
 0x233   :  { %13802 = vmatpush3.bf16.msra.mxu1 %v15052_v25 }
 0x234   :  { %13803 = vmatprep.subr.bf16.mxu1 %v15054_v29  ;;  %13782 = vmatpush3.bf16.msra.mxu0 %v15055_v32  ;;  %v15088_v29 = vld [vmem:[%s19256_s1 + $0x12a0] sm:$0xff]   ;;  %v15089_v32 = vld [vmem:[%s19256_s1 + $0x1268] sm:$0xff]  }
 0x235   :  { %13783 = vmatprep.subr.bf16.mxu0 %v15057_v38 }
 0x236   :  { %v13481_v24 = vpop.f32.mrb[40].mxu0 }
 0x237   :  { %v13482_v28 = vpop.f32.mrb[41].mxu0  ;;  %13804 = vmatpush3.bf16.msra.mxu1 %v15056_v35  ;;  %v15090_v35 = vld [vmem:[%s19256_s1 + $0x12e8] sm:$0xff]  }
 0x238   :  { %v13483_v30 = vadd.f32 %v13482_v28, %v13481_v24  ;;  %v13484_v34 = vpop.f32.mrb[42].mxu0  ;;  %13805 = vmatprep.subr.bf16.mxu1 %v15058_v41  ;;  %13784 = vmatpush3.bf16.msra.mxu0 %v15059_v44  ;;  %v15093_v41 = vld [vmem:[%s19256_s1 + $0x1270] sm:$0xff]  }
 0x239   :  { %v13503_v26 = vpop.f32.mrb[40].mxu1  ;;  %v13485_v39 = vpop.f32.mrb[43].mxu0  ;;  %13785 = vmatprep.subr.bf16.mxu0 %v15061_v48  ;;  %v15096_v44 = vld [vmem:[%s19256_s1 + $0x12b0] sm:$0xff]   ;;  %v15100_v48 = vld [vmem:[%s19256_s1 + $0x12b8] sm:$0xff]  }
 0x23a   :  { %v13504_v31 = vpop.f32.mrb[41].mxu1  ;;  %v9849_v36 = vadd.f32 %v13483_v30, %v17419_v47  ;;  %v13486_v42 = vadd.f32 %v13485_v39, %v13484_v34  ;;  %v15092_v39 = vld [vmem:[%s19256_s1 + $0x12a8] sm:$0xff]  }
 0x23b   :  { %v13505_v33 = vadd.f32 %v13504_v31, %v13503_v26  ;;  %v13506_v37 = vpop.f32.mrb[42].mxu1  ;;  %13806 = vmatpush3.bf16.msra.mxu1 %v15060_v46  ;;  %v15087_v26 = vld [vmem:[%s19256_s1 + $0x1220] sm:$0xff]   ;;  %v15098_v46 = vld [vmem:[%s19256_s1 + $0x12f8] sm:$0xff]  }
 0x23c   :  { %v13507_v43 = vpop.f32.mrb[43].mxu1  ;;  %v9852_v47 = vadd.f32 %v13486_v42, %v17434_v56  ;;  %13807 = vmatprep.subr.bf16.mxu1 %v15062_v50  ;;  %13786 = vmatpush3.bf16.msra.mxu0 %v15063_v51  ;;  %v15068_v56 = vld [vmem:[%s19256_s1 + $0x11b8] sm:$0xff]   ;;  %v15094_v42 = vld [vmem:[%s19256_s1 + $0x12f0] sm:$0xff]   ;;  %v127_v50 = vld [vmem:[%s19257_s0 + $0x320] sm:$0xff] }
 0x23d   :  { %v17536_v40 = vadd.f32 %v13505_v33, %v9849_v36  ;;  %v13508_v45 = vadd.f32 %v13507_v43, %v13506_v37  ;;  %13787 = vmatprep.subr.bf16.mxu0 %v15065_v53  ;;  %v15091_v37 = vld [vmem:[%s19256_s1 + $0x1228] sm:$0xff]   ;;  %v15095_v43 = vld [vmem:[%s19256_s1 + $0x1230] sm:$0xff]  }
 0x23e   :  { %v64_v53 = vld [vmem:[%s19257_s0 + $0x128] sm:$0xff] }
 0x23f   :  { %v17551_v49 = vadd.f32 %v13508_v45, %v9852_v47  ;;  %13808 = vmatpush3.bf16.msra.mxu1 %v15064_v52  ;;  %v15097_v45 = vld [vmem:[%s19256_s1 + $0x1278] sm:$0xff]  }
 0x240   :  { %13809 = vmatprep.subr.bf16.mxu1 %v15066_v54  ;;  %13788 = vmatpush3.bf16.msra.mxu0 %v15067_v55  ;;  %v15099_v47 = vld [vmem:[%s19256_s1 + $0x1238] sm:$0xff]   ;;  %v128_v54 = vld [vmem:[%s19257_s0 + $0x328] sm:$0xff] }
 0x241   :  { %13817 = vmatprep.subr.bf16.mxu0 %v15069_v1  ;;  %v11929_v55 = vcombine.low %v64_v53, %v128_v54  ;;  %v15109_v1 = vld [vmem:[%s19256_s1 + $0x1350] sm:$0xff]  }
 0x243   :  { %13810 = vmatpush3.bf16.msra.mxu1 %v15068_v56  ;;  %10421 = vmatmul.mubr.bf16.vlgmr.msra.gmra.mrb[68].mxu0 %v11923_v60  ;;  %v11930_v56 = vcombine.high %v64_v53, %v128_v54  ;;  %v15104_v60 = vld [vmem:[%s19256_s1 + $0x1380] sm:$0xff]   ;;  %v15137_v53 = vld [vmem:[%s19256_s1 + $0x1448] sm:$0xff]  }
 0x244   :  { %13839 = vmatprep.subr.bf16.mxu1 %v15070_v2  ;;  %13818 = vmatpush3.bf16.msra.mxu0 %v15071_v3  ;;  %v15110_v2 = vld [vmem:[%s19256_s1 + $0x13d0] sm:$0xff]   ;;  %v15138_v54 = vld [vmem:[%s19256_s1 + $0x14c8] sm:$0xff]  }
 0x245   :  { %13819 = vmatprep.subr.bf16.mxu0 %v15073_v5  ;;  %v15111_v3 = vld [vmem:[%s19256_s1 + $0x1310] sm:$0xff]   ;;  %v15113_v5 = vld [vmem:[%s19256_s1 + $0x1358] sm:$0xff]  }
 0x246   :  { %10462 = vmatmul.mubr.bf16.vlgmr.msra.gmra.mrb[68].mxu1 %v11925_v63  ;;  %v15107_v63 = vld [vmem:[%s19256_s1 + $0x1308] sm:$0xff]  }
 0x247   :  { %13840 = vmatpush3.bf16.msra.mxu1 %v15072_v4  ;;  %10543 = vmatprep.mubr.bf16.mxu1 %v11930_v56  ;;  %v15112_v4 = vld [vmem:[%s19256_s1 + $0x1390] sm:$0xff]   ;;  %v15140_v56 = vld [vmem:[%s19256_s1 + $0x1488] sm:$0xff]  }
 0x248   :  { %13841 = vmatprep.subr.bf16.mxu1 %v15074_v6  ;;  %13820 = vmatpush3.bf16.msra.mxu0 %v15075_v7  ;;  %v15114_v6 = vld [vmem:[%s19256_s1 + $0x13d8] sm:$0xff]  }
 0x249   :  { %13821 = vmatprep.subr.bf16.mxu0 %v15077_v9 }
 0x24b   :  { %13842 = vmatpush3.bf16.msra.mxu1 %v15076_v8  ;;  %v15115_v8 = vld [vmem:[%s19256_s1 + $0x1318] sm:$0xff]  }
 0x24c   :  { %13843 = vmatprep.subr.bf16.mxu1 %v15078_v10  ;;  %13822 = vmatpush3.bf16.msra.mxu0 %v15079_v11  ;;  %v15116_v10 = vld [vmem:[%s19256_s1 + $0x1398] sm:$0xff]  }
 0x24d   :  { %13823 = vmatprep.subr.bf16.mxu0 %v15081_v13 }
 0x24f   :  { %13844 = vmatpush3.bf16.msra.mxu1 %v15080_v12  ;;  %v15117_v12 = vld [vmem:[%s19256_s1 + $0x1360] sm:$0xff]  }
 0x250   :  { %13845 = vmatprep.subr.bf16.mxu1 %v15082_v14  ;;  %13824 = vmatpush3.bf16.msra.mxu0 %v15083_v16 }
 0x251   :  { %13825 = vmatprep.subr.bf16.mxu0 %v15085_v20 }
 0x253   :  { %13846 = vmatpush3.bf16.msra.mxu1 %v15084_v18  ;;  %v15119_v18 = vld [vmem:[%s19256_s1 + $0x1320] sm:$0xff]  }
 0x254   :  { %13847 = vmatprep.subr.bf16.mxu1 %v15086_v23  ;;  %13826 = vmatpush3.bf16.msra.mxu0 %v15087_v26 }
 0x255   :  { %13827 = vmatprep.subr.bf16.mxu0 %v15089_v32 }
 0x256   :  { %v13525_v15 = vpop.f32.mrb[44].mxu0 }
 0x257   :  { %v13526_v19 = vpop.f32.mrb[45].mxu0  ;;  %13848 = vmatpush3.bf16.msra.mxu1 %v15088_v29  ;;  %v15123_v29 = vld [vmem:[%s19256_s1 + $0x1328] sm:$0xff]  }
 0x258   :  { %v13527_v21 = vadd.f32 %v13526_v19, %v13525_v15  ;;  %v13528_v25 = vpop.f32.mrb[46].mxu0  ;;  %13849 = vmatprep.subr.bf16.mxu1 %v15090_v35  ;;  %13828 = vmatpush3.bf16.msra.mxu0 %v15091_v37  ;;  %v15118_v15 = vld [vmem:[%s19256_s1 + $0x13e0] sm:$0xff]   ;;  %v15127_v35 = vld [vmem:[%s19256_s1 + $0x1330] sm:$0xff]   ;;  %v15129_v37 = vld [vmem:[%s19256_s1 + $0x1378] sm:$0xff]  }
 0x259   :  { %v13547_v17 = vpop.f32.mrb[44].mxu1  ;;  %v13529_v30 = vpop.f32.mrb[47].mxu0  ;;  %13829 = vmatprep.subr.bf16.mxu0 %v15093_v41  ;;  %v65_v41 = vld [vmem:[%s19257_s0 + $0x130] sm:$0xff] }
 0x25a   :  { %v13548_v22 = vpop.f32.mrb[45].mxu1  ;;  %v9931_v27 = vadd.f32 %v13527_v21, %v17536_v40  ;;  %v13530_v33 = vadd.f32 %v13529_v30, %v13528_v25  ;;  %v15120_v21 = vld [vmem:[%s19256_s1 + $0x13a0] sm:$0xff]  }
 0x25b   :  { %v13549_v24 = vadd.f32 %v13548_v22, %v13547_v17  ;;  %v13550_v28 = vpop.f32.mrb[46].mxu1  ;;  %13850 = vmatpush3.bf16.msra.mxu1 %v15092_v39  ;;  %v15131_v39 = vld [vmem:[%s19256_s1 + $0x1338] sm:$0xff]  }
 0x25c   :  { %v13551_v34 = vpop.f32.mrb[47].mxu1  ;;  %v9934_v38 = vadd.f32 %v13530_v33, %v17551_v49  ;;  %13851 = vmatprep.subr.bf16.mxu1 %v15094_v42  ;;  %13830 = vmatpush3.bf16.msra.mxu0 %v15095_v43  ;;  %v63_v49 = vld [vmem:[%s19257_s0 + $0x120] sm:$0xff]  ;;  %v15125_v33 = vld [vmem:[%s19256_s1 + $0x1370] sm:$0xff]   ;;  %v66_v43 = vld [vmem:[%s19257_s0 + $0x138] sm:$0xff] }
 0x25d   :  { %v17647_v31 = vadd.f32 %v13549_v24, %v9931_v27  ;;  %v13552_v36 = vadd.f32 %v13551_v34, %v13550_v28  ;;  %13831 = vmatprep.subr.bf16.mxu0 %v15097_v45  ;;  %v11927_v51 = vcombine.low %v63_v49, %v127_v50  ;;  %v11928_v52 = vcombine.high %v63_v49, %v127_v50  ;;  %v15121_v24 = vld [vmem:[%s19256_s1 + $0x1368] sm:$0xff]   ;;  %v15126_v34 = vld [vmem:[%s19256_s1 + $0x13f0] sm:$0xff]   ;;  %v15133_v49 = vld [vmem:[%s19256_s1 + $0x1440] sm:$0xff]  }
 0x25e   :  { %v15122_v27 = vld [vmem:[%s19256_s1 + $0x13e8] sm:$0xff]   ;;  %v129_v42 = vld [vmem:[%s19257_s0 + $0x330] sm:$0xff]  ;;  %v15134_v50 = vld [vmem:[%s19256_s1 + $0x14c0] sm:$0xff]  }
 0x25f   :  { %v17662_v40 = vadd.f32 %v13552_v36, %v9934_v38  ;;  %13852 = vmatpush3.bf16.msra.mxu1 %v15096_v44  ;;  %10502 = vmatprep.mubr.bf16.mxu0 %v11928_v52  ;;  %v15128_v36 = vld [vmem:[%s19256_s1 + $0x13b0] sm:$0xff]   ;;  %v15130_v38 = vld [vmem:[%s19256_s1 + $0x13f8] sm:$0xff]   ;;  %v11931_v45 = vcombine.low %v65_v41, %v129_v42  ;;  %v15136_v52 = vld [vmem:[%s19256_s1 + $0x1480] sm:$0xff]  }
 0x260   :  { %13853 = vmatprep.subr.bf16.mxu1 %v15098_v46  ;;  %13832 = vmatpush3.bf16.msra.mxu0 %v15099_v47  ;;  %v130_v44 = vld [vmem:[%s19257_s0 + $0x338] sm:$0xff]  ;;  %v11932_v46 = vcombine.high %v65_v41, %v129_v42  ;;  %v15165_v41 = vld [vmem:[%s19256_s1 + $0x1540] sm:$0xff]  }
 0x261   :  { %13861 = vmatprep.subr.bf16.mxu0 %v15101_v57  ;;  %v11933_v47 = vcombine.low %v66_v43, %v130_v44  ;;  %v15141_v57 = vld [vmem:[%s19256_s1 + $0x1450] sm:$0xff]   ;;  %v15166_v42 = vld [vmem:[%s19256_s1 + $0x15c0] sm:$0xff]  }
 0x263   :  { %13854 = vmatpush3.bf16.msra.mxu1 %v15100_v48  ;;  %10503 = vmatmul.mubr.bf16.vlgmr.msra.gmra.mrb[72].mxu0 %v11927_v51  ;;  %v11934_v48 = vcombine.high %v66_v43, %v130_v44  ;;  %v15135_v51 = vld [vmem:[%s19256_s1 + $0x1400] sm:$0xff]  }
 0x264   :  { %13883 = vmatprep.subr.bf16.mxu1 %v15102_v58  ;;  %13862 = vmatpush3.bf16.msra.mxu0 %v15103_v59  ;;  %v15142_v58 = vld [vmem:[%s19256_s1 + $0x14d0] sm:$0xff]   ;;  %v15167_v43 = vld [vmem:[%s19256_s1 + $0x1500] sm:$0xff]  }
 0x265   :  { %13863 = vmatprep.subr.bf16.mxu0 %v15105_v61  ;;  %10584 = vmatprep.mubr.bf16.mxu0 %v11932_v46  ;;  %v15143_v59 = vld [vmem:[%s19256_s1 + $0x1410] sm:$0xff]   ;;  %v15145_v61 = vld [vmem:[%s19256_s1 + $0x1458] sm:$0xff]   ;;  %v15168_v44 = vld [vmem:[%s19256_s1 + $0x1580] sm:$0xff]  }
 0x266   :  { %10544 = vmatmul.mubr.bf16.vlgmr.msra.gmra.mrb[72].mxu1 %v11929_v55  ;;  %v15139_v55 = vld [vmem:[%s19256_s1 + $0x1408] sm:$0xff]  }
 0x267   :  { %13884 = vmatpush3.bf16.msra.mxu1 %v15104_v60  ;;  %10625 = vmatprep.mubr.bf16.mxu1 %v11934_v48  ;;  %v15144_v60 = vld [vmem:[%s19256_s1 + $0x1490] sm:$0xff]   ;;  %v15170_v46 = vld [vmem:[%s19256_s1 + $0x15c8] sm:$0xff]  }
 0x268   :  { %13885 = vmatprep.subr.bf16.mxu1 %v15106_v62  ;;  %13864 = vmatpush3.bf16.msra.mxu0 %v15107_v63  ;;  %v15146_v62 = vld [vmem:[%s19256_s1 + $0x14d8] sm:$0xff]   ;;  %v15172_v48 = vld [vmem:[%s19256_s1 + $0x1588] sm:$0xff]  }
 0x269   :  { %13865 = vmatprep.subr.bf16.mxu0 %v15109_v1  ;;  %v15147_v63 = vld [vmem:[%s19256_s1 + $0x1418] sm:$0xff]  }
 0x26a   :  { %v15148_v1 = vld [vmem:[%s19256_s1 + $0x1498] sm:$0xff]  }
 0x26b   :  { %13886 = vmatpush3.bf16.msra.mxu1 %v15108_v0 }
 0x26c   :  { %13887 = vmatprep.subr.bf16.mxu1 %v15110_v2  ;;  %13866 = vmatpush3.bf16.msra.mxu0 %v15111_v3  ;;  %v15149_v3 = vld [vmem:[%s19256_s1 + $0x1460] sm:$0xff]  }
 0x26d   :  { %13867 = vmatprep.subr.bf16.mxu0 %v15113_v5  ;;  %v15150_v5 = vld [vmem:[%s19256_s1 + $0x14e0] sm:$0xff]  }
 0x26f   :  { %13888 = vmatpush3.bf16.msra.mxu1 %v15112_v4 }
 0x270   :  { %13889 = vmatprep.subr.bf16.mxu1 %v15114_v6  ;;  %13868 = vmatpush3.bf16.msra.mxu0 %v15115_v8  ;;  %v15151_v8 = vld [vmem:[%s19256_s1 + $0x1420] sm:$0xff]  }
 0x271   :  { %13869 = vmatprep.subr.bf16.mxu0 %v15117_v12 }
 0x273   :  { %13890 = vmatpush3.bf16.msra.mxu1 %v15116_v10 }
 0x274   :  { %13891 = vmatprep.subr.bf16.mxu1 %v15118_v15  ;;  %13870 = vmatpush3.bf16.msra.mxu0 %v15119_v18 }
 0x275   :  { %13871 = vmatprep.subr.bf16.mxu0 %v15121_v24  ;;  %v15157_v24 = vld [vmem:[%s19256_s1 + $0x1470] sm:$0xff]  }
 0x276   :  { %v13569_v7 = vpop.f32.mrb[48].mxu0 }
 0x277   :  { %v13570_v11 = vpop.f32.mrb[49].mxu0  ;;  %13892 = vmatpush3.bf16.msra.mxu1 %v15120_v21 }
 0x278   :  { %v13571_v13 = vadd.f32 %v13570_v11, %v13569_v7  ;;  %v13572_v17 = vpop.f32.mrb[50].mxu0  ;;  %13893 = vmatprep.subr.bf16.mxu1 %v15122_v27  ;;  %13872 = vmatpush3.bf16.msra.mxu0 %v15123_v29  ;;  %v15152_v11 = vld [vmem:[%s19256_s1 + $0x14a0] sm:$0xff]   ;;  %v15159_v27 = vld [vmem:[%s19256_s1 + $0x1430] sm:$0xff]   ;;  %v15161_v29 = vld [vmem:[%s19256_s1 + $0x1478] sm:$0xff]  }
 0x279   :  { %v13591_v9 = vpop.f32.mrb[48].mxu1  ;;  %v13573_v22 = vpop.f32.mrb[51].mxu0  ;;  %13873 = vmatprep.subr.bf16.mxu0 %v15125_v33  ;;  %v67_v33 = vld [vmem:[%s19257_s0 + $0x140] sm:$0xff] }
 0x27a   :  { %v13592_v14 = vpop.f32.mrb[49].mxu1  ;;  %v10013_v19 = vadd.f32 %v13571_v13, %v17647_v31  ;;  %v13574_v25 = vadd.f32 %v13573_v22, %v13572_v17  ;;  %v15124_v31 = vld [vmem:[%s19256_s1 + $0x13a8] sm:$0xff]  }
 0x27b   :  { %v13593_v16 = vadd.f32 %v13592_v14, %v13591_v9  ;;  %v13594_v20 = vpop.f32.mrb[50].mxu1  ;;  %13894 = vmatpush3.bf16.msra.mxu1 %v15124_v31  ;;  %v15153_v14 = vld [vmem:[%s19256_s1 + $0x1468] sm:$0xff]   ;;  %v15163_v31 = vld [vmem:[%s19256_s1 + $0x1438] sm:$0xff]  }
 0x27c   :  { %v13595_v26 = vpop.f32.mrb[51].mxu1  ;;  %v10016_v30 = vadd.f32 %v13574_v25, %v17662_v40  ;;  %13895 = vmatprep.subr.bf16.mxu1 %v15126_v34  ;;  %13874 = vmatpush3.bf16.msra.mxu0 %v15127_v35  ;;  %v15132_v40 = vld [vmem:[%s19256_s1 + $0x13b8] sm:$0xff]   ;;  %v15154_v17 = vld [vmem:[%s19256_s1 + $0x14e8] sm:$0xff]   ;;  %v131_v34 = vld [vmem:[%s19257_s0 + $0x340] sm:$0xff] }
 0x27d   :  { %v17761_v23 = vadd.f32 %v13593_v16, %v10013_v19  ;;  %v13596_v28 = vadd.f32 %v13595_v26, %v13594_v20  ;;  %13875 = vmatprep.subr.bf16.mxu0 %v15129_v37  ;;  %v15155_v20 = vld [vmem:[%s19256_s1 + $0x1428] sm:$0xff]   ;;  %v15158_v26 = vld [vmem:[%s19256_s1 + $0x14f0] sm:$0xff]   ;;  %v11936_v37 = vcombine.high %v67_v33, %v131_v34 }
 0x27e   :  { %v15156_v22 = vld [vmem:[%s19256_s1 + $0x14a8] sm:$0xff]  }
 0x27f   :  { %v17776_v32 = vadd.f32 %v13596_v28, %v10016_v30  ;;  %13896 = vmatpush3.bf16.msra.mxu1 %v15128_v36  ;;  %v15160_v28 = vld [vmem:[%s19256_s1 + $0x14b0] sm:$0xff]   ;;  %v15162_v30 = vld [vmem:[%s19256_s1 + $0x14f8] sm:$0xff]   ;;  %v68_v35 = vld [vmem:[%s19257_s0 + $0x148] sm:$0xff]  ;;  %v11935_v36 = vcombine.low %v67_v33, %v131_v34 }
 0x280   :  { %13897 = vmatprep.subr.bf16.mxu1 %v15130_v38  ;;  %13876 = vmatpush3.bf16.msra.mxu0 %v15131_v39  ;;  %v132_v38 = vld [vmem:[%s19257_s0 + $0x348] sm:$0xff]  ;;  %v15197_v33 = vld [vmem:[%s19256_s1 + $0x1640] sm:$0xff]  }
 0x281   :  { %13905 = vmatprep.subr.bf16.mxu0 %v15133_v49  ;;  %v11937_v39 = vcombine.low %v68_v35, %v132_v38  ;;  %v15173_v49 = vld [vmem:[%s19256_s1 + $0x1550] sm:$0xff]   ;;  %v15198_v34 = vld [vmem:[%s19256_s1 + $0x16c0] sm:$0xff]  }
 0x283   :  { %13898 = vmatpush3.bf16.msra.mxu1 %v15132_v40  ;;  %10585 = vmatmul.mubr.bf16.vlgmr.msra.gmra.mrb[76].mxu0 %v11931_v45  ;;  %v11938_v40 = vcombine.high %v68_v35, %v132_v38  ;;  %v15169_v45 = vld [vmem:[%s19256_s1 + $0x1548] sm:$0xff]   ;;  %v15199_v35 = vld [vmem:[%s19256_s1 + $0x1600] sm:$0xff]  }
 0x284   :  { %13927 = vmatprep.subr.bf16.mxu1 %v15134_v50  ;;  %13906 = vmatpush3.bf16.msra.mxu0 %v15135_v51  ;;  %v15174_v50 = vld [vmem:[%s19256_s1 + $0x15d0] sm:$0xff]   ;;  %v15202_v38 = vld [vmem:[%s19256_s1 + $0x16c8] sm:$0xff]  }
 0x285   :  { %13907 = vmatprep.subr.bf16.mxu0 %v15137_v53  ;;  %10666 = vmatprep.mubr.bf16.mxu0 %v11936_v37  ;;  %v15175_v51 = vld [vmem:[%s19256_s1 + $0x1510] sm:$0xff]   ;;  %v15177_v53 = vld [vmem:[%s19256_s1 + $0x1558] sm:$0xff]   ;;  %v15201_v37 = vld [vmem:[%s19256_s1 + $0x1648] sm:$0xff]  }
 0x286   :  { %10626 = vmatmul.mubr.bf16.vlgmr.msra.gmra.mrb[76].mxu1 %v11933_v47  ;;  %v15171_v47 = vld [vmem:[%s19256_s1 + $0x1508] sm:$0xff]  }
 0x287   :  { %13928 = vmatpush3.bf16.msra.mxu1 %v15136_v52  ;;  %10707 = vmatprep.mubr.bf16.mxu1 %v11938_v40  ;;  %v15176_v52 = vld [vmem:[%s19256_s1 + $0x1590] sm:$0xff]   ;;  %v15204_v40 = vld [vmem:[%s19256_s1 + $0x1688] sm:$0xff]  }
 0x288   :  { %13929 = vmatprep.subr.bf16.mxu1 %v15138_v54  ;;  %13908 = vmatpush3.bf16.msra.mxu0 %v15139_v55  ;;  %v15178_v54 = vld [vmem:[%s19256_s1 + $0x15d8] sm:$0xff]  }
 0x289   :  { %13909 = vmatprep.subr.bf16.mxu0 %v15141_v57 }
 0x28b   :  { %13930 = vmatpush3.bf16.msra.mxu1 %v15140_v56  ;;  %v15179_v56 = vld [vmem:[%s19256_s1 + $0x1518] sm:$0xff]  }
 0x28c   :  { %13931 = vmatprep.subr.bf16.mxu1 %v15142_v58  ;;  %13910 = vmatpush3.bf16.msra.mxu0 %v15143_v59  ;;  %v15180_v58 = vld [vmem:[%s19256_s1 + $0x1598] sm:$0xff]  }
 0x28d   :  { %13911 = vmatprep.subr.bf16.mxu0 %v15145_v61 }
 0x28f   :  { %13932 = vmatpush3.bf16.msra.mxu1 %v15144_v60  ;;  %v15181_v60 = vld [vmem:[%s19256_s1 + $0x1560] sm:$0xff]  }
 0x290   :  { %13933 = vmatprep.subr.bf16.mxu1 %v15146_v62  ;;  %13912 = vmatpush3.bf16.msra.mxu0 %v15147_v63  ;;  %v15182_v63 = vld [vmem:[%s19256_s1 + $0x15e0] sm:$0xff]  }
 0x291   :  { %13913 = vmatprep.subr.bf16.mxu0 %v15149_v3 }
 0x293   :  { %13934 = vmatpush3.bf16.msra.mxu1 %v15148_v1 }
 0x294   :  { %13935 = vmatprep.subr.bf16.mxu1 %v15150_v5  ;;  %13914 = vmatpush3.bf16.msra.mxu0 %v15151_v8  ;;  %v15184_v5 = vld [vmem:[%s19256_s1 + $0x15a0] sm:$0xff]   ;;  %v15185_v8 = vld [vmem:[%s19256_s1 + $0x1568] sm:$0xff]  }
 0x295   :  { %13915 = vmatprep.subr.bf16.mxu0 %v15153_v14 }
 0x296   :  { %v13613_v0 = vpop.f32.mrb[52].mxu0 }
 0x297   :  { %v13614_v4 = vpop.f32.mrb[53].mxu0  ;;  %13936 = vmatpush3.bf16.msra.mxu1 %v15152_v11  ;;  %v15186_v11 = vld [vmem:[%s19256_s1 + $0x15e8] sm:$0xff]  }
 0x298   :  { %v13615_v6 = vadd.f32 %v13614_v4, %v13613_v0  ;;  %v13616_v10 = vpop.f32.mrb[54].mxu0  ;;  %13937 = vmatprep.subr.bf16.mxu1 %v15154_v17  ;;  %13916 = vmatpush3.bf16.msra.mxu0 %v15155_v20  ;;  %v15189_v17 = vld [vmem:[%s19256_s1 + $0x1570] sm:$0xff]  }
 0x299   :  { %v13635_v2 = vpop.f32.mrb[52].mxu1  ;;  %v13617_v15 = vpop.f32.mrb[55].mxu0  ;;  %13917 = vmatprep.subr.bf16.mxu0 %v15157_v24  ;;  %v15192_v20 = vld [vmem:[%s19256_s1 + $0x15b0] sm:$0xff]   ;;  %v15196_v24 = vld [vmem:[%s19256_s1 + $0x15b8] sm:$0xff]  }
 0x29a   :  { %v13636_v7 = vpop.f32.mrb[53].mxu1  ;;  %v10095_v12 = vadd.f32 %v13615_v6, %v17761_v23  ;;  %v13618_v18 = vadd.f32 %v13617_v15, %v13616_v10  ;;  %v15188_v15 = vld [vmem:[%s19256_s1 + $0x15a8] sm:$0xff]  }
 0x29b   :  { %v13637_v9 = vadd.f32 %v13636_v7, %v13635_v2  ;;  %v13638_v13 = vpop.f32.mrb[54].mxu1  ;;  %13938 = vmatpush3.bf16.msra.mxu1 %v15156_v22  ;;  %v15183_v2 = vld [vmem:[%s19256_s1 + $0x1520] sm:$0xff]   ;;  %v15194_v22 = vld [vmem:[%s19256_s1 + $0x15f8] sm:$0xff]  }
 0x29c   :  { %v13639_v19 = vpop.f32.mrb[55].mxu1  ;;  %v10098_v23 = vadd.f32 %v13618_v18, %v17776_v32  ;;  %13939 = vmatprep.subr.bf16.mxu1 %v15158_v26  ;;  %13918 = vmatpush3.bf16.msra.mxu0 %v15159_v27  ;;  %v15164_v32 = vld [vmem:[%s19256_s1 + $0x14b8] sm:$0xff]   ;;  %v15190_v18 = vld [vmem:[%s19256_s1 + $0x15f0] sm:$0xff]  }
 0x29d   :  { %v17878_v16 = vadd.f32 %v13637_v9, %v10095_v12  ;;  %v13640_v21 = vadd.f32 %v13639_v19, %v13638_v13  ;;  %13919 = vmatprep.subr.bf16.mxu0 %v15161_v29  ;;  %v15187_v13 = vld [vmem:[%s19256_s1 + $0x1528] sm:$0xff]   ;;  %v15191_v19 = vld [vmem:[%s19256_s1 + $0x1530] sm:$0xff]   ;;  %v70_v29 = vld [vmem:[%s19257_s0 + $0x158] sm:$0xff] }
 0x29e   :  { %v133_v26 = vld [vmem:[%s19257_s0 + $0x350] sm:$0xff] }
 0x29f   :  { %v17893_v25 = vadd.f32 %v13640_v21, %v10098_v23  ;;  %13940 = vmatpush3.bf16.msra.mxu1 %v15160_v28  ;;  %v15193_v21 = vld [vmem:[%s19256_s1 + $0x1578] sm:$0xff]  }
 0x2a0   :  { %13941 = vmatprep.subr.bf16.mxu1 %v15162_v30  ;;  %13920 = vmatpush3.bf16.msra.mxu0 %v15163_v31  ;;  %v15195_v23 = vld [vmem:[%s19256_s1 + $0x1538] sm:$0xff]  }
 0x2a1   :  { %13949 = vmatprep.subr.bf16.mxu0 %v15165_v41  ;;  %v134_v30 = vld [vmem:[%s19257_s0 + $0x358] sm:$0xff]  ;;  %v15205_v41 = vld [vmem:[%s19256_s1 + $0x1650] sm:$0xff]  }
 0x2a2   :  { %v11941_v31 = vcombine.low %v70_v29, %v134_v30 }
 0x2a3   :  { %13942 = vmatpush3.bf16.msra.mxu1 %v15164_v32  ;;  %10667 = vmatmul.mubr.bf16.vlgmr.msra.gmra.mrb[80].mxu0 %v11935_v36  ;;  %v11942_v32 = vcombine.high %v70_v29, %v134_v30  ;;  %v15200_v36 = vld [vmem:[%s19256_s1 + $0x1680] sm:$0xff]   ;;  %v15233_v29 = vld [vmem:[%s19256_s1 + $0x1748] sm:$0xff]  }
 0x2a4   :  { %13971 = vmatprep.subr.bf16.mxu1 %v15166_v42  ;;  %13950 = vmatpush3.bf16.msra.mxu0 %v15167_v43  ;;  %v15206_v42 = vld [vmem:[%s19256_s1 + $0x16d0] sm:$0xff]   ;;  %v15234_v30 = vld [vmem:[%s19256_s1 + $0x17c8] sm:$0xff]  }
 0x2a5   :  { %13951 = vmatprep.subr.bf16.mxu0 %v15169_v45  ;;  %v15207_v43 = vld [vmem:[%s19256_s1 + $0x1610] sm:$0xff]   ;;  %v15209_v45 = vld [vmem:[%s19256_s1 + $0x1658] sm:$0xff]  }
 0x2a6   :  { %10708 = vmatmul.mubr.bf16.vlgmr.msra.gmra.mrb[80].mxu1 %v11937_v39  ;;  %v15203_v39 = vld [vmem:[%s19256_s1 + $0x1608] sm:$0xff]  }
 0x2a7   :  { %13972 = vmatpush3.bf16.msra.mxu1 %v15168_v44  ;;  %10789 = vmatprep.mubr.bf16.mxu1 %v11942_v32  ;;  %v15208_v44 = vld [vmem:[%s19256_s1 + $0x1690] sm:$0xff]   ;;  %v15236_v32 = vld [vmem:[%s19256_s1 + $0x1788] sm:$0xff]  }
 0x2a8   :  { %13973 = vmatprep.subr.bf16.mxu1 %v15170_v46  ;;  %13952 = vmatpush3.bf16.msra.mxu0 %v15171_v47  ;;  %v15210_v46 = vld [vmem:[%s19256_s1 + $0x16d8] sm:$0xff]  }
 0x2a9   :  { %13953 = vmatprep.subr.bf16.mxu0 %v15173_v49 }
 0x2ab   :  { %13974 = vmatpush3.bf16.msra.mxu1 %v15172_v48  ;;  %v15211_v48 = vld [vmem:[%s19256_s1 + $0x1618] sm:$0xff]  }
 0x2ac   :  { %13975 = vmatprep.subr.bf16.mxu1 %v15174_v50  ;;  %13954 = vmatpush3.bf16.msra.mxu0 %v15175_v51  ;;  %v15212_v50 = vld [vmem:[%s19256_s1 + $0x1698] sm:$0xff]  }
 0x2ad   :  { %13955 = vmatprep.subr.bf16.mxu0 %v15177_v53 }
 0x2af   :  { %13976 = vmatpush3.bf16.msra.mxu1 %v15176_v52  ;;  %v15213_v52 = vld [vmem:[%s19256_s1 + $0x1660] sm:$0xff]  }
 0x2b0   :  { %13977 = vmatprep.subr.bf16.mxu1 %v15178_v54  ;;  %13956 = vmatpush3.bf16.msra.mxu0 %v15179_v56 }
 0x2b1   :  { %13957 = vmatprep.subr.bf16.mxu0 %v15181_v60 }
 0x2b3   :  { %13978 = vmatpush3.bf16.msra.mxu1 %v15180_v58  ;;  %v15215_v58 = vld [vmem:[%s19256_s1 + $0x1620] sm:$0xff]  }
 0x2b4   :  { %13979 = vmatprep.subr.bf16.mxu1 %v15182_v63  ;;  %13958 = vmatpush3.bf16.msra.mxu0 %v15183_v2 }
 0x2b5   :  { %13959 = vmatprep.subr.bf16.mxu0 %v15185_v8 }
 0x2b6   :  { %v13657_v55 = vpop.f32.mrb[56].mxu0 }
 0x2b7   :  { %v13658_v59 = vpop.f32.mrb[57].mxu0  ;;  %13980 = vmatpush3.bf16.msra.mxu1 %v15184_v5  ;;  %v15219_v5 = vld [vmem:[%s19256_s1 + $0x1628] sm:$0xff]  }
 0x2b8   :  { %v13659_v61 = vadd.f32 %v13658_v59, %v13657_v55  ;;  %v13660_v1 = vpop.f32.mrb[58].mxu0  ;;  %13981 = vmatprep.subr.bf16.mxu1 %v15186_v11  ;;  %13960 = vmatpush3.bf16.msra.mxu0 %v15187_v13  ;;  %v15214_v55 = vld [vmem:[%s19256_s1 + $0x16e0] sm:$0xff]   ;;  %v15223_v11 = vld [vmem:[%s19256_s1 + $0x1630] sm:$0xff]   ;;  %v15225_v13 = vld [vmem:[%s19256_s1 + $0x1678] sm:$0xff]  }
 0x2b9   :  { %v13679_v57 = vpop.f32.mrb[56].mxu1  ;;  %v13661_v6 = vpop.f32.mrb[59].mxu0  ;;  %13961 = vmatprep.subr.bf16.mxu0 %v15189_v17  ;;  %v71_v17 = vld [vmem:[%s19257_s0 + $0x160] sm:$0xff] }
 0x2ba   :  { %v13680_v62 = vpop.f32.mrb[57].mxu1  ;;  %v10177_v3 = vadd.f32 %v13659_v61, %v17878_v16  ;;  %v13662_v9 = vadd.f32 %v13661_v6, %v13660_v1  ;;  %v15216_v61 = vld [vmem:[%s19256_s1 + $0x16a0] sm:$0xff]  }
 0x2bb   :  { %v13681_v0 = vadd.f32 %v13680_v62, %v13679_v57  ;;  %v13682_v4 = vpop.f32.mrb[58].mxu1  ;;  %13982 = vmatpush3.bf16.msra.mxu1 %v15188_v15  ;;  %v15227_v15 = vld [vmem:[%s19256_s1 + $0x1638] sm:$0xff]  }
 0x2bc   :  { %v13683_v10 = vpop.f32.mrb[59].mxu1  ;;  %v10180_v14 = vadd.f32 %v13662_v9, %v17893_v25  ;;  %13983 = vmatprep.subr.bf16.mxu1 %v15190_v18  ;;  %13962 = vmatpush3.bf16.msra.mxu0 %v15191_v19  ;;  %v69_v25 = vld [vmem:[%s19257_s0 + $0x150] sm:$0xff]  ;;  %v135_v18 = vld [vmem:[%s19257_s0 + $0x360] sm:$0xff]  ;;  %v72_v19 = vld [vmem:[%s19257_s0 + $0x168] sm:$0xff] }
 0x2bd   :  { %v17989_v7 = vadd.f32 %v13681_v0, %v10177_v3  ;;  %v13684_v12 = vadd.f32 %v13683_v10, %v13682_v4  ;;  %13963 = vmatprep.subr.bf16.mxu0 %v15193_v21  ;;  %v11939_v27 = vcombine.low %v69_v25, %v133_v26  ;;  %v11940_v28 = vcombine.high %v69_v25, %v133_v26  ;;  %v15217_v0 = vld [vmem:[%s19256_s1 + $0x1668] sm:$0xff]   ;;  %v15221_v9 = vld [vmem:[%s19256_s1 + $0x1670] sm:$0xff]   ;;  %v15229_v25 = vld [vmem:[%s19256_s1 + $0x1740] sm:$0xff]  }
 0x2be   :  { %v15218_v3 = vld [vmem:[%s19256_s1 + $0x16e8] sm:$0xff]   ;;  %v15222_v10 = vld [vmem:[%s19256_s1 + $0x16f0] sm:$0xff]   ;;  %v11943_v21 = vcombine.low %v71_v17, %v135_v18  ;;  %v15230_v26 = vld [vmem:[%s19256_s1 + $0x17c0] sm:$0xff]  }
 0x2bf   :  { %v18004_v16 = vadd.f32 %v13684_v12, %v10180_v14  ;;  %13984 = vmatpush3.bf16.msra.mxu1 %v15192_v20  ;;  %10748 = vmatprep.mubr.bf16.mxu0 %v11940_v28  ;;  %v15224_v12 = vld [vmem:[%s19256_s1 + $0x16b0] sm:$0xff]   ;;  %v15226_v14 = vld [vmem:[%s19256_s1 + $0x16f8] sm:$0xff]   ;;  %v136_v20 = vld [vmem:[%s19257_s0 + $0x368] sm:$0xff] }
 0x2c0   :  { %13985 = vmatprep.subr.bf16.mxu1 %v15194_v22  ;;  %13964 = vmatpush3.bf16.msra.mxu0 %v15195_v23  ;;  %v11944_v22 = vcombine.high %v71_v17, %v135_v18  ;;  %v11945_v23 = vcombine.low %v72_v19, %v136_v20  ;;  %v15232_v28 = vld [vmem:[%s19256_s1 + $0x1780] sm:$0xff]  }
 0x2c1   :  { %13993 = vmatprep.subr.bf16.mxu0 %v15197_v33  ;;  %v15237_v33 = vld [vmem:[%s19256_s1 + $0x1750] sm:$0xff]   ;;  %v15261_v17 = vld [vmem:[%s19256_s1 + $0x1840] sm:$0xff]  }
 0x2c2   :  { %v15262_v18 = vld [vmem:[%s19256_s1 + $0x18c0] sm:$0xff]  }
 0x2c3   :  { %13986 = vmatpush3.bf16.msra.mxu1 %v15196_v24  ;;  %10749 = vmatmul.mubr.bf16.vlgmr.msra.gmra.mrb[84].mxu0 %v11939_v27  ;;  %v11946_v24 = vcombine.high %v72_v19, %v136_v20  ;;  %v15231_v27 = vld [vmem:[%s19256_s1 + $0x1700] sm:$0xff]  }
 0x2c4   :  { %14015 = vmatprep.subr.bf16.mxu1 %v15198_v34  ;;  %13994 = vmatpush3.bf16.msra.mxu0 %v15199_v35  ;;  %v15238_v34 = vld [vmem:[%s19256_s1 + $0x17d0] sm:$0xff]   ;;  %v15263_v19 = vld [vmem:[%s19256_s1 + $0x1800] sm:$0xff]  }
 0x2c5   :  { %13995 = vmatprep.subr.bf16.mxu0 %v15201_v37  ;;  %10830 = vmatprep.mubr.bf16.mxu0 %v11944_v22  ;;  %v15239_v35 = vld [vmem:[%s19256_s1 + $0x1710] sm:$0xff]   ;;  %v15241_v37 = vld [vmem:[%s19256_s1 + $0x1758] sm:$0xff]   ;;  %v15264_v20 = vld [vmem:[%s19256_s1 + $0x1880] sm:$0xff]  }
 0x2c6   :  { %10790 = vmatmul.mubr.bf16.vlgmr.msra.gmra.mrb[84].mxu1 %v11941_v31  ;;  %v15235_v31 = vld [vmem:[%s19256_s1 + $0x1708] sm:$0xff]  }
 0x2c7   :  { %14016 = vmatpush3.bf16.msra.mxu1 %v15200_v36  ;;  %10871 = vmatprep.mubr.bf16.mxu1 %v11946_v24  ;;  %v15240_v36 = vld [vmem:[%s19256_s1 + $0x1790] sm:$0xff]   ;;  %v15266_v22 = vld [vmem:[%s19256_s1 + $0x18c8] sm:$0xff]  }
 0x2c8   :  { %14017 = vmatprep.subr.bf16.mxu1 %v15202_v38  ;;  %13996 = vmatpush3.bf16.msra.mxu0 %v15203_v39  ;;  %v15242_v38 = vld [vmem:[%s19256_s1 + $0x17d8] sm:$0xff]   ;;  %v15268_v24 = vld [vmem:[%s19256_s1 + $0x1888] sm:$0xff]  }
 0x2c9   :  { %13997 = vmatprep.subr.bf16.mxu0 %v15205_v41  ;;  %v15243_v39 = vld [vmem:[%s19256_s1 + $0x1718] sm:$0xff]  }
 0x2ca   :  { %v15244_v41 = vld [vmem:[%s19256_s1 + $0x1798] sm:$0xff]  }
 0x2cb   :  { %14018 = vmatpush3.bf16.msra.mxu1 %v15204_v40 }
 0x2cc   :  { %14019 = vmatprep.subr.bf16.mxu1 %v15206_v42  ;;  %13998 = vmatpush3.bf16.msra.mxu0 %v15207_v43  ;;  %v15245_v43 = vld [vmem:[%s19256_s1 + $0x1760] sm:$0xff]  }
 0x2cd   :  { %13999 = vmatprep.subr.bf16.mxu0 %v15209_v45  ;;  %v15246_v45 = vld [vmem:[%s19256_s1 + $0x17e0] sm:$0xff]  }
 0x2cf   :  { %14020 = vmatpush3.bf16.msra.mxu1 %v15208_v44 }
 0x2d0   :  { %14021 = vmatprep.subr.bf16.mxu1 %v15210_v46  ;;  %14000 = vmatpush3.bf16.msra.mxu0 %v15211_v48  ;;  %v15247_v48 = vld [vmem:[%s19256_s1 + $0x1720] sm:$0xff]  }
 0x2d1   :  { %14001 = vmatprep.subr.bf16.mxu0 %v15213_v52 }
 0x2d3   :  { %14022 = vmatpush3.bf16.msra.mxu1 %v15212_v50 }
 0x2d4   :  { %14023 = vmatprep.subr.bf16.mxu1 %v15214_v55  ;;  %14002 = vmatpush3.bf16.msra.mxu0 %v15215_v58 }
 0x2d5   :  { %14003 = vmatprep.subr.bf16.mxu0 %v15217_v0  ;;  %v15253_v0 = vld [vmem:[%s19256_s1 + $0x1770] sm:$0xff]  }
 0x2d6   :  { %v13701_v47 = vpop.f32.mrb[60].mxu0 }
 0x2d7   :  { %v13702_v51 = vpop.f32.mrb[61].mxu0  ;;  %14024 = vmatpush3.bf16.msra.mxu1 %v15216_v61 }
 0x2d8   :  { %v13703_v53 = vadd.f32 %v13702_v51, %v13701_v47  ;;  %v13704_v57 = vpop.f32.mrb[62].mxu0  ;;  %14025 = vmatprep.subr.bf16.mxu1 %v15218_v3  ;;  %14004 = vmatpush3.bf16.msra.mxu0 %v15219_v5  ;;  %v15248_v51 = vld [vmem:[%s19256_s1 + $0x17a0] sm:$0xff]   ;;  %v15255_v3 = vld [vmem:[%s19256_s1 + $0x1730] sm:$0xff]   ;;  %v15257_v5 = vld [vmem:[%s19256_s1 + $0x1778] sm:$0xff]  }
 0x2d9   :  { %v13723_v49 = vpop.f32.mrb[60].mxu1  ;;  %v13705_v62 = vpop.f32.mrb[63].mxu0  ;;  %14005 = vmatprep.subr.bf16.mxu0 %v15221_v9  ;;  %v73_v9 = vld [vmem:[%s19257_s0 + $0x170] sm:$0xff] }
 0x2da   :  { %v13724_v54 = vpop.f32.mrb[61].mxu1  ;;  %v10259_v59 = vadd.f32 %v13703_v53, %v17989_v7  ;;  %v13706_v1 = vadd.f32 %v13705_v62, %v13704_v57  ;;  %v15220_v7 = vld [vmem:[%s19256_s1 + $0x16a8] sm:$0xff]  }
 0x2db   :  { %v13725_v56 = vadd.f32 %v13724_v54, %v13723_v49  ;;  %v13726_v60 = vpop.f32.mrb[62].mxu1  ;;  %14026 = vmatpush3.bf16.msra.mxu1 %v15220_v7  ;;  %v15249_v54 = vld [vmem:[%s19256_s1 + $0x1768] sm:$0xff]   ;;  %v15259_v7 = vld [vmem:[%s19256_s1 + $0x1738] sm:$0xff]  }
 0x2dc   :  { %v13727_v2 = vpop.f32.mrb[63].mxu1  ;;  %v10262_v6 = vadd.f32 %v13706_v1, %v18004_v16  ;;  %14027 = vmatprep.subr.bf16.mxu1 %v15222_v10  ;;  %14006 = vmatpush3.bf16.msra.mxu0 %v15223_v11  ;;  %v15228_v16 = vld [vmem:[%s19256_s1 + $0x16b8] sm:$0xff]   ;;  %v15250_v57 = vld [vmem:[%s19256_s1 + $0x17e8] sm:$0xff]   ;;  %v137_v10 = vld [vmem:[%s19257_s0 + $0x370] sm:$0xff] }
 0x2dd   :  { %v18103_v63 = vadd.f32 %v13725_v56, %v10259_v59  ;;  %v13728_v4 = vadd.f32 %v13727_v2, %v13726_v60  ;;  %14007 = vmatprep.subr.bf16.mxu0 %v15225_v13  ;;  %v15251_v60 = vld [vmem:[%s19256_s1 + $0x1728] sm:$0xff]   ;;  %v15254_v2 = vld [vmem:[%s19256_s1 + $0x17f0] sm:$0xff]   ;;  %v74_v11 = vld [vmem:[%s19257_s0 + $0x178] sm:$0xff]  ;;  %v11948_v13 = vcombine.high %v73_v9, %v137_v10 }
 0x2de   :  { %v15252_v62 = vld [vmem:[%s19256_s1 + $0x17a8] sm:$0xff]  }
 0x2df   :  { %v18118_v8 = vadd.f32 %v13728_v4, %v10262_v6  ;;  %14028 = vmatpush3.bf16.msra.mxu1 %v15224_v12  ;;  %v15256_v4 = vld [vmem:[%s19256_s1 + $0x17b0] sm:$0xff]   ;;  %v15258_v6 = vld [vmem:[%s19256_s1 + $0x17f8] sm:$0xff]   ;;  %v11947_v12 = vcombine.low %v73_v9, %v137_v10  ;;  %v15293_v9 = vld [vmem:[%s19256_s1 + $0x1940] sm:$0xff]  }
 0x2e0   :  { %14029 = vmatprep.subr.bf16.mxu1 %v15226_v14  ;;  %14008 = vmatpush3.bf16.msra.mxu0 %v15227_v15  ;;  %v138_v14 = vld [vmem:[%s19257_s0 + $0x378] sm:$0xff]  ;;  %v15294_v10 = vld [vmem:[%s19256_s1 + $0x19c0] sm:$0xff]  }
 0x2e1   :  { %14037 = vmatprep.subr.bf16.mxu0 %v15229_v25  ;;  %v11949_v15 = vcombine.low %v74_v11, %v138_v14  ;;  %v15269_v25 = vld [vmem:[%s19256_s1 + $0x1850] sm:$0xff]  }
 0x2e3   :  { %14030 = vmatpush3.bf16.msra.mxu1 %v15228_v16  ;;  %10831 = vmatmul.mubr.bf16.vlgmr.msra.gmra.mrb[88].mxu0 %v11943_v21  ;;  %v11950_v16 = vcombine.high %v74_v11, %v138_v14  ;;  %v15265_v21 = vld [vmem:[%s19256_s1 + $0x1848] sm:$0xff]   ;;  %v15295_v11 = vld [vmem:[%s19256_s1 + $0x1900] sm:$0xff]  }
 0x2e4   :  { %14059 = vmatprep.subr.bf16.mxu1 %v15230_v26  ;;  %14038 = vmatpush3.bf16.msra.mxu0 %v15231_v27  ;;  %v15270_v26 = vld [vmem:[%s19256_s1 + $0x18d0] sm:$0xff]   ;;  %v15298_v14 = vld [vmem:[%s19256_s1 + $0x19c8] sm:$0xff]  }
 0x2e5   :  { %14039 = vmatprep.subr.bf16.mxu0 %v15233_v29  ;;  %10912 = vmatprep.mubr.bf16.mxu0 %v11948_v13  ;;  %v15271_v27 = vld [vmem:[%s19256_s1 + $0x1810] sm:$0xff]   ;;  %v15273_v29 = vld [vmem:[%s19256_s1 + $0x1858] sm:$0xff]   ;;  %v15297_v13 = vld [vmem:[%s19256_s1 + $0x1948] sm:$0xff]  }
 0x2e6   :  { %10872 = vmatmul.mubr.bf16.vlgmr.msra.gmra.mrb[88].mxu1 %v11945_v23  ;;  %v15267_v23 = vld [vmem:[%s19256_s1 + $0x1808] sm:$0xff]  }
 0x2e7   :  { %14060 = vmatpush3.bf16.msra.mxu1 %v15232_v28  ;;  %10953 = vmatprep.mubr.bf16.mxu1 %v11950_v16  ;;  %v15272_v28 = vld [vmem:[%s19256_s1 + $0x1890] sm:$0xff]   ;;  %v15300_v16 = vld [vmem:[%s19256_s1 + $0x1988] sm:$0xff]  }
 0x2e8   :  { %14061 = vmatprep.subr.bf16.mxu1 %v15234_v30  ;;  %14040 = vmatpush3.bf16.msra.mxu0 %v15235_v31  ;;  %v15274_v30 = vld [vmem:[%s19256_s1 + $0x18d8] sm:$0xff]  }
 0x2e9   :  { %14041 = vmatprep.subr.bf16.mxu0 %v15237_v33 }
 0x2eb   :  { %14062 = vmatpush3.bf16.msra.mxu1 %v15236_v32  ;;  %v15275_v32 = vld [vmem:[%s19256_s1 + $0x1818] sm:$0xff]  }
 0x2ec   :  { %14063 = vmatprep.subr.bf16.mxu1 %v15238_v34  ;;  %14042 = vmatpush3.bf16.msra.mxu0 %v15239_v35  ;;  %v15276_v34 = vld [vmem:[%s19256_s1 + $0x1898] sm:$0xff]  }
 0x2ed   :  { %14043 = vmatprep.subr.bf16.mxu0 %v15241_v37 }
 0x2ef   :  { %14064 = vmatpush3.bf16.msra.mxu1 %v15240_v36  ;;  %v15277_v36 = vld [vmem:[%s19256_s1 + $0x1860] sm:$0xff]  }
 0x2f0   :  { %14065 = vmatprep.subr.bf16.mxu1 %v15242_v38  ;;  %14044 = vmatpush3.bf16.msra.mxu0 %v15243_v39  ;;  %v15278_v39 = vld [vmem:[%s19256_s1 + $0x18e0] sm:$0xff]  }
 0x2f1   :  { %14045 = vmatprep.subr.bf16.mxu0 %v15245_v43 }
 0x2f3   :  { %14066 = vmatpush3.bf16.msra.mxu1 %v15244_v41 }
 0x2f4   :  { %14067 = vmatprep.subr.bf16.mxu1 %v15246_v45  ;;  %14046 = vmatpush3.bf16.msra.mxu0 %v15247_v48  ;;  %v15280_v45 = vld [vmem:[%s19256_s1 + $0x18a0] sm:$0xff]   ;;  %v15281_v48 = vld [vmem:[%s19256_s1 + $0x1868] sm:$0xff]  }
 0x2f5   :  { %14047 = vmatprep.subr.bf16.mxu0 %v15249_v54 }
 0x2f6   :  { %v13745_v40 = vpop.f32.mrb[64].mxu0 }
 0x2f7   :  { %v13746_v44 = vpop.f32.mrb[65].mxu0  ;;  %14068 = vmatpush3.bf16.msra.mxu1 %v15248_v51  ;;  %v15282_v51 = vld [vmem:[%s19256_s1 + $0x18e8] sm:$0xff]  }
 0x2f8   :  { %v13747_v46 = vadd.f32 %v13746_v44, %v13745_v40  ;;  %v13748_v50 = vpop.f32.mrb[66].mxu0  ;;  %14069 = vmatprep.subr.bf16.mxu1 %v15250_v57  ;;  %14048 = vmatpush3.bf16.msra.mxu0 %v15251_v60  ;;  %v15285_v57 = vld [vmem:[%s19256_s1 + $0x1870] sm:$0xff]  }
 0x2f9   :  { %v13767_v42 = vpop.f32.mrb[64].mxu1  ;;  %v13749_v55 = vpop.f32.mrb[67].mxu0  ;;  %14049 = vmatprep.subr.bf16.mxu0 %v15253_v0  ;;  %v15288_v60 = vld [vmem:[%s19256_s1 + $0x18b0] sm:$0xff]   ;;  %v15292_v0 = vld [vmem:[%s19256_s1 + $0x18b8] sm:$0xff]  }
 0x2fa   :  { %v13768_v47 = vpop.f32.mrb[65].mxu1  ;;  %v10341_v52 = vadd.f32 %v13747_v46, %v18103_v63  ;;  %v13750_v58 = vadd.f32 %v13749_v55, %v13748_v50  ;;  %v15284_v55 = vld [vmem:[%s19256_s1 + $0x18a8] sm:$0xff]  }
 0x2fb   :  { %v13769_v49 = vadd.f32 %v13768_v47, %v13767_v42  ;;  %v13770_v53 = vpop.f32.mrb[66].mxu1  ;;  %14070 = vmatpush3.bf16.msra.mxu1 %v15252_v62  ;;  %v15279_v42 = vld [vmem:[%s19256_s1 + $0x1820] sm:$0xff]   ;;  %v15290_v62 = vld [vmem:[%s19256_s1 + $0x18f8] sm:$0xff]  }
 0x2fc   :  { %v13771_v59 = vpop.f32.mrb[67].mxu1  ;;  %v10344_v63 = vadd.f32 %v13750_v58, %v18118_v8  ;;  %14071 = vmatprep.subr.bf16.mxu1 %v15254_v2  ;;  %14050 = vmatpush3.bf16.msra.mxu0 %v15255_v3  ;;  %v15260_v8 = vld [vmem:[%s19256_s1 + $0x17b8] sm:$0xff]   ;;  %v15286_v58 = vld [vmem:[%s19256_s1 + $0x18f0] sm:$0xff]   ;;  %v139_v2 = vld [vmem:[%s19257_s0 + $0x380] sm:$0xff] }
 0x2fd   :  { %v18220_v56 = vadd.f32 %v13769_v49, %v10341_v52  ;;  %v13772_v61 = vadd.f32 %v13771_v59, %v13770_v53  ;;  %14051 = vmatprep.subr.bf16.mxu0 %v15257_v5  ;;  %v15283_v53 = vld [vmem:[%s19256_s1 + $0x1828] sm:$0xff]   ;;  %v15287_v59 = vld [vmem:[%s19256_s1 + $0x1830] sm:$0xff]  }
 0x2fe   :  { %v76_v5 = vld [vmem:[%s19257_s0 + $0x188] sm:$0xff] }
 0x2ff   :  { %v18235_v1 = vadd.f32 %v13772_v61, %v10344_v63  ;;  %14072 = vmatpush3.bf16.msra.mxu1 %v15256_v4  ;;  %v15289_v61 = vld [vmem:[%s19256_s1 + $0x1878] sm:$0xff]  }
 0x300   :  { %14073 = vmatprep.subr.bf16.mxu1 %v15258_v6  ;;  %14052 = vmatpush3.bf16.msra.mxu0 %v15259_v7  ;;  %v15291_v63 = vld [vmem:[%s19256_s1 + $0x1838] sm:$0xff]   ;;  %v140_v6 = vld [vmem:[%s19257_s0 + $0x388] sm:$0xff] }
 0x301   :  { %14081 = vmatprep.subr.bf16.mxu0 %v15261_v17  ;;  %v11953_v7 = vcombine.low %v76_v5, %v140_v6  ;;  %v15301_v17 = vld [vmem:[%s19256_s1 + $0x1950] sm:$0xff]  }
 0x303   :  { %14074 = vmatpush3.bf16.msra.mxu1 %v15260_v8  ;;  %10913 = vmatmul.mubr.bf16.vlgmr.msra.gmra.mrb[92].mxu0 %v11947_v12  ;;  %v11954_v8 = vcombine.high %v76_v5, %v140_v6  ;;  %v15296_v12 = vld [vmem:[%s19256_s1 + $0x1980] sm:$0xff]   ;;  %v15329_v5 = vld [vmem:[%s19256_s1 + $0x1a48] sm:$0xff]  }
 0x304   :  { %14103 = vmatprep.subr.bf16.mxu1 %v15262_v18  ;;  %14082 = vmatpush3.bf16.msra.mxu0 %v15263_v19  ;;  %v15302_v18 = vld [vmem:[%s19256_s1 + $0x19d0] sm:$0xff]   ;;  %v15330_v6 = vld [vmem:[%s19256_s1 + $0x1ac8] sm:$0xff]  }
 0x305   :  { %14083 = vmatprep.subr.bf16.mxu0 %v15265_v21  ;;  %v15303_v19 = vld [vmem:[%s19256_s1 + $0x1910] sm:$0xff]   ;;  %v15305_v21 = vld [vmem:[%s19256_s1 + $0x1958] sm:$0xff]  }
 0x306   :  { %10954 = vmatmul.mubr.bf16.vlgmr.msra.gmra.mrb[92].mxu1 %v11949_v15  ;;  %v15299_v15 = vld [vmem:[%s19256_s1 + $0x1908] sm:$0xff]  }
 0x307   :  { %14104 = vmatpush3.bf16.msra.mxu1 %v15264_v20  ;;  %11035 = vmatprep.mubr.bf16.mxu1 %v11954_v8  ;;  %v15304_v20 = vld [vmem:[%s19256_s1 + $0x1990] sm:$0xff]   ;;  %v15332_v8 = vld [vmem:[%s19256_s1 + $0x1a88] sm:$0xff]  }
 0x308   :  { %14105 = vmatprep.subr.bf16.mxu1 %v15266_v22  ;;  %14084 = vmatpush3.bf16.msra.mxu0 %v15267_v23  ;;  %v15306_v22 = vld [vmem:[%s19256_s1 + $0x19d8] sm:$0xff]  }
 0x309   :  { %14085 = vmatprep.subr.bf16.mxu0 %v15269_v25 }
 0x30b   :  { %14106 = vmatpush3.bf16.msra.mxu1 %v15268_v24  ;;  %v15307_v24 = vld [vmem:[%s19256_s1 + $0x1918] sm:$0xff]  }
 0x30c   :  { %14107 = vmatprep.subr.bf16.mxu1 %v15270_v26  ;;  %14086 = vmatpush3.bf16.msra.mxu0 %v15271_v27  ;;  %v15308_v26 = vld [vmem:[%s19256_s1 + $0x1998] sm:$0xff]  }
 0x30d   :  { %14087 = vmatprep.subr.bf16.mxu0 %v15273_v29 }
 0x30f   :  { %14108 = vmatpush3.bf16.msra.mxu1 %v15272_v28  ;;  %v15309_v28 = vld [vmem:[%s19256_s1 + $0x1960] sm:$0xff]  }
 0x310   :  { %14109 = vmatprep.subr.bf16.mxu1 %v15274_v30  ;;  %14088 = vmatpush3.bf16.msra.mxu0 %v15275_v32 }
 0x311   :  { %14089 = vmatprep.subr.bf16.mxu0 %v15277_v36 }
 0x313   :  { %14110 = vmatpush3.bf16.msra.mxu1 %v15276_v34  ;;  %v15311_v34 = vld [vmem:[%s19256_s1 + $0x1920] sm:$0xff]  }
 0x314   :  { %14111 = vmatprep.subr.bf16.mxu1 %v15278_v39  ;;  %14090 = vmatpush3.bf16.msra.mxu0 %v15279_v42 }
 0x315   :  { %14091 = vmatprep.subr.bf16.mxu0 %v15281_v48 }
 0x316   :  { %v13789_v31 = vpop.f32.mrb[68].mxu0 }
 0x317   :  { %v13790_v35 = vpop.f32.mrb[69].mxu0  ;;  %14112 = vmatpush3.bf16.msra.mxu1 %v15280_v45  ;;  %v15315_v45 = vld [vmem:[%s19256_s1 + $0x1928] sm:$0xff]  }
 0x318   :  { %v13791_v37 = vadd.f32 %v13790_v35, %v13789_v31  ;;  %v13792_v41 = vpop.f32.mrb[70].mxu0  ;;  %14113 = vmatprep.subr.bf16.mxu1 %v15282_v51  ;;  %14092 = vmatpush3.bf16.msra.mxu0 %v15283_v53  ;;  %v15310_v31 = vld [vmem:[%s19256_s1 + $0x19e0] sm:$0xff]   ;;  %v15319_v51 = vld [vmem:[%s19256_s1 + $0x1930] sm:$0xff]   ;;  %v15321_v53 = vld [vmem:[%s19256_s1 + $0x1978] sm:$0xff]  }
 0x319   :  { %v13811_v33 = vpop.f32.mrb[68].mxu1  ;;  %v13793_v46 = vpop.f32.mrb[71].mxu0  ;;  %14093 = vmatprep.subr.bf16.mxu0 %v15285_v57  ;;  %v77_v57 = vld [vmem:[%s19257_s0 + $0x190] sm:$0xff] }
 0x31a   :  { %v13812_v38 = vpop.f32.mrb[69].mxu1  ;;  %v10423_v43 = vadd.f32 %v13791_v37, %v18220_v56  ;;  %v13794_v49 = vadd.f32 %v13793_v46, %v13792_v41  ;;  %v15312_v37 = vld [vmem:[%s19256_s1 + $0x19a0] sm:$0xff]  }
 0x31b   :  { %v13813_v40 = vadd.f32 %v13812_v38, %v13811_v33  ;;  %v13814_v44 = vpop.f32.mrb[70].mxu1  ;;  %14114 = vmatpush3.bf16.msra.mxu1 %v15284_v55  ;;  %v15323_v55 = vld [vmem:[%s19256_s1 + $0x1938] sm:$0xff]  }
 0x31c   :  { %v13815_v50 = vpop.f32.mrb[71].mxu1  ;;  %v10426_v54 = vadd.f32 %v13794_v49, %v18235_v1  ;;  %14115 = vmatprep.subr.bf16.mxu1 %v15286_v58  ;;  %14094 = vmatpush3.bf16.msra.mxu0 %v15287_v59  ;;  %v75_v1 = vld [vmem:[%s19257_s0 + $0x180] sm:$0xff]  ;;  %v15317_v49 = vld [vmem:[%s19256_s1 + $0x1970] sm:$0xff]   ;;  %v78_v59 = vld [vmem:[%s19257_s0 + $0x198] sm:$0xff] }
 0x31d   :  { %v18331_v47 = vadd.f32 %v13813_v40, %v10423_v43  ;;  %v13816_v52 = vadd.f32 %v13815_v50, %v13814_v44  ;;  %14095 = vmatprep.subr.bf16.mxu0 %v15289_v61  ;;  %v11951_v3 = vcombine.low %v75_v1, %v139_v2  ;;  %v11952_v4 = vcombine.high %v75_v1, %v139_v2  ;;  %v15313_v40 = vld [vmem:[%s19256_s1 + $0x1968] sm:$0xff]   ;;  %v15318_v50 = vld [vmem:[%s19256_s1 + $0x19f0] sm:$0xff]   ;;  %v15325_v1 = vld [vmem:[%s19256_s1 + $0x1a40] sm:$0xff]  }
 0x31e   :  { %v15314_v43 = vld [vmem:[%s19256_s1 + $0x19e8] sm:$0xff]   ;;  %v141_v58 = vld [vmem:[%s19257_s0 + $0x390] sm:$0xff]  ;;  %v15326_v2 = vld [vmem:[%s19256_s1 + $0x1ac0] sm:$0xff]  }
 0x31f   :  { %v18346_v56 = vadd.f32 %v13816_v52, %v10426_v54  ;;  %14116 = vmatpush3.bf16.msra.mxu1 %v15288_v60  ;;  %10994 = vmatprep.mubr.bf16.mxu0 %v11952_v4  ;;  %v15320_v52 = vld [vmem:[%s19256_s1 + $0x19b0] sm:$0xff]   ;;  %v15322_v54 = vld [vmem:[%s19256_s1 + $0x19f8] sm:$0xff]   ;;  %v11955_v61 = vcombine.low %v77_v57, %v141_v58  ;;  %v15328_v4 = vld [vmem:[%s19256_s1 + $0x1a80] sm:$0xff]  }
 0x320   :  { %14117 = vmatprep.subr.bf16.mxu1 %v15290_v62  ;;  %14096 = vmatpush3.bf16.msra.mxu0 %v15291_v63  ;;  %v142_v60 = vld [vmem:[%s19257_s0 + $0x398] sm:$0xff]  ;;  %v11956_v62 = vcombine.high %v77_v57, %v141_v58  ;;  %v15357_v57 = vld [vmem:[%s19256_s1 + $0x1b40] sm:$0xff]  }
 0x321   :  { %14125 = vmatprep.subr.bf16.mxu0 %v15293_v9  ;;  %v11957_v63 = vcombine.low %v78_v59, %v142_v60  ;;  %v15333_v9 = vld [vmem:[%s19256_s1 + $0x1a50] sm:$0xff]   ;;  %v15358_v58 = vld [vmem:[%s19256_s1 + $0x1bc0] sm:$0xff]  }
 0x323   :  { %14118 = vmatpush3.bf16.msra.mxu1 %v15292_v0  ;;  %10995 = vmatmul.mubr.bf16.vlgmr.msra.gmra.mrb[96].mxu0 %v11951_v3  ;;  %v11958_v0 = vcombine.high %v78_v59, %v142_v60  ;;  %v15327_v3 = vld [vmem:[%s19256_s1 + $0x1a00] sm:$0xff]  }
 0x324   :  { %14147 = vmatprep.subr.bf16.mxu1 %v15294_v10  ;;  %14126 = vmatpush3.bf16.msra.mxu0 %v15295_v11  ;;  %v15334_v10 = vld [vmem:[%s19256_s1 + $0x1ad0] sm:$0xff]   ;;  %v15359_v59 = vld [vmem:[%s19256_s1 + $0x1b00] sm:$0xff]  }
 0x325   :  { %14127 = vmatprep.subr.bf16.mxu0 %v15297_v13  ;;  %11076 = vmatprep.mubr.bf16.mxu0 %v11956_v62  ;;  %v15335_v11 = vld [vmem:[%s19256_s1 + $0x1a10] sm:$0xff]   ;;  %v15337_v13 = vld [vmem:[%s19256_s1 + $0x1a58] sm:$0xff]   ;;  %v15360_v60 = vld [vmem:[%s19256_s1 + $0x1b80] sm:$0xff]  }
 0x326   :  { %11036 = vmatmul.mubr.bf16.vlgmr.msra.gmra.mrb[96].mxu1 %v11953_v7  ;;  %v15331_v7 = vld [vmem:[%s19256_s1 + $0x1a08] sm:$0xff]  }
 0x327   :  { %14148 = vmatpush3.bf16.msra.mxu1 %v15296_v12  ;;  %11117 = vmatprep.mubr.bf16.mxu1 %v11958_v0  ;;  %v15336_v12 = vld [vmem:[%s19256_s1 + $0x1a90] sm:$0xff]   ;;  %v15362_v62 = vld [vmem:[%s19256_s1 + $0x1bc8] sm:$0xff]  }
 0x328   :  { %14149 = vmatprep.subr.bf16.mxu1 %v15298_v14  ;;  %14128 = vmatpush3.bf16.msra.mxu0 %v15299_v15  ;;  %v15338_v14 = vld [vmem:[%s19256_s1 + $0x1ad8] sm:$0xff]   ;;  %v15364_v0 = vld [vmem:[%s19256_s1 + $0x1b88] sm:$0xff]  }
 0x329   :  { %14129 = vmatprep.subr.bf16.mxu0 %v15301_v17  ;;  %v15339_v15 = vld [vmem:[%s19256_s1 + $0x1a18] sm:$0xff]  }
 0x32a   :  { %v15340_v17 = vld [vmem:[%s19256_s1 + $0x1a98] sm:$0xff]  }
 0x32b   :  { %14150 = vmatpush3.bf16.msra.mxu1 %v15300_v16 }
 0x32c   :  { %14151 = vmatprep.subr.bf16.mxu1 %v15302_v18  ;;  %14130 = vmatpush3.bf16.msra.mxu0 %v15303_v19  ;;  %v15341_v19 = vld [vmem:[%s19256_s1 + $0x1a60] sm:$0xff]  }
 0x32d   :  { %14131 = vmatprep.subr.bf16.mxu0 %v15305_v21  ;;  %v15342_v21 = vld [vmem:[%s19256_s1 + $0x1ae0] sm:$0xff]  }
 0x32f   :  { %14152 = vmatpush3.bf16.msra.mxu1 %v15304_v20 }
 0x330   :  { %14153 = vmatprep.subr.bf16.mxu1 %v15306_v22  ;;  %14132 = vmatpush3.bf16.msra.mxu0 %v15307_v24  ;;  %v15343_v24 = vld [vmem:[%s19256_s1 + $0x1a20] sm:$0xff]  }
 0x331   :  { %14133 = vmatprep.subr.bf16.mxu0 %v15309_v28 }
 0x333   :  { %14154 = vmatpush3.bf16.msra.mxu1 %v15308_v26 }
 0x334   :  { %14155 = vmatprep.subr.bf16.mxu1 %v15310_v31  ;;  %14134 = vmatpush3.bf16.msra.mxu0 %v15311_v34 }
 0x335   :  { %14135 = vmatprep.subr.bf16.mxu0 %v15313_v40  ;;  %v15349_v40 = vld [vmem:[%s19256_s1 + $0x1a70] sm:$0xff]  }
 0x336   :  { %v13833_v23 = vpop.f32.mrb[72].mxu0 }
 0x337   :  { %v13834_v27 = vpop.f32.mrb[73].mxu0  ;;  %14156 = vmatpush3.bf16.msra.mxu1 %v15312_v37 }
 0x338   :  { %v13835_v29 = vadd.f32 %v13834_v27, %v13833_v23  ;;  %v13836_v33 = vpop.f32.mrb[74].mxu0  ;;  %14157 = vmatprep.subr.bf16.mxu1 %v15314_v43  ;;  %14136 = vmatpush3.bf16.msra.mxu0 %v15315_v45  ;;  %v15344_v27 = vld [vmem:[%s19256_s1 + $0x1aa0] sm:$0xff]   ;;  %v15351_v43 = vld [vmem:[%s19256_s1 + $0x1a30] sm:$0xff]   ;;  %v15353_v45 = vld [vmem:[%s19256_s1 + $0x1a78] sm:$0xff]  }
 0x339   :  { %v13855_v25 = vpop.f32.mrb[72].mxu1  ;;  %v13837_v38 = vpop.f32.mrb[75].mxu0  ;;  %14137 = vmatprep.subr.bf16.mxu0 %v15317_v49  ;;  %v79_v49 = vld [vmem:[%s19257_s0 + $0x1a0] sm:$0xff] }
 0x33a   :  { %v13856_v30 = vpop.f32.mrb[73].mxu1  ;;  %v10505_v35 = vadd.f32 %v13835_v29, %v18331_v47  ;;  %v13838_v41 = vadd.f32 %v13837_v38, %v13836_v33  ;;  %v15316_v47 = vld [vmem:[%s19256_s1 + $0x19a8] sm:$0xff]  }
 0x33b   :  { %v13857_v32 = vadd.f32 %v13856_v30, %v13855_v25  ;;  %v13858_v36 = vpop.f32.mrb[74].mxu1  ;;  %14158 = vmatpush3.bf16.msra.mxu1 %v15316_v47  ;;  %v15345_v30 = vld [vmem:[%s19256_s1 + $0x1a68] sm:$0xff]   ;;  %v15355_v47 = vld [vmem:[%s19256_s1 + $0x1a38] sm:$0xff]  }
 0x33c   :  { %v13859_v42 = vpop.f32.mrb[75].mxu1  ;;  %v10508_v46 = vadd.f32 %v13838_v41, %v18346_v56  ;;  %14159 = vmatprep.subr.bf16.mxu1 %v15318_v50  ;;  %14138 = vmatpush3.bf16.msra.mxu0 %v15319_v51  ;;  %v15324_v56 = vld [vmem:[%s19256_s1 + $0x19b8] sm:$0xff]   ;;  %v15346_v33 = vld [vmem:[%s19256_s1 + $0x1ae8] sm:$0xff]   ;;  %v143_v50 = vld [vmem:[%s19257_s0 + $0x3a0] sm:$0xff] }
 0x33d   :  { %v18445_v39 = vadd.f32 %v13857_v32, %v10505_v35  ;;  %v13860_v44 = vadd.f32 %v13859_v42, %v13858_v36  ;;  %14139 = vmatprep.subr.bf16.mxu0 %v15321_v53  ;;  %v15347_v36 = vld [vmem:[%s19256_s1 + $0x1a28] sm:$0xff]   ;;  %v15350_v42 = vld [vmem:[%s19256_s1 + $0x1af0] sm:$0xff]   ;;  %v11960_v53 = vcombine.high %v79_v49, %v143_v50 }
 0x33e   :  { %v15348_v38 = vld [vmem:[%s19256_s1 + $0x1aa8] sm:$0xff]  }
 0x33f   :  { %v18460_v48 = vadd.f32 %v13860_v44, %v10508_v46  ;;  %14160 = vmatpush3.bf16.msra.mxu1 %v15320_v52  ;;  %v15352_v44 = vld [vmem:[%s19256_s1 + $0x1ab0] sm:$0xff]   ;;  %v15354_v46 = vld [vmem:[%s19256_s1 + $0x1af8] sm:$0xff]   ;;  %v80_v51 = vld [vmem:[%s19257_s0 + $0x1a8] sm:$0xff]  ;;  %v11959_v52 = vcombine.low %v79_v49, %v143_v50 }
 0x340   :  { %14161 = vmatprep.subr.bf16.mxu1 %v15322_v54  ;;  %14140 = vmatpush3.bf16.msra.mxu0 %v15323_v55  ;;  %v144_v54 = vld [vmem:[%s19257_s0 + $0x3a8] sm:$0xff]  ;;  %v15389_v49 = vld [vmem:[%s19256_s1 + $0x1c40] sm:$0xff]  }
 0x341   :  { %14169 = vmatprep.subr.bf16.mxu0 %v15325_v1  ;;  %v11961_v55 = vcombine.low %v80_v51, %v144_v54  ;;  %v15365_v1 = vld [vmem:[%s19256_s1 + $0x1b50] sm:$0xff]   ;;  %v15390_v50 = vld [vmem:[%s19256_s1 + $0x1cc0] sm:$0xff]  }
 0x343   :  { %14162 = vmatpush3.bf16.msra.mxu1 %v15324_v56  ;;  %11077 = vmatmul.mubr.bf16.vlgmr.msra.gmra.mrb[100].mxu0 %v11955_v61  ;;  %v11962_v56 = vcombine.high %v80_v51, %v144_v54  ;;  %v15361_v61 = vld [vmem:[%s19256_s1 + $0x1b48] sm:$0xff]   ;;  %v15391_v51 = vld [vmem:[%s19256_s1 + $0x1c00] sm:$0xff]  }
 0x344   :  { %14191 = vmatprep.subr.bf16.mxu1 %v15326_v2  ;;  %14170 = vmatpush3.bf16.msra.mxu0 %v15327_v3  ;;  %v15366_v2 = vld [vmem:[%s19256_s1 + $0x1bd0] sm:$0xff]   ;;  %v15394_v54 = vld [vmem:[%s19256_s1 + $0x1cc8] sm:$0xff]  }
 0x345   :  { %14171 = vmatprep.subr.bf16.mxu0 %v15329_v5  ;;  %11158 = vmatprep.mubr.bf16.mxu0 %v11960_v53  ;;  %v15367_v3 = vld [vmem:[%s19256_s1 + $0x1b10] sm:$0xff]   ;;  %v15369_v5 = vld [vmem:[%s19256_s1 + $0x1b58] sm:$0xff]   ;;  %v15393_v53 = vld [vmem:[%s19256_s1 + $0x1c48] sm:$0xff]  }
 0x346   :  { %11118 = vmatmul.mubr.bf16.vlgmr.msra.gmra.mrb[100].mxu1 %v11957_v63  ;;  %v15363_v63 = vld [vmem:[%s19256_s1 + $0x1b08] sm:$0xff]  }
 0x347   :  { %14192 = vmatpush3.bf16.msra.mxu1 %v15328_v4  ;;  %11199 = vmatprep.mubr.bf16.mxu1 %v11962_v56  ;;  %v15368_v4 = vld [vmem:[%s19256_s1 + $0x1b90] sm:$0xff]   ;;  %v15396_v56 = vld [vmem:[%s19256_s1 + $0x1c88] sm:$0xff]  }
 0x348   :  { %14193 = vmatprep.subr.bf16.mxu1 %v15330_v6  ;;  %14172 = vmatpush3.bf16.msra.mxu0 %v15331_v7  ;;  %v15370_v6 = vld [vmem:[%s19256_s1 + $0x1bd8] sm:$0xff]  }
 0x349   :  { %14173 = vmatprep.subr.bf16.mxu0 %v15333_v9 }
 0x34b   :  { %14194 = vmatpush3.bf16.msra.mxu1 %v15332_v8  ;;  %v15371_v8 = vld [vmem:[%s19256_s1 + $0x1b18] sm:$0xff]  }
 0x34c   :  { %14195 = vmatprep.subr.bf16.mxu1 %v15334_v10  ;;  %14174 = vmatpush3.bf16.msra.mxu0 %v15335_v11  ;;  %v15372_v10 = vld [vmem:[%s19256_s1 + $0x1b98] sm:$0xff]  }
 0x34d   :  { %14175 = vmatprep.subr.bf16.mxu0 %v15337_v13 }
 0x34f   :  { %14196 = vmatpush3.bf16.msra.mxu1 %v15336_v12  ;;  %v15373_v12 = vld [vmem:[%s19256_s1 + $0x1b60] sm:$0xff]  }
 0x350   :  { %14197 = vmatprep.subr.bf16.mxu1 %v15338_v14  ;;  %14176 = vmatpush3.bf16.msra.mxu0 %v15339_v15  ;;  %v15374_v15 = vld [vmem:[%s19256_s1 + $0x1be0] sm:$0xff]  }
 0x351   :  { %14177 = vmatprep.subr.bf16.mxu0 %v15341_v19 }
 0x353   :  { %14198 = vmatpush3.bf16.msra.mxu1 %v15340_v17 }
 0x354   :  { %14199 = vmatprep.subr.bf16.mxu1 %v15342_v21  ;;  %14178 = vmatpush3.bf16.msra.mxu0 %v15343_v24  ;;  %v15376_v21 = vld [vmem:[%s19256_s1 + $0x1ba0] sm:$0xff]   ;;  %v15377_v24 = vld [vmem:[%s19256_s1 + $0x1b68] sm:$0xff]  }
 0x355   :  { %14179 = vmatprep.subr.bf16.mxu0 %v15345_v30 }
 0x356   :  { %v13877_v16 = vpop.f32.mrb[76].mxu0 }
 0x357   :  { %v13878_v20 = vpop.f32.mrb[77].mxu0  ;;  %14200 = vmatpush3.bf16.msra.mxu1 %v15344_v27  ;;  %v15378_v27 = vld [vmem:[%s19256_s1 + $0x1be8] sm:$0xff]  }
 0x358   :  { %v13879_v22 = vadd.f32 %v13878_v20, %v13877_v16  ;;  %v13880_v26 = vpop.f32.mrb[78].mxu0  ;;  %14201 = vmatprep.subr.bf16.mxu1 %v15346_v33  ;;  %14180 = vmatpush3.bf16.msra.mxu0 %v15347_v36  ;;  %v15381_v33 = vld [vmem:[%s19256_s1 + $0x1b70] sm:$0xff]  }
 0x359   :  { %v13899_v18 = vpop.f32.mrb[76].mxu1  ;;  %v13881_v31 = vpop.f32.mrb[79].mxu0  ;;  %14181 = vmatprep.subr.bf16.mxu0 %v15349_v40  ;;  %v15384_v36 = vld [vmem:[%s19256_s1 + $0x1bb0] sm:$0xff]   ;;  %v15388_v40 = vld [vmem:[%s19256_s1 + $0x1bb8] sm:$0xff]  }
 0x35a   :  { %v13900_v23 = vpop.f32.mrb[77].mxu1  ;;  %v10587_v28 = vadd.f32 %v13879_v22, %v18445_v39  ;;  %v13882_v34 = vadd.f32 %v13881_v31, %v13880_v26  ;;  %v15380_v31 = vld [vmem:[%s19256_s1 + $0x1ba8] sm:$0xff]  }
 0x35b   :  { %v13901_v25 = vadd.f32 %v13900_v23, %v13899_v18  ;;  %v13902_v29 = vpop.f32.mrb[78].mxu1  ;;  %14202 = vmatpush3.bf16.msra.mxu1 %v15348_v38  ;;  %v15375_v18 = vld [vmem:[%s19256_s1 + $0x1b20] sm:$0xff]   ;;  %v15386_v38 = vld [vmem:[%s19256_s1 + $0x1bf8] sm:$0xff]  }
 0x35c   :  { %v13903_v35 = vpop.f32.mrb[79].mxu1  ;;  %v10590_v39 = vadd.f32 %v13882_v34, %v18460_v48  ;;  %14203 = vmatprep.subr.bf16.mxu1 %v15350_v42  ;;  %14182 = vmatpush3.bf16.msra.mxu0 %v15351_v43  ;;  %v15356_v48 = vld [vmem:[%s19256_s1 + $0x1ab8] sm:$0xff]   ;;  %v15382_v34 = vld [vmem:[%s19256_s1 + $0x1bf0] sm:$0xff]  }
 0x35d   :  { %v18562_v32 = vadd.f32 %v13901_v25, %v10587_v28  ;;  %v13904_v37 = vadd.f32 %v13903_v35, %v13902_v29  ;;  %14183 = vmatprep.subr.bf16.mxu0 %v15353_v45  ;;  %v15379_v29 = vld [vmem:[%s19256_s1 + $0x1b28] sm:$0xff]   ;;  %v15383_v35 = vld [vmem:[%s19256_s1 + $0x1b30] sm:$0xff]   ;;  %v82_v45 = vld [vmem:[%s19257_s0 + $0x1b8] sm:$0xff] }
 0x35e   :  { %v145_v42 = vld [vmem:[%s19257_s0 + $0x3b0] sm:$0xff] }
 0x35f   :  { %v18577_v41 = vadd.f32 %v13904_v37, %v10590_v39  ;;  %14204 = vmatpush3.bf16.msra.mxu1 %v15352_v44  ;;  %v15385_v37 = vld [vmem:[%s19256_s1 + $0x1b78] sm:$0xff]  }
 0x360   :  { %14205 = vmatprep.subr.bf16.mxu1 %v15354_v46  ;;  %14184 = vmatpush3.bf16.msra.mxu0 %v15355_v47  ;;  %v15387_v39 = vld [vmem:[%s19256_s1 + $0x1b38] sm:$0xff]  }
 0x361   :  { %14213 = vmatprep.subr.bf16.mxu0 %v15357_v57  ;;  %v146_v46 = vld [vmem:[%s19257_s0 + $0x3b8] sm:$0xff]  ;;  %v15397_v57 = vld [vmem:[%s19256_s1 + $0x1c50] sm:$0xff]  }
 0x362   :  { %v11965_v47 = vcombine.low %v82_v45, %v146_v46 }
 0x363   :  { %14206 = vmatpush3.bf16.msra.mxu1 %v15356_v48  ;;  %11159 = vmatmul.mubr.bf16.vlgmr.msra.gmra.mrb[104].mxu0 %v11959_v52  ;;  %v11966_v48 = vcombine.high %v82_v45, %v146_v46  ;;  %v15392_v52 = vld [vmem:[%s19256_s1 + $0x1c80] sm:$0xff]   ;;  %v15425_v45 = vld [vmem:[%s19256_s1 + $0x1d48] sm:$0xff]  }
 0x364   :  { %14235 = vmatprep.subr.bf16.mxu1 %v15358_v58  ;;  %14214 = vmatpush3.bf16.msra.mxu0 %v15359_v59  ;;  %v15398_v58 = vld [vmem:[%s19256_s1 + $0x1cd0] sm:$0xff]   ;;  %v15426_v46 = vld [vmem:[%s19256_s1 + $0x1dc8] sm:$0xff]  }
 0x365   :  { %14215 = vmatprep.subr.bf16.mxu0 %v15361_v61  ;;  %v15399_v59 = vld [vmem:[%s19256_s1 + $0x1c10] sm:$0xff]   ;;  %v15401_v61 = vld [vmem:[%s19256_s1 + $0x1c58] sm:$0xff]  }
 0x366   :  { %11200 = vmatmul.mubr.bf16.vlgmr.msra.gmra.mrb[104].mxu1 %v11961_v55  ;;  %v15395_v55 = vld [vmem:[%s19256_s1 + $0x1c08] sm:$0xff]  }
 0x367   :  { %14236 = vmatpush3.bf16.msra.mxu1 %v15360_v60  ;;  %11281 = vmatprep.mubr.bf16.mxu1 %v11966_v48  ;;  %v15400_v60 = vld [vmem:[%s19256_s1 + $0x1c90] sm:$0xff]   ;;  %v15428_v48 = vld [vmem:[%s19256_s1 + $0x1d88] sm:$0xff]  }
 0x368   :  { %14237 = vmatprep.subr.bf16.mxu1 %v15362_v62  ;;  %14216 = vmatpush3.bf16.msra.mxu0 %v15363_v63  ;;  %v15402_v62 = vld [vmem:[%s19256_s1 + $0x1cd8] sm:$0xff]  }
 0x369   :  { %14217 = vmatprep.subr.bf16.mxu0 %v15365_v1 }
 0x36b   :  { %14238 = vmatpush3.bf16.msra.mxu1 %v15364_v0  ;;  %v15403_v0 = vld [vmem:[%s19256_s1 + $0x1c18] sm:$0xff]  }
 0x36c   :  { %14239 = vmatprep.subr.bf16.mxu1 %v15366_v2  ;;  %14218 = vmatpush3.bf16.msra.mxu0 %v15367_v3  ;;  %v15404_v2 = vld [vmem:[%s19256_s1 + $0x1c98] sm:$0xff]  }
 0x36d   :  { %14219 = vmatprep.subr.bf16.mxu0 %v15369_v5 }
 0x36f   :  { %14240 = vmatpush3.bf16.msra.mxu1 %v15368_v4  ;;  %v15405_v4 = vld [vmem:[%s19256_s1 + $0x1c60] sm:$0xff]  }
 0x370   :  { %14241 = vmatprep.subr.bf16.mxu1 %v15370_v6  ;;  %14220 = vmatpush3.bf16.msra.mxu0 %v15371_v8 }
 0x371   :  { %14221 = vmatprep.subr.bf16.mxu0 %v15373_v12 }
 0x373   :  { %14242 = vmatpush3.bf16.msra.mxu1 %v15372_v10  ;;  %v15407_v10 = vld [vmem:[%s19256_s1 + $0x1c20] sm:$0xff]  }
 0x374   :  { %14243 = vmatprep.subr.bf16.mxu1 %v15374_v15  ;;  %14222 = vmatpush3.bf16.msra.mxu0 %v15375_v18 }
 0x375   :  { %14223 = vmatprep.subr.bf16.mxu0 %v15377_v24 }
 0x376   :  { %v13921_v7 = vpop.f32.mrb[80].mxu0 }
 0x377   :  { %v13922_v11 = vpop.f32.mrb[81].mxu0  ;;  %14244 = vmatpush3.bf16.msra.mxu1 %v15376_v21  ;;  %v15411_v21 = vld [vmem:[%s19256_s1 + $0x1c28] sm:$0xff]  }
 0x378   :  { %v13923_v13 = vadd.f32 %v13922_v11, %v13921_v7  ;;  %v13924_v17 = vpop.f32.mrb[82].mxu0  ;;  %14245 = vmatprep.subr.bf16.mxu1 %v15378_v27  ;;  %14224 = vmatpush3.bf16.msra.mxu0 %v15379_v29  ;;  %v15406_v7 = vld [vmem:[%s19256_s1 + $0x1ce0] sm:$0xff]   ;;  %v15415_v27 = vld [vmem:[%s19256_s1 + $0x1c30] sm:$0xff]   ;;  %v15417_v29 = vld [vmem:[%s19256_s1 + $0x1c78] sm:$0xff]  }
 0x379   :  { %v13943_v9 = vpop.f32.mrb[80].mxu1  ;;  %v13925_v22 = vpop.f32.mrb[83].mxu0  ;;  %14225 = vmatprep.subr.bf16.mxu0 %v15381_v33  ;;  %v83_v33 = vld [vmem:[%s19257_s0 + $0x1c0] sm:$0xff] }
 0x37a   :  { %v13944_v14 = vpop.f32.mrb[81].mxu1  ;;  %v10669_v19 = vadd.f32 %v13923_v13, %v18562_v32  ;;  %v13926_v25 = vadd.f32 %v13925_v22, %v13924_v17  ;;  %v15408_v13 = vld [vmem:[%s19256_s1 + $0x1ca0] sm:$0xff]  }
 0x37b   :  { %v13945_v16 = vadd.f32 %v13944_v14, %v13943_v9  ;;  %v13946_v20 = vpop.f32.mrb[82].mxu1  ;;  %14246 = vmatpush3.bf16.msra.mxu1 %v15380_v31  ;;  %v15419_v31 = vld [vmem:[%s19256_s1 + $0x1c38] sm:$0xff]  }
 0x37c   :  { %v13947_v26 = vpop.f32.mrb[83].mxu1  ;;  %v10672_v30 = vadd.f32 %v13926_v25, %v18577_v41  ;;  %14247 = vmatprep.subr.bf16.mxu1 %v15382_v34  ;;  %14226 = vmatpush3.bf16.msra.mxu0 %v15383_v35  ;;  %v81_v41 = vld [vmem:[%s19257_s0 + $0x1b0] sm:$0xff]  ;;  %v147_v34 = vld [vmem:[%s19257_s0 + $0x3c0] sm:$0xff]  ;;  %v84_v35 = vld [vmem:[%s19257_s0 + $0x1c8] sm:$0xff] }
 0x37d   :  { %v18673_v23 = vadd.f32 %v13945_v16, %v10669_v19  ;;  %v13948_v28 = vadd.f32 %v13947_v26, %v13946_v20  ;;  %14227 = vmatprep.subr.bf16.mxu0 %v15385_v37  ;;  %v11963_v43 = vcombine.low %v81_v41, %v145_v42  ;;  %v11964_v44 = vcombine.high %v81_v41, %v145_v42  ;;  %v15409_v16 = vld [vmem:[%s19256_s1 + $0x1c68] sm:$0xff]   ;;  %v15413_v25 = vld [vmem:[%s19256_s1 + $0x1c70] sm:$0xff]   ;;  %v15421_v41 = vld [vmem:[%s19256_s1 + $0x1d40] sm:$0xff]  }
 0x37e   :  { %v15410_v19 = vld [vmem:[%s19256_s1 + $0x1ce8] sm:$0xff]   ;;  %v15414_v26 = vld [vmem:[%s19256_s1 + $0x1cf0] sm:$0xff]   ;;  %v11967_v37 = vcombine.low %v83_v33, %v147_v34  ;;  %v15422_v42 = vld [vmem:[%s19256_s1 + $0x1dc0] sm:$0xff]  }
 0x37f   :  { %v18688_v32 = vadd.f32 %v13948_v28, %v10672_v30  ;;  %14248 = vmatpush3.bf16.msra.mxu1 %v15384_v36  ;;  %11240 = vmatprep.mubr.bf16.mxu0 %v11964_v44  ;;  %v15416_v28 = vld [vmem:[%s19256_s1 + $0x1cb0] sm:$0xff]   ;;  %v15418_v30 = vld [vmem:[%s19256_s1 + $0x1cf8] sm:$0xff]   ;;  %v148_v36 = vld [vmem:[%s19257_s0 + $0x3c8] sm:$0xff] }
 0x380   :  { %14249 = vmatprep.subr.bf16.mxu1 %v15386_v38  ;;  %14228 = vmatpush3.bf16.msra.mxu0 %v15387_v39  ;;  %v11968_v38 = vcombine.high %v83_v33, %v147_v34  ;;  %v11969_v39 = vcombine.low %v84_v35, %v148_v36  ;;  %v15424_v44 = vld [vmem:[%s19256_s1 + $0x1d80] sm:$0xff]  }
 0x381   :  { %14257 = vmatprep.subr.bf16.mxu0 %v15389_v49  ;;  %v15429_v49 = vld [vmem:[%s19256_s1 + $0x1d50] sm:$0xff]   ;;  %v15453_v33 = vld [vmem:[%s19256_s1 + $0x1e40] sm:$0xff]  }
 0x382   :  { %v15454_v34 = vld [vmem:[%s19256_s1 + $0x1ec0] sm:$0xff]  }
 0x383   :  { %14250 = vmatpush3.bf16.msra.mxu1 %v15388_v40  ;;  %11241 = vmatmul.mubr.bf16.vlgmr.msra.gmra.mrb[108].mxu0 %v11963_v43  ;;  %v11970_v40 = vcombine.high %v84_v35, %v148_v36  ;;  %v15423_v43 = vld [vmem:[%s19256_s1 + $0x1d00] sm:$0xff]  }
 0x384   :  { %14279 = vmatprep.subr.bf16.mxu1 %v15390_v50  ;;  %14258 = vmatpush3.bf16.msra.mxu0 %v15391_v51  ;;  %v15430_v50 = vld [vmem:[%s19256_s1 + $0x1dd0] sm:$0xff]   ;;  %v15455_v35 = vld [vmem:[%s19256_s1 + $0x1e00] sm:$0xff]  }
 0x385   :  { %14259 = vmatprep.subr.bf16.mxu0 %v15393_v53  ;;  %11322 = vmatprep.mubr.bf16.mxu0 %v11968_v38  ;;  %v15431_v51 = vld [vmem:[%s19256_s1 + $0x1d10] sm:$0xff]   ;;  %v15433_v53 = vld [vmem:[%s19256_s1 + $0x1d58] sm:$0xff]   ;;  %v15456_v36 = vld [vmem:[%s19256_s1 + $0x1e80] sm:$0xff]  }
 0x386   :  { %11282 = vmatmul.mubr.bf16.vlgmr.msra.gmra.mrb[108].mxu1 %v11965_v47  ;;  %v15427_v47 = vld [vmem:[%s19256_s1 + $0x1d08] sm:$0xff]  }
 0x387   :  { %14280 = vmatpush3.bf16.msra.mxu1 %v15392_v52  ;;  %11363 = vmatprep.mubr.bf16.mxu1 %v11970_v40  ;;  %v15432_v52 = vld [vmem:[%s19256_s1 + $0x1d90] sm:$0xff]   ;;  %v15458_v38 = vld [vmem:[%s19256_s1 + $0x1ec8] sm:$0xff]  }
 0x388   :  { %14281 = vmatprep.subr.bf16.mxu1 %v15394_v54  ;;  %14260 = vmatpush3.bf16.msra.mxu0 %v15395_v55  ;;  %v15434_v54 = vld [vmem:[%s19256_s1 + $0x1dd8] sm:$0xff]   ;;  %v15460_v40 = vld [vmem:[%s19256_s1 + $0x1e88] sm:$0xff]  }
 0x389   :  { %14261 = vmatprep.subr.bf16.mxu0 %v15397_v57  ;;  %v15435_v55 = vld [vmem:[%s19256_s1 + $0x1d18] sm:$0xff]  }
 0x38a   :  { %v15436_v57 = vld [vmem:[%s19256_s1 + $0x1d98] sm:$0xff]  }
 0x38b   :  { %14282 = vmatpush3.bf16.msra.mxu1 %v15396_v56 }
 0x38c   :  { %14283 = vmatprep.subr.bf16.mxu1 %v15398_v58  ;;  %14262 = vmatpush3.bf16.msra.mxu0 %v15399_v59  ;;  %v15437_v59 = vld [vmem:[%s19256_s1 + $0x1d60] sm:$0xff]  }
 0x38d   :  { %14263 = vmatprep.subr.bf16.mxu0 %v15401_v61  ;;  %v15438_v61 = vld [vmem:[%s19256_s1 + $0x1de0] sm:$0xff]  }
 0x38f   :  { %14284 = vmatpush3.bf16.msra.mxu1 %v15400_v60 }
 0x390   :  { %14285 = vmatprep.subr.bf16.mxu1 %v15402_v62  ;;  %14264 = vmatpush3.bf16.msra.mxu0 %v15403_v0  ;;  %v15439_v0 = vld [vmem:[%s19256_s1 + $0x1d20] sm:$0xff]  }
 0x391   :  { %14265 = vmatprep.subr.bf16.mxu0 %v15405_v4 }
 0x393   :  { %14286 = vmatpush3.bf16.msra.mxu1 %v15404_v2 }
 0x394   :  { %14287 = vmatprep.subr.bf16.mxu1 %v15406_v7  ;;  %14266 = vmatpush3.bf16.msra.mxu0 %v15407_v10 }
 0x395   :  { %14267 = vmatprep.subr.bf16.mxu0 %v15409_v16  ;;  %v15445_v16 = vld [vmem:[%s19256_s1 + $0x1d70] sm:$0xff]  }
 0x396   :  { %v13965_v63 = vpop.f32.mrb[84].mxu0 }
 0x397   :  { %v13966_v3 = vpop.f32.mrb[85].mxu0  ;;  %14288 = vmatpush3.bf16.msra.mxu1 %v15408_v13 }
 0x398   :  { %v13967_v5 = vadd.f32 %v13966_v3, %v13965_v63  ;;  %v13968_v9 = vpop.f32.mrb[86].mxu0  ;;  %14289 = vmatprep.subr.bf16.mxu1 %v15410_v19  ;;  %14268 = vmatpush3.bf16.msra.mxu0 %v15411_v21  ;;  %v15440_v3 = vld [vmem:[%s19256_s1 + $0x1da0] sm:$0xff]   ;;  %v15447_v19 = vld [vmem:[%s19256_s1 + $0x1d30] sm:$0xff]   ;;  %v15449_v21 = vld [vmem:[%s19256_s1 + $0x1d78] sm:$0xff]  }
 0x399   :  { %v13987_v1 = vpop.f32.mrb[84].mxu1  ;;  %v13969_v14 = vpop.f32.mrb[87].mxu0  ;;  %14269 = vmatprep.subr.bf16.mxu0 %v15413_v25  ;;  %v85_v25 = vld [vmem:[%s19257_s0 + $0x1d0] sm:$0xff] }
 0x39a   :  { %v13988_v6 = vpop.f32.mrb[85].mxu1  ;;  %v10751_v11 = vadd.f32 %v13967_v5, %v18673_v23  ;;  %v13970_v17 = vadd.f32 %v13969_v14, %v13968_v9  ;;  %v15412_v23 = vld [vmem:[%s19256_s1 + $0x1ca8] sm:$0xff]  }
 0x39b   :  { %v13989_v8 = vadd.f32 %v13988_v6, %v13987_v1  ;;  %v13990_v12 = vpop.f32.mrb[86].mxu1  ;;  %14290 = vmatpush3.bf16.msra.mxu1 %v15412_v23  ;;  %v15441_v6 = vld [vmem:[%s19256_s1 + $0x1d68] sm:$0xff]   ;;  %v15451_v23 = vld [vmem:[%s19256_s1 + $0x1d38] sm:$0xff]  }
 0x39c   :  { %v13991_v18 = vpop.f32.mrb[87].mxu1  ;;  %v10754_v22 = vadd.f32 %v13970_v17, %v18688_v32  ;;  %14291 = vmatprep.subr.bf16.mxu1 %v15414_v26  ;;  %14270 = vmatpush3.bf16.msra.mxu0 %v15415_v27  ;;  %v15420_v32 = vld [vmem:[%s19256_s1 + $0x1cb8] sm:$0xff]   ;;  %v15442_v9 = vld [vmem:[%s19256_s1 + $0x1de8] sm:$0xff]   ;;  %v149_v26 = vld [vmem:[%s19257_s0 + $0x3d0] sm:$0xff] }
 0x39d   :  { %v18787_v15 = vadd.f32 %v13989_v8, %v10751_v11  ;;  %v13992_v20 = vadd.f32 %v13991_v18, %v13990_v12  ;;  %14271 = vmatprep.subr.bf16.mxu0 %v15417_v29  ;;  %v15443_v12 = vld [vmem:[%s19256_s1 + $0x1d28] sm:$0xff]   ;;  %v15446_v18 = vld [vmem:[%s19256_s1 + $0x1df0] sm:$0xff]   ;;  %v86_v27 = vld [vmem:[%s19257_s0 + $0x1d8] sm:$0xff]  ;;  %v11972_v29 = vcombine.high %v85_v25, %v149_v26 }
 0x39e   :  { %v15444_v14 = vld [vmem:[%s19256_s1 + $0x1da8] sm:$0xff]  }
 0x39f   :  { %v18802_v24 = vadd.f32 %v13992_v20, %v10754_v22  ;;  %14292 = vmatpush3.bf16.msra.mxu1 %v15416_v28  ;;  %v15448_v20 = vld [vmem:[%s19256_s1 + $0x1db0] sm:$0xff]   ;;  %v15450_v22 = vld [vmem:[%s19256_s1 + $0x1df8] sm:$0xff]   ;;  %v11971_v28 = vcombine.low %v85_v25, %v149_v26  ;;  %v15485_v25 = vld [vmem:[%s19256_s1 + $0x1f40] sm:$0xff]  }
 0x3a0   :  { %14293 = vmatprep.subr.bf16.mxu1 %v15418_v30  ;;  %14272 = vmatpush3.bf16.msra.mxu0 %v15419_v31  ;;  %v150_v30 = vld [vmem:[%s19257_s0 + $0x3d8] sm:$0xff]  ;;  %v15486_v26 = vld [vmem:[%s19256_s1 + $0x1fc0] sm:$0xff]  }
 0x3a1   :  { %14301 = vmatprep.subr.bf16.mxu0 %v15421_v41  ;;  %v11973_v31 = vcombine.low %v86_v27, %v150_v30  ;;  %v15461_v41 = vld [vmem:[%s19256_s1 + $0x1e50] sm:$0xff]  }
 0x3a3   :  { %14294 = vmatpush3.bf16.msra.mxu1 %v15420_v32  ;;  %11323 = vmatmul.mubr.bf16.vlgmr.msra.gmra.mrb[112].mxu0 %v11967_v37  ;;  %v11974_v32 = vcombine.high %v86_v27, %v150_v30  ;;  %v15457_v37 = vld [vmem:[%s19256_s1 + $0x1e48] sm:$0xff]   ;;  %v15487_v27 = vld [vmem:[%s19256_s1 + $0x1f00] sm:$0xff]  }
 0x3a4   :  { %14323 = vmatprep.subr.bf16.mxu1 %v15422_v42  ;;  %14302 = vmatpush3.bf16.msra.mxu0 %v15423_v43  ;;  %v15462_v42 = vld [vmem:[%s19256_s1 + $0x1ed0] sm:$0xff]   ;;  %v15490_v30 = vld [vmem:[%s19256_s1 + $0x1fc8] sm:$0xff]  }
 0x3a5   :  { %14303 = vmatprep.subr.bf16.mxu0 %v15425_v45  ;;  %11404 = vmatprep.mubr.bf16.mxu0 %v11972_v29  ;;  %v15463_v43 = vld [vmem:[%s19256_s1 + $0x1e10] sm:$0xff]   ;;  %v15465_v45 = vld [vmem:[%s19256_s1 + $0x1e58] sm:$0xff]   ;;  %v15489_v29 = vld [vmem:[%s19256_s1 + $0x1f48] sm:$0xff]  }
 0x3a6   :  { %11364 = vmatmul.mubr.bf16.vlgmr.msra.gmra.mrb[112].mxu1 %v11969_v39  ;;  %v15459_v39 = vld [vmem:[%s19256_s1 + $0x1e08] sm:$0xff]  }
 0x3a7   :  { %14324 = vmatpush3.bf16.msra.mxu1 %v15424_v44  ;;  %11445 = vmatprep.mubr.bf16.mxu1 %v11974_v32  ;;  %v15464_v44 = vld [vmem:[%s19256_s1 + $0x1e90] sm:$0xff]   ;;  %v15492_v32 = vld [vmem:[%s19256_s1 + $0x1f88] sm:$0xff]  }
 0x3a8   :  { %14325 = vmatprep.subr.bf16.mxu1 %v15426_v46  ;;  %14304 = vmatpush3.bf16.msra.mxu0 %v15427_v47  ;;  %v15466_v46 = vld [vmem:[%s19256_s1 + $0x1ed8] sm:$0xff]  }
 0x3a9   :  { %14305 = vmatprep.subr.bf16.mxu0 %v15429_v49 }
 0x3ab   :  { %14326 = vmatpush3.bf16.msra.mxu1 %v15428_v48  ;;  %v15467_v48 = vld [vmem:[%s19256_s1 + $0x1e18] sm:$0xff]  }
 0x3ac   :  { %14327 = vmatprep.subr.bf16.mxu1 %v15430_v50  ;;  %14306 = vmatpush3.bf16.msra.mxu0 %v15431_v51  ;;  %v15468_v50 = vld [vmem:[%s19256_s1 + $0x1e98] sm:$0xff]  }
 0x3ad   :  { %14307 = vmatprep.subr.bf16.mxu0 %v15433_v53 }
 0x3af   :  { %14328 = vmatpush3.bf16.msra.mxu1 %v15432_v52  ;;  %v15469_v52 = vld [vmem:[%s19256_s1 + $0x1e60] sm:$0xff]  }
 0x3b0   :  { %14329 = vmatprep.subr.bf16.mxu1 %v15434_v54  ;;  %14308 = vmatpush3.bf16.msra.mxu0 %v15435_v55  ;;  %v15470_v55 = vld [vmem:[%s19256_s1 + $0x1ee0] sm:$0xff]  }
 0x3b1   :  { %14309 = vmatprep.subr.bf16.mxu0 %v15437_v59 }
 0x3b3   :  { %14330 = vmatpush3.bf16.msra.mxu1 %v15436_v57 }
 0x3b4   :  { %14331 = vmatprep.subr.bf16.mxu1 %v15438_v61  ;;  %14310 = vmatpush3.bf16.msra.mxu0 %v15439_v0  ;;  %v15472_v61 = vld [vmem:[%s19256_s1 + $0x1ea0] sm:$0xff]   ;;  %v15473_v0 = vld [vmem:[%s19256_s1 + $0x1e68] sm:$0xff]  }
 0x3b5   :  { %14311 = vmatprep.subr.bf16.mxu0 %v15441_v6 }
 0x3b6   :  { %v14009_v56 = vpop.f32.mrb[88].mxu0 }
 0x3b7   :  { %v14010_v60 = vpop.f32.mrb[89].mxu0  ;;  %14332 = vmatpush3.bf16.msra.mxu1 %v15440_v3  ;;  %v15474_v3 = vld [vmem:[%s19256_s1 + $0x1ee8] sm:$0xff]  }
 0x3b8   :  { %v14011_v62 = vadd.f32 %v14010_v60, %v14009_v56  ;;  %v14012_v2 = vpop.f32.mrb[90].mxu0  ;;  %14333 = vmatprep.subr.bf16.mxu1 %v15442_v9  ;;  %14312 = vmatpush3.bf16.msra.mxu0 %v15443_v12  ;;  %v15477_v9 = vld [vmem:[%s19256_s1 + $0x1e70] sm:$0xff]  }
 0x3b9   :  { %v14031_v58 = vpop.f32.mrb[88].mxu1  ;;  %v14013_v7 = vpop.f32.mrb[91].mxu0  ;;  %14313 = vmatprep.subr.bf16.mxu0 %v15445_v16  ;;  %v15480_v12 = vld [vmem:[%s19256_s1 + $0x1eb0] sm:$0xff]   ;;  %v15484_v16 = vld [vmem:[%s19256_s1 + $0x1eb8] sm:$0xff]  }
 0x3ba   :  { %v14032_v63 = vpop.f32.mrb[89].mxu1  ;;  %v10833_v4 = vadd.f32 %v14011_v62, %v18787_v15  ;;  %v14014_v10 = vadd.f32 %v14013_v7, %v14012_v2  ;;  %v15476_v7 = vld [vmem:[%s19256_s1 + $0x1ea8] sm:$0xff]  }
 0x3bb   :  { %v14033_v1 = vadd.f32 %v14032_v63, %v14031_v58  ;;  %v14034_v5 = vpop.f32.mrb[90].mxu1  ;;  %14334 = vmatpush3.bf16.msra.mxu1 %v15444_v14  ;;  %v15471_v58 = vld [vmem:[%s19256_s1 + $0x1e20] sm:$0xff]   ;;  %v15482_v14 = vld [vmem:[%s19256_s1 + $0x1ef8] sm:$0xff]  }
 0x3bc   :  { %v14035_v11 = vpop.f32.mrb[91].mxu1  ;;  %v10836_v15 = vadd.f32 %v14014_v10, %v18802_v24  ;;  %14335 = vmatprep.subr.bf16.mxu1 %v15446_v18  ;;  %14314 = vmatpush3.bf16.msra.mxu0 %v15447_v19  ;;  %v15452_v24 = vld [vmem:[%s19256_s1 + $0x1db8] sm:$0xff]   ;;  %v15478_v10 = vld [vmem:[%s19256_s1 + $0x1ef0] sm:$0xff]   ;;  %v151_v18 = vld [vmem:[%s19257_s0 + $0x3e0] sm:$0xff] }
 0x3bd   :  { %v18904_v8 = vadd.f32 %v14033_v1, %v10833_v4  ;;  %v14036_v13 = vadd.f32 %v14035_v11, %v14034_v5  ;;  %14315 = vmatprep.subr.bf16.mxu0 %v15449_v21  ;;  %v15475_v5 = vld [vmem:[%s19256_s1 + $0x1e28] sm:$0xff]   ;;  %v15479_v11 = vld [vmem:[%s19256_s1 + $0x1e30] sm:$0xff]  }
 0x3be   :  { %v88_v21 = vld [vmem:[%s19257_s0 + $0x1e8] sm:$0xff] }
 0x3bf   :  { %v18919_v17 = vadd.f32 %v14036_v13, %v10836_v15  ;;  %14336 = vmatpush3.bf16.msra.mxu1 %v15448_v20  ;;  %v15481_v13 = vld [vmem:[%s19256_s1 + $0x1e78] sm:$0xff]  }
 0x3c0   :  { %14337 = vmatprep.subr.bf16.mxu1 %v15450_v22  ;;  %14316 = vmatpush3.bf16.msra.mxu0 %v15451_v23  ;;  %v15483_v15 = vld [vmem:[%s19256_s1 + $0x1e38] sm:$0xff]   ;;  %v152_v22 = vld [vmem:[%s19257_s0 + $0x3e8] sm:$0xff] }
 0x3c1   :  { %14345 = vmatprep.subr.bf16.mxu0 %v15453_v33  ;;  %v11977_v23 = vcombine.low %v88_v21, %v152_v22  ;;  %v15493_v33 = vld [vmem:[%s19256_s1 + $0x1f50] sm:$0xff]  }
 0x3c3   :  { %14338 = vmatpush3.bf16.msra.mxu1 %v15452_v24  ;;  %11405 = vmatmul.mubr.bf16.vlgmr.msra.gmra.mrb[116].mxu0 %v11971_v28  ;;  %v11978_v24 = vcombine.high %v88_v21, %v152_v22  ;;  %v15488_v28 = vld [vmem:[%s19256_s1 + $0x1f80] sm:$0xff]  }
 0x3c4   :  { %14367 = vmatprep.subr.bf16.mxu1 %v15454_v34  ;;  %14346 = vmatpush3.bf16.msra.mxu0 %v15455_v35  ;;  %v15494_v34 = vld [vmem:[%s19256_s1 + $0x1fd0] sm:$0xff]  }
 0x3c5   :  { %14347 = vmatprep.subr.bf16.mxu0 %v15457_v37  ;;  %v15495_v35 = vld [vmem:[%s19256_s1 + $0x1f10] sm:$0xff]   ;;  %v15497_v37 = vld [vmem:[%s19256_s1 + $0x1f58] sm:$0xff]  }
 0x3c6   :  { %11446 = vmatmul.mubr.bf16.vlgmr.msra.gmra.mrb[116].mxu1 %v11973_v31  ;;  %v15491_v31 = vld [vmem:[%s19256_s1 + $0x1f08] sm:$0xff]  }
 0x3c7   :  { %14368 = vmatpush3.bf16.msra.mxu1 %v15456_v36  ;;  %11527 = vmatprep.mubr.bf16.mxu1 %v11978_v24  ;;  %v15496_v36 = vld [vmem:[%s19256_s1 + $0x1f90] sm:$0xff]  }
 0x3c8   :  { %14369 = vmatprep.subr.bf16.mxu1 %v15458_v38  ;;  %14348 = vmatpush3.bf16.msra.mxu0 %v15459_v39  ;;  %v15498_v38 = vld [vmem:[%s19256_s1 + $0x1fd8] sm:$0xff]  }
 0x3c9   :  { %14349 = vmatprep.subr.bf16.mxu0 %v15461_v41 }
 0x3cb   :  { %14370 = vmatpush3.bf16.msra.mxu1 %v15460_v40  ;;  %v15499_v40 = vld [vmem:[%s19256_s1 + $0x1f18] sm:$0xff]  }
 0x3cc   :  { %14371 = vmatprep.subr.bf16.mxu1 %v15462_v42  ;;  %14350 = vmatpush3.bf16.msra.mxu0 %v15463_v43  ;;  %v15500_v42 = vld [vmem:[%s19256_s1 + $0x1f98] sm:$0xff]  }
 0x3cd   :  { %14351 = vmatprep.subr.bf16.mxu0 %v15465_v45 }
 0x3cf   :  { %14372 = vmatpush3.bf16.msra.mxu1 %v15464_v44  ;;  %v15501_v44 = vld [vmem:[%s19256_s1 + $0x1f60] sm:$0xff]  }
 0x3d0   :  { %14373 = vmatprep.subr.bf16.mxu1 %v15466_v46  ;;  %14352 = vmatpush3.bf16.msra.mxu0 %v15467_v48 }
 0x3d1   :  { %14353 = vmatprep.subr.bf16.mxu0 %v15469_v52 }
 0x3d3   :  { %14374 = vmatpush3.bf16.msra.mxu1 %v15468_v50  ;;  %v15503_v50 = vld [vmem:[%s19256_s1 + $0x1f20] sm:$0xff]  }
 0x3d4   :  { %14375 = vmatprep.subr.bf16.mxu1 %v15470_v55  ;;  %14354 = vmatpush3.bf16.msra.mxu0 %v15471_v58 }
 0x3d5   :  { %14355 = vmatprep.subr.bf16.mxu0 %v15473_v0 }
 0x3d6   :  { %v14053_v47 = vpop.f32.mrb[92].mxu0 }
 0x3d7   :  { %v14054_v51 = vpop.f32.mrb[93].mxu0  ;;  %14376 = vmatpush3.bf16.msra.mxu1 %v15472_v61  ;;  %v15507_v61 = vld [vmem:[%s19256_s1 + $0x1f28] sm:$0xff]  }
 0x3d8   :  { %v14055_v53 = vadd.f32 %v14054_v51, %v14053_v47  ;;  %v14056_v57 = vpop.f32.mrb[94].mxu0  ;;  %14377 = vmatprep.subr.bf16.mxu1 %v15474_v3  ;;  %14356 = vmatpush3.bf16.msra.mxu0 %v15475_v5  ;;  %v15502_v47 = vld [vmem:[%s19256_s1 + $0x1fe0] sm:$0xff]   ;;  %v15511_v3 = vld [vmem:[%s19256_s1 + $0x1f30] sm:$0xff]   ;;  %v15513_v5 = vld [vmem:[%s19256_s1 + $0x1f78] sm:$0xff]  }
 0x3d9   :  { %v14075_v49 = vpop.f32.mrb[92].mxu1  ;;  %v14057_v62 = vpop.f32.mrb[95].mxu0  ;;  %14357 = vmatprep.subr.bf16.mxu0 %v15477_v9  ;;  %v89_v9 = vld [vmem:[%s19257_s0 + $0x1f0] sm:$0xff] }
 0x3da   :  { %v14076_v54 = vpop.f32.mrb[93].mxu1  ;;  %v10915_v59 = vadd.f32 %v14055_v53, %v18904_v8  ;;  %v14058_v1 = vadd.f32 %v14057_v62, %v14056_v57  ;;  %v15504_v53 = vld [vmem:[%s19256_s1 + $0x1fa0] sm:$0xff]  }
 0x3db   :  { %v14077_v56 = vadd.f32 %v14076_v54, %v14075_v49  ;;  %v14078_v60 = vpop.f32.mrb[94].mxu1  ;;  %14378 = vmatpush3.bf16.msra.mxu1 %v15476_v7  ;;  %v15515_v7 = vld [vmem:[%s19256_s1 + $0x1f38] sm:$0xff]  }
 0x3dc   :  { %v14079_v2 = vpop.f32.mrb[95].mxu1  ;;  %v10918_v6 = vadd.f32 %v14058_v1, %v18919_v17  ;;  %14379 = vmatprep.subr.bf16.mxu1 %v15478_v10  ;;  %14358 = vmatpush3.bf16.msra.mxu0 %v15479_v11  ;;  %v87_v17 = vld [vmem:[%s19257_s0 + $0x1e0] sm:$0xff]  ;;  %v15509_v1 = vld [vmem:[%s19256_s1 + $0x1f70] sm:$0xff]   ;;  %v90_v11 = vld [vmem:[%s19257_s0 + $0x1f8] sm:$0xff] }
 0x3dd   :  { %v19015_v63 = vadd.f32 %v14077_v56, %v10915_v59  ;;  %v14080_v4 = vadd.f32 %v14079_v2, %v14078_v60  ;;  %14359 = vmatprep.subr.bf16.mxu0 %v15481_v13  ;;  %v11975_v19 = vcombine.low %v87_v17, %v151_v18  ;;  %v11976_v20 = vcombine.high %v87_v17, %v151_v18  ;;  %v15505_v56 = vld [vmem:[%s19256_s1 + $0x1f68] sm:$0xff]   ;;  %v15510_v2 = vld [vmem:[%s19256_s1 + $0x1ff0] sm:$0xff]  }
 0x3de   :  { %v15506_v59 = vld [vmem:[%s19256_s1 + $0x1fe8] sm:$0xff]   ;;  %v153_v10 = vld [vmem:[%s19257_s0 + $0x3f0] sm:$0xff] }
 0x3df   :  { %v19030_v8 = vadd.f32 %v14080_v4, %v10918_v6  ;;  %14380 = vmatpush3.bf16.msra.mxu1 %v15480_v12  ;;  %11486 = vmatprep.mubr.bf16.mxu0 %v11976_v20  ;;  %v15512_v4 = vld [vmem:[%s19256_s1 + $0x1fb0] sm:$0xff]   ;;  %v15514_v6 = vld [vmem:[%s19256_s1 + $0x1ff8] sm:$0xff]   ;;  %v11979_v13 = vcombine.low %v89_v9, %v153_v10 }
 0x3e0   :  { %14381 = vmatprep.subr.bf16.mxu1 %v15482_v14  ;;  %14360 = vmatpush3.bf16.msra.mxu0 %v15483_v15  ;;  %v154_v12 = vld [vmem:[%s19257_s0 + $0x3f8] sm:$0xff]  ;;  %v11980_v14 = vcombine.high %v89_v9, %v153_v10  ;;  %v15525_v10 = vld [vmem:[%s19260_s5] sm:$0xff]  }
 0x3e1   :  { %14389 = vmatprep.subr.bf16.mxu0 %v15485_v25  ;;  %v11981_v15 = vcombine.low %v90_v11, %v154_v12  ;;  %v15524_v9 = vld [vmem:[%s19259_s3 + $0x38] sm:$0xff]  }
 0x3e3   :  { %14382 = vmatpush3.bf16.msra.mxu1 %v15484_v16  ;;  %11487 = vmatmul.mubr.bf16.vlgmr.msra.gmra.mrb[120].mxu0 %v11975_v19  ;;  %v11982_v16 = vcombine.high %v90_v11, %v154_v12  ;;  %v15526_v11 = vld [vmem:[%s19260_s5 + $0x8] sm:$0xff]   ;;  %v15527_v12 = vld [vmem:[%s19260_s5 + $0x10] sm:$0xff]  }
 0x3e4   :  { %14411 = vmatprep.subr.bf16.mxu1 %v15486_v26  ;;  %14390 = vmatpush3.bf16.msra.mxu0 %v15487_v27 }
 0x3e5   :  { %14391 = vmatprep.subr.bf16.mxu0 %v15489_v29  ;;  %11568 = vmatprep.mubr.bf16.mxu0 %v11980_v14 }
 0x3e6   :  { %11528 = vmatmul.mubr.bf16.vlgmr.msra.gmra.mrb[120].mxu1 %v11977_v23 }
 0x3e7   :  { %14412 = vmatpush3.bf16.msra.mxu1 %v15488_v28  ;;  %11609 = vmatprep.mubr.bf16.mxu1 %v11982_v16 }
 0x3e8   :  { %14413 = vmatprep.subr.bf16.mxu1 %v15490_v30  ;;  %14392 = vmatpush3.bf16.msra.mxu0 %v15491_v31 }
 0x3e9   :  { %14393 = vmatprep.subr.bf16.mxu0 %v15493_v33 }
 0x3eb   :  { %14414 = vmatpush3.bf16.msra.mxu1 %v15492_v32 }
 0x3ec   :  { %14415 = vmatprep.subr.bf16.mxu1 %v15494_v34  ;;  %14394 = vmatpush3.bf16.msra.mxu0 %v15495_v35 }
 0x3ed   :  { %14395 = vmatprep.subr.bf16.mxu0 %v15497_v37 }
 0x3ef   :  { %14416 = vmatpush3.bf16.msra.mxu1 %v15496_v36 }
 0x3f0   :  { %14417 = vmatprep.subr.bf16.mxu1 %v15498_v38  ;;  %14396 = vmatpush3.bf16.msra.mxu0 %v15499_v40 }
 0x3f1   :  { %14397 = vmatprep.subr.bf16.mxu0 %v15501_v44 }
 0x3f3   :  { %14418 = vmatpush3.bf16.msra.mxu1 %v15500_v42 }
 0x3f4   :  { %14419 = vmatprep.subr.bf16.mxu1 %v15502_v47  ;;  %14398 = vmatpush3.bf16.msra.mxu0 %v15503_v50  ;;  %v15517_v50 = vld [vmem:[%s19259_s3] sm:$0xff]  }
 0x3f5   :  { %14399 = vmatprep.subr.bf16.mxu0 %v15505_v56 }
 0x3f6   :  { %v14097_v39 = vpop.f32.mrb[96].mxu0 }
 0x3f7   :  { %v14098_v43 = vpop.f32.mrb[97].mxu0  ;;  %14420 = vmatpush3.bf16.msra.mxu1 %v15504_v53  ;;  %v15520_v53 = vld [vmem:[%s19259_s3 + $0x18] sm:$0xff]  }
 0x3f8   :  { %v14099_v45 = vadd.f32 %v14098_v43, %v14097_v39  ;;  %v14100_v49 = vpop.f32.mrb[98].mxu0  ;;  %14421 = vmatprep.subr.bf16.mxu1 %v15506_v59  ;;  %14400 = vmatpush3.bf16.msra.mxu0 %v15507_v61 }
 0x3f9   :  { %v14119_v41 = vpop.f32.mrb[96].mxu1  ;;  %v14101_v54 = vpop.f32.mrb[99].mxu0  ;;  %14401 = vmatprep.subr.bf16.mxu0 %v15509_v1 }
 0x3fa   :  { %v14120_v46 = vpop.f32.mrb[97].mxu1  ;;  %v10997_v51 = vadd.f32 %v14099_v45, %v19015_v63  ;;  %v14102_v57 = vadd.f32 %v14101_v54, %v14100_v49  ;;  %v15508_v63 = vld [vmem:[%s19256_s1 + $0x1fa8] sm:$0xff]   ;;  %v15533_v49 = vmov 0.0   ;;  %v15521_v54 = vld [vmem:[%s19259_s3 + $0x20] sm:$0xff]  }
 0x3fb   :  { %v14121_v48 = vadd.f32 %v14120_v46, %v14119_v41  ;;  %v14122_v52 = vpop.f32.mrb[98].mxu1  ;;  %14422 = vmatpush3.bf16.msra.mxu1 %v15508_v63 }
 0x3fc   :  { %v14123_v58 = vpop.f32.mrb[99].mxu1  ;;  %v11000_v62 = vadd.f32 %v14102_v57, %v19030_v8  ;;  %14423 = vmatprep.subr.bf16.mxu1 %v15510_v2  ;;  %14402 = vmatpush3.bf16.msra.mxu0 %v15511_v3  ;;  %v15516_v8 = vld [vmem:[%s19256_s1 + $0x1fb8] sm:$0xff]  }
 0x3fd   :  { %v11038_v55 = vadd.f32 %v14121_v48, %v10997_v51  ;;  %v14124_v60 = vadd.f32 %v14123_v58, %v14122_v52  ;;  %14403 = vmatprep.subr.bf16.mxu0 %v15513_v5  ;;  %v15518_v51 = vld [vmem:[%s19259_s3 + $0x8] sm:$0xff]   ;;  %v15519_v52 = vld [vmem:[%s19259_s3 + $0x10] sm:$0xff]  }
 0x3ff   :  { %v11041_v0 = vadd.f32 %v14124_v60, %v11000_v62  ;;  %14424 = vmatpush3.bf16.msra.mxu1 %v15512_v4 }
 0x400   :  { %14425 = vmatprep.subr.bf16.mxu1 %v15514_v6  ;;  %14404 = vmatpush3.bf16.msra.mxu0 %v15515_v7  ;;  %v15522_v6 = vld [vmem:[%s19259_s3 + $0x28] sm:$0xff]  }
 0x401   :  { %14451 = vmatprep.subr.bf16.mxu0 %v15533_v49 }
 0x403   :  { %14426 = vmatpush3.bf16.msra.mxu1 %v15516_v8  ;;  %11569 = vmatmul.mubr.bf16.vlgmr.msra.gmra.mrb[124].mxu0 %v11979_v13  ;;  %v15523_v8 = vld [vmem:[%s19259_s3 + $0x30] sm:$0xff]   ;;  %v15528_v13 = vld [vmem:[%s19260_s5 + $0x18] sm:$0xff]  }
 0x404   :  { %14471 = vmatprep.subr.bf16.mxu1 %v15533_v49  ;;  %14452 = vmatpush3.bf16.msra.mxu0 %v15517_v50 }
 0x405   :  { %14453 = vmatprep.subr.bf16.mxu0 %v15533_v49  ;;  %14467 = vmatprep.mubr.msk.bf16.mxu0 %vm15534_vm0, %v15533_v49 }
 0x406   :  { %11610 = vmatmul.mubr.bf16.vlgmr.msra.gmra.mrb[124].mxu1 %v11981_v15 }
 0x407   :  { %14487 = vmatprep.mubr.msk.bf16.mxu1 %vm15534_vm0, %v15533_v49  ;;  %14472 = vmatpush3.bf16.msra.mxu1 %v15525_v10 }
 0x408   :  { %14454 = vmatpush3.bf16.msra.mxu0 %v15518_v51  ;;  %14473 = vmatprep.subr.bf16.mxu1 %v15533_v49 }
 0x409   :  { %14455 = vmatprep.subr.bf16.mxu0 %v15533_v49 }
 0x40b   :  { %14474 = vmatpush3.bf16.msra.mxu1 %v15526_v11 }
 0x40c   :  { %14456 = vmatpush3.bf16.msra.mxu0 %v15519_v52  ;;  %14475 = vmatprep.subr.bf16.mxu1 %v15533_v49 }
 0x40d   :  { %14457 = vmatprep.subr.bf16.mxu0 %v15533_v49 }
 0x40f   :  { %14476 = vmatpush3.bf16.msra.mxu1 %v15527_v12 }
 0x410   :  { %14458 = vmatpush3.bf16.msra.mxu0 %v15520_v53  ;;  %14477 = vmatprep.subr.bf16.mxu1 %v15533_v49 }
 0x411   :  { %14459 = vmatprep.subr.bf16.mxu0 %v15533_v49 }
 0x413   :  { %14478 = vmatpush3.bf16.msra.mxu1 %v15528_v13 }
 0x414   :  { %14460 = vmatpush3.bf16.msra.mxu0 %v15521_v54  ;;  %14479 = vmatprep.subr.bf16.mxu1 %v15533_v49 }
 0x415   :  { %14461 = vmatprep.subr.bf16.mxu0 %v15533_v49 }
 0x416   :  { %v14141_v17 = vpop.f32.mrb[100].mxu0 }
 0x417   :  { %v14142_v19 = vpop.f32.mrb[101].mxu0 }
 0x418   :  { %v14143_v21 = vadd.f32 %v14142_v19, %v14141_v17  ;;  %v14144_v23 = vpop.f32.mrb[102].mxu0  ;;  %14462 = vmatpush3.bf16.msra.mxu0 %v15522_v6 }
 0x419   :  { %v14163_v18 = vpop.f32.mrb[100].mxu1  ;;  %v14145_v25 = vpop.f32.mrb[103].mxu0  ;;  %14463 = vmatprep.subr.bf16.mxu0 %v15533_v49 }
 0x41a   :  { %v14164_v20 = vpop.f32.mrb[101].mxu1  ;;  %v11079_v27 = vadd.f32 %v14143_v21, %v11038_v55  ;;  %v14146_v28 = vadd.f32 %v14145_v25, %v14144_v23 }
 0x41b   :  { %v14165_v22 = vadd.f32 %v14164_v20, %v14163_v18  ;;  %v14166_v24 = vpop.f32.mrb[102].mxu1  ;;  %v15529_v18 = vld [vmem:[%s19260_s5 + $0x20] sm:$0xff]  }
 0x41c   :  { %v14167_v26 = vpop.f32.mrb[103].mxu1  ;;  %v11082_v31 = vadd.f32 %v14146_v28, %v11041_v0  ;;  %14464 = vmatpush3.bf16.msra.mxu0 %v15523_v8  ;;  %14480 = vmatpush3.bf16.msra.mxu1 %v15529_v18  ;;  %v15530_v28 = vld [vmem:[%s19260_s5 + $0x28] sm:$0xff]  }
 0x41d   :  { %v14168_v29 = vadd.f32 %v14167_v26, %v14166_v24  ;;  %v11120_v30 = vadd.f32 %v14165_v22, %v11079_v27  ;;  %14465 = vmatprep.subr.bf16.mxu0 %v15533_v49  ;;  %14481 = vmatprep.subr.bf16.mxu1 %v15533_v49 }
 0x41f   :  { %v11123_v32 = vadd.f32 %v14168_v29, %v11082_v31 }
 0x420   :  { %14466 = vmatpush3.bf16.msra.mxu0 %v15524_v9  ;;  %14482 = vmatpush3.bf16.msra.mxu1 %v15530_v28 }
 0x421   :  { %14483 = vmatprep.subr.bf16.mxu1 %v15533_v49 }
 0x436   :  { %v14185_v33 = vpop.f32.mrb[104].mxu0 }
 0x437   :  { %v14186_v35 = vpop.f32.mrb[105].mxu0 }
 0x438   :  { %v14187_v36 = vadd.f32 %v14186_v35, %v14185_v33  ;;  %v14188_v38 = vpop.f32.mrb[106].mxu0 }
 0x439   :  { %v14207_v34 = vpop.f32.mrb[104].mxu1  ;;  %v14189_v41 = vpop.f32.mrb[107].mxu0 }
 0x43a   :  { %v14208_v37 = vpop.f32.mrb[105].mxu1  ;;  %v11161_v42 = vadd.f32 %v14187_v36, %v11120_v30  ;;  %v14190_v43 = vadd.f32 %v14189_v41, %v14188_v38 }
 0x43b   :  { %v14209_v39 = vadd.f32 %v14208_v37, %v14207_v34  ;;  %v14210_v40 = vpop.f32.mrb[106].mxu1 }
 0x43c   :  { %v14211_v44 = vpop.f32.mrb[107].mxu1  ;;  %v11164_v47 = vadd.f32 %v14190_v43, %v11123_v32 }
 0x43d   :  { %v14212_v45 = vadd.f32 %v14211_v44, %v14210_v40  ;;  %v11202_v46 = vadd.f32 %v14209_v39, %v11161_v42 }
 0x43f   :  { %v11205_v48 = vadd.f32 %v14212_v45, %v11164_v47 }
 0x456   :  { %v14229_v55 = vpop.f32.mrb[108].mxu0 }
 0x457   :  { %v14230_v57 = vpop.f32.mrb[109].mxu0 }
 0x458   :  { %v14231_v58 = vadd.f32 %v14230_v57, %v14229_v55  ;;  %v14232_v60 = vpop.f32.mrb[110].mxu0 }
 0x459   :  { %v14251_v56 = vpop.f32.mrb[108].mxu1  ;;  %v14233_v63 = vpop.f32.mrb[111].mxu0 }
 0x45a   :  { %v14252_v59 = vpop.f32.mrb[109].mxu1  ;;  %v11243_v0 = vadd.f32 %v14231_v58, %v11202_v46  ;;  %v14234_v1 = vadd.f32 %v14233_v63, %v14232_v60 }
 0x45b   :  { %v14253_v61 = vadd.f32 %v14252_v59, %v14251_v56  ;;  %v14254_v62 = vpop.f32.mrb[110].mxu1 }
 0x45c   :  { %v14255_v2 = vpop.f32.mrb[111].mxu1  ;;  %v11246_v5 = vadd.f32 %v14234_v1, %v11205_v48 }
 0x45d   :  { %v14256_v3 = vadd.f32 %v14255_v2, %v14254_v62  ;;  %v11284_v4 = vadd.f32 %v14253_v61, %v11243_v0 }
 0x45f   :  { %v11287_v7 = vadd.f32 %v14256_v3, %v11246_v5 }
 0x476   :  { %v14273_v14 = vpop.f32.mrb[112].mxu0 }
 0x477   :  { %v14274_v16 = vpop.f32.mrb[113].mxu0 }
 0x478   :  { %v14275_v19 = vadd.f32 %v14274_v16, %v14273_v14  ;;  %v14276_v21 = vpop.f32.mrb[114].mxu0 }
 0x479   :  { %v14295_v15 = vpop.f32.mrb[112].mxu1  ;;  %v14277_v23 = vpop.f32.mrb[115].mxu0 }
 0x47a   :  { %v14296_v17 = vpop.f32.mrb[113].mxu1  ;;  %v11325_v25 = vadd.f32 %v14275_v19, %v11284_v4  ;;  %v14278_v26 = vadd.f32 %v14277_v23, %v14276_v21  ;;  %v15532_v21 = vld [vmem:[%s19260_s5 + $0x38] sm:$0xff]  }
 0x47b   :  { %v14297_v20 = vadd.f32 %v14296_v17, %v14295_v15  ;;  %v14298_v22 = vpop.f32.mrb[114].mxu1 }
 0x47c   :  { %v14299_v24 = vpop.f32.mrb[115].mxu1  ;;  %v11328_v30 = vadd.f32 %v14278_v26, %v11287_v7 }
 0x47d   :  { %v14300_v27 = vadd.f32 %v14299_v24, %v14298_v22  ;;  %v11366_v29 = vadd.f32 %v14297_v20, %v11325_v25  ;;  %v15531_v20 = vld [vmem:[%s19260_s5 + $0x30] sm:$0xff]   ;;  %v13007_v22 = vld [vmem:[%s19261_s4] ss:$0 sm:$0xff] }
 0x47e   :  { %14484 = vmatpush3.bf16.msra.mxu1 %v15531_v20 }
 0x47f   :  { %v11369_v31 = vadd.f32 %v14300_v27, %v11328_v30  ;;  %14485 = vmatprep.subr.bf16.mxu1 %v15533_v49  ;;  %v13016_v49 = vld [vmem:[%s19262_s6] ss:$0 sm:$0xff] }
 0x482   :  { %14486 = vmatpush3.bf16.msra.mxu1 %v15532_v21 }
 0x496   :  { %v14317_v32 = vpop.f32.mrb[116].mxu0 }
 0x497   :  { %v14318_v34 = vpop.f32.mrb[117].mxu0 }
 0x498   :  { %v14319_v35 = vadd.f32 %v14318_v34, %v14317_v32  ;;  %v14320_v37 = vpop.f32.mrb[118].mxu0 }
 0x499   :  { %v14339_v33 = vpop.f32.mrb[116].mxu1  ;;  %v14321_v40 = vpop.f32.mrb[119].mxu0 }
 0x49a   :  { %v14340_v36 = vpop.f32.mrb[117].mxu1  ;;  %v11407_v41 = vadd.f32 %v14319_v35, %v11366_v29  ;;  %v14322_v42 = vadd.f32 %v14321_v40, %v14320_v37 }
 0x49b   :  { %v14341_v38 = vadd.f32 %v14340_v36, %v14339_v33  ;;  %v14342_v39 = vpop.f32.mrb[118].mxu1 }
 0x49c   :  { %v14343_v43 = vpop.f32.mrb[119].mxu1  ;;  %v11410_v46 = vadd.f32 %v14322_v42, %v11369_v31 }
 0x49d   :  { %v14344_v44 = vadd.f32 %v14343_v43, %v14342_v39  ;;  %v11448_v45 = vadd.f32 %v14341_v38, %v11407_v41 }
 0x49f   :  { %v11451_v47 = vadd.f32 %v14344_v44, %v11410_v46 }
 0x4b6   :  { %v14361_v48 = vpop.f32.mrb[120].mxu0 }
 0x4b7   :  { %v14362_v51 = vpop.f32.mrb[121].mxu0 }
 0x4b8   :  { %v14363_v52 = vadd.f32 %v14362_v51, %v14361_v48  ;;  %v14364_v54 = vpop.f32.mrb[122].mxu0 }
 0x4b9   :  { %v14383_v50 = vpop.f32.mrb[120].mxu1  ;;  %v14365_v57 = vpop.f32.mrb[123].mxu0 }
 0x4ba   :  { %v14384_v53 = vpop.f32.mrb[121].mxu1  ;;  %v11489_v58 = vadd.f32 %v14363_v52, %v11448_v45  ;;  %v14366_v59 = vadd.f32 %v14365_v57, %v14364_v54 }
 0x4bb   :  { %v14385_v55 = vadd.f32 %v14384_v53, %v14383_v50  ;;  %v14386_v56 = vpop.f32.mrb[122].mxu1 }
 0x4bc   :  { %v14387_v60 = vpop.f32.mrb[123].mxu1  ;;  %v11492_v63 = vadd.f32 %v14366_v59, %v11451_v47 }
 0x4bd   :  { %v14388_v61 = vadd.f32 %v14387_v60, %v14386_v56  ;;  %v11530_v62 = vadd.f32 %v14385_v55, %v11489_v58 }
 0x4bf   :  { %v11533_v0 = vadd.f32 %v14388_v61, %v11492_v63 }
 0x4d6   :  { %v14405_v1 = vpop.f32.mrb[124].mxu0 }
 0x4d7   :  { %v14406_v3 = vpop.f32.mrb[125].mxu0 }
 0x4d8   :  { %v14407_v5 = vadd.f32 %v14406_v3, %v14405_v1  ;;  %v14408_v7 = vpop.f32.mrb[126].mxu0 }
 0x4d9   :  { %v14427_v2 = vpop.f32.mrb[124].mxu1  ;;  %v14409_v9 = vpop.f32.mrb[127].mxu0 }
 0x4da   :  { %v14428_v4 = vpop.f32.mrb[125].mxu1  ;;  %v11571_v11 = vadd.f32 %v14407_v5, %v11530_v62  ;;  %v14410_v12 = vadd.f32 %v14409_v9, %v14408_v7 }
 0x4db   :  { %v14429_v6 = vadd.f32 %v14428_v4, %v14427_v2  ;;  %v14430_v8 = vpop.f32.mrb[126].mxu1 }
 0x4dc   :  { %v14431_v10 = vpop.f32.mrb[127].mxu1  ;;  %v11574_v15 = vadd.f32 %v14410_v12, %v11533_v0 }
 0x4dd   :  { %v14432_v13 = vadd.f32 %v14431_v10, %v14430_v8  ;;  %v11612_v14 = vadd.f32 %v14429_v6, %v11571_v11 }
 0x4df   :  { %v11615_v16 = vadd.f32 %v14432_v13, %v11574_v15  ;;  %v11618_v17 = vmax.f32 %v11612_v14, 0.0 }
 0x4e1   :  { %v11619_v18 = vmax.f32 %v11615_v16, 0.0 }
 0x4e3   :  { %v11620_v19 = vpack.c.bf16 %v11619_v18, %v11618_v17 }
 0x4e5   :  { %14468 = vmatmul.mubr.bf16.vlgmr.msra.gmra.mrb[128].mxu0 %v11620_v19 }
 0x5b8   :  { %v11726_v23 = vpop.f32.mrb[128].mxu0 }
 0x5b9   :  { %v11727_v24 = vadd.f32 %v13007_v22, %v11726_v23  ;;  %v14469_v25 = vpop.f32.mrb[129].mxu0 }
 0x5ba   :  { %v11729_v26 = vpop.f32.mrb[130].mxu0 }
 0x5bb   :  { %v11730_v27 = vadd.f32 %v13007_v22, %v11729_v26  ;;  %v14470_v28 = vpop.f32.mrb[131].mxu0  ;;  %v11733_v29 = vmax.f32 %v11727_v24, 0.0 }
 0x5bd   :  { %v11734_v30 = vmax.f32 %v11730_v27, 0.0 }
 0x5bf   :  { %v11735_v31 = vpack.c.bf16 %v11734_v30, %v11733_v29 }
 0x5c1   :  { %14488 = vmatmul.mubr.bf16.vlgmr.msra.gmra.mrb[128].mxu1 %v11735_v31 }
 0x694   :  { %v11841_v32 = vpop.f32.mrb[128].mxu1 }
 0x695   :  { %v11842_v33 = vadd.f32 %v13016_v49, %v11841_v32  ;;  %v14489_v34 = vpop.f32.mrb[129].mxu1 }
 0x696   :  { %v11844_v35 = vpop.f32.mrb[130].mxu1 }
 0x697   :  { %11848 = vst [vmem:[%s19263_s7] sm:$0xff] %v11842_v33  ;;  %v11845_v36 = vadd.f32 %v13016_v49, %v11844_v35  ;;  %v14490_v37 = vpop.f32.mrb[131].mxu1 }
 0x699   :  { %11849 = vst [vmem:[%s19263_s7 + $0x8] sm:$0xff] %v11845_v36 }

</bundles_post_ra>
